<compile_context>
chip_gen: v7x
topology: tpu7x:2x2x1
jax: 0.10.0
libtpu: 0.0.40
codegen_flags: <defaults>
</compile_context>

<pallas_src>
import functools

import jax
import jax.numpy as jnp
from jax.experimental import pallas as pl
from jax.experimental.pallas import tpu as pltpu

_VMEM_LIMIT = 48 * 1024 * 1024  # stays under v7x's 64 MiB/TC physical VMEM


def bn_fold(gamma, beta, mean, var, eps=1e-5):
    scale = gamma / jnp.sqrt(var + eps)
    return scale, beta - mean * scale


def _largest_divisor_leq(n, cap):
    for d in range(min(n, cap), 0, -1):
        if n % d == 0:
            return d
    return 1


# ----------------------------------------------------------------------------
# Kernel 1: conv1 (1x1) + BN1 + ReLU  [+ identity projection + BN]
# (stride already folded into the input by the wrapper)
# ----------------------------------------------------------------------------
def _conv1_bn_relu_kernel(*refs, proj):
    if proj:
        (x_ref, w1_ref, s1_ref, b1_ref,
         wi_ref, si_ref, bi_ref, t1_ref, res_ref) = refs
    else:
        x_ref, w1_ref, s1_ref, b1_ref, t1_ref = refs
        res_ref = None

    _, th, wout, cmid = t1_ref.shape
    cin = x_ref.shape[-1]
    xb = x_ref[0].reshape(th * wout, cin).astype(jnp.bfloat16)

    y = jnp.dot(xb, w1_ref[...], preferred_element_type=jnp.float32)
    y = jnp.maximum(y * s1_ref[...] + b1_ref[...], 0.0)
    t1_ref[...] = y.reshape(1, th, wout, cmid).astype(t1_ref.dtype)

    if proj:
        cexp = res_ref.shape[-1]
        r = jnp.dot(xb, wi_ref[...], preferred_element_type=jnp.float32)
        r = r * si_ref[...] + bi_ref[...]
        res_ref[...] = r.reshape(1, th, wout, cexp).astype(res_ref.dtype)


def conv1_stage(x, w1, s1, b1, proj_w, proj_s, proj_b, *, row_tile):
    N, Hout, Wout, Cin = x.shape
    Cmid = w1.shape[1]
    proj = proj_w is not None

    th = _largest_divisor_leq(Hout, max(1, row_tile // max(Wout, 1)))
    grid = (N, Hout // th)

    def full(shape):
        nd = len(shape)
        return pl.BlockSpec(shape, lambda n, h, _nd=nd: (0,) * _nd)

    in_specs = [
        pl.BlockSpec((1, th, Wout, Cin), lambda n, h: (n, h, 0, 0)),
        full((Cin, Cmid)), full((1, Cmid)), full((1, Cmid)),
    ]
    args = [x, w1.astype(jnp.bfloat16),
            s1.reshape(1, Cmid), b1.reshape(1, Cmid)]
    out_shape = [jax.ShapeDtypeStruct((N, Hout, Wout, Cmid), jnp.bfloat16)]
    out_specs = [pl.BlockSpec((1, th, Wout, Cmid), lambda n, h: (n, h, 0, 0))]

    flops = 2 * N * Hout * Wout * Cin * Cmid
    out_bytes = N * Hout * Wout * Cmid * 2
    if proj:
        Cexp = proj_w.shape[1]
        in_specs += [full((Cin, Cexp)), full((1, Cexp)), full((1, Cexp))]
        args += [proj_w.astype(jnp.bfloat16),
                 proj_s.reshape(1, Cexp), proj_b.reshape(1, Cexp)]
        out_shape.append(jax.ShapeDtypeStruct((N, Hout, Wout, Cexp), jnp.bfloat16))
        out_specs.append(pl.BlockSpec((1, th, Wout, Cexp), lambda n, h: (n, h, 0, 0)))
        flops += 2 * N * Hout * Wout * Cin * Cexp
        out_bytes += N * Hout * Wout * Cexp * 2

    bytes_accessed = (int(x.size) * x.dtype.itemsize + out_bytes
                      + 4 * sum(int(a.size) for a in args[1:]))

    kernel = functools.partial(_conv1_bn_relu_kernel, proj=proj)
    outs = pl.pallas_call(
        kernel,
        grid=grid,
        in_specs=in_specs,
        out_specs=tuple(out_specs),
        out_shape=tuple(out_shape),
        compiler_params=pltpu.CompilerParams(
            dimension_semantics=("parallel", "parallel"),
            vmem_limit_bytes=_VMEM_LIMIT),
        cost_estimate=pl.CostEstimate(flops=int(flops), transcendentals=0,
                                      bytes_accessed=int(bytes_accessed)),
    )(*args)

    if proj:
        t1, res = outs
        return t1, res
    t1 = outs[0] if isinstance(outs, (list, tuple)) else outs
    return t1, None


# ----------------------------------------------------------------------------
# Kernel 2: conv2(3x3)+BN2+ReLU -> conv3(1x1)+BN3 -> CBAM (channel + spatial
#           attention) -> residual add -> ReLU, fully fused per image.
# ----------------------------------------------------------------------------
def _fused_tail_kernel(t1_ref, res_ref, w2_ref, s2_ref, b2_ref,
                       w3_ref, s3_ref, b3_ref,
                       cw1_ref, cb1_ref, cw2_ref, cb2_ref,
                       wsa_ref, sasb_ref,
                       o_ref, t1p_ref, pp_ref):
    _, H, W, Cmid = t1_ref.shape
    Cexp = o_ref.shape[-1]

    # ---- conv2: 3x3, pad 1, + BN2 + ReLU (bf16 halo in VMEM scratch) ----
    t1p_ref[...] = jnp.zeros_like(t1p_ref)            # in-VMEM zero halo
    t1p_ref[1:1 + H, 1:1 + W, :] = t1_ref[0].astype(t1p_ref.dtype)
    acc = jnp.zeros((H * W, Cmid), jnp.float32)
    for dy in range(3):
        for dx in range(3):
            patch = t1p_ref[dy:dy + H, dx:dx + W, :].reshape(H * W, Cmid)
            acc = acc + jnp.dot(patch, w2_ref[dy, dx],
                                preferred_element_type=jnp.float32)
    t2 = jnp.maximum(acc * s2_ref[...] + b2_ref[...], 0.0)

    # ---- conv3: 1x1 + BN3 (no ReLU) ----
    y = jnp.dot(t2.astype(jnp.bfloat16), w3_ref[...],
                preferred_element_type=jnp.float32)
    y = y * s3_ref[...] + b3_ref[...]                  # (H*W, Cexp) f32

    # ---- CBAM channel attention: global avg/max pool + shared MLP ----
    avg_p = jnp.mean(y, axis=0, keepdims=True)         # (1, Cexp)
    max_p = jnp.max(y, axis=0, keepdims=True)          # (1, Cexp)
    p = jnp.concatenate([avg_p, max_p], axis=0)        # (2, Cexp) - one MLP pass
    h = jnp.dot(p, cw1_ref[...], preferred_element_type=jnp.float32)
    h = jnp.maximum(h + cb1_ref[...], 0.0)
    m = jnp.dot(h, cw2_ref[...], preferred_element_type=jnp.float32) + cb2_ref[...]
    att = jax.nn.sigmoid(m[0:1] + m[1:2])              # (1, Cexp)
    ya = (y * att).reshape(H, W, Cexp)                 # attended features

    # ---- ChannelPool (max / mean over channels), W on the lane axis ----
    cmax = jnp.max(ya, axis=2)                         # (H, W)
    cmean = jnp.mean(ya, axis=2)                       # (H, W)
    pp_ref[...] = jnp.zeros_like(pp_ref)               # (2, H+6, W+6) halo
    pp_ref[0, 3:3 + H, 3:3 + W] = cmax
    pp_ref[1, 3:3 + H, 3:3 + W] = cmean

    # ---- 7x7 spatial-attention conv (2->1) + BN + sigmoid gate ----
    sacc = jnp.zeros((H, W), jnp.float32)
    for dy in range(7):
        for dx in range(7):
            k = (dy * 7 + dx) * 2
            sacc = (sacc
                    + pp_ref[0, dy:dy + H, dx:dx + W] * wsa_ref[k]
                    + pp_ref[1, dy:dy + H, dx:dx + W] * wsa_ref[k + 1])
    gate = jax.nn.sigmoid(sacc * sasb_ref[0] + sasb_ref[1])   # (H, W)

    # ---- gate * attended features + residual, final ReLU ----
    out = ya * gate[:, :, None] + res_ref[0].astype(jnp.float32)
    o_ref[0] = jnp.maximum(out, 0.0)


def fused_tail_stage(t1, residual, w2, s2, b2, w3, s3, b3,
                     cw1, cb1, cw2, cb2, w_sa, sa_sb):
    N, H, W, Cmid = t1.shape
    Cexp = w3.shape[1]
    Cr = cw1.shape[1]

    def full(shape):
        nd = len(shape)
        return pl.BlockSpec(shape, lambda n, _nd=nd: (0,) * _nd)

    smem = pl.BlockSpec(memory_space=pltpu.MemorySpace.SMEM)

    in_specs = [
        pl.BlockSpec((1, H, W, Cmid), lambda n: (n, 0, 0, 0)),   # t1
        pl.BlockSpec((1, H, W, Cexp), lambda n: (n, 0, 0, 0)),   # residual
        full((3, 3, Cmid, Cmid)),                                # conv2 w
        full((1, Cmid)), full((1, Cmid)),                        # bn2 scale/bias
        full((Cmid, Cexp)),                                      # conv3 w
        full((1, Cexp)), full((1, Cexp)),                        # bn3 scale/bias
        full((Cexp, Cr)), full((1, Cr)),                         # CA fc1
        full((Cr, Cexp)), full((1, Cexp)),                       # CA fc2
        smem, smem,                                              # SA weights / bn
    ]
    out_spec = pl.BlockSpec((1, H, W, Cexp), lambda n: (n, 0, 0, 0))
    scratch = [
        pltpu.VMEM((H + 2, W + 2, Cmid), jnp.bfloat16),  # padded conv1 output
        pltpu.VMEM((2, H + 6, W + 6), jnp.float32),      # padded pooled planes
    ]

    flops = 2 * N * H * W * (9 * Cmid * Cmid + Cmid * Cexp + 98 + 2 * Cexp)
    transcend = N * (H * W + 2 * Cexp)
    bytes_accessed = (int(t1.size) * t1.dtype.itemsize
                      + int(residual.size) * residual.dtype.itemsize
                      + N * H * W * Cexp * 4)

    return pl.pallas_call(
        _fused_tail_kernel,
        grid=(N,),
        in_specs=in_specs,
        out_specs=out_spec,
        out_shape=jax.ShapeDtypeStruct((N, H, W, Cexp), jnp.float32),
        scratch_shapes=scratch,
        compiler_params=pltpu.CompilerParams(
            dimension_semantics=("parallel",),
            vmem_limit_bytes=_VMEM_LIMIT),
        cost_estimate=pl.CostEstimate(flops=int(flops),
                                      transcendentals=int(transcend),
                                      bytes_accessed=int(bytes_accessed)),
    )(t1, residual,
      w2.astype(jnp.bfloat16), s2.reshape(1, Cmid), b2.reshape(1, Cmid),
      w3.astype(jnp.bfloat16), s3.reshape(1, Cexp), b3.reshape(1, Cexp),
      cw1, cb1.reshape(1, Cr), cw2, cb2.reshape(1, Cexp),
      w_sa, sa_sb)


# ----------------------------------------------------------------------------
# Full BottleNeck forward
# ----------------------------------------------------------------------------
def bottleneck_forward(x_nchw, params, *, stride=1, expansion=4, row_tile=1024):
    x = jnp.transpose(x_nchw, (0, 2, 3, 1)).astype(jnp.float32)  # NCHW -> NHWC
    N, Hin, Win, Cin = x.shape
    Cmid = params["conv1_w"].shape[1]
    Cexp = Cmid * expansion

    s1, b1 = bn_fold(*params["bn1"])
    s2, b2 = bn_fold(*params["bn2"])
    s3, b3 = bn_fold(*params["bn3"])

    proj = (stride != 1) or (Cin != Cexp)

    # A 1x1 conv with stride s only reads every s-th pixel: fold the stride into
    # the entry transpose (XLA fuses the slice) so kernel 1 never DMAs dropped rows.
    x_s = x if stride == 1 else x[:, ::stride, ::stride, :]
    # When the block has a projection, x is never needed at f32 again (both 1x1
    # convs run in bf16 anyway) -> write the transposed copy as bf16.
    x_conv = x_s.astype(jnp.bfloat16) if proj else x_s

    if proj:
        si, bi = bn_fold(*params["id_bn"])
        t1, residual = conv1_stage(x_conv, params["conv1_w"], s1, b1,
                                   params["id_conv_w"], si, bi,
                                   row_tile=row_tile)
    else:
        t1, _ = conv1_stage(x_conv, params["conv1_w"], s1, b1, None, None, None,
                            row_tile=row_tile)
        residual = x_s

    # Fold spatial-attention BN into two scalars; flatten 7x7x2 conv weights.
    ssa, bsa = bn_fold(*params["sa_bn"])
    w_sa = params["sa_conv_w"].reshape(-1)              # (7,7,2) -> (98,)
    sa_sb = jnp.concatenate([ssa.reshape(-1), bsa.reshape(-1)])   # (2,)

    out = fused_tail_stage(t1, residual,
                           params["conv2_w"], s2, b2,
                           params["conv3_w"], s3, b3,
                           params["ca_fc1_w"], params["ca_fc1_b"],
                           params["ca_fc2_w"], params["ca_fc2_b"],
                           w_sa, sa_sb)
    return jnp.transpose(out, (0, 3, 1, 2))             # NHWC -> NCHW


if __name__ == "__main__":
    key = jax.random.PRNGKey(0)
    N, Cin, H, W = 2, 16, 16, 16
    Cmid, expansion, stride = 8, 4, 1
    Cexp = Cmid * expansion          # 32
    Cr = max(Cexp // 16, 1)          # 2  (CBAM reduction ratio 16)

    keys = jax.random.split(key, 24)

    def nrm(k, shape, s=0.1):
        return jax.random.normal(k, shape, jnp.float32) * s

    def bn_params(k, c):
        k1, k2, k3, k4 = jax.random.split(k, 4)
        gamma = jax.random.uniform(k1, (c,), jnp.float32, 0.5, 1.5)
        beta = nrm(k2, (c,))
        mean = nrm(k3, (c,))
        var = jax.random.uniform(k4, (c,), jnp.float32, 0.5, 1.5)
        return gamma, beta, mean, var

    params = {
        # conv weights stored as (Cin, Cout) / (kh, kw, Cin, Cout) for NHWC
        "conv1_w": nrm(keys[0], (Cin, Cmid)),
        "bn1": bn_params(keys[1], Cmid),
        "conv2_w": nrm(keys[2], (3, 3, Cmid, Cmid)),
        "bn2": bn_params(keys[3], Cmid),
        "conv3_w": nrm(keys[4], (Cmid, Cexp)),
        "bn3": bn_params(keys[5], Cexp),
        "id_conv_w": nrm(keys[6], (Cin, Cexp)),
        "id_bn": bn_params(keys[7], Cexp),
        # CBAM shared MLP (nn.Linear weights as (in, out), biases included)
        "ca_fc1_w": nrm(keys[8], (Cexp, Cr)),
        "ca_fc1_b": nrm(keys[9], (Cr,)),
        "ca_fc2_w": nrm(keys[10], (Cr, Cexp)),
        "ca_fc2_b": nrm(keys[11], (Cexp,)),
        # CBAM spatial 7x7 conv weight as (kh, kw, 2): [...,0]=max, [...,1]=mean
        "sa_conv_w": nrm(keys[12], (7, 7, 2)),
        "sa_bn": bn_params(keys[13], 1),
    }

    x = jax.random.normal(keys[20], (N, Cin, H, W), jnp.float32)

    fwd = jax.jit(functools.partial(bottleneck_forward, stride=stride,
                                    expansion=expansion, row_tile=128))
    out = jax.block_until_ready(fwd(x, params))

    assert out.shape == (N, Cexp, H, W), out.shape
    assert bool(jnp.all(jnp.isfinite(out)))
    print("KERNEL_OK")
</pallas_src>

<mosaic_0001>
module attributes {stable_mosaic.version = 11 : i64} {
  func.func @_conv1_bn_relu_kernel(%arg0: i32, %arg1: i32, %arg2: memref<1x8x16x16xbf16, #tpu.memory_space<vmem>>, %arg3: memref<16x8xbf16, #tpu.memory_space<vmem>>, %arg4: memref<1x8xf32, #tpu.memory_space<vmem>>, %arg5: memref<1x8xf32, #tpu.memory_space<vmem>>, %arg6: memref<16x32xbf16, #tpu.memory_space<vmem>>, %arg7: memref<1x32xf32, #tpu.memory_space<vmem>>, %arg8: memref<1x32xf32, #tpu.memory_space<vmem>>, %arg9: memref<1x8x16x8xbf16, #tpu.memory_space<vmem>>, %arg10: memref<1x8x16x32xbf16, #tpu.memory_space<vmem>>) attributes {dimension_semantics = [#tpu.dimension_semantics<parallel>, #tpu.dimension_semantics<parallel>], iteration_bounds = array<i64: 2, 2>, scalar_prefetch = 0 : i64, scratch_operands = 0 : i64, tpu.core_type = #tpu.core_type<tc>, window_params = [{transform_indices = @transform_0, window_bounds = array<i64: 1, 8, 16, 16>}, {pipeline_mode = #tpu.pipeline_mode<synchronous>, transform_indices = @transform_1, window_bounds = array<i64: 16, 8>}, {pipeline_mode = #tpu.pipeline_mode<synchronous>, transform_indices = @transform_2, window_bounds = array<i64: 1, 8>}, {pipeline_mode = #tpu.pipeline_mode<synchronous>, transform_indices = @transform_3, window_bounds = array<i64: 1, 8>}, {pipeline_mode = #tpu.pipeline_mode<synchronous>, transform_indices = @transform_4, window_bounds = array<i64: 16, 32>}, {pipeline_mode = #tpu.pipeline_mode<synchronous>, transform_indices = @transform_5, window_bounds = array<i64: 1, 32>}, {pipeline_mode = #tpu.pipeline_mode<synchronous>, transform_indices = @transform_6, window_bounds = array<i64: 1, 32>}, {transform_indices = @transform_7, window_bounds = array<i64: 1, 8, 16, 8>}, {transform_indices = @transform_8, window_bounds = array<i64: 1, 8, 16, 32>}]} {
    %c0 = arith.constant 0 : index
    %c0_0 = arith.constant 0 : index
    %c0_1 = arith.constant 0 : index
    %c0_2 = arith.constant 0 : index
    %0 = vector.load %arg2[%c0, %c0_0, %c0_1, %c0_2] : memref<1x8x16x16xbf16, #tpu.memory_space<vmem>>, vector<1x8x16x16xbf16>
    %1 = vector.shape_cast %0 : vector<1x8x16x16xbf16> to vector<8x16x16xbf16>
    %2 = vector.shape_cast %1 : vector<8x16x16xbf16> to vector<128x16xbf16>
    %c0_3 = arith.constant 0 : index
    %c0_4 = arith.constant 0 : index
    %3 = vector.load %arg3[%c0_3, %c0_4] : memref<16x8xbf16, #tpu.memory_space<vmem>>, vector<16x8xbf16>
    %cst = arith.constant dense<0.000000e+00> : vector<128x8xf32>
    %4 = tpu.matmul %2, %3, %cst {dimension_numbers = #tpu.dot_dimension_numbers<[1], [0], [0], [1], [0, 0, 1, 1], [], []>} : vector<128x16xbf16>, vector<16x8xbf16>, vector<128x8xf32> -> vector<128x8xf32>
    %c0_5 = arith.constant 0 : index
    %c0_6 = arith.constant 0 : index
    %5 = vector.load %arg4[%c0_5, %c0_6] : memref<1x8xf32, #tpu.memory_space<vmem>>, vector<1x8xf32>
    %6 = vector.broadcast %5 : vector<1x8xf32> to vector<128x8xf32>
    %7 = arith.mulf %4, %6 : vector<128x8xf32>
    %c0_7 = arith.constant 0 : index
    %c0_8 = arith.constant 0 : index
    %8 = vector.load %arg5[%c0_7, %c0_8] : memref<1x8xf32, #tpu.memory_space<vmem>>, vector<1x8xf32>
    %9 = vector.broadcast %8 : vector<1x8xf32> to vector<128x8xf32>
    %10 = arith.addf %7, %9 : vector<128x8xf32>
    %cst_9 = arith.constant 0.000000e+00 : f32
    %11 = vector.broadcast %cst_9 : f32 to vector<128x8xf32>
    %12 = arith.maximumf %10, %11 : vector<128x8xf32>
    %13 = vector.shape_cast %12 : vector<128x8xf32> to vector<1x8x16x8xf32>
    %14 = arith.truncf %13 : vector<1x8x16x8xf32> to vector<1x8x16x8xbf16>
    %c0_10 = arith.constant 0 : index
    %c0_11 = arith.constant 0 : index
    %c0_12 = arith.constant 0 : index
    %c0_13 = arith.constant 0 : index
    %15 = vector.load %arg9[%c0_10, %c0_11, %c0_12, %c0_13] : memref<1x8x16x8xbf16, #tpu.memory_space<vmem>>, vector<1x8x16x8xbf16>
    tpu.vector_store %arg9[%c0_10, %c0_11, %c0_12, %c0_13], %14 {strides = array<i32>} : memref<1x8x16x8xbf16, #tpu.memory_space<vmem>>, vector<1x8x16x8xbf16>,
    %c0_14 = arith.constant 0 : index
    %c0_15 = arith.constant 0 : index
    %16 = vector.load %arg6[%c0_14, %c0_15] : memref<16x32xbf16, #tpu.memory_space<vmem>>, vector<16x32xbf16>
    %cst_16 = arith.constant dense<0.000000e+00> : vector<128x32xf32>
    %17 = tpu.matmul %2, %16, %cst_16 {dimension_numbers = #tpu.dot_dimension_numbers<[1], [0], [0], [1], [0, 0, 1, 1], [], []>} : vector<128x16xbf16>, vector<16x32xbf16>, vector<128x32xf32> -> vector<128x32xf32>
    %c0_17 = arith.constant 0 : index
    %c0_18 = arith.constant 0 : index
    %18 = vector.load %arg7[%c0_17, %c0_18] : memref<1x32xf32, #tpu.memory_space<vmem>>, vector<1x32xf32>
    %19 = vector.broadcast %18 : vector<1x32xf32> to vector<128x32xf32>
    %20 = arith.mulf %17, %19 : vector<128x32xf32>
    %c0_19 = arith.constant 0 : index
    %c0_20 = arith.constant 0 : index
    %21 = vector.load %arg8[%c0_19, %c0_20] : memref<1x32xf32, #tpu.memory_space<vmem>>, vector<1x32xf32>
    %22 = vector.broadcast %21 : vector<1x32xf32> to vector<128x32xf32>
    %23 = arith.addf %20, %22 : vector<128x32xf32>
    %24 = vector.shape_cast %23 : vector<128x32xf32> to vector<1x8x16x32xf32>
    %25 = arith.truncf %24 : vector<1x8x16x32xf32> to vector<1x8x16x32xbf16>
    %c0_21 = arith.constant 0 : index
    %c0_22 = arith.constant 0 : index
    %c0_23 = arith.constant 0 : index
    %c0_24 = arith.constant 0 : index
    %26 = vector.load %arg10[%c0_21, %c0_22, %c0_23, %c0_24] : memref<1x8x16x32xbf16, #tpu.memory_space<vmem>>, vector<1x8x16x32xbf16>
    tpu.vector_store %arg10[%c0_21, %c0_22, %c0_23, %c0_24], %25 {strides = array<i32>} : memref<1x8x16x32xbf16, #tpu.memory_space<vmem>>, vector<1x8x16x32xbf16>,
    return
  }
  func.func @transform_0(%arg0: i32, %arg1: i32) -> (i32, i32, i32, i32) {
    %c0_i32 = arith.constant 0 : i32
    %c0_i32_0 = arith.constant 0 : i32
    %c0_i32_1 = arith.constant 0 : i32
    return %arg0, %arg1, %c0_i32, %c0_i32_0 : i32, i32, i32, i32
  }
  func.func @transform_1(%arg0: i32, %arg1: i32) -> (i32, i32) {
    %c0_i32 = arith.constant 0 : i32
    %c0_i32_0 = arith.constant 0 : i32
    %c0_i32_1 = arith.constant 0 : i32
    return %c0_i32, %c0_i32_0 : i32, i32
  }
  func.func @transform_2(%arg0: i32, %arg1: i32) -> (i32, i32) {
    %c0_i32 = arith.constant 0 : i32
    %c0_i32_0 = arith.constant 0 : i32
    %c0_i32_1 = arith.constant 0 : i32
    return %c0_i32, %c0_i32_0 : i32, i32
  }
  func.func @transform_3(%arg0: i32, %arg1: i32) -> (i32, i32) {
    %c0_i32 = arith.constant 0 : i32
    %c0_i32_0 = arith.constant 0 : i32
    %c0_i32_1 = arith.constant 0 : i32
    return %c0_i32, %c0_i32_0 : i32, i32
  }
  func.func @transform_4(%arg0: i32, %arg1: i32) -> (i32, i32) {
    %c0_i32 = arith.constant 0 : i32
    %c0_i32_0 = arith.constant 0 : i32
    %c0_i32_1 = arith.constant 0 : i32
    return %c0_i32, %c0_i32_0 : i32, i32
  }
  func.func @transform_5(%arg0: i32, %arg1: i32) -> (i32, i32) {
    %c0_i32 = arith.constant 0 : i32
    %c0_i32_0 = arith.constant 0 : i32
    %c0_i32_1 = arith.constant 0 : i32
    return %c0_i32, %c0_i32_0 : i32, i32
  }
  func.func @transform_6(%arg0: i32, %arg1: i32) -> (i32, i32) {
    %c0_i32 = arith.constant 0 : i32
    %c0_i32_0 = arith.constant 0 : i32
    %c0_i32_1 = arith.constant 0 : i32
    return %c0_i32, %c0_i32_0 : i32, i32
  }
  func.func @transform_7(%arg0: i32, %arg1: i32) -> (i32, i32, i32, i32) {
    %c0_i32 = arith.constant 0 : i32
    %c0_i32_0 = arith.constant 0 : i32
    %c0_i32_1 = arith.constant 0 : i32
    return %arg0, %arg1, %c0_i32, %c0_i32_0 : i32, i32, i32, i32
  }
  func.func @transform_8(%arg0: i32, %arg1: i32) -> (i32, i32, i32, i32) {
    %c0_i32 = arith.constant 0 : i32
    %c0_i32_0 = arith.constant 0 : i32
    %c0_i32_1 = arith.constant 0 : i32
    return %arg0, %arg1, %c0_i32, %c0_i32_0 : i32, i32, i32, i32
  }
}

module attributes {stable_mosaic.version = 11 : i64} {
  func.func @_fused_tail_kernel(%arg0: i32, %arg1: memref<1x16x16x8xbf16, #tpu.memory_space<vmem>>, %arg2: memref<1x16x16x32xbf16, #tpu.memory_space<vmem>>, %arg3: memref<3x3x8x8xbf16, #tpu.memory_space<vmem>>, %arg4: memref<1x8xf32, #tpu.memory_space<vmem>>, %arg5: memref<1x8xf32, #tpu.memory_space<vmem>>, %arg6: memref<8x32xbf16, #tpu.memory_space<vmem>>, %arg7: memref<1x32xf32, #tpu.memory_space<vmem>>, %arg8: memref<1x32xf32, #tpu.memory_space<vmem>>, %arg9: memref<32x2xf32, #tpu.memory_space<vmem>>, %arg10: memref<1x2xf32, #tpu.memory_space<vmem>>, %arg11: memref<2x32xf32, #tpu.memory_space<vmem>>, %arg12: memref<1x32xf32, #tpu.memory_space<vmem>>, %arg13: memref<98xf32, #tpu.memory_space<smem>>, %arg14: memref<2xf32, #tpu.memory_space<smem>>, %arg15: memref<1x16x16x32xf32, #tpu.memory_space<vmem>>, %arg16: memref<18x18x8xbf16, #tpu.memory_space<vmem>>, %arg17: memref<2x22x22xf32, #tpu.memory_space<vmem>>) attributes {dimension_semantics = [#tpu.dimension_semantics<parallel>], iteration_bounds = array<i64: 2>, scalar_prefetch = 0 : i64, scratch_operands = 2 : i64, tpu.core_type = #tpu.core_type<tc>, window_params = [{transform_indices = @transform_0, window_bounds = array<i64: 1, 16, 16, 8>}, {transform_indices = @transform_1, window_bounds = array<i64: 1, 16, 16, 32>}, {pipeline_mode = #tpu.pipeline_mode<synchronous>, transform_indices = @transform_2, window_bounds = array<i64: 3, 3, 8, 8>}, {pipeline_mode = #tpu.pipeline_mode<synchronous>, transform_indices = @transform_3, window_bounds = array<i64: 1, 8>}, {pipeline_mode = #tpu.pipeline_mode<synchronous>, transform_indices = @transform_4, window_bounds = array<i64: 1, 8>}, {pipeline_mode = #tpu.pipeline_mode<synchronous>, transform_indices = @transform_5, window_bounds = array<i64: 8, 32>}, {pipeline_mode = #tpu.pipeline_mode<synchronous>, transform_indices = @transform_6, window_bounds = array<i64: 1, 32>}, {pipeline_mode = #tpu.pipeline_mode<synchronous>, transform_indices = @transform_7, window_bounds = array<i64: 1, 32>}, {pipeline_mode = #tpu.pipeline_mode<synchronous>, transform_indices = @transform_8, window_bounds = array<i64: 32, 2>}, {pipeline_mode = #tpu.pipeline_mode<synchronous>, transform_indices = @transform_9, window_bounds = array<i64: 1, 2>}, {pipeline_mode = #tpu.pipeline_mode<synchronous>, transform_indices = @transform_10, window_bounds = array<i64: 2, 32>}, {pipeline_mode = #tpu.pipeline_mode<synchronous>, transform_indices = @transform_11, window_bounds = array<i64: 1, 32>}, {transform_indices = @transform_12, window_bounds = array<i64: 98>}, {transform_indices = @transform_13, window_bounds = array<i64: 2>}, {transform_indices = @transform_14, window_bounds = array<i64: 1, 16, 16, 32>}]} {
    %cst = arith.constant 0.000000e+00 : bf16
    %0 = vector.broadcast %cst : bf16 to vector<18x18x8xbf16>
    %c0 = arith.constant 0 : index
    %c0_0 = arith.constant 0 : index
    %c0_1 = arith.constant 0 : index
    %1 = vector.load %arg16[%c0, %c0_0, %c0_1] : memref<18x18x8xbf16, #tpu.memory_space<vmem>>, vector<18x18x8xbf16>
    tpu.vector_store %arg16[%c0, %c0_0, %c0_1], %0 {strides = array<i32>} : memref<18x18x8xbf16, #tpu.memory_space<vmem>>, vector<18x18x8xbf16>,
    %c0_2 = arith.constant 0 : index
    %c0_3 = arith.constant 0 : index
    %c0_4 = arith.constant 0 : index
    %c0_5 = arith.constant 0 : index
    %2 = vector.load %arg1[%c0_2, %c0_3, %c0_4, %c0_5] : memref<1x16x16x8xbf16, #tpu.memory_space<vmem>>, vector<1x16x16x8xbf16>
    %3 = vector.shape_cast %2 : vector<1x16x16x8xbf16> to vector<16x16x8xbf16>
    %c1 = arith.constant 1 : index
    %c1_6 = arith.constant 1 : index
    %c0_7 = arith.constant 0 : index
    %4 = vector.load %arg16[%c1, %c1_6, %c0_7] : memref<18x18x8xbf16, #tpu.memory_space<vmem>>, vector<16x16x8xbf16>
    tpu.vector_store %arg16[%c1, %c1_6, %c0_7], %3 {strides = array<i32>} : memref<18x18x8xbf16, #tpu.memory_space<vmem>>, vector<16x16x8xbf16>,
    %cst_8 = arith.constant 0.000000e+00 : f32
    %5 = vector.broadcast %cst_8 : f32 to vector<256x8xf32>
    %c0_9 = arith.constant 0 : index
    %c0_10 = arith.constant 0 : index
    %c0_11 = arith.constant 0 : index
    %6 = vector.load %arg16[%c0_9, %c0_10, %c0_11] : memref<18x18x8xbf16, #tpu.memory_space<vmem>>, vector<16x16x8xbf16>
    %7 = vector.shape_cast %6 : vector<16x16x8xbf16> to vector<256x8xbf16>
    %c0_12 = arith.constant 0 : index
    %c0_13 = arith.constant 0 : index
    %c0_14 = arith.constant 0 : index
    %c0_15 = arith.constant 0 : index
    %8 = vector.load %arg3[%c0_12, %c0_13, %c0_14, %c0_15] : memref<3x3x8x8xbf16, #tpu.memory_space<vmem>>, vector<1x1x8x8xbf16>
    %9 = vector.shape_cast %8 : vector<1x1x8x8xbf16> to vector<8x8xbf16>
    %cst_16 = arith.constant dense<0.000000e+00> : vector<256x8xf32>
    %10 = tpu.matmul %7, %9, %cst_16 {dimension_numbers = #tpu.dot_dimension_numbers<[1], [0], [0], [1], [0, 0, 1, 1], [], []>} : vector<256x8xbf16>, vector<8x8xbf16>, vector<256x8xf32> -> vector<256x8xf32>
    %11 = arith.addf %5, %10 : vector<256x8xf32>
    %c0_17 = arith.constant 0 : index
    %c1_18 = arith.constant 1 : index
    %c0_19 = arith.constant 0 : index
    %12 = vector.load %arg16[%c0_17, %c1_18, %c0_19] : memref<18x18x8xbf16, #tpu.memory_space<vmem>>, vector<16x16x8xbf16>
    %13 = vector.shape_cast %12 : vector<16x16x8xbf16> to vector<256x8xbf16>
    %c0_20 = arith.constant 0 : index
    %c1_21 = arith.constant 1 : index
    %c0_22 = arith.constant 0 : index
    %c0_23 = arith.constant 0 : index
    %14 = vector.load %arg3[%c0_20, %c1_21, %c0_22, %c0_23] : memref<3x3x8x8xbf16, #tpu.memory_space<vmem>>, vector<1x1x8x8xbf16>
    %15 = vector.shape_cast %14 : vector<1x1x8x8xbf16> to vector<8x8xbf16>
    %cst_24 = arith.constant dense<0.000000e+00> : vector<256x8xf32>
    %16 = tpu.matmul %13, %15, %cst_24 {dimension_numbers = #tpu.dot_dimension_numbers<[1], [0], [0], [1], [0, 0, 1, 1], [], []>} : vector<256x8xbf16>, vector<8x8xbf16>, vector<256x8xf32> -> vector<256x8xf32>
    %17 = arith.addf %11, %16 : vector<256x8xf32>
    %c0_25 = arith.constant 0 : index
    %c2 = arith.constant 2 : index
    %c0_26 = arith.constant 0 : index
    %18 = vector.load %arg16[%c0_25, %c2, %c0_26] : memref<18x18x8xbf16, #tpu.memory_space<vmem>>, vector<16x16x8xbf16>
    %19 = vector.shape_cast %18 : vector<16x16x8xbf16> to vector<256x8xbf16>
    %c0_27 = arith.constant 0 : index
    %c2_28 = arith.constant 2 : index
    %c0_29 = arith.constant 0 : index
    %c0_30 = arith.constant 0 : index
    %20 = vector.load %arg3[%c0_27, %c2_28, %c0_29, %c0_30] : memref<3x3x8x8xbf16, #tpu.memory_space<vmem>>, vector<1x1x8x8xbf16>
    %21 = vector.shape_cast %20 : vector<1x1x8x8xbf16> to vector<8x8xbf16>
    %cst_31 = arith.constant dense<0.000000e+00> : vector<256x8xf32>
    %22 = tpu.matmul %19, %21, %cst_31 {dimension_numbers = #tpu.dot_dimension_numbers<[1], [0], [0], [1], [0, 0, 1, 1], [], []>} : vector<256x8xbf16>, vector<8x8xbf16>, vector<256x8xf32> -> vector<256x8xf32>
    %23 = arith.addf %17, %22 : vector<256x8xf32>
    %c1_32 = arith.constant 1 : index
    %c0_33 = arith.constant 0 : index
    %c0_34 = arith.constant 0 : index
    %24 = vector.load %arg16[%c1_32, %c0_33, %c0_34] : memref<18x18x8xbf16, #tpu.memory_space<vmem>>, vector<16x16x8xbf16>
    %25 = vector.shape_cast %24 : vector<16x16x8xbf16> to vector<256x8xbf16>
    %c1_35 = arith.constant 1 : index
    %c0_36 = arith.constant 0 : index
    %c0_37 = arith.constant 0 : index
    %c0_38 = arith.constant 0 : index
    %26 = vector.load %arg3[%c1_35, %c0_36, %c0_37, %c0_38] : memref<3x3x8x8xbf16, #tpu.memory_space<vmem>>, vector<1x1x8x8xbf16>
    %27 = vector.shape_cast %26 : vector<1x1x8x8xbf16> to vector<8x8xbf16>
    %cst_39 = arith.constant dense<0.000000e+00> : vector<256x8xf32>
    %28 = tpu.matmul %25, %27, %cst_39 {dimension_numbers = #tpu.dot_dimension_numbers<[1], [0], [0], [1], [0, 0, 1, 1], [], []>} : vector<256x8xbf16>, vector<8x8xbf16>, vector<256x8xf32> -> vector<256x8xf32>
    %29 = arith.addf %23, %28 : vector<256x8xf32>
    %c1_40 = arith.constant 1 : index
    %c1_41 = arith.constant 1 : index
    %c0_42 = arith.constant 0 : index
    %30 = vector.load %arg16[%c1_40, %c1_41, %c0_42] : memref<18x18x8xbf16, #tpu.memory_space<vmem>>, vector<16x16x8xbf16>
    %31 = vector.shape_cast %30 : vector<16x16x8xbf16> to vector<256x8xbf16>
    %c1_43 = arith.constant 1 : index
    %c1_44 = arith.constant 1 : index
    %c0_45 = arith.constant 0 : index
    %c0_46 = arith.constant 0 : index
    %32 = vector.load %arg3[%c1_43, %c1_44, %c0_45, %c0_46] : memref<3x3x8x8xbf16, #tpu.memory_space<vmem>>, vector<1x1x8x8xbf16>
    %33 = vector.shape_cast %32 : vector<1x1x8x8xbf16> to vector<8x8xbf16>
    %cst_47 = arith.constant dense<0.000000e+00> : vector<256x8xf32>
    %34 = tpu.matmul %31, %33, %cst_47 {dimension_numbers = #tpu.dot_dimension_numbers<[1], [0], [0], [1], [0, 0, 1, 1], [], []>} : vector<256x8xbf16>, vector<8x8xbf16>, vector<256x8xf32> -> vector<256x8xf32>
    %35 = arith.addf %29, %34 : vector<256x8xf32>
    %c1_48 = arith.constant 1 : index
    %c2_49 = arith.constant 2 : index
    %c0_50 = arith.constant 0 : index
    %36 = vector.load %arg16[%c1_48, %c2_49, %c0_50] : memref<18x18x8xbf16, #tpu.memory_space<vmem>>, vector<16x16x8xbf16>
    %37 = vector.shape_cast %36 : vector<16x16x8xbf16> to vector<256x8xbf16>
    %c1_51 = arith.constant 1 : index
    %c2_52 = arith.constant 2 : index
    %c0_53 = arith.constant 0 : index
    %c0_54 = arith.constant 0 : index
    %38 = vector.load %arg3[%c1_51, %c2_52, %c0_53, %c0_54] : memref<3x3x8x8xbf16, #tpu.memory_space<vmem>>, vector<1x1x8x8xbf16>
    %39 = vector.shape_cast %38 : vector<1x1x8x8xbf16> to vector<8x8xbf16>
    %cst_55 = arith.constant dense<0.000000e+00> : vector<256x8xf32>
    %40 = tpu.matmul %37, %39, %cst_55 {dimension_numbers = #tpu.dot_dimension_numbers<[1], [0], [0], [1], [0, 0, 1, 1], [], []>} : vector<256x8xbf16>, vector<8x8xbf16>, vector<256x8xf32> -> vector<256x8xf32>
    %41 = arith.addf %35, %40 : vector<256x8xf32>
    %c2_56 = arith.constant 2 : index
    %c0_57 = arith.constant 0 : index
    %c0_58 = arith.constant 0 : index
    %42 = vector.load %arg16[%c2_56, %c0_57, %c0_58] : memref<18x18x8xbf16, #tpu.memory_space<vmem>>, vector<16x16x8xbf16>
    %43 = vector.shape_cast %42 : vector<16x16x8xbf16> to vector<256x8xbf16>
    %c2_59 = arith.constant 2 : index
    %c0_60 = arith.constant 0 : index
    %c0_61 = arith.constant 0 : index
    %c0_62 = arith.constant 0 : index
    %44 = vector.load %arg3[%c2_59, %c0_60, %c0_61, %c0_62] : memref<3x3x8x8xbf16, #tpu.memory_space<vmem>>, vector<1x1x8x8xbf16>
    %45 = vector.shape_cast %44 : vector<1x1x8x8xbf16> to vector<8x8xbf16>
    %cst_63 = arith.constant dense<0.000000e+00> : vector<256x8xf32>
    %46 = tpu.matmul %43, %45, %cst_63 {dimension_numbers = #tpu.dot_dimension_numbers<[1], [0], [0], [1], [0, 0, 1, 1], [], []>} : vector<256x8xbf16>, vector<8x8xbf16>, vector<256x8xf32> -> vector<256x8xf32>
    %47 = arith.addf %41, %46 : vector<256x8xf32>
    %c2_64 = arith.constant 2 : index
    %c1_65 = arith.constant 1 : index
    %c0_66 = arith.constant 0 : index
    %48 = vector.load %arg16[%c2_64, %c1_65, %c0_66] : memref<18x18x8xbf16, #tpu.memory_space<vmem>>, vector<16x16x8xbf16>
    %49 = vector.shape_cast %48 : vector<16x16x8xbf16> to vector<256x8xbf16>
    %c2_67 = arith.constant 2 : index
    %c1_68 = arith.constant 1 : index
    %c0_69 = arith.constant 0 : index
    %c0_70 = arith.constant 0 : index
    %50 = vector.load %arg3[%c2_67, %c1_68, %c0_69, %c0_70] : memref<3x3x8x8xbf16, #tpu.memory_space<vmem>>, vector<1x1x8x8xbf16>
    %51 = vector.shape_cast %50 : vector<1x1x8x8xbf16> to vector<8x8xbf16>
    %cst_71 = arith.constant dense<0.000000e+00> : vector<256x8xf32>
    %52 = tpu.matmul %49, %51, %cst_71 {dimension_numbers = #tpu.dot_dimension_numbers<[1], [0], [0], [1], [0, 0, 1, 1], [], []>} : vector<256x8xbf16>, vector<8x8xbf16>, vector<256x8xf32> -> vector<256x8xf32>
    %53 = arith.addf %47, %52 : vector<256x8xf32>
    %c2_72 = arith.constant 2 : index
    %c2_73 = arith.constant 2 : index
    %c0_74 = arith.constant 0 : index
    %54 = vector.load %arg16[%c2_72, %c2_73, %c0_74] : memref<18x18x8xbf16, #tpu.memory_space<vmem>>, vector<16x16x8xbf16>
    %55 = vector.shape_cast %54 : vector<16x16x8xbf16> to vector<256x8xbf16>
    %c2_75 = arith.constant 2 : index
    %c2_76 = arith.constant 2 : index
    %c0_77 = arith.constant 0 : index
    %c0_78 = arith.constant 0 : index
    %56 = vector.load %arg3[%c2_75, %c2_76, %c0_77, %c0_78] : memref<3x3x8x8xbf16, #tpu.memory_space<vmem>>, vector<1x1x8x8xbf16>
    %57 = vector.shape_cast %56 : vector<1x1x8x8xbf16> to vector<8x8xbf16>
    %cst_79 = arith.constant dense<0.000000e+00> : vector<256x8xf32>
    %58 = tpu.matmul %55, %57, %cst_79 {dimension_numbers = #tpu.dot_dimension_numbers<[1], [0], [0], [1], [0, 0, 1, 1], [], []>} : vector<256x8xbf16>, vector<8x8xbf16>, vector<256x8xf32> -> vector<256x8xf32>
    %59 = arith.addf %53, %58 : vector<256x8xf32>
    %c0_80 = arith.constant 0 : index
    %c0_81 = arith.constant 0 : index
    %60 = vector.load %arg4[%c0_80, %c0_81] : memref<1x8xf32, #tpu.memory_space<vmem>>, vector<1x8xf32>
    %61 = vector.broadcast %60 : vector<1x8xf32> to vector<256x8xf32>
    %62 = arith.mulf %59, %61 : vector<256x8xf32>
    %c0_82 = arith.constant 0 : index
    %c0_83 = arith.constant 0 : index
    %63 = vector.load %arg5[%c0_82, %c0_83] : memref<1x8xf32, #tpu.memory_space<vmem>>, vector<1x8xf32>
    %64 = vector.broadcast %63 : vector<1x8xf32> to vector<256x8xf32>
    %65 = arith.addf %62, %64 : vector<256x8xf32>
    %cst_84 = arith.constant 0.000000e+00 : f32
    %66 = vector.broadcast %cst_84 : f32 to vector<256x8xf32>
    %67 = arith.maximumf %65, %66 : vector<256x8xf32>
    %68 = arith.truncf %67 : vector<256x8xf32> to vector<256x8xbf16>
    %c0_85 = arith.constant 0 : index
    %c0_86 = arith.constant 0 : index
    %69 = vector.load %arg6[%c0_85, %c0_86] : memref<8x32xbf16, #tpu.memory_space<vmem>>, vector<8x32xbf16>
    %cst_87 = arith.constant dense<0.000000e+00> : vector<256x32xf32>
    %70 = tpu.matmul %68, %69, %cst_87 {dimension_numbers = #tpu.dot_dimension_numbers<[1], [0], [0], [1], [0, 0, 1, 1], [], []>} : vector<256x8xbf16>, vector<8x32xbf16>, vector<256x32xf32> -> vector<256x32xf32>
    %c0_88 = arith.constant 0 : index
    %c0_89 = arith.constant 0 : index
    %71 = vector.load %arg7[%c0_88, %c0_89] : memref<1x32xf32, #tpu.memory_space<vmem>>, vector<1x32xf32>
    %72 = vector.broadcast %71 : vector<1x32xf32> to vector<256x32xf32>
    %73 = arith.mulf %70, %72 : vector<256x32xf32>
    %c0_90 = arith.constant 0 : index
    %c0_91 = arith.constant 0 : index
    %74 = vector.load %arg8[%c0_90, %c0_91] : memref<1x32xf32, #tpu.memory_space<vmem>>, vector<1x32xf32>
    %75 = vector.broadcast %74 : vector<1x32xf32> to vector<256x32xf32>
    %76 = arith.addf %73, %75 : vector<256x32xf32>
    %cst_92 = arith.constant dense<0.000000e+00> : vector<32xf32>
    %77 = vector.multi_reduction <add>, %76, %cst_92 [0] : vector<256x32xf32> to vector<32xf32>
    %78 = vector.shape_cast %77 : vector<32xf32> to vector<1x32xf32>
    %cst_93 = arith.constant 2.560000e+02 : f32
    %79 = vector.broadcast %cst_93 : f32 to vector<1x32xf32>
    %80 = arith.divf %78, %79 : vector<1x32xf32>
    %cst_94 = arith.constant dense<0xFF800000> : vector<32xf32>
    %81 = vector.multi_reduction <maximumf>, %76, %cst_94 [0] : vector<256x32xf32> to vector<32xf32>
    %82 = vector.shape_cast %81 : vector<32xf32> to vector<1x32xf32>
    %83 = tpu.concatenate %80, %82 in 0 : vector<1x32xf32>, vector<1x32xf32> -> vector<2x32xf32>
    %c0_95 = arith.constant 0 : index
    %c0_96 = arith.constant 0 : index
    %84 = vector.load %arg9[%c0_95, %c0_96] : memref<32x2xf32, #tpu.memory_space<vmem>>, vector<32x2xf32>
    %cst_97 = arith.constant dense<0.000000e+00> : vector<2x2xf32>
    %85 = tpu.matmul %83, %84, %cst_97 {dimension_numbers = #tpu.dot_dimension_numbers<[1], [0], [0], [1], [0, 0, 1, 1], [], []>} : vector<2x32xf32>, vector<32x2xf32>, vector<2x2xf32> -> vector<2x2xf32>
    %c0_98 = arith.constant 0 : index
    %c0_99 = arith.constant 0 : index
    %86 = vector.load %arg10[%c0_98, %c0_99] : memref<1x2xf32, #tpu.memory_space<vmem>>, vector<1x2xf32>
    %87 = vector.broadcast %86 : vector<1x2xf32> to vector<2x2xf32>
    %88 = arith.addf %85, %87 : vector<2x2xf32>
    %cst_100 = arith.constant 0.000000e+00 : f32
    %89 = vector.broadcast %cst_100 : f32 to vector<2x2xf32>
    %90 = arith.maximumf %88, %89 : vector<2x2xf32>
    %c0_101 = arith.constant 0 : index
    %c0_102 = arith.constant 0 : index
    %91 = vector.load %arg11[%c0_101, %c0_102] : memref<2x32xf32, #tpu.memory_space<vmem>>, vector<2x32xf32>
    %cst_103 = arith.constant dense<0.000000e+00> : vector<2x32xf32>
    %92 = tpu.matmul %90, %91, %cst_103 {dimension_numbers = #tpu.dot_dimension_numbers<[1], [0], [0], [1], [0, 0, 1, 1], [], []>} : vector<2x2xf32>, vector<2x32xf32>, vector<2x32xf32> -> vector<2x32xf32>
    %c0_104 = arith.constant 0 : index
    %c0_105 = arith.constant 0 : index
    %93 = vector.load %arg12[%c0_104, %c0_105] : memref<1x32xf32, #tpu.memory_space<vmem>>, vector<1x32xf32>
    %94 = vector.broadcast %93 : vector<1x32xf32> to vector<2x32xf32>
    %95 = arith.addf %92, %94 : vector<2x32xf32>
    %96 = vector.extract_strided_slice %95 {offsets = [0, 0], sizes = [1, 32], strides = [1, 1]} : vector<2x32xf32> to vector<1x32xf32>
    %97 = vector.extract_strided_slice %95 {offsets = [1, 0], sizes = [1, 32], strides = [1, 1]} : vector<2x32xf32> to vector<1x32xf32>
    %98 = arith.addf %96, %97 : vector<1x32xf32>
    %99 = arith.negf %98 : vector<1x32xf32>
    %100 = math.exp %99 : vector<1x32xf32>
    %cst_106 = arith.constant 1.000000e+00 : f32
    %101 = vector.broadcast %cst_106 : f32 to vector<1x32xf32>
    %102 = arith.addf %101, %100 : vector<1x32xf32>
    %103 = arith.divf %101, %102 : vector<1x32xf32>
    %104 = vector.broadcast %103 : vector<1x32xf32> to vector<256x32xf32>
    %105 = arith.mulf %76, %104 : vector<256x32xf32>
    %106 = vector.shape_cast %105 : vector<256x32xf32> to vector<16x16x32xf32>
    %cst_107 = arith.constant dense<0xFF800000> : vector<16x16xf32>
    %107 = vector.multi_reduction <maximumf>, %106, %cst_107 [2] : vector<16x16x32xf32> to vector<16x16xf32>
    %cst_108 = arith.constant dense<0.000000e+00> : vector<16x16xf32>
    %108 = vector.multi_reduction <add>, %106, %cst_108 [2] : vector<16x16x32xf32> to vector<16x16xf32>
    %cst_109 = arith.constant 3.200000e+01 : f32
    %109 = vector.broadcast %cst_109 : f32 to vector<16x16xf32>
    %110 = arith.divf %108, %109 : vector<16x16xf32>
    %cst_110 = arith.constant 0.000000e+00 : f32
    %111 = vector.broadcast %cst_110 : f32 to vector<2x22x22xf32>
    %c0_111 = arith.constant 0 : index
    %c0_112 = arith.constant 0 : index
    %c0_113 = arith.constant 0 : index
    %112 = vector.load %arg17[%c0_111, %c0_112, %c0_113] : memref<2x22x22xf32, #tpu.memory_space<vmem>>, vector<2x22x22xf32>
    tpu.vector_store %arg17[%c0_111, %c0_112, %c0_113], %111 {strides = array<i32>} : memref<2x22x22xf32, #tpu.memory_space<vmem>>, vector<2x22x22xf32>,
    %c0_114 = arith.constant 0 : index
    %c3 = arith.constant 3 : index
    %c3_115 = arith.constant 3 : index
    %113 = vector.load %arg17[%c0_114, %c3, %c3_115] : memref<2x22x22xf32, #tpu.memory_space<vmem>>, vector<1x16x16xf32>
    %114 = vector.shape_cast %113 : vector<1x16x16xf32> to vector<16x16xf32>
    %115 = vector.shape_cast %107 : vector<16x16xf32> to vector<1x16x16xf32>
    tpu.vector_store %arg17[%c0_114, %c3, %c3_115], %115 {strides = array<i32>} : memref<2x22x22xf32, #tpu.memory_space<vmem>>, vector<1x16x16xf32>,
    %c1_116 = arith.constant 1 : index
    %c3_117 = arith.constant 3 : index
    %c3_118 = arith.constant 3 : index
    %116 = vector.load %arg17[%c1_116, %c3_117, %c3_118] : memref<2x22x22xf32, #tpu.memory_space<vmem>>, vector<1x16x16xf32>
    %117 = vector.shape_cast %116 : vector<1x16x16xf32> to vector<16x16xf32>
    %118 = vector.shape_cast %110 : vector<16x16xf32> to vector<1x16x16xf32>
    tpu.vector_store %arg17[%c1_116, %c3_117, %c3_118], %118 {strides = array<i32>} : memref<2x22x22xf32, #tpu.memory_space<vmem>>, vector<1x16x16xf32>,
    %cst_119 = arith.constant 0.000000e+00 : f32
    %119 = vector.broadcast %cst_119 : f32 to vector<16x16xf32>
    %c0_120 = arith.constant 0 : index
    %c0_121 = arith.constant 0 : index
    %c0_122 = arith.constant 0 : index
    %120 = vector.load %arg17[%c0_120, %c0_121, %c0_122] : memref<2x22x22xf32, #tpu.memory_space<vmem>>, vector<1x16x16xf32>
    %121 = vector.shape_cast %120 : vector<1x16x16xf32> to vector<16x16xf32>
    %c0_123 = arith.constant 0 : index
    %122 = memref.load %arg13[%c0_123] : memref<98xf32, #tpu.memory_space<smem>>
    %123 = vector.broadcast %122 : f32 to vector<16x16xf32>
    %124 = arith.mulf %121, %123 : vector<16x16xf32>
    %125 = arith.addf %119, %124 : vector<16x16xf32>
    %c1_124 = arith.constant 1 : index
    %c0_125 = arith.constant 0 : index
    %c0_126 = arith.constant 0 : index
    %126 = vector.load %arg17[%c1_124, %c0_125, %c0_126] : memref<2x22x22xf32, #tpu.memory_space<vmem>>, vector<1x16x16xf32>
    %127 = vector.shape_cast %126 : vector<1x16x16xf32> to vector<16x16xf32>
    %c1_127 = arith.constant 1 : index
    %128 = memref.load %arg13[%c1_127] : memref<98xf32, #tpu.memory_space<smem>>
    %129 = vector.broadcast %128 : f32 to vector<16x16xf32>
    %130 = arith.mulf %127, %129 : vector<16x16xf32>
    %131 = arith.addf %125, %130 : vector<16x16xf32>
    %c0_128 = arith.constant 0 : index
    %c0_129 = arith.constant 0 : index
    %c1_130 = arith.constant 1 : index
    %132 = vector.load %arg17[%c0_128, %c0_129, %c1_130] : memref<2x22x22xf32, #tpu.memory_space<vmem>>, vector<1x16x16xf32>
    %133 = vector.shape_cast %132 : vector<1x16x16xf32> to vector<16x16xf32>
    %c2_131 = arith.constant 2 : index
    %134 = memref.load %arg13[%c2_131] : memref<98xf32, #tpu.memory_space<smem>>
    %135 = vector.broadcast %134 : f32 to vector<16x16xf32>
    %136 = arith.mulf %133, %135 : vector<16x16xf32>
    %137 = arith.addf %131, %136 : vector<16x16xf32>
    %c1_132 = arith.constant 1 : index
    %c0_133 = arith.constant 0 : index
    %c1_134 = arith.constant 1 : index
    %138 = vector.load %arg17[%c1_132, %c0_133, %c1_134] : memref<2x22x22xf32, #tpu.memory_space<vmem>>, vector<1x16x16xf32>
    %139 = vector.shape_cast %138 : vector<1x16x16xf32> to vector<16x16xf32>
    %c3_135 = arith.constant 3 : index
    %140 = memref.load %arg13[%c3_135] : memref<98xf32, #tpu.memory_space<smem>>
    %141 = vector.broadcast %140 : f32 to vector<16x16xf32>
    %142 = arith.mulf %139, %141 : vector<16x16xf32>
    %143 = arith.addf %137, %142 : vector<16x16xf32>
    %c0_136 = arith.constant 0 : index
    %c0_137 = arith.constant 0 : index
    %c2_138 = arith.constant 2 : index
    %144 = vector.load %arg17[%c0_136, %c0_137, %c2_138] : memref<2x22x22xf32, #tpu.memory_space<vmem>>, vector<1x16x16xf32>
    %145 = vector.shape_cast %144 : vector<1x16x16xf32> to vector<16x16xf32>
    %c4 = arith.constant 4 : index
    %146 = memref.load %arg13[%c4] : memref<98xf32, #tpu.memory_space<smem>>
    %147 = vector.broadcast %146 : f32 to vector<16x16xf32>
    %148 = arith.mulf %145, %147 : vector<16x16xf32>
    %149 = arith.addf %143, %148 : vector<16x16xf32>
    %c1_139 = arith.constant 1 : index
    %c0_140 = arith.constant 0 : index
    %c2_141 = arith.constant 2 : index
    %150 = vector.load %arg17[%c1_139, %c0_140, %c2_141] : memref<2x22x22xf32, #tpu.memory_space<vmem>>, vector<1x16x16xf32>
    %151 = vector.shape_cast %150 : vector<1x16x16xf32> to vector<16x16xf32>
    %c5 = arith.constant 5 : index
    %152 = memref.load %arg13[%c5] : memref<98xf32, #tpu.memory_space<smem>>
    %153 = vector.broadcast %152 : f32 to vector<16x16xf32>
    %154 = arith.mulf %151, %153 : vector<16x16xf32>
    %155 = arith.addf %149, %154 : vector<16x16xf32>
    %c0_142 = arith.constant 0 : index
    %c0_143 = arith.constant 0 : index
    %c3_144 = arith.constant 3 : index
    %156 = vector.load %arg17[%c0_142, %c0_143, %c3_144] : memref<2x22x22xf32, #tpu.memory_space<vmem>>, vector<1x16x16xf32>
    %157 = vector.shape_cast %156 : vector<1x16x16xf32> to vector<16x16xf32>
    %c6 = arith.constant 6 : index
    %158 = memref.load %arg13[%c6] : memref<98xf32, #tpu.memory_space<smem>>
    %159 = vector.broadcast %158 : f32 to vector<16x16xf32>
    %160 = arith.mulf %157, %159 : vector<16x16xf32>
    %161 = arith.addf %155, %160 : vector<16x16xf32>
    %c1_145 = arith.constant 1 : index
    %c0_146 = arith.constant 0 : index
    %c3_147 = arith.constant 3 : index
    %162 = vector.load %arg17[%c1_145, %c0_146, %c3_147] : memref<2x22x22xf32, #tpu.memory_space<vmem>>, vector<1x16x16xf32>
    %163 = vector.shape_cast %162 : vector<1x16x16xf32> to vector<16x16xf32>
    %c7 = arith.constant 7 : index
    %164 = memref.load %arg13[%c7] : memref<98xf32, #tpu.memory_space<smem>>
    %165 = vector.broadcast %164 : f32 to vector<16x16xf32>
    %166 = arith.mulf %163, %165 : vector<16x16xf32>
    %167 = arith.addf %161, %166 : vector<16x16xf32>
    %c0_148 = arith.constant 0 : index
    %c0_149 = arith.constant 0 : index
    %c4_150 = arith.constant 4 : index
    %168 = vector.load %arg17[%c0_148, %c0_149, %c4_150] : memref<2x22x22xf32, #tpu.memory_space<vmem>>, vector<1x16x16xf32>
    %169 = vector.shape_cast %168 : vector<1x16x16xf32> to vector<16x16xf32>
    %c8 = arith.constant 8 : index
    %170 = memref.load %arg13[%c8] : memref<98xf32, #tpu.memory_space<smem>>
    %171 = vector.broadcast %170 : f32 to vector<16x16xf32>
    %172 = arith.mulf %169, %171 : vector<16x16xf32>
    %173 = arith.addf %167, %172 : vector<16x16xf32>
    %c1_151 = arith.constant 1 : index
    %c0_152 = arith.constant 0 : index
    %c4_153 = arith.constant 4 : index
    %174 = vector.load %arg17[%c1_151, %c0_152, %c4_153] : memref<2x22x22xf32, #tpu.memory_space<vmem>>, vector<1x16x16xf32>
    %175 = vector.shape_cast %174 : vector<1x16x16xf32> to vector<16x16xf32>
    %c9 = arith.constant 9 : index
    %176 = memref.load %arg13[%c9] : memref<98xf32, #tpu.memory_space<smem>>
    %177 = vector.broadcast %176 : f32 to vector<16x16xf32>
    %178 = arith.mulf %175, %177 : vector<16x16xf32>
    %179 = arith.addf %173, %178 : vector<16x16xf32>
    %c0_154 = arith.constant 0 : index
    %c0_155 = arith.constant 0 : index
    %c5_156 = arith.constant 5 : index
    %180 = vector.load %arg17[%c0_154, %c0_155, %c5_156] : memref<2x22x22xf32, #tpu.memory_space<vmem>>, vector<1x16x16xf32>
    %181 = vector.shape_cast %180 : vector<1x16x16xf32> to vector<16x16xf32>
    %c10 = arith.constant 10 : index
    %182 = memref.load %arg13[%c10] : memref<98xf32, #tpu.memory_space<smem>>
    %183 = vector.broadcast %182 : f32 to vector<16x16xf32>
    %184 = arith.mulf %181, %183 : vector<16x16xf32>
    %185 = arith.addf %179, %184 : vector<16x16xf32>
    %c1_157 = arith.constant 1 : index
    %c0_158 = arith.constant 0 : index
    %c5_159 = arith.constant 5 : index
    %186 = vector.load %arg17[%c1_157, %c0_158, %c5_159] : memref<2x22x22xf32, #tpu.memory_space<vmem>>, vector<1x16x16xf32>
    %187 = vector.shape_cast %186 : vector<1x16x16xf32> to vector<16x16xf32>
    %c11 = arith.constant 11 : index
    %188 = memref.load %arg13[%c11] : memref<98xf32, #tpu.memory_space<smem>>
    %189 = vector.broadcast %188 : f32 to vector<16x16xf32>
    %190 = arith.mulf %187, %189 : vector<16x16xf32>
    %191 = arith.addf %185, %190 : vector<16x16xf32>
    %c0_160 = arith.constant 0 : index
    %c0_161 = arith.constant 0 : index
    %c6_162 = arith.constant 6 : index
    %192 = vector.load %arg17[%c0_160, %c0_161, %c6_162] : memref<2x22x22xf32, #tpu.memory_space<vmem>>, vector<1x16x16xf32>
    %193 = vector.shape_cast %192 : vector<1x16x16xf32> to vector<16x16xf32>
    %c12 = arith.constant 12 : index
    %194 = memref.load %arg13[%c12] : memref<98xf32, #tpu.memory_space<smem>>
    %195 = vector.broadcast %194 : f32 to vector<16x16xf32>
    %196 = arith.mulf %193, %195 : vector<16x16xf32>
    %197 = arith.addf %191, %196 : vector<16x16xf32>
    %c1_163 = arith.constant 1 : index
    %c0_164 = arith.constant 0 : index
    %c6_165 = arith.constant 6 : index
    %198 = vector.load %arg17[%c1_163, %c0_164, %c6_165] : memref<2x22x22xf32, #tpu.memory_space<vmem>>, vector<1x16x16xf32>
    %199 = vector.shape_cast %198 : vector<1x16x16xf32> to vector<16x16xf32>
    %c13 = arith.constant 13 : index
    %200 = memref.load %arg13[%c13] : memref<98xf32, #tpu.memory_space<smem>>
    %201 = vector.broadcast %200 : f32 to vector<16x16xf32>
    %202 = arith.mulf %199, %201 : vector<16x16xf32>
    %203 = arith.addf %197, %202 : vector<16x16xf32>
    %c0_166 = arith.constant 0 : index
    %c1_167 = arith.constant 1 : index
    %c0_168 = arith.constant 0 : index
    %204 = vector.load %arg17[%c0_166, %c1_167, %c0_168] : memref<2x22x22xf32, #tpu.memory_space<vmem>>, vector<1x16x16xf32>
    %205 = vector.shape_cast %204 : vector<1x16x16xf32> to vector<16x16xf32>
    %c14 = arith.constant 14 : index
    %206 = memref.load %arg13[%c14] : memref<98xf32, #tpu.memory_space<smem>>
    %207 = vector.broadcast %206 : f32 to vector<16x16xf32>
    %208 = arith.mulf %205, %207 : vector<16x16xf32>
    %209 = arith.addf %203, %208 : vector<16x16xf32>
    %c1_169 = arith.constant 1 : index
    %c1_170 = arith.constant 1 : index
    %c0_171 = arith.constant 0 : index
    %210 = vector.load %arg17[%c1_169, %c1_170, %c0_171] : memref<2x22x22xf32, #tpu.memory_space<vmem>>, vector<1x16x16xf32>
    %211 = vector.shape_cast %210 : vector<1x16x16xf32> to vector<16x16xf32>
    %c15 = arith.constant 15 : index
    %212 = memref.load %arg13[%c15] : memref<98xf32, #tpu.memory_space<smem>>
    %213 = vector.broadcast %212 : f32 to vector<16x16xf32>
    %214 = arith.mulf %211, %213 : vector<16x16xf32>
    %215 = arith.addf %209, %214 : vector<16x16xf32>
    %c0_172 = arith.constant 0 : index
    %c1_173 = arith.constant 1 : index
    %c1_174 = arith.constant 1 : index
    %216 = vector.load %arg17[%c0_172, %c1_173, %c1_174] : memref<2x22x22xf32, #tpu.memory_space<vmem>>, vector<1x16x16xf32>
    %217 = vector.shape_cast %216 : vector<1x16x16xf32> to vector<16x16xf32>
    %c16 = arith.constant 16 : index
    %218 = memref.load %arg13[%c16] : memref<98xf32, #tpu.memory_space<smem>>
    %219 = vector.broadcast %218 : f32 to vector<16x16xf32>
    %220 = arith.mulf %217, %219 : vector<16x16xf32>
    %221 = arith.addf %215, %220 : vector<16x16xf32>
    %c1_175 = arith.constant 1 : index
    %c1_176 = arith.constant 1 : index
    %c1_177 = arith.constant 1 : index
    %222 = vector.load %arg17[%c1_175, %c1_176, %c1_177] : memref<2x22x22xf32, #tpu.memory_space<vmem>>, vector<1x16x16xf32>
    %223 = vector.shape_cast %222 : vector<1x16x16xf32> to vector<16x16xf32>
    %c17 = arith.constant 17 : index
    %224 = memref.load %arg13[%c17] : memref<98xf32, #tpu.memory_space<smem>>
    %225 = vector.broadcast %224 : f32 to vector<16x16xf32>
    %226 = arith.mulf %223, %225 : vector<16x16xf32>
    %227 = arith.addf %221, %226 : vector<16x16xf32>
    %c0_178 = arith.constant 0 : index
    %c1_179 = arith.constant 1 : index
    %c2_180 = arith.constant 2 : index
    %228 = vector.load %arg17[%c0_178, %c1_179, %c2_180] : memref<2x22x22xf32, #tpu.memory_space<vmem>>, vector<1x16x16xf32>
    %229 = vector.shape_cast %228 : vector<1x16x16xf32> to vector<16x16xf32>
    %c18 = arith.constant 18 : index
    %230 = memref.load %arg13[%c18] : memref<98xf32, #tpu.memory_space<smem>>
    %231 = vector.broadcast %230 : f32 to vector<16x16xf32>
    %232 = arith.mulf %229, %231 : vector<16x16xf32>
    %233 = arith.addf %227, %232 : vector<16x16xf32>
    %c1_181 = arith.constant 1 : index
    %c1_182 = arith.constant 1 : index
    %c2_183 = arith.constant 2 : index
    %234 = vector.load %arg17[%c1_181, %c1_182, %c2_183] : memref<2x22x22xf32, #tpu.memory_space<vmem>>, vector<1x16x16xf32>
    %235 = vector.shape_cast %234 : vector<1x16x16xf32> to vector<16x16xf32>
    %c19 = arith.constant 19 : index
    %236 = memref.load %arg13[%c19] : memref<98xf32, #tpu.memory_space<smem>>
    %237 = vector.broadcast %236 : f32 to vector<16x16xf32>
    %238 = arith.mulf %235, %237 : vector<16x16xf32>
    %239 = arith.addf %233, %238 : vector<16x16xf32>
    %c0_184 = arith.constant 0 : index
    %c1_185 = arith.constant 1 : index
    %c3_186 = arith.constant 3 : index
    %240 = vector.load %arg17[%c0_184, %c1_185, %c3_186] : memref<2x22x22xf32, #tpu.memory_space<vmem>>, vector<1x16x16xf32>
    %241 = vector.shape_cast %240 : vector<1x16x16xf32> to vector<16x16xf32>
    %c20 = arith.constant 20 : index
    %242 = memref.load %arg13[%c20] : memref<98xf32, #tpu.memory_space<smem>>
    %243 = vector.broadcast %242 : f32 to vector<16x16xf32>
    %244 = arith.mulf %241, %243 : vector<16x16xf32>
    %245 = arith.addf %239, %244 : vector<16x16xf32>
    %c1_187 = arith.constant 1 : index
    %c1_188 = arith.constant 1 : index
    %c3_189 = arith.constant 3 : index
    %246 = vector.load %arg17[%c1_187, %c1_188, %c3_189] : memref<2x22x22xf32, #tpu.memory_space<vmem>>, vector<1x16x16xf32>
    %247 = vector.shape_cast %246 : vector<1x16x16xf32> to vector<16x16xf32>
    %c21 = arith.constant 21 : index
    %248 = memref.load %arg13[%c21] : memref<98xf32, #tpu.memory_space<smem>>
    %249 = vector.broadcast %248 : f32 to vector<16x16xf32>
    %250 = arith.mulf %247, %249 : vector<16x16xf32>
    %251 = arith.addf %245, %250 : vector<16x16xf32>
    %c0_190 = arith.constant 0 : index
    %c1_191 = arith.constant 1 : index
    %c4_192 = arith.constant 4 : index
    %252 = vector.load %arg17[%c0_190, %c1_191, %c4_192] : memref<2x22x22xf32, #tpu.memory_space<vmem>>, vector<1x16x16xf32>
    %253 = vector.shape_cast %252 : vector<1x16x16xf32> to vector<16x16xf32>
    %c22 = arith.constant 22 : index
    %254 = memref.load %arg13[%c22] : memref<98xf32, #tpu.memory_space<smem>>
    %255 = vector.broadcast %254 : f32 to vector<16x16xf32>
    %256 = arith.mulf %253, %255 : vector<16x16xf32>
    %257 = arith.addf %251, %256 : vector<16x16xf32>
    %c1_193 = arith.constant 1 : index
    %c1_194 = arith.constant 1 : index
    %c4_195 = arith.constant 4 : index
    %258 = vector.load %arg17[%c1_193, %c1_194, %c4_195] : memref<2x22x22xf32, #tpu.memory_space<vmem>>, vector<1x16x16xf32>
    %259 = vector.shape_cast %258 : vector<1x16x16xf32> to vector<16x16xf32>
    %c23 = arith.constant 23 : index
    %260 = memref.load %arg13[%c23] : memref<98xf32, #tpu.memory_space<smem>>
    %261 = vector.broadcast %260 : f32 to vector<16x16xf32>
    %262 = arith.mulf %259, %261 : vector<16x16xf32>
    %263 = arith.addf %257, %262 : vector<16x16xf32>
    %c0_196 = arith.constant 0 : index
    %c1_197 = arith.constant 1 : index
    %c5_198 = arith.constant 5 : index
    %264 = vector.load %arg17[%c0_196, %c1_197, %c5_198] : memref<2x22x22xf32, #tpu.memory_space<vmem>>, vector<1x16x16xf32>
    %265 = vector.shape_cast %264 : vector<1x16x16xf32> to vector<16x16xf32>
    %c24 = arith.constant 24 : index
    %266 = memref.load %arg13[%c24] : memref<98xf32, #tpu.memory_space<smem>>
    %267 = vector.broadcast %266 : f32 to vector<16x16xf32>
    %268 = arith.mulf %265, %267 : vector<16x16xf32>
    %269 = arith.addf %263, %268 : vector<16x16xf32>
    %c1_199 = arith.constant 1 : index
    %c1_200 = arith.constant 1 : index
    %c5_201 = arith.constant 5 : index
    %270 = vector.load %arg17[%c1_199, %c1_200, %c5_201] : memref<2x22x22xf32, #tpu.memory_space<vmem>>, vector<1x16x16xf32>
    %271 = vector.shape_cast %270 : vector<1x16x16xf32> to vector<16x16xf32>
    %c25 = arith.constant 25 : index
    %272 = memref.load %arg13[%c25] : memref<98xf32, #tpu.memory_space<smem>>
    %273 = vector.broadcast %272 : f32 to vector<16x16xf32>
    %274 = arith.mulf %271, %273 : vector<16x16xf32>
    %275 = arith.addf %269, %274 : vector<16x16xf32>
    %c0_202 = arith.constant 0 : index
    %c1_203 = arith.constant 1 : index
    %c6_204 = arith.constant 6 : index
    %276 = vector.load %arg17[%c0_202, %c1_203, %c6_204] : memref<2x22x22xf32, #tpu.memory_space<vmem>>, vector<1x16x16xf32>
    %277 = vector.shape_cast %276 : vector<1x16x16xf32> to vector<16x16xf32>
    %c26 = arith.constant 26 : index
    %278 = memref.load %arg13[%c26] : memref<98xf32, #tpu.memory_space<smem>>
    %279 = vector.broadcast %278 : f32 to vector<16x16xf32>
    %280 = arith.mulf %277, %279 : vector<16x16xf32>
    %281 = arith.addf %275, %280 : vector<16x16xf32>
    %c1_205 = arith.constant 1 : index
    %c1_206 = arith.constant 1 : index
    %c6_207 = arith.constant 6 : index
    %282 = vector.load %arg17[%c1_205, %c1_206, %c6_207] : memref<2x22x22xf32, #tpu.memory_space<vmem>>, vector<1x16x16xf32>
    %283 = vector.shape_cast %282 : vector<1x16x16xf32> to vector<16x16xf32>
    %c27 = arith.constant 27 : index
    %284 = memref.load %arg13[%c27] : memref<98xf32, #tpu.memory_space<smem>>
    %285 = vector.broadcast %284 : f32 to vector<16x16xf32>
    %286 = arith.mulf %283, %285 : vector<16x16xf32>
    %287 = arith.addf %281, %286 : vector<16x16xf32>
    %c0_208 = arith.constant 0 : index
    %c2_209 = arith.constant 2 : index
    %c0_210 = arith.constant 0 : index
    %288 = vector.load %arg17[%c0_208, %c2_209, %c0_210] : memref<2x22x22xf32, #tpu.memory_space<vmem>>, vector<1x16x16xf32>
    %289 = vector.shape_cast %288 : vector<1x16x16xf32> to vector<16x16xf32>
    %c28 = arith.constant 28 : index
    %290 = memref.load %arg13[%c28] : memref<98xf32, #tpu.memory_space<smem>>
    %291 = vector.broadcast %290 : f32 to vector<16x16xf32>
    %292 = arith.mulf %289, %291 : vector<16x16xf32>
    %293 = arith.addf %287, %292 : vector<16x16xf32>
    %c1_211 = arith.constant 1 : index
    %c2_212 = arith.constant 2 : index
    %c0_213 = arith.constant 0 : index
    %294 = vector.load %arg17[%c1_211, %c2_212, %c0_213] : memref<2x22x22xf32, #tpu.memory_space<vmem>>, vector<1x16x16xf32>
    %295 = vector.shape_cast %294 : vector<1x16x16xf32> to vector<16x16xf32>
    %c29 = arith.constant 29 : index
    %296 = memref.load %arg13[%c29] : memref<98xf32, #tpu.memory_space<smem>>
    %297 = vector.broadcast %296 : f32 to vector<16x16xf32>
    %298 = arith.mulf %295, %297 : vector<16x16xf32>
    %299 = arith.addf %293, %298 : vector<16x16xf32>
    %c0_214 = arith.constant 0 : index
    %c2_215 = arith.constant 2 : index
    %c1_216 = arith.constant 1 : index
    %300 = vector.load %arg17[%c0_214, %c2_215, %c1_216] : memref<2x22x22xf32, #tpu.memory_space<vmem>>, vector<1x16x16xf32>
    %301 = vector.shape_cast %300 : vector<1x16x16xf32> to vector<16x16xf32>
    %c30 = arith.constant 30 : index
    %302 = memref.load %arg13[%c30] : memref<98xf32, #tpu.memory_space<smem>>
    %303 = vector.broadcast %302 : f32 to vector<16x16xf32>
    %304 = arith.mulf %301, %303 : vector<16x16xf32>
    %305 = arith.addf %299, %304 : vector<16x16xf32>
    %c1_217 = arith.constant 1 : index
    %c2_218 = arith.constant 2 : index
    %c1_219 = arith.constant 1 : index
    %306 = vector.load %arg17[%c1_217, %c2_218, %c1_219] : memref<2x22x22xf32, #tpu.memory_space<vmem>>, vector<1x16x16xf32>
    %307 = vector.shape_cast %306 : vector<1x16x16xf32> to vector<16x16xf32>
    %c31 = arith.constant 31 : index
    %308 = memref.load %arg13[%c31] : memref<98xf32, #tpu.memory_space<smem>>
    %309 = vector.broadcast %308 : f32 to vector<16x16xf32>
    %310 = arith.mulf %307, %309 : vector<16x16xf32>
    %311 = arith.addf %305, %310 : vector<16x16xf32>
    %c0_220 = arith.constant 0 : index
    %c2_221 = arith.constant 2 : index
    %c2_222 = arith.constant 2 : index
    %312 = vector.load %arg17[%c0_220, %c2_221, %c2_222] : memref<2x22x22xf32, #tpu.memory_space<vmem>>, vector<1x16x16xf32>
    %313 = vector.shape_cast %312 : vector<1x16x16xf32> to vector<16x16xf32>
    %c32 = arith.constant 32 : index
    %314 = memref.load %arg13[%c32] : memref<98xf32, #tpu.memory_space<smem>>
    %315 = vector.broadcast %314 : f32 to vector<16x16xf32>
    %316 = arith.mulf %313, %315 : vector<16x16xf32>
    %317 = arith.addf %311, %316 : vector<16x16xf32>
    %c1_223 = arith.constant 1 : index
    %c2_224 = arith.constant 2 : index
    %c2_225 = arith.constant 2 : index
    %318 = vector.load %arg17[%c1_223, %c2_224, %c2_225] : memref<2x22x22xf32, #tpu.memory_space<vmem>>, vector<1x16x16xf32>
    %319 = vector.shape_cast %318 : vector<1x16x16xf32> to vector<16x16xf32>
    %c33 = arith.constant 33 : index
    %320 = memref.load %arg13[%c33] : memref<98xf32, #tpu.memory_space<smem>>
    %321 = vector.broadcast %320 : f32 to vector<16x16xf32>
    %322 = arith.mulf %319, %321 : vector<16x16xf32>
    %323 = arith.addf %317, %322 : vector<16x16xf32>
    %c0_226 = arith.constant 0 : index
    %c2_227 = arith.constant 2 : index
    %c3_228 = arith.constant 3 : index
    %324 = vector.load %arg17[%c0_226, %c2_227, %c3_228] : memref<2x22x22xf32, #tpu.memory_space<vmem>>, vector<1x16x16xf32>
    %325 = vector.shape_cast %324 : vector<1x16x16xf32> to vector<16x16xf32>
    %c34 = arith.constant 34 : index
    %326 = memref.load %arg13[%c34] : memref<98xf32, #tpu.memory_space<smem>>
    %327 = vector.broadcast %326 : f32 to vector<16x16xf32>
    %328 = arith.mulf %325, %327 : vector<16x16xf32>
    %329 = arith.addf %323, %328 : vector<16x16xf32>
    %c1_229 = arith.constant 1 : index
    %c2_230 = arith.constant 2 : index
    %c3_231 = arith.constant 3 : index
    %330 = vector.load %arg17[%c1_229, %c2_230, %c3_231] : memref<2x22x22xf32, #tpu.memory_space<vmem>>, vector<1x16x16xf32>
    %331 = vector.shape_cast %330 : vector<1x16x16xf32> to vector<16x16xf32>
    %c35 = arith.constant 35 : index
    %332 = memref.load %arg13[%c35] : memref<98xf32, #tpu.memory_space<smem>>
    %333 = vector.broadcast %332 : f32 to vector<16x16xf32>
    %334 = arith.mulf %331, %333 : vector<16x16xf32>
    %335 = arith.addf %329, %334 : vector<16x16xf32>
    %c0_232 = arith.constant 0 : index
    %c2_233 = arith.constant 2 : index
    %c4_234 = arith.constant 4 : index
    %336 = vector.load %arg17[%c0_232, %c2_233, %c4_234] : memref<2x22x22xf32, #tpu.memory_space<vmem>>, vector<1x16x16xf32>
    %337 = vector.shape_cast %336 : vector<1x16x16xf32> to vector<16x16xf32>
    %c36 = arith.constant 36 : index
    %338 = memref.load %arg13[%c36] : memref<98xf32, #tpu.memory_space<smem>>
    %339 = vector.broadcast %338 : f32 to vector<16x16xf32>
    %340 = arith.mulf %337, %339 : vector<16x16xf32>
    %341 = arith.addf %335, %340 : vector<16x16xf32>
    %c1_235 = arith.constant 1 : index
    %c2_236 = arith.constant 2 : index
    %c4_237 = arith.constant 4 : index
    %342 = vector.load %arg17[%c1_235, %c2_236, %c4_237] : memref<2x22x22xf32, #tpu.memory_space<vmem>>, vector<1x16x16xf32>
    %343 = vector.shape_cast %342 : vector<1x16x16xf32> to vector<16x16xf32>
    %c37 = arith.constant 37 : index
    %344 = memref.load %arg13[%c37] : memref<98xf32, #tpu.memory_space<smem>>
    %345 = vector.broadcast %344 : f32 to vector<16x16xf32>
    %346 = arith.mulf %343, %345 : vector<16x16xf32>
    %347 = arith.addf %341, %346 : vector<16x16xf32>
    %c0_238 = arith.constant 0 : index
    %c2_239 = arith.constant 2 : index
    %c5_240 = arith.constant 5 : index
    %348 = vector.load %arg17[%c0_238, %c2_239, %c5_240] : memref<2x22x22xf32, #tpu.memory_space<vmem>>, vector<1x16x16xf32>
    %349 = vector.shape_cast %348 : vector<1x16x16xf32> to vector<16x16xf32>
    %c38 = arith.constant 38 : index
    %350 = memref.load %arg13[%c38] : memref<98xf32, #tpu.memory_space<smem>>
    %351 = vector.broadcast %350 : f32 to vector<16x16xf32>
    %352 = arith.mulf %349, %351 : vector<16x16xf32>
    %353 = arith.addf %347, %352 : vector<16x16xf32>
    %c1_241 = arith.constant 1 : index
    %c2_242 = arith.constant 2 : index
    %c5_243 = arith.constant 5 : index
    %354 = vector.load %arg17[%c1_241, %c2_242, %c5_243] : memref<2x22x22xf32, #tpu.memory_space<vmem>>, vector<1x16x16xf32>
    %355 = vector.shape_cast %354 : vector<1x16x16xf32> to vector<16x16xf32>
    %c39 = arith.constant 39 : index
    %356 = memref.load %arg13[%c39] : memref<98xf32, #tpu.memory_space<smem>>
    %357 = vector.broadcast %356 : f32 to vector<16x16xf32>
    %358 = arith.mulf %355, %357 : vector<16x16xf32>
    %359 = arith.addf %353, %358 : vector<16x16xf32>
    %c0_244 = arith.constant 0 : index
    %c2_245 = arith.constant 2 : index
    %c6_246 = arith.constant 6 : index
    %360 = vector.load %arg17[%c0_244, %c2_245, %c6_246] : memref<2x22x22xf32, #tpu.memory_space<vmem>>, vector<1x16x16xf32>
    %361 = vector.shape_cast %360 : vector<1x16x16xf32> to vector<16x16xf32>
    %c40 = arith.constant 40 : index
    %362 = memref.load %arg13[%c40] : memref<98xf32, #tpu.memory_space<smem>>
    %363 = vector.broadcast %362 : f32 to vector<16x16xf32>
    %364 = arith.mulf %361, %363 : vector<16x16xf32>
    %365 = arith.addf %359, %364 : vector<16x16xf32>
    %c1_247 = arith.constant 1 : index
    %c2_248 = arith.constant 2 : index
    %c6_249 = arith.constant 6 : index
    %366 = vector.load %arg17[%c1_247, %c2_248, %c6_249] : memref<2x22x22xf32, #tpu.memory_space<vmem>>, vector<1x16x16xf32>
    %367 = vector.shape_cast %366 : vector<1x16x16xf32> to vector<16x16xf32>
    %c41 = arith.constant 41 : index
    %368 = memref.load %arg13[%c41] : memref<98xf32, #tpu.memory_space<smem>>
    %369 = vector.broadcast %368 : f32 to vector<16x16xf32>
    %370 = arith.mulf %367, %369 : vector<16x16xf32>
    %371 = arith.addf %365, %370 : vector<16x16xf32>
    %c0_250 = arith.constant 0 : index
    %c3_251 = arith.constant 3 : index
    %c0_252 = arith.constant 0 : index
    %372 = vector.load %arg17[%c0_250, %c3_251, %c0_252] : memref<2x22x22xf32, #tpu.memory_space<vmem>>, vector<1x16x16xf32>
    %373 = vector.shape_cast %372 : vector<1x16x16xf32> to vector<16x16xf32>
    %c42 = arith.constant 42 : index
    %374 = memref.load %arg13[%c42] : memref<98xf32, #tpu.memory_space<smem>>
    %375 = vector.broadcast %374 : f32 to vector<16x16xf32>
    %376 = arith.mulf %373, %375 : vector<16x16xf32>
    %377 = arith.addf %371, %376 : vector<16x16xf32>
    %c1_253 = arith.constant 1 : index
    %c3_254 = arith.constant 3 : index
    %c0_255 = arith.constant 0 : index
    %378 = vector.load %arg17[%c1_253, %c3_254, %c0_255] : memref<2x22x22xf32, #tpu.memory_space<vmem>>, vector<1x16x16xf32>
    %379 = vector.shape_cast %378 : vector<1x16x16xf32> to vector<16x16xf32>
    %c43 = arith.constant 43 : index
    %380 = memref.load %arg13[%c43] : memref<98xf32, #tpu.memory_space<smem>>
    %381 = vector.broadcast %380 : f32 to vector<16x16xf32>
    %382 = arith.mulf %379, %381 : vector<16x16xf32>
    %383 = arith.addf %377, %382 : vector<16x16xf32>
    %c0_256 = arith.constant 0 : index
    %c3_257 = arith.constant 3 : index
    %c1_258 = arith.constant 1 : index
    %384 = vector.load %arg17[%c0_256, %c3_257, %c1_258] : memref<2x22x22xf32, #tpu.memory_space<vmem>>, vector<1x16x16xf32>
    %385 = vector.shape_cast %384 : vector<1x16x16xf32> to vector<16x16xf32>
    %c44 = arith.constant 44 : index
    %386 = memref.load %arg13[%c44] : memref<98xf32, #tpu.memory_space<smem>>
    %387 = vector.broadcast %386 : f32 to vector<16x16xf32>
    %388 = arith.mulf %385, %387 : vector<16x16xf32>
    %389 = arith.addf %383, %388 : vector<16x16xf32>
    %c1_259 = arith.constant 1 : index
    %c3_260 = arith.constant 3 : index
    %c1_261 = arith.constant 1 : index
    %390 = vector.load %arg17[%c1_259, %c3_260, %c1_261] : memref<2x22x22xf32, #tpu.memory_space<vmem>>, vector<1x16x16xf32>
    %391 = vector.shape_cast %390 : vector<1x16x16xf32> to vector<16x16xf32>
    %c45 = arith.constant 45 : index
    %392 = memref.load %arg13[%c45] : memref<98xf32, #tpu.memory_space<smem>>
    %393 = vector.broadcast %392 : f32 to vector<16x16xf32>
    %394 = arith.mulf %391, %393 : vector<16x16xf32>
    %395 = arith.addf %389, %394 : vector<16x16xf32>
    %c0_262 = arith.constant 0 : index
    %c3_263 = arith.constant 3 : index
    %c2_264 = arith.constant 2 : index
    %396 = vector.load %arg17[%c0_262, %c3_263, %c2_264] : memref<2x22x22xf32, #tpu.memory_space<vmem>>, vector<1x16x16xf32>
    %397 = vector.shape_cast %396 : vector<1x16x16xf32> to vector<16x16xf32>
    %c46 = arith.constant 46 : index
    %398 = memref.load %arg13[%c46] : memref<98xf32, #tpu.memory_space<smem>>
    %399 = vector.broadcast %398 : f32 to vector<16x16xf32>
    %400 = arith.mulf %397, %399 : vector<16x16xf32>
    %401 = arith.addf %395, %400 : vector<16x16xf32>
    %c1_265 = arith.constant 1 : index
    %c3_266 = arith.constant 3 : index
    %c2_267 = arith.constant 2 : index
    %402 = vector.load %arg17[%c1_265, %c3_266, %c2_267] : memref<2x22x22xf32, #tpu.memory_space<vmem>>, vector<1x16x16xf32>
    %403 = vector.shape_cast %402 : vector<1x16x16xf32> to vector<16x16xf32>
    %c47 = arith.constant 47 : index
    %404 = memref.load %arg13[%c47] : memref<98xf32, #tpu.memory_space<smem>>
    %405 = vector.broadcast %404 : f32 to vector<16x16xf32>
    %406 = arith.mulf %403, %405 : vector<16x16xf32>
    %407 = arith.addf %401, %406 : vector<16x16xf32>
    %c0_268 = arith.constant 0 : index
    %c3_269 = arith.constant 3 : index
    %c3_270 = arith.constant 3 : index
    %408 = vector.load %arg17[%c0_268, %c3_269, %c3_270] : memref<2x22x22xf32, #tpu.memory_space<vmem>>, vector<1x16x16xf32>
    %409 = vector.shape_cast %408 : vector<1x16x16xf32> to vector<16x16xf32>
    %c48 = arith.constant 48 : index
    %410 = memref.load %arg13[%c48] : memref<98xf32, #tpu.memory_space<smem>>
    %411 = vector.broadcast %410 : f32 to vector<16x16xf32>
    %412 = arith.mulf %409, %411 : vector<16x16xf32>
    %413 = arith.addf %407, %412 : vector<16x16xf32>
    %c1_271 = arith.constant 1 : index
    %c3_272 = arith.constant 3 : index
    %c3_273 = arith.constant 3 : index
    %414 = vector.load %arg17[%c1_271, %c3_272, %c3_273] : memref<2x22x22xf32, #tpu.memory_space<vmem>>, vector<1x16x16xf32>
    %415 = vector.shape_cast %414 : vector<1x16x16xf32> to vector<16x16xf32>
    %c49 = arith.constant 49 : index
    %416 = memref.load %arg13[%c49] : memref<98xf32, #tpu.memory_space<smem>>
    %417 = vector.broadcast %416 : f32 to vector<16x16xf32>
    %418 = arith.mulf %415, %417 : vector<16x16xf32>
    %419 = arith.addf %413, %418 : vector<16x16xf32>
    %c0_274 = arith.constant 0 : index
    %c3_275 = arith.constant 3 : index
    %c4_276 = arith.constant 4 : index
    %420 = vector.load %arg17[%c0_274, %c3_275, %c4_276] : memref<2x22x22xf32, #tpu.memory_space<vmem>>, vector<1x16x16xf32>
    %421 = vector.shape_cast %420 : vector<1x16x16xf32> to vector<16x16xf32>
    %c50 = arith.constant 50 : index
    %422 = memref.load %arg13[%c50] : memref<98xf32, #tpu.memory_space<smem>>
    %423 = vector.broadcast %422 : f32 to vector<16x16xf32>
    %424 = arith.mulf %421, %423 : vector<16x16xf32>
    %425 = arith.addf %419, %424 : vector<16x16xf32>
    %c1_277 = arith.constant 1 : index
    %c3_278 = arith.constant 3 : index
    %c4_279 = arith.constant 4 : index
    %426 = vector.load %arg17[%c1_277, %c3_278, %c4_279] : memref<2x22x22xf32, #tpu.memory_space<vmem>>, vector<1x16x16xf32>
    %427 = vector.shape_cast %426 : vector<1x16x16xf32> to vector<16x16xf32>
    %c51 = arith.constant 51 : index
    %428 = memref.load %arg13[%c51] : memref<98xf32, #tpu.memory_space<smem>>
    %429 = vector.broadcast %428 : f32 to vector<16x16xf32>
    %430 = arith.mulf %427, %429 : vector<16x16xf32>
    %431 = arith.addf %425, %430 : vector<16x16xf32>
    %c0_280 = arith.constant 0 : index
    %c3_281 = arith.constant 3 : index
    %c5_282 = arith.constant 5 : index
    %432 = vector.load %arg17[%c0_280, %c3_281, %c5_282] : memref<2x22x22xf32, #tpu.memory_space<vmem>>, vector<1x16x16xf32>
    %433 = vector.shape_cast %432 : vector<1x16x16xf32> to vector<16x16xf32>
    %c52 = arith.constant 52 : index
    %434 = memref.load %arg13[%c52] : memref<98xf32, #tpu.memory_space<smem>>
    %435 = vector.broadcast %434 : f32 to vector<16x16xf32>
    %436 = arith.mulf %433, %435 : vector<16x16xf32>
    %437 = arith.addf %431, %436 : vector<16x16xf32>
    %c1_283 = arith.constant 1 : index
    %c3_284 = arith.constant 3 : index
    %c5_285 = arith.constant 5 : index
    %438 = vector.load %arg17[%c1_283, %c3_284, %c5_285] : memref<2x22x22xf32, #tpu.memory_space<vmem>>, vector<1x16x16xf32>
    %439 = vector.shape_cast %438 : vector<1x16x16xf32> to vector<16x16xf32>
    %c53 = arith.constant 53 : index
    %440 = memref.load %arg13[%c53] : memref<98xf32, #tpu.memory_space<smem>>
    %441 = vector.broadcast %440 : f32 to vector<16x16xf32>
    %442 = arith.mulf %439, %441 : vector<16x16xf32>
    %443 = arith.addf %437, %442 : vector<16x16xf32>
    %c0_286 = arith.constant 0 : index
    %c3_287 = arith.constant 3 : index
    %c6_288 = arith.constant 6 : index
    %444 = vector.load %arg17[%c0_286, %c3_287, %c6_288] : memref<2x22x22xf32, #tpu.memory_space<vmem>>, vector<1x16x16xf32>
    %445 = vector.shape_cast %444 : vector<1x16x16xf32> to vector<16x16xf32>
    %c54 = arith.constant 54 : index
    %446 = memref.load %arg13[%c54] : memref<98xf32, #tpu.memory_space<smem>>
    %447 = vector.broadcast %446 : f32 to vector<16x16xf32>
    %448 = arith.mulf %445, %447 : vector<16x16xf32>
    %449 = arith.addf %443, %448 : vector<16x16xf32>
    %c1_289 = arith.constant 1 : index
    %c3_290 = arith.constant 3 : index
    %c6_291 = arith.constant 6 : index
    %450 = vector.load %arg17[%c1_289, %c3_290, %c6_291] : memref<2x22x22xf32, #tpu.memory_space<vmem>>, vector<1x16x16xf32>
    %451 = vector.shape_cast %450 : vector<1x16x16xf32> to vector<16x16xf32>
    %c55 = arith.constant 55 : index
    %452 = memref.load %arg13[%c55] : memref<98xf32, #tpu.memory_space<smem>>
    %453 = vector.broadcast %452 : f32 to vector<16x16xf32>
    %454 = arith.mulf %451, %453 : vector<16x16xf32>
    %455 = arith.addf %449, %454 : vector<16x16xf32>
    %c0_292 = arith.constant 0 : index
    %c4_293 = arith.constant 4 : index
    %c0_294 = arith.constant 0 : index
    %456 = vector.load %arg17[%c0_292, %c4_293, %c0_294] : memref<2x22x22xf32, #tpu.memory_space<vmem>>, vector<1x16x16xf32>
    %457 = vector.shape_cast %456 : vector<1x16x16xf32> to vector<16x16xf32>
    %c56 = arith.constant 56 : index
    %458 = memref.load %arg13[%c56] : memref<98xf32, #tpu.memory_space<smem>>
    %459 = vector.broadcast %458 : f32 to vector<16x16xf32>
    %460 = arith.mulf %457, %459 : vector<16x16xf32>
    %461 = arith.addf %455, %460 : vector<16x16xf32>
    %c1_295 = arith.constant 1 : index
    %c4_296 = arith.constant 4 : index
    %c0_297 = arith.constant 0 : index
    %462 = vector.load %arg17[%c1_295, %c4_296, %c0_297] : memref<2x22x22xf32, #tpu.memory_space<vmem>>, vector<1x16x16xf32>
    %463 = vector.shape_cast %462 : vector<1x16x16xf32> to vector<16x16xf32>
    %c57 = arith.constant 57 : index
    %464 = memref.load %arg13[%c57] : memref<98xf32, #tpu.memory_space<smem>>
    %465 = vector.broadcast %464 : f32 to vector<16x16xf32>
    %466 = arith.mulf %463, %465 : vector<16x16xf32>
    %467 = arith.addf %461, %466 : vector<16x16xf32>
    %c0_298 = arith.constant 0 : index
    %c4_299 = arith.constant 4 : index
    %c1_300 = arith.constant 1 : index
    %468 = vector.load %arg17[%c0_298, %c4_299, %c1_300] : memref<2x22x22xf32, #tpu.memory_space<vmem>>, vector<1x16x16xf32>
    %469 = vector.shape_cast %468 : vector<1x16x16xf32> to vector<16x16xf32>
    %c58 = arith.constant 58 : index
    %470 = memref.load %arg13[%c58] : memref<98xf32, #tpu.memory_space<smem>>
    %471 = vector.broadcast %470 : f32 to vector<16x16xf32>
    %472 = arith.mulf %469, %471 : vector<16x16xf32>
    %473 = arith.addf %467, %472 : vector<16x16xf32>
    %c1_301 = arith.constant 1 : index
    %c4_302 = arith.constant 4 : index
    %c1_303 = arith.constant 1 : index
    %474 = vector.load %arg17[%c1_301, %c4_302, %c1_303] : memref<2x22x22xf32, #tpu.memory_space<vmem>>, vector<1x16x16xf32>
    %475 = vector.shape_cast %474 : vector<1x16x16xf32> to vector<16x16xf32>
    %c59 = arith.constant 59 : index
    %476 = memref.load %arg13[%c59] : memref<98xf32, #tpu.memory_space<smem>>
    %477 = vector.broadcast %476 : f32 to vector<16x16xf32>
    %478 = arith.mulf %475, %477 : vector<16x16xf32>
    %479 = arith.addf %473, %478 : vector<16x16xf32>
    %c0_304 = arith.constant 0 : index
    %c4_305 = arith.constant 4 : index
    %c2_306 = arith.constant 2 : index
    %480 = vector.load %arg17[%c0_304, %c4_305, %c2_306] : memref<2x22x22xf32, #tpu.memory_space<vmem>>, vector<1x16x16xf32>
    %481 = vector.shape_cast %480 : vector<1x16x16xf32> to vector<16x16xf32>
    %c60 = arith.constant 60 : index
    %482 = memref.load %arg13[%c60] : memref<98xf32, #tpu.memory_space<smem>>
    %483 = vector.broadcast %482 : f32 to vector<16x16xf32>
    %484 = arith.mulf %481, %483 : vector<16x16xf32>
    %485 = arith.addf %479, %484 : vector<16x16xf32>
    %c1_307 = arith.constant 1 : index
    %c4_308 = arith.constant 4 : index
    %c2_309 = arith.constant 2 : index
    %486 = vector.load %arg17[%c1_307, %c4_308, %c2_309] : memref<2x22x22xf32, #tpu.memory_space<vmem>>, vector<1x16x16xf32>
    %487 = vector.shape_cast %486 : vector<1x16x16xf32> to vector<16x16xf32>
    %c61 = arith.constant 61 : index
    %488 = memref.load %arg13[%c61] : memref<98xf32, #tpu.memory_space<smem>>
    %489 = vector.broadcast %488 : f32 to vector<16x16xf32>
    %490 = arith.mulf %487, %489 : vector<16x16xf32>
    %491 = arith.addf %485, %490 : vector<16x16xf32>
    %c0_310 = arith.constant 0 : index
    %c4_311 = arith.constant 4 : index
    %c3_312 = arith.constant 3 : index
    %492 = vector.load %arg17[%c0_310, %c4_311, %c3_312] : memref<2x22x22xf32, #tpu.memory_space<vmem>>, vector<1x16x16xf32>
    %493 = vector.shape_cast %492 : vector<1x16x16xf32> to vector<16x16xf32>
    %c62 = arith.constant 62 : index
    %494 = memref.load %arg13[%c62] : memref<98xf32, #tpu.memory_space<smem>>
    %495 = vector.broadcast %494 : f32 to vector<16x16xf32>
    %496 = arith.mulf %493, %495 : vector<16x16xf32>
    %497 = arith.addf %491, %496 : vector<16x16xf32>
    %c1_313 = arith.constant 1 : index
    %c4_314 = arith.constant 4 : index
    %c3_315 = arith.constant 3 : index
    %498 = vector.load %arg17[%c1_313, %c4_314, %c3_315] : memref<2x22x22xf32, #tpu.memory_space<vmem>>, vector<1x16x16xf32>
    %499 = vector.shape_cast %498 : vector<1x16x16xf32> to vector<16x16xf32>
    %c63 = arith.constant 63 : index
    %500 = memref.load %arg13[%c63] : memref<98xf32, #tpu.memory_space<smem>>
    %501 = vector.broadcast %500 : f32 to vector<16x16xf32>
    %502 = arith.mulf %499, %501 : vector<16x16xf32>
    %503 = arith.addf %497, %502 : vector<16x16xf32>
    %c0_316 = arith.constant 0 : index
    %c4_317 = arith.constant 4 : index
    %c4_318 = arith.constant 4 : index
    %504 = vector.load %arg17[%c0_316, %c4_317, %c4_318] : memref<2x22x22xf32, #tpu.memory_space<vmem>>, vector<1x16x16xf32>
    %505 = vector.shape_cast %504 : vector<1x16x16xf32> to vector<16x16xf32>
    %c64 = arith.constant 64 : index
    %506 = memref.load %arg13[%c64] : memref<98xf32, #tpu.memory_space<smem>>
    %507 = vector.broadcast %506 : f32 to vector<16x16xf32>
    %508 = arith.mulf %505, %507 : vector<16x16xf32>
    %509 = arith.addf %503, %508 : vector<16x16xf32>
    %c1_319 = arith.constant 1 : index
    %c4_320 = arith.constant 4 : index
    %c4_321 = arith.constant 4 : index
    %510 = vector.load %arg17[%c1_319, %c4_320, %c4_321] : memref<2x22x22xf32, #tpu.memory_space<vmem>>, vector<1x16x16xf32>
    %511 = vector.shape_cast %510 : vector<1x16x16xf32> to vector<16x16xf32>
    %c65 = arith.constant 65 : index
    %512 = memref.load %arg13[%c65] : memref<98xf32, #tpu.memory_space<smem>>
    %513 = vector.broadcast %512 : f32 to vector<16x16xf32>
    %514 = arith.mulf %511, %513 : vector<16x16xf32>
    %515 = arith.addf %509, %514 : vector<16x16xf32>
    %c0_322 = arith.constant 0 : index
    %c4_323 = arith.constant 4 : index
    %c5_324 = arith.constant 5 : index
    %516 = vector.load %arg17[%c0_322, %c4_323, %c5_324] : memref<2x22x22xf32, #tpu.memory_space<vmem>>, vector<1x16x16xf32>
    %517 = vector.shape_cast %516 : vector<1x16x16xf32> to vector<16x16xf32>
    %c66 = arith.constant 66 : index
    %518 = memref.load %arg13[%c66] : memref<98xf32, #tpu.memory_space<smem>>
    %519 = vector.broadcast %518 : f32 to vector<16x16xf32>
    %520 = arith.mulf %517, %519 : vector<16x16xf32>
    %521 = arith.addf %515, %520 : vector<16x16xf32>
    %c1_325 = arith.constant 1 : index
    %c4_326 = arith.constant 4 : index
    %c5_327 = arith.constant 5 : index
    %522 = vector.load %arg17[%c1_325, %c4_326, %c5_327] : memref<2x22x22xf32, #tpu.memory_space<vmem>>, vector<1x16x16xf32>
    %523 = vector.shape_cast %522 : vector<1x16x16xf32> to vector<16x16xf32>
    %c67 = arith.constant 67 : index
    %524 = memref.load %arg13[%c67] : memref<98xf32, #tpu.memory_space<smem>>
    %525 = vector.broadcast %524 : f32 to vector<16x16xf32>
    %526 = arith.mulf %523, %525 : vector<16x16xf32>
    %527 = arith.addf %521, %526 : vector<16x16xf32>
    %c0_328 = arith.constant 0 : index
    %c4_329 = arith.constant 4 : index
    %c6_330 = arith.constant 6 : index
    %528 = vector.load %arg17[%c0_328, %c4_329, %c6_330] : memref<2x22x22xf32, #tpu.memory_space<vmem>>, vector<1x16x16xf32>
    %529 = vector.shape_cast %528 : vector<1x16x16xf32> to vector<16x16xf32>
    %c68 = arith.constant 68 : index
    %530 = memref.load %arg13[%c68] : memref<98xf32, #tpu.memory_space<smem>>
    %531 = vector.broadcast %530 : f32 to vector<16x16xf32>
    %532 = arith.mulf %529, %531 : vector<16x16xf32>
    %533 = arith.addf %527, %532 : vector<16x16xf32>
    %c1_331 = arith.constant 1 : index
    %c4_332 = arith.constant 4 : index
    %c6_333 = arith.constant 6 : index
    %534 = vector.load %arg17[%c1_331, %c4_332, %c6_333] : memref<2x22x22xf32, #tpu.memory_space<vmem>>, vector<1x16x16xf32>
    %535 = vector.shape_cast %534 : vector<1x16x16xf32> to vector<16x16xf32>
    %c69 = arith.constant 69 : index
    %536 = memref.load %arg13[%c69] : memref<98xf32, #tpu.memory_space<smem>>
    %537 = vector.broadcast %536 : f32 to vector<16x16xf32>
    %538 = arith.mulf %535, %537 : vector<16x16xf32>
    %539 = arith.addf %533, %538 : vector<16x16xf32>
    %c0_334 = arith.constant 0 : index
    %c5_335 = arith.constant 5 : index
    %c0_336 = arith.constant 0 : index
    %540 = vector.load %arg17[%c0_334, %c5_335, %c0_336] : memref<2x22x22xf32, #tpu.memory_space<vmem>>, vector<1x16x16xf32>
    %541 = vector.shape_cast %540 : vector<1x16x16xf32> to vector<16x16xf32>
    %c70 = arith.constant 70 : index
    %542 = memref.load %arg13[%c70] : memref<98xf32, #tpu.memory_space<smem>>
    %543 = vector.broadcast %542 : f32 to vector<16x16xf32>
    %544 = arith.mulf %541, %543 : vector<16x16xf32>
    %545 = arith.addf %539, %544 : vector<16x16xf32>
    %c1_337 = arith.constant 1 : index
    %c5_338 = arith.constant 5 : index
    %c0_339 = arith.constant 0 : index
    %546 = vector.load %arg17[%c1_337, %c5_338, %c0_339] : memref<2x22x22xf32, #tpu.memory_space<vmem>>, vector<1x16x16xf32>
    %547 = vector.shape_cast %546 : vector<1x16x16xf32> to vector<16x16xf32>
    %c71 = arith.constant 71 : index
    %548 = memref.load %arg13[%c71] : memref<98xf32, #tpu.memory_space<smem>>
    %549 = vector.broadcast %548 : f32 to vector<16x16xf32>
    %550 = arith.mulf %547, %549 : vector<16x16xf32>
    %551 = arith.addf %545, %550 : vector<16x16xf32>
    %c0_340 = arith.constant 0 : index
    %c5_341 = arith.constant 5 : index
    %c1_342 = arith.constant 1 : index
    %552 = vector.load %arg17[%c0_340, %c5_341, %c1_342] : memref<2x22x22xf32, #tpu.memory_space<vmem>>, vector<1x16x16xf32>
    %553 = vector.shape_cast %552 : vector<1x16x16xf32> to vector<16x16xf32>
    %c72 = arith.constant 72 : index
    %554 = memref.load %arg13[%c72] : memref<98xf32, #tpu.memory_space<smem>>
    %555 = vector.broadcast %554 : f32 to vector<16x16xf32>
    %556 = arith.mulf %553, %555 : vector<16x16xf32>
    %557 = arith.addf %551, %556 : vector<16x16xf32>
    %c1_343 = arith.constant 1 : index
    %c5_344 = arith.constant 5 : index
    %c1_345 = arith.constant 1 : index
    %558 = vector.load %arg17[%c1_343, %c5_344, %c1_345] : memref<2x22x22xf32, #tpu.memory_space<vmem>>, vector<1x16x16xf32>
    %559 = vector.shape_cast %558 : vector<1x16x16xf32> to vector<16x16xf32>
    %c73 = arith.constant 73 : index
    %560 = memref.load %arg13[%c73] : memref<98xf32, #tpu.memory_space<smem>>
    %561 = vector.broadcast %560 : f32 to vector<16x16xf32>
    %562 = arith.mulf %559, %561 : vector<16x16xf32>
    %563 = arith.addf %557, %562 : vector<16x16xf32>
    %c0_346 = arith.constant 0 : index
    %c5_347 = arith.constant 5 : index
    %c2_348 = arith.constant 2 : index
    %564 = vector.load %arg17[%c0_346, %c5_347, %c2_348] : memref<2x22x22xf32, #tpu.memory_space<vmem>>, vector<1x16x16xf32>
    %565 = vector.shape_cast %564 : vector<1x16x16xf32> to vector<16x16xf32>
    %c74 = arith.constant 74 : index
    %566 = memref.load %arg13[%c74] : memref<98xf32, #tpu.memory_space<smem>>
    %567 = vector.broadcast %566 : f32 to vector<16x16xf32>
    %568 = arith.mulf %565, %567 : vector<16x16xf32>
    %569 = arith.addf %563, %568 : vector<16x16xf32>
    %c1_349 = arith.constant 1 : index
    %c5_350 = arith.constant 5 : index
    %c2_351 = arith.constant 2 : index
    %570 = vector.load %arg17[%c1_349, %c5_350, %c2_351] : memref<2x22x22xf32, #tpu.memory_space<vmem>>, vector<1x16x16xf32>
    %571 = vector.shape_cast %570 : vector<1x16x16xf32> to vector<16x16xf32>
    %c75 = arith.constant 75 : index
    %572 = memref.load %arg13[%c75] : memref<98xf32, #tpu.memory_space<smem>>
    %573 = vector.broadcast %572 : f32 to vector<16x16xf32>
    %574 = arith.mulf %571, %573 : vector<16x16xf32>
    %575 = arith.addf %569, %574 : vector<16x16xf32>
    %c0_352 = arith.constant 0 : index
    %c5_353 = arith.constant 5 : index
    %c3_354 = arith.constant 3 : index
    %576 = vector.load %arg17[%c0_352, %c5_353, %c3_354] : memref<2x22x22xf32, #tpu.memory_space<vmem>>, vector<1x16x16xf32>
    %577 = vector.shape_cast %576 : vector<1x16x16xf32> to vector<16x16xf32>
    %c76 = arith.constant 76 : index
    %578 = memref.load %arg13[%c76] : memref<98xf32, #tpu.memory_space<smem>>
    %579 = vector.broadcast %578 : f32 to vector<16x16xf32>
    %580 = arith.mulf %577, %579 : vector<16x16xf32>
    %581 = arith.addf %575, %580 : vector<16x16xf32>
    %c1_355 = arith.constant 1 : index
    %c5_356 = arith.constant 5 : index
    %c3_357 = arith.constant 3 : index
    %582 = vector.load %arg17[%c1_355, %c5_356, %c3_357] : memref<2x22x22xf32, #tpu.memory_space<vmem>>, vector<1x16x16xf32>
    %583 = vector.shape_cast %582 : vector<1x16x16xf32> to vector<16x16xf32>
    %c77 = arith.constant 77 : index
    %584 = memref.load %arg13[%c77] : memref<98xf32, #tpu.memory_space<smem>>
    %585 = vector.broadcast %584 : f32 to vector<16x16xf32>
    %586 = arith.mulf %583, %585 : vector<16x16xf32>
    %587 = arith.addf %581, %586 : vector<16x16xf32>
    %c0_358 = arith.constant 0 : index
    %c5_359 = arith.constant 5 : index
    %c4_360 = arith.constant 4 : index
    %588 = vector.load %arg17[%c0_358, %c5_359, %c4_360] : memref<2x22x22xf32, #tpu.memory_space<vmem>>, vector<1x16x16xf32>
    %589 = vector.shape_cast %588 : vector<1x16x16xf32> to vector<16x16xf32>
    %c78 = arith.constant 78 : index
    %590 = memref.load %arg13[%c78] : memref<98xf32, #tpu.memory_space<smem>>
    %591 = vector.broadcast %590 : f32 to vector<16x16xf32>
    %592 = arith.mulf %589, %591 : vector<16x16xf32>
    %593 = arith.addf %587, %592 : vector<16x16xf32>
    %c1_361 = arith.constant 1 : index
    %c5_362 = arith.constant 5 : index
    %c4_363 = arith.constant 4 : index
    %594 = vector.load %arg17[%c1_361, %c5_362, %c4_363] : memref<2x22x22xf32, #tpu.memory_space<vmem>>, vector<1x16x16xf32>
    %595 = vector.shape_cast %594 : vector<1x16x16xf32> to vector<16x16xf32>
    %c79 = arith.constant 79 : index
    %596 = memref.load %arg13[%c79] : memref<98xf32, #tpu.memory_space<smem>>
    %597 = vector.broadcast %596 : f32 to vector<16x16xf32>
    %598 = arith.mulf %595, %597 : vector<16x16xf32>
    %599 = arith.addf %593, %598 : vector<16x16xf32>
    %c0_364 = arith.constant 0 : index
    %c5_365 = arith.constant 5 : index
    %c5_366 = arith.constant 5 : index
    %600 = vector.load %arg17[%c0_364, %c5_365, %c5_366] : memref<2x22x22xf32, #tpu.memory_space<vmem>>, vector<1x16x16xf32>
    %601 = vector.shape_cast %600 : vector<1x16x16xf32> to vector<16x16xf32>
    %c80 = arith.constant 80 : index
    %602 = memref.load %arg13[%c80] : memref<98xf32, #tpu.memory_space<smem>>
    %603 = vector.broadcast %602 : f32 to vector<16x16xf32>
    %604 = arith.mulf %601, %603 : vector<16x16xf32>
    %605 = arith.addf %599, %604 : vector<16x16xf32>
    %c1_367 = arith.constant 1 : index
    %c5_368 = arith.constant 5 : index
    %c5_369 = arith.constant 5 : index
    %606 = vector.load %arg17[%c1_367, %c5_368, %c5_369] : memref<2x22x22xf32, #tpu.memory_space<vmem>>, vector<1x16x16xf32>
    %607 = vector.shape_cast %606 : vector<1x16x16xf32> to vector<16x16xf32>
    %c81 = arith.constant 81 : index
    %608 = memref.load %arg13[%c81] : memref<98xf32, #tpu.memory_space<smem>>
    %609 = vector.broadcast %608 : f32 to vector<16x16xf32>
    %610 = arith.mulf %607, %609 : vector<16x16xf32>
    %611 = arith.addf %605, %610 : vector<16x16xf32>
    %c0_370 = arith.constant 0 : index
    %c5_371 = arith.constant 5 : index
    %c6_372 = arith.constant 6 : index
    %612 = vector.load %arg17[%c0_370, %c5_371, %c6_372] : memref<2x22x22xf32, #tpu.memory_space<vmem>>, vector<1x16x16xf32>
    %613 = vector.shape_cast %612 : vector<1x16x16xf32> to vector<16x16xf32>
    %c82 = arith.constant 82 : index
    %614 = memref.load %arg13[%c82] : memref<98xf32, #tpu.memory_space<smem>>
    %615 = vector.broadcast %614 : f32 to vector<16x16xf32>
    %616 = arith.mulf %613, %615 : vector<16x16xf32>
    %617 = arith.addf %611, %616 : vector<16x16xf32>
    %c1_373 = arith.constant 1 : index
    %c5_374 = arith.constant 5 : index
    %c6_375 = arith.constant 6 : index
    %618 = vector.load %arg17[%c1_373, %c5_374, %c6_375] : memref<2x22x22xf32, #tpu.memory_space<vmem>>, vector<1x16x16xf32>
    %619 = vector.shape_cast %618 : vector<1x16x16xf32> to vector<16x16xf32>
    %c83 = arith.constant 83 : index
    %620 = memref.load %arg13[%c83] : memref<98xf32, #tpu.memory_space<smem>>
    %621 = vector.broadcast %620 : f32 to vector<16x16xf32>
    %622 = arith.mulf %619, %621 : vector<16x16xf32>
    %623 = arith.addf %617, %622 : vector<16x16xf32>
    %c0_376 = arith.constant 0 : index
    %c6_377 = arith.constant 6 : index
    %c0_378 = arith.constant 0 : index
    %624 = vector.load %arg17[%c0_376, %c6_377, %c0_378] : memref<2x22x22xf32, #tpu.memory_space<vmem>>, vector<1x16x16xf32>
    %625 = vector.shape_cast %624 : vector<1x16x16xf32> to vector<16x16xf32>
    %c84 = arith.constant 84 : index
    %626 = memref.load %arg13[%c84] : memref<98xf32, #tpu.memory_space<smem>>
    %627 = vector.broadcast %626 : f32 to vector<16x16xf32>
    %628 = arith.mulf %625, %627 : vector<16x16xf32>
    %629 = arith.addf %623, %628 : vector<16x16xf32>
    %c1_379 = arith.constant 1 : index
    %c6_380 = arith.constant 6 : index
    %c0_381 = arith.constant 0 : index
    %630 = vector.load %arg17[%c1_379, %c6_380, %c0_381] : memref<2x22x22xf32, #tpu.memory_space<vmem>>, vector<1x16x16xf32>
    %631 = vector.shape_cast %630 : vector<1x16x16xf32> to vector<16x16xf32>
    %c85 = arith.constant 85 : index
    %632 = memref.load %arg13[%c85] : memref<98xf32, #tpu.memory_space<smem>>
    %633 = vector.broadcast %632 : f32 to vector<16x16xf32>
    %634 = arith.mulf %631, %633 : vector<16x16xf32>
    %635 = arith.addf %629, %634 : vector<16x16xf32>
    %c0_382 = arith.constant 0 : index
    %c6_383 = arith.constant 6 : index
    %c1_384 = arith.constant 1 : index
    %636 = vector.load %arg17[%c0_382, %c6_383, %c1_384] : memref<2x22x22xf32, #tpu.memory_space<vmem>>, vector<1x16x16xf32>
    %637 = vector.shape_cast %636 : vector<1x16x16xf32> to vector<16x16xf32>
    %c86 = arith.constant 86 : index
    %638 = memref.load %arg13[%c86] : memref<98xf32, #tpu.memory_space<smem>>
    %639 = vector.broadcast %638 : f32 to vector<16x16xf32>
    %640 = arith.mulf %637, %639 : vector<16x16xf32>
    %641 = arith.addf %635, %640 : vector<16x16xf32>
    %c1_385 = arith.constant 1 : index
    %c6_386 = arith.constant 6 : index
    %c1_387 = arith.constant 1 : index
    %642 = vector.load %arg17[%c1_385, %c6_386, %c1_387] : memref<2x22x22xf32, #tpu.memory_space<vmem>>, vector<1x16x16xf32>
    %643 = vector.shape_cast %642 : vector<1x16x16xf32> to vector<16x16xf32>
    %c87 = arith.constant 87 : index
    %644 = memref.load %arg13[%c87] : memref<98xf32, #tpu.memory_space<smem>>
    %645 = vector.broadcast %644 : f32 to vector<16x16xf32>
    %646 = arith.mulf %643, %645 : vector<16x16xf32>
    %647 = arith.addf %641, %646 : vector<16x16xf32>
    %c0_388 = arith.constant 0 : index
    %c6_389 = arith.constant 6 : index
    %c2_390 = arith.constant 2 : index
    %648 = vector.load %arg17[%c0_388, %c6_389, %c2_390] : memref<2x22x22xf32, #tpu.memory_space<vmem>>, vector<1x16x16xf32>
    %649 = vector.shape_cast %648 : vector<1x16x16xf32> to vector<16x16xf32>
    %c88 = arith.constant 88 : index
    %650 = memref.load %arg13[%c88] : memref<98xf32, #tpu.memory_space<smem>>
    %651 = vector.broadcast %650 : f32 to vector<16x16xf32>
    %652 = arith.mulf %649, %651 : vector<16x16xf32>
    %653 = arith.addf %647, %652 : vector<16x16xf32>
    %c1_391 = arith.constant 1 : index
    %c6_392 = arith.constant 6 : index
    %c2_393 = arith.constant 2 : index
    %654 = vector.load %arg17[%c1_391, %c6_392, %c2_393] : memref<2x22x22xf32, #tpu.memory_space<vmem>>, vector<1x16x16xf32>
    %655 = vector.shape_cast %654 : vector<1x16x16xf32> to vector<16x16xf32>
    %c89 = arith.constant 89 : index
    %656 = memref.load %arg13[%c89] : memref<98xf32, #tpu.memory_space<smem>>
    %657 = vector.broadcast %656 : f32 to vector<16x16xf32>
    %658 = arith.mulf %655, %657 : vector<16x16xf32>
    %659 = arith.addf %653, %658 : vector<16x16xf32>
    %c0_394 = arith.constant 0 : index
    %c6_395 = arith.constant 6 : index
    %c3_396 = arith.constant 3 : index
    %660 = vector.load %arg17[%c0_394, %c6_395, %c3_396] : memref<2x22x22xf32, #tpu.memory_space<vmem>>, vector<1x16x16xf32>
    %661 = vector.shape_cast %660 : vector<1x16x16xf32> to vector<16x16xf32>
    %c90 = arith.constant 90 : index
    %662 = memref.load %arg13[%c90] : memref<98xf32, #tpu.memory_space<smem>>
    %663 = vector.broadcast %662 : f32 to vector<16x16xf32>
    %664 = arith.mulf %661, %663 : vector<16x16xf32>
    %665 = arith.addf %659, %664 : vector<16x16xf32>
    %c1_397 = arith.constant 1 : index
    %c6_398 = arith.constant 6 : index
    %c3_399 = arith.constant 3 : index
    %666 = vector.load %arg17[%c1_397, %c6_398, %c3_399] : memref<2x22x22xf32, #tpu.memory_space<vmem>>, vector<1x16x16xf32>
    %667 = vector.shape_cast %666 : vector<1x16x16xf32> to vector<16x16xf32>
    %c91 = arith.constant 91 : index
    %668 = memref.load %arg13[%c91] : memref<98xf32, #tpu.memory_space<smem>>
    %669 = vector.broadcast %668 : f32 to vector<16x16xf32>
    %670 = arith.mulf %667, %669 : vector<16x16xf32>
    %671 = arith.addf %665, %670 : vector<16x16xf32>
    %c0_400 = arith.constant 0 : index
    %c6_401 = arith.constant 6 : index
    %c4_402 = arith.constant 4 : index
    %672 = vector.load %arg17[%c0_400, %c6_401, %c4_402] : memref<2x22x22xf32, #tpu.memory_space<vmem>>, vector<1x16x16xf32>
    %673 = vector.shape_cast %672 : vector<1x16x16xf32> to vector<16x16xf32>
    %c92 = arith.constant 92 : index
    %674 = memref.load %arg13[%c92] : memref<98xf32, #tpu.memory_space<smem>>
    %675 = vector.broadcast %674 : f32 to vector<16x16xf32>
    %676 = arith.mulf %673, %675 : vector<16x16xf32>
    %677 = arith.addf %671, %676 : vector<16x16xf32>
    %c1_403 = arith.constant 1 : index
    %c6_404 = arith.constant 6 : index
    %c4_405 = arith.constant 4 : index
    %678 = vector.load %arg17[%c1_403, %c6_404, %c4_405] : memref<2x22x22xf32, #tpu.memory_space<vmem>>, vector<1x16x16xf32>
    %679 = vector.shape_cast %678 : vector<1x16x16xf32> to vector<16x16xf32>
    %c93 = arith.constant 93 : index
    %680 = memref.load %arg13[%c93] : memref<98xf32, #tpu.memory_space<smem>>
    %681 = vector.broadcast %680 : f32 to vector<16x16xf32>
    %682 = arith.mulf %679, %681 : vector<16x16xf32>
    %683 = arith.addf %677, %682 : vector<16x16xf32>
    %c0_406 = arith.constant 0 : index
    %c6_407 = arith.constant 6 : index
    %c5_408 = arith.constant 5 : index
    %684 = vector.load %arg17[%c0_406, %c6_407, %c5_408] : memref<2x22x22xf32, #tpu.memory_space<vmem>>, vector<1x16x16xf32>
    %685 = vector.shape_cast %684 : vector<1x16x16xf32> to vector<16x16xf32>
    %c94 = arith.constant 94 : index
    %686 = memref.load %arg13[%c94] : memref<98xf32, #tpu.memory_space<smem>>
    %687 = vector.broadcast %686 : f32 to vector<16x16xf32>
    %688 = arith.mulf %685, %687 : vector<16x16xf32>
    %689 = arith.addf %683, %688 : vector<16x16xf32>
    %c1_409 = arith.constant 1 : index
    %c6_410 = arith.constant 6 : index
    %c5_411 = arith.constant 5 : index
    %690 = vector.load %arg17[%c1_409, %c6_410, %c5_411] : memref<2x22x22xf32, #tpu.memory_space<vmem>>, vector<1x16x16xf32>
    %691 = vector.shape_cast %690 : vector<1x16x16xf32> to vector<16x16xf32>
    %c95 = arith.constant 95 : index
    %692 = memref.load %arg13[%c95] : memref<98xf32, #tpu.memory_space<smem>>
    %693 = vector.broadcast %692 : f32 to vector<16x16xf32>
    %694 = arith.mulf %691, %693 : vector<16x16xf32>
    %695 = arith.addf %689, %694 : vector<16x16xf32>
    %c0_412 = arith.constant 0 : index
    %c6_413 = arith.constant 6 : index
    %c6_414 = arith.constant 6 : index
    %696 = vector.load %arg17[%c0_412, %c6_413, %c6_414] : memref<2x22x22xf32, #tpu.memory_space<vmem>>, vector<1x16x16xf32>
    %697 = vector.shape_cast %696 : vector<1x16x16xf32> to vector<16x16xf32>
    %c96 = arith.constant 96 : index
    %698 = memref.load %arg13[%c96] : memref<98xf32, #tpu.memory_space<smem>>
    %699 = vector.broadcast %698 : f32 to vector<16x16xf32>
    %700 = arith.mulf %697, %699 : vector<16x16xf32>
    %701 = arith.addf %695, %700 : vector<16x16xf32>
    %c1_415 = arith.constant 1 : index
    %c6_416 = arith.constant 6 : index
    %c6_417 = arith.constant 6 : index
    %702 = vector.load %arg17[%c1_415, %c6_416, %c6_417] : memref<2x22x22xf32, #tpu.memory_space<vmem>>, vector<1x16x16xf32>
    %703 = vector.shape_cast %702 : vector<1x16x16xf32> to vector<16x16xf32>
    %c97 = arith.constant 97 : index
    %704 = memref.load %arg13[%c97] : memref<98xf32, #tpu.memory_space<smem>>
    %705 = vector.broadcast %704 : f32 to vector<16x16xf32>
    %706 = arith.mulf %703, %705 : vector<16x16xf32>
    %707 = arith.addf %701, %706 : vector<16x16xf32>
    %c0_418 = arith.constant 0 : index
    %708 = memref.load %arg14[%c0_418] : memref<2xf32, #tpu.memory_space<smem>>
    %709 = vector.broadcast %708 : f32 to vector<16x16xf32>
    %710 = arith.mulf %707, %709 : vector<16x16xf32>
    %c1_419 = arith.constant 1 : index
    %711 = memref.load %arg14[%c1_419] : memref<2xf32, #tpu.memory_space<smem>>
    %712 = vector.broadcast %711 : f32 to vector<16x16xf32>
    %713 = arith.addf %710, %712 : vector<16x16xf32>
    %714 = arith.negf %713 : vector<16x16xf32>
    %715 = math.exp %714 : vector<16x16xf32>
    %cst_420 = arith.constant 1.000000e+00 : f32
    %716 = vector.broadcast %cst_420 : f32 to vector<16x16xf32>
    %717 = arith.addf %716, %715 : vector<16x16xf32>
    %718 = arith.divf %716, %717 : vector<16x16xf32>
    %719 = vector.shape_cast %718 : vector<16x16xf32> to vector<16x16x1xf32>
    %720 = vector.broadcast %719 : vector<16x16x1xf32> to vector<16x16x32xf32>
    %721 = arith.mulf %106, %720 : vector<16x16x32xf32>
    %c0_421 = arith.constant 0 : index
    %c0_422 = arith.constant 0 : index
    %c0_423 = arith.constant 0 : index
    %c0_424 = arith.constant 0 : index
    %722 = vector.load %arg2[%c0_421, %c0_422, %c0_423, %c0_424] : memref<1x16x16x32xbf16, #tpu.memory_space<vmem>>, vector<1x16x16x32xbf16>
    %723 = vector.shape_cast %722 : vector<1x16x16x32xbf16> to vector<16x16x32xbf16>
    %724 = arith.extf %723 : vector<16x16x32xbf16> to vector<16x16x32xf32>
    %725 = arith.addf %721, %724 : vector<16x16x32xf32>
    %cst_425 = arith.constant 0.000000e+00 : f32
    %726 = vector.broadcast %cst_425 : f32 to vector<16x16x32xf32>
    %727 = arith.maximumf %725, %726 : vector<16x16x32xf32>
    %c0_426 = arith.constant 0 : index
    %c0_427 = arith.constant 0 : index
    %c0_428 = arith.constant 0 : index
    %c0_429 = arith.constant 0 : index
    %728 = vector.load %arg15[%c0_426, %c0_427, %c0_428, %c0_429] : memref<1x16x16x32xf32, #tpu.memory_space<vmem>>, vector<1x16x16x32xf32>
    %729 = vector.shape_cast %728 : vector<1x16x16x32xf32> to vector<16x16x32xf32>
    %730 = vector.shape_cast %727 : vector<16x16x32xf32> to vector<1x16x16x32xf32>
    tpu.vector_store %arg15[%c0_426, %c0_427, %c0_428, %c0_429], %730 {strides = array<i32>} : memref<1x16x16x32xf32, #tpu.memory_space<vmem>>, vector<1x16x16x32xf32>,
    return
  }
  func.func @transform_0(%arg0: i32) -> (i32, i32, i32, i32) {
    %c0_i32 = arith.constant 0 : i32
    %c0_i32_0 = arith.constant 0 : i32
    %c0_i32_1 = arith.constant 0 : i32
    %c0_i32_2 = arith.constant 0 : i32
    return %arg0, %c0_i32, %c0_i32_0, %c0_i32_1 : i32, i32, i32, i32
  }
  func.func @transform_1(%arg0: i32) -> (i32, i32, i32, i32) {
    %c0_i32 = arith.constant 0 : i32
    %c0_i32_0 = arith.constant 0 : i32
    %c0_i32_1 = arith.constant 0 : i32
    %c0_i32_2 = arith.constant 0 : i32
    return %arg0, %c0_i32, %c0_i32_0, %c0_i32_1 : i32, i32, i32, i32
  }
  func.func @transform_2(%arg0: i32) -> (i32, i32, i32, i32) {
    %c0_i32 = arith.constant 0 : i32
    %c0_i32_0 = arith.constant 0 : i32
    %c0_i32_1 = arith.constant 0 : i32
    %c0_i32_2 = arith.constant 0 : i32
    %c0_i32_3 = arith.constant 0 : i32
    return %c0_i32, %c0_i32_0, %c0_i32_1, %c0_i32_2 : i32, i32, i32, i32
  }
  func.func @transform_3(%arg0: i32) -> (i32, i32) {
    %c0_i32 = arith.constant 0 : i32
    %c0_i32_0 = arith.constant 0 : i32
    %c0_i32_1 = arith.constant 0 : i32
    return %c0_i32, %c0_i32_0 : i32, i32
  }
  func.func @transform_4(%arg0: i32) -> (i32, i32) {
    %c0_i32 = arith.constant 0 : i32
    %c0_i32_0 = arith.constant 0 : i32
    %c0_i32_1 = arith.constant 0 : i32
    return %c0_i32, %c0_i32_0 : i32, i32
  }
  func.func @transform_5(%arg0: i32) -> (i32, i32) {
    %c0_i32 = arith.constant 0 : i32
    %c0_i32_0 = arith.constant 0 : i32
    %c0_i32_1 = arith.constant 0 : i32
    return %c0_i32, %c0_i32_0 : i32, i32
  }
  func.func @transform_6(%arg0: i32) -> (i32, i32) {
    %c0_i32 = arith.constant 0 : i32
    %c0_i32_0 = arith.constant 0 : i32
    %c0_i32_1 = arith.constant 0 : i32
    return %c0_i32, %c0_i32_0 : i32, i32
  }
  func.func @transform_7(%arg0: i32) -> (i32, i32) {
    %c0_i32 = arith.constant 0 : i32
    %c0_i32_0 = arith.constant 0 : i32
    %c0_i32_1 = arith.constant 0 : i32
    return %c0_i32, %c0_i32_0 : i32, i32
  }
  func.func @transform_8(%arg0: i32) -> (i32, i32) {
    %c0_i32 = arith.constant 0 : i32
    %c0_i32_0 = arith.constant 0 : i32
    %c0_i32_1 = arith.constant 0 : i32
    return %c0_i32, %c0_i32_0 : i32, i32
  }
  func.func @transform_9(%arg0: i32) -> (i32, i32) {
    %c0_i32 = arith.constant 0 : i32
    %c0_i32_0 = arith.constant 0 : i32
    %c0_i32_1 = arith.constant 0 : i32
    return %c0_i32, %c0_i32_0 : i32, i32
  }
  func.func @transform_10(%arg0: i32) -> (i32, i32) {
    %c0_i32 = arith.constant 0 : i32
    %c0_i32_0 = arith.constant 0 : i32
    %c0_i32_1 = arith.constant 0 : i32
    return %c0_i32, %c0_i32_0 : i32, i32
  }
  func.func @transform_11(%arg0: i32) -> (i32, i32) {
    %c0_i32 = arith.constant 0 : i32
    %c0_i32_0 = arith.constant 0 : i32
    %c0_i32_1 = arith.constant 0 : i32
    return %c0_i32, %c0_i32_0 : i32, i32
  }
  func.func @transform_12(%arg0: i32) -> i32 {
    %c0_i32 = arith.constant 0 : i32
    %c0_i32_0 = arith.constant 0 : i32
    return %c0_i32 : i32
  }
  func.func @transform_13(%arg0: i32) -> i32 {
    %c0_i32 = arith.constant 0 : i32
    %c0_i32_0 = arith.constant 0 : i32
    return %c0_i32 : i32
  }
  func.func @transform_14(%arg0: i32) -> (i32, i32, i32, i32) {
    %c0_i32 = arith.constant 0 : i32
    %c0_i32_0 = arith.constant 0 : i32
    %c0_i32_1 = arith.constant 0 : i32
    %c0_i32_2 = arith.constant 0 : i32
    return %arg0, %c0_i32, %c0_i32_0, %c0_i32_1 : i32, i32, i32, i32
  }
}

</mosaic_0001>

<bundles_post_ra>
// kernel: bottleneck_forward.2
= control target key start
LH: loop header
LB: loop body
LE: loop exit
PB: predicated region body
PF: predicated region fallthrough
CT: control target
= control target key end

     0   :  { %s1395_s27 = smov 0   ;;  %s1397_s28 = smov 0   ;;  %s1628_s0 = inlined_call_operand.vmem [shape: bf16[2,16,16,16], index: 0, kind: input, shape index: {}]   ;;  %s1629_s1 = inlined_call_operand.vmem [shape: bf16[16,8], index: 1, kind: input, shape index: {}]   ;;  %s1630_s2 = inlined_call_operand.vmem [shape: f32[1,8], index: 2, kind: input, shape index: {}]   ;;  %s1631_s3 = inlined_call_operand.vmem [shape: f32[1,8], index: 3, kind: input, shape index: {}]   ;;  %s1632_s4 = inlined_call_operand.vmem [shape: bf16[16,32], index: 4, kind: input, shape index: {}]   ;;  %s1633_s5 = inlined_call_operand.vmem [shape: f32[1,32], index: 5, kind: input, shape index: {}]   ;;  %s1634_s6 = inlined_call_operand.vmem [shape: f32[1,32], index: 6, kind: input, shape index: {}]   ;;  %s1635_s7 = inlined_call_operand.vmem [shape: bf16[2,16,16,8], index: 7, kind: output, shape index: {0}]   ;;  %s1636_s8 = inlined_call_operand.vmem [shape: bf16[2,16,16,32], index: 8, kind: output, shape index: {1}]  }
   0x1   :  { %s1399_s29 = smov 0   ;;  %s1401_s30 = smov 0  }
   0x2   :  { %s1403_s9 = smov 0  }
   0x3 LB: > { %s28_s10 = sadd.s32 1, %s1340_s29  ;;  %s31_s11 = sadd.s32 1, %s1344_s30  ;;  %s1348_s9 = sphi %s1403_s9, %s19_s9   ;;  %s1344_s30 = sphi %s1401_s30, %s1640_s30   ;;  %s1340_s29 = sphi %s1399_s29, %s1639_s29   ;;  %s1336_s28 = sphi %s1397_s28, %s1638_s28   ;;  %s1332_s27 = sphi %s1395_s27, %s1637_s27  }
   0x4   : > { %p29_p0 = scmp.ge.s32.totalorder %s28_s10, 2  ;;  %p1097_p1 = scmp.ge.s32.totalorder %s1348_s9, 1 }
   0x5   : > { %p289_p2 = scmp.lt.s32.totalorder %s1348_s9, 5 }
   0x6   : > { %s1642_s10 = smov (%p29_p0, %s28_s10), 0  ;;  %s1644_s11 = smov (!%p29_p0, %s31_s11), %s1344_s30 }
   0x7   : > { %p290_p3 = pnand %p1097_p1, %p289_p2  ;;  %p33_p4 = scmp.ge.s32.totalorder %s1644_s11, 2 }
   0x8   : > { %v1300_v0 = vld [vmem:[%s1629_s1] sm:$0xff] (!%p290_p3)   ;;  %s1098_s14 = sshll.u32 (!%p290_p3), %s1332_s27, 3  ;;  %p344_p5 = scmp.lt.s32.totalorder (!%p290_p3), %s1336_s28, 1  ;;  %vm441_vm0 = vcmask (!%p290_p3), 130048   ;;  %vm689_vm1 = vcmask (!%p290_p3), 60416   ;;  %vm921_vm2 = vcmask (!%p290_p3), 257024  }
   0x9   : > { %s1646_s11 = smov (%p33_p4, %s1644_s11), 0  ;;  %293 = sbr.rel (%p290_p3) target bundleno = 272 (0x110), region = 48 }
   0xa   : > { %v1301_v1 = vld [vmem:[%s1632_s4] sm:$0xff] (!%p290_p3)   ;;  %1224 = vmatprep.subr.bf16.mxu0 (!%p290_p3), %v1300_v0  ;;  %p346_p6 = scmp.lt.s32.totalorder (!%p290_p3), %s1098_s14, 15 }
   0xb   : > { %1242 = vmatprep.subr.bf16.mxu1 (!%p290_p3), %v1301_v1  ;;  %1225 = vmatpush3.bf16.msra.mxu0 (!%p290_p3), %v1300_v0  ;;  %v1456_v10 = vld [vmem:[%s1630_s2] ss:$0 sm:$0xff] (!%p290_p3) }
   0xc   : > { %1243 = vmatpush3.bf16.msra.mxu1 (!%p290_p3), %v1301_v1  ;;  %v1461_v11 = vld [vmem:[%s1633_s5] ss:$0 sm:$0xff] (!%p290_p3) }
   0xd   : > { %v1466_v13 = vld [vmem:[%s1631_s3] ss:$0 sm:$0xff] (!%p290_p3) }
   0xe   : > { %v1471_v15 = vld [vmem:[%s1634_s6] ss:$0 sm:$0xff] (!%p290_p3) }
  0x10   : > { %s1648_s28 = smov (!%p344_p5, %s1336_s28), 1  ;;  %s1650_s14 = smov (!%p346_p6, %s1098_s14), 15 }
  0x11   : > { %s1100_s17 = sshll.u32 %s1648_s28, 5  ;;  %s1099_s18 = sshll.u32 %s1650_s14, 1 }
  0x12   : > { %s350_s19 = sadd.s32 %s1100_s17, %s1099_s18 }
  0x13   : > { %s1431_s20 = sshll.u32 %s350_s19, 2 }
  0x14   : > { %s352_s23 = scalar_lea.vmem %s1628_s0, %s1431_s20  ;;  %s1485_s17 = scalar_lea.vmem %s1636_s8, %s1431_s20 }
  0x15   : > { %v1302_v2 = vld [vmem:[%s352_s23] sm:$0xff]   ;;  %v1303_v3 = vld [vmem:[%s352_s23 + $0x8] sm:$0xff]   ;;  %v1304_v4 = vld [vmem:[%s352_s23 + $0x10] sm:$0xff]   ;;  %s1497_s21 = scalar_lea.vmem %s1635_s7, %s1431_s20 }
  0x16   : > { %1226 = vmatprep.mubr.msk.bf16.mxu0 %vm441_vm0, %v1302_v2  ;;  %1244 = vmatprep.mubr.msk.bf16.mxu1 %vm441_vm0, %v1302_v2  ;;  %v1305_v5 = vld [vmem:[%s352_s23 + $0x18] sm:$0xff]   ;;  %v1306_v6 = vld [vmem:[%s352_s23 + $0x20] sm:$0xff]   ;;  %v1307_v7 = vld [vmem:[%s352_s23 + $0x28] sm:$0xff]  }
  0x17   : > { %1227 = vmatmul.mubr.msk.bf16.vlgmr.msra.gmra.mrb[0].mxu0 %vm441_vm0, %v1303_v3  ;;  %1245 = vmatmul.mubr.msk.bf16.vlgmr.msra.gmra.mrb[0].mxu1 %vm441_vm0, %v1303_v3  ;;  %v1308_v8 = vld [vmem:[%s352_s23 + $0x30] sm:$0xff]   ;;  %v1309_v9 = vld [vmem:[%s352_s23 + $0x38] sm:$0xff]  }
  0x18   : > { %1230 = vmatprep.mubr.msk.bf16.mxu0 %vm441_vm0, %v1304_v4  ;;  %1248 = vmatprep.mubr.msk.bf16.mxu1 %vm441_vm0, %v1304_v4 }
  0x1f   : > { %1231 = vmatmul.mubr.msk.bf16.gmra.mrb[4].mxu0 %vm441_vm0, %v1305_v5  ;;  %1249 = vmatmul.mubr.msk.bf16.gmra.mrb[4].mxu1 %vm441_vm0, %v1305_v5 }
  0x20   : > { %1234 = vmatprep.mubr.msk.bf16.mxu0 %vm441_vm0, %v1306_v6  ;;  %1252 = vmatprep.mubr.msk.bf16.mxu1 %vm441_vm0, %v1306_v6 }
  0x27   : > { %1235 = vmatmul.mubr.msk.bf16.gmra.mrb[8].mxu0 %vm441_vm0, %v1307_v7  ;;  %1253 = vmatmul.mubr.msk.bf16.gmra.mrb[8].mxu1 %vm441_vm0, %v1307_v7 }
  0x28   : > { %1238 = vmatprep.mubr.msk.bf16.mxu0 %vm441_vm0, %v1308_v8  ;;  %1256 = vmatprep.mubr.msk.bf16.mxu1 %vm441_vm0, %v1308_v8 }
  0x2f   : > { %1239 = vmatmul.mubr.msk.bf16.gmra.mrb[12].mxu0 %vm441_vm0, %v1309_v9  ;;  %1257 = vmatmul.mubr.msk.bf16.gmra.mrb[12].mxu1 %vm441_vm0, %v1309_v9 }
  0xea   : > { %v1228_v12 = vpop.f32.mrb[0].mxu0  ;;  %v1246_v14 = vpop.f32.mrb[0].mxu1 }
  0xeb   : > { %v572_v16 = vmul.f32 %v1228_v12, %v1456_v10  ;;  %v820_v17 = vmul.f32 %v1246_v14, %v1461_v11  ;;  %v500_v18 = vpop.f32.mrb[1].mxu0  ;;  %v748_v19 = vpop.f32.mrb[1].mxu1 }
  0xec   : > { %v570_v20 = vmul.f32 %v1456_v10, %v500_v18  ;;  %v818_v21 = vmul.f32 %v1461_v11, %v748_v19  ;;  %v1229_v22 = vpop.f32.mrb[2].mxu0  ;;  %v1247_v23 = vpop.f32.mrb[2].mxu1 }
  0xed   : > { %v595_v24 = vadd.f32 %v1466_v13, %v572_v16  ;;  %v843_v25 = vadd.f32 %v1471_v15, %v820_v17  ;;  %v573_v26 = vmul.f32 %v1229_v22, %v1456_v10  ;;  %v821_v27 = vmul.f32 %v1247_v23, %v1461_v11  ;;  %v503_v28 = vpop.f32.mrb[3].mxu0  ;;  %v751_v29 = vpop.f32.mrb[3].mxu1 }
  0xee   : > { %v593_v30 = vadd.f32 %v1466_v13, %v570_v20  ;;  %v841_v31 = vadd.f32 %v1471_v15, %v818_v21  ;;  %v571_v32 = vmul.f32 %v1456_v10, %v503_v28  ;;  %v819_v33 = vmul.f32 %v1461_v11, %v751_v29 }
  0xef   : > { %v611_v34 = vmax.f32 %v595_v24, 0.0  ;;  %v1192_v35 = vpack.c.bf16 %v843_v25, %v843_v25  ;;  %v596_v36 = vadd.f32 %v1466_v13, %v573_v26  ;;  %v844_v37 = vadd.f32 %v1471_v15, %v821_v27 }
  0xf0   : > { %v609_v38 = vmax.f32 %v593_v30, 0.0  ;;  %v1190_v39 = vpack.c.bf16 %v841_v31, %v841_v31  ;;  %v594_v40 = vadd.f32 %v1466_v13, %v571_v32  ;;  %v842_v41 = vadd.f32 %v1471_v15, %v819_v33 }
  0xf1   : > { %v1176_v42 = vpack.c.bf16 %v611_v34, %v611_v34  ;;  %924 = vst.msk [vmem:[%s1485_s17 + $0x8] sm:$0xf] %vm921_vm2, %v1192_v35  ;;  %v612_v43 = vmax.f32 %v596_v36, 0.0  ;;  %v1193_v44 = vpack.c.bf16 %v844_v37, %v844_v37 }
  0xf2   : > { %v1174_v45 = vpack.c.bf16 %v609_v38, %v609_v38  ;;  %922 = vst.msk [vmem:[%s1485_s17] sm:$0xf] %vm921_vm2, %v1190_v39  ;;  %v610_v46 = vmax.f32 %v594_v40, 0.0  ;;  %v1191_v47 = vpack.c.bf16 %v842_v41, %v842_v41  ;;  %v1232_v48 = vpop.f32.mrb[4].mxu0  ;;  %v1250_v49 = vpop.f32.mrb[4].mxu1 }
  0xf3   : > { %692 = vst.msk [vmem:[%s1497_s21 + $0x8] sm:$0xf] %vm689_vm1, %v1176_v42  ;;  %v1177_v50 = vpack.c.bf16 %v612_v43, %v612_v43  ;;  %v576_v51 = vmul.f32 %v1232_v48, %v1456_v10  ;;  %v824_v52 = vmul.f32 %v1250_v49, %v1461_v11  ;;  %v516_v53 = vpop.f32.mrb[5].mxu0  ;;  %v764_v54 = vpop.f32.mrb[5].mxu1 }
  0xf4   : > { %925 = vst.msk [vmem:[%s1485_s17 + $0xc] sm:$0xf] %vm921_vm2, %v1193_v44  ;;  %v1175_v55 = vpack.c.bf16 %v610_v46, %v610_v46  ;;  %923 = vst.msk [vmem:[%s1485_s17 + $0x4] sm:$0xf] %vm921_vm2, %v1191_v47  ;;  %v574_v56 = vmul.f32 %v1456_v10, %v516_v53  ;;  %v822_v57 = vmul.f32 %v1461_v11, %v764_v54  ;;  %v1233_v58 = vpop.f32.mrb[6].mxu0  ;;  %v1251_v59 = vpop.f32.mrb[6].mxu1 }
  0xf5   : > { %690 = vst.msk [vmem:[%s1497_s21] sm:$0xf] %vm689_vm1, %v1174_v45  ;;  %693 = vst.msk [vmem:[%s1497_s21 + $0xc] sm:$0xf] %vm689_vm1, %v1177_v50  ;;  %v599_v60 = vadd.f32 %v1466_v13, %v576_v51  ;;  %v847_v61 = vadd.f32 %v1471_v15, %v824_v52  ;;  %v577_v62 = vmul.f32 %v1233_v58, %v1456_v10  ;;  %v519_v0 = vpop.f32.mrb[7].mxu0  ;;  %v767_v1 = vpop.f32.mrb[7].mxu1 }
  0xf6   : > { %v825_v63 = vmul.f32 %v1251_v59, %v1461_v11  ;;  %691 = vst.msk [vmem:[%s1497_s21 + $0x4] sm:$0xf] %vm689_vm1, %v1175_v55  ;;  %v597_v2 = vadd.f32 %v1466_v13, %v574_v56  ;;  %v845_v3 = vadd.f32 %v1471_v15, %v822_v57  ;;  %v575_v4 = vmul.f32 %v1456_v10, %v519_v0 }
  0xf7   : > { %v823_v5 = vmul.f32 %v1461_v11, %v767_v1  ;;  %v615_v6 = vmax.f32 %v599_v60, 0.0  ;;  %v1196_v7 = vpack.c.bf16 %v847_v61, %v847_v61  ;;  %v600_v8 = vadd.f32 %v1466_v13, %v577_v62 }
  0xf8   : > { %v848_v9 = vadd.f32 %v1471_v15, %v825_v63  ;;  %v613_v12 = vmax.f32 %v597_v2, 0.0  ;;  %v1194_v14 = vpack.c.bf16 %v845_v3, %v845_v3  ;;  %v598_v16 = vadd.f32 %v1466_v13, %v575_v4 }
  0xf9   : > { %v846_v17 = vadd.f32 %v1471_v15, %v823_v5  ;;  %v1180_v18 = vpack.c.bf16 %v615_v6, %v615_v6  ;;  %928 = vst.msk [vmem:[%s1485_s17 + $0x18] sm:$0xf] %vm921_vm2, %v1196_v7  ;;  %v616_v19 = vmax.f32 %v600_v8, 0.0 }
  0xfa   : > { %v1197_v20 = vpack.c.bf16 %v848_v9, %v848_v9  ;;  %v1178_v21 = vpack.c.bf16 %v613_v12, %v613_v12  ;;  %926 = vst.msk [vmem:[%s1485_s17 + $0x10] sm:$0xf] %vm921_vm2, %v1194_v14  ;;  %v614_v22 = vmax.f32 %v598_v16, 0.0  ;;  %v1236_v24 = vpop.f32.mrb[8].mxu0  ;;  %v1254_v25 = vpop.f32.mrb[8].mxu1 }
  0xfb   : > { %v1195_v23 = vpack.c.bf16 %v846_v17, %v846_v17  ;;  %696 = vst.msk [vmem:[%s1497_s21 + $0x18] sm:$0xf] %vm689_vm1, %v1180_v18  ;;  %v1181_v26 = vpack.c.bf16 %v616_v19, %v616_v19  ;;  %v580_v27 = vmul.f32 %v1236_v24, %v1456_v10  ;;  %v828_v28 = vmul.f32 %v1254_v25, %v1461_v11  ;;  %v532_v29 = vpop.f32.mrb[9].mxu0  ;;  %v780_v30 = vpop.f32.mrb[9].mxu1 }
  0xfc   : > { %929 = vst.msk [vmem:[%s1485_s17 + $0x1c] sm:$0xf] %vm921_vm2, %v1197_v20  ;;  %v1179_v31 = vpack.c.bf16 %v614_v22, %v614_v22  ;;  %v578_v32 = vmul.f32 %v1456_v10, %v532_v29  ;;  %v826_v33 = vmul.f32 %v1461_v11, %v780_v30  ;;  %v1237_v34 = vpop.f32.mrb[10].mxu0  ;;  %v1255_v35 = vpop.f32.mrb[10].mxu1 }
  0xfd   : > { %694 = vst.msk [vmem:[%s1497_s21 + $0x10] sm:$0xf] %vm689_vm1, %v1178_v21  ;;  %697 = vst.msk [vmem:[%s1497_s21 + $0x1c] sm:$0xf] %vm689_vm1, %v1181_v26  ;;  %v603_v36 = vadd.f32 %v1466_v13, %v580_v27  ;;  %v851_v37 = vadd.f32 %v1471_v15, %v828_v28  ;;  %v581_v38 = vmul.f32 %v1237_v34, %v1456_v10  ;;  %v535_v40 = vpop.f32.mrb[11].mxu0  ;;  %v783_v41 = vpop.f32.mrb[11].mxu1 }
  0xfe   : > { %927 = vst.msk [vmem:[%s1485_s17 + $0x14] sm:$0xf] %vm921_vm2, %v1195_v23  ;;  %v829_v39 = vmul.f32 %v1255_v35, %v1461_v11  ;;  %v601_v42 = vadd.f32 %v1466_v13, %v578_v32  ;;  %v849_v43 = vadd.f32 %v1471_v15, %v826_v33  ;;  %v579_v44 = vmul.f32 %v1456_v10, %v535_v40 }
  0xff   : > { %695 = vst.msk [vmem:[%s1497_s21 + $0x14] sm:$0xf] %vm689_vm1, %v1179_v31  ;;  %v827_v45 = vmul.f32 %v1461_v11, %v783_v41  ;;  %v619_v46 = vmax.f32 %v603_v36, 0.0  ;;  %v1200_v47 = vpack.c.bf16 %v851_v37, %v851_v37  ;;  %v604_v48 = vadd.f32 %v1466_v13, %v581_v38 }
 0x100   : > { %v852_v49 = vadd.f32 %v1471_v15, %v829_v39  ;;  %v617_v50 = vmax.f32 %v601_v42, 0.0  ;;  %v1198_v51 = vpack.c.bf16 %v849_v43, %v849_v43  ;;  %v602_v52 = vadd.f32 %v1466_v13, %v579_v44 }
 0x101   : > { %v850_v53 = vadd.f32 %v1471_v15, %v827_v45  ;;  %v1184_v54 = vpack.c.bf16 %v619_v46, %v619_v46  ;;  %932 = vst.msk [vmem:[%s1485_s17 + $0x28] sm:$0xf] %vm921_vm2, %v1200_v47  ;;  %v620_v55 = vmax.f32 %v604_v48, 0.0 }
 0x102   : > { %v1201_v56 = vpack.c.bf16 %v852_v49, %v852_v49  ;;  %v1182_v57 = vpack.c.bf16 %v617_v50, %v617_v50  ;;  %930 = vst.msk [vmem:[%s1485_s17 + $0x20] sm:$0xf] %vm921_vm2, %v1198_v51  ;;  %v618_v58 = vmax.f32 %v602_v52, 0.0  ;;  %v1240_v60 = vpop.f32.mrb[12].mxu0  ;;  %v1258_v61 = vpop.f32.mrb[12].mxu1 }
 0x103   : > { %v1199_v59 = vpack.c.bf16 %v850_v53, %v850_v53  ;;  %700 = vst.msk [vmem:[%s1497_s21 + $0x28] sm:$0xf] %vm689_vm1, %v1184_v54  ;;  %v1185_v62 = vpack.c.bf16 %v620_v55, %v620_v55  ;;  %v584_v63 = vmul.f32 %v1240_v60, %v1456_v10  ;;  %v832_v0 = vmul.f32 %v1258_v61, %v1461_v11  ;;  %v548_v1 = vpop.f32.mrb[13].mxu0  ;;  %v796_v2 = vpop.f32.mrb[13].mxu1 }
 0x104   : > { %933 = vst.msk [vmem:[%s1485_s17 + $0x2c] sm:$0xf] %vm921_vm2, %v1201_v56  ;;  %v1183_v3 = vpack.c.bf16 %v618_v58, %v618_v58  ;;  %v582_v4 = vmul.f32 %v1456_v10, %v548_v1  ;;  %v830_v5 = vmul.f32 %v1461_v11, %v796_v2  ;;  %v1241_v6 = vpop.f32.mrb[14].mxu0  ;;  %v1259_v7 = vpop.f32.mrb[14].mxu1 }
 0x105   : > { %698 = vst.msk [vmem:[%s1497_s21 + $0x20] sm:$0xf] %vm689_vm1, %v1182_v57  ;;  %701 = vst.msk [vmem:[%s1497_s21 + $0x2c] sm:$0xf] %vm689_vm1, %v1185_v62  ;;  %v607_v8 = vadd.f32 %v1466_v13, %v584_v63  ;;  %v855_v9 = vadd.f32 %v1471_v15, %v832_v0  ;;  %v585_v12 = vmul.f32 %v1241_v6, %v1456_v10  ;;  %v551_v16 = vpop.f32.mrb[15].mxu0  ;;  %v799_v17 = vpop.f32.mrb[15].mxu1 }
 0x106   : > { %931 = vst.msk [vmem:[%s1485_s17 + $0x24] sm:$0xf] %vm921_vm2, %v1199_v59  ;;  %v833_v14 = vmul.f32 %v1259_v7, %v1461_v11  ;;  %v605_v18 = vadd.f32 %v1466_v13, %v582_v4  ;;  %v853_v19 = vadd.f32 %v1471_v15, %v830_v5  ;;  %v583_v20 = vmul.f32 %v1456_v10, %v551_v16 }
 0x107   : > { %699 = vst.msk [vmem:[%s1497_s21 + $0x24] sm:$0xf] %vm689_vm1, %v1183_v3  ;;  %v831_v21 = vmul.f32 %v1461_v11, %v799_v17  ;;  %v623_v22 = vmax.f32 %v607_v8, 0.0  ;;  %v1204_v23 = vpack.c.bf16 %v855_v9, %v855_v9  ;;  %v608_v24 = vadd.f32 %v1466_v13, %v585_v12 }
 0x108   : > { %v856_v25 = vadd.f32 %v1471_v15, %v833_v14  ;;  %v621_v26 = vmax.f32 %v605_v18, 0.0  ;;  %v1202_v27 = vpack.c.bf16 %v853_v19, %v853_v19  ;;  %v606_v28 = vadd.f32 %v1466_v13, %v583_v20 }
 0x109   : > { %v854_v29 = vadd.f32 %v1471_v15, %v831_v21  ;;  %v1188_v10 = vpack.c.bf16 %v623_v22, %v623_v22  ;;  %936 = vst.msk [vmem:[%s1485_s17 + $0x38] sm:$0xf] %vm921_vm2, %v1204_v23  ;;  %v624_v11 = vmax.f32 %v608_v24, 0.0 }
 0x10a   : > { %v1205_v30 = vpack.c.bf16 %v856_v25, %v856_v25  ;;  %v1186_v31 = vpack.c.bf16 %v621_v26, %v621_v26  ;;  %934 = vst.msk [vmem:[%s1485_s17 + $0x30] sm:$0xf] %vm921_vm2, %v1202_v27  ;;  %v622_v32 = vmax.f32 %v606_v28, 0.0 }
 0x10b   : > { %v1203_v33 = vpack.c.bf16 %v854_v29, %v854_v29  ;;  %704 = vst.msk [vmem:[%s1497_s21 + $0x38] sm:$0xf] %vm689_vm1, %v1188_v10  ;;  %v1189_v34 = vpack.c.bf16 %v624_v11, %v624_v11 }
 0x10c   : > { %937 = vst.msk [vmem:[%s1485_s17 + $0x3c] sm:$0xf] %vm921_vm2, %v1205_v30  ;;  %v1187_v13 = vpack.c.bf16 %v622_v32, %v622_v32 }
 0x10d   : > { %702 = vst.msk [vmem:[%s1497_s21 + $0x30] sm:$0xf] %vm689_vm1, %v1186_v31  ;;  %705 = vst.msk [vmem:[%s1497_s21 + $0x3c] sm:$0xf] %vm689_vm1, %v1189_v34 }
 0x10e   : > { %935 = vst.msk [vmem:[%s1485_s17 + $0x34] sm:$0xf] %vm921_vm2, %v1203_v33 }
 0x10f   : > { %703 = vst.msk [vmem:[%s1497_s21 + $0x34] sm:$0xf] %vm689_vm1, %v1187_v13 }
 0x110 PF: > { %s19_s9 = sadd.s32 1, %s1348_s9   ;;  %s1637_s27 = smov %s1340_s29 }
 0x111   : > { %p16_p7 = scmp.ge.s32.totalorder %s19_s9, 6   ;;  %s1638_s28 = smov %s1344_s30 }
 0x112   : > { %s1639_s29 = smov %s1642_s10  ;;  %s1640_s30 = smov %s1646_s11 }
 0x113   :  { %18 = sbr.rel (!%p16_p7) target bundleno = 3 (0x3), region = 90 }

// kernel: bottleneck_forward.3
= control target key start
LH: loop header
LB: loop body
LE: loop exit
PB: predicated region body
PF: predicated region fallthrough
CT: control target
= control target key end

     0   :  { %s14710_s0 = inlined_call_operand.vmem [shape: bf16[2,16,16,8], index: 0, kind: input, shape index: {}]   ;;  %s14711_s1 = inlined_call_operand.vmem [shape: bf16[2,16,16,32], index: 1, kind: input, shape index: {}]   ;;  %s14712_s2 = inlined_call_operand.vmem [shape: bf16[3,3,8,8], index: 2, kind: input, shape index: {}]   ;;  %s14713_s3 = inlined_call_operand.vmem [shape: f32[1,8], index: 3, kind: input, shape index: {}]   ;;  %s14714_s4 = inlined_call_operand.vmem [shape: f32[1,8], index: 4, kind: input, shape index: {}]   ;;  %s14715_s5 = inlined_call_operand.vmem [shape: bf16[8,32], index: 5, kind: input, shape index: {}]   ;;  %s14716_s6 = inlined_call_operand.vmem [shape: f32[1,32], index: 6, kind: input, shape index: {}]   ;;  %s14717_s7 = inlined_call_operand.vmem [shape: f32[1,32], index: 7, kind: input, shape index: {}]   ;;  %s14718_s8 = inlined_call_operand.vmem [shape: f32[32,2], index: 8, kind: input, shape index: {}]   ;;  %s14719_s9 = inlined_call_operand.vmem [shape: f32[1,2], index: 9, kind: input, shape index: {}]   ;;  %s14720_s10 = inlined_call_operand.vmem [shape: f32[2,32], index: 10, kind: input, shape index: {}]   ;;  %s14721_s11 = inlined_call_operand.vmem [shape: f32[1,32], index: 11, kind: input, shape index: {}]   ;;  %s14722_s12 = inlined_call_operand.vmem [shape: f32[98], index: 12, kind: input, shape index: {}]   ;;  %s14723_s13 = inlined_call_operand.vmem [shape: f32[2], index: 13, kind: input, shape index: {}]   ;;  %s14724_s14 = inlined_call_operand.hbm [shape: f32[2,16,16,32], index: 14, kind: output, shape index: {}]  }
   0x1   :  { %14858 = sst [smem:[#allocation90_spill]] %s14710_s0 }
   0x2   :  { %14859 = sst [smem:[#allocation91_spill]] %s14712_s2 }
   0x3   :  { %14860 = sst [smem:[#allocation92_spill]] %s14713_s3 }
   0x4   :  { %14861 = sst [smem:[#allocation93_spill]] %s14714_s4 }
   0x5   :  { %14862 = sst [smem:[#allocation94_spill]] %s14715_s5 }
   0x6   :  { %14863 = sst [smem:[#allocation95_spill]] %s14716_s6 }
   0x7   :  { %14864 = sst [smem:[#allocation96_spill]] %s14717_s7 }
   0x8   :  { %14865 = sst [smem:[#allocation97_spill]] %s14718_s8 }
   0x9   :  { %14866 = sst [smem:[#allocation98_spill]] %s14719_s9 }
   0xa   :  { %14867 = sst [smem:[#allocation99_spill]] %s14720_s10 }
   0xb   :  { %14868 = sst [smem:[#allocation100_spill]] %s14721_s11 }
   0xc   :  { %14869 = sst [smem:[#allocation101_spill]] %s14722_s12 }
   0xd   :  { %14870 = sst [smem:[#allocation102_spill]] %s14723_s13 }
   0xe   :  { %19 = vsyncpa [#allocation6], 0 }
   0xf   :  { %20 = vsyncpa [#allocation8], 0 }
  0x10   :  { %21 = vsyncpa [#allocation5], 0 }
  0x11   :  { %23 = vsyncpa [#allocation5 + $0x1], 0  ;;  %s10555_s29 = smov 0   ;;  %s10557_s30 = smov 0  }
  0x12   :  { %s10559_s15 = smov 0   ;;  %s10561_s16 = smov 0  }
  0x13 LB: > { %14871 = sst [smem:[#allocation13_spill]] %s10459_s15  ;;  %s10576_s17 = sadd.s32 4294967295, %s10463_s16   ;;  %s10463_s16 = sphi %s10561_s16, %s15184_s16   ;;  %s10459_s15 = sphi %s10559_s15, %s15186_s15   ;;  %s10455_s30 = sphi %s10557_s30, %s15188_s30   ;;  %s10451_s29 = sphi %s10555_s29, %s15187_s29  }
  0x14   : > { %s8799_s18 = sadd.s32 4294967294, %s10463_s16   ;;  %s10580_s19 = sadd.s32 1, %s10463_s16  }
  0x15   : > { %14872 = sst [smem:[#allocation14_spill]] %s10580_s19  ;;  %s340_s20 = sadd.s32 1, %s10459_s15 }
  0x16   : > { %s337_s21 = ssub.s32 %s10463_s16, %s10580_s19  ;;  %p350_p0 = scmp.ne.s32.totalorder %s10459_s15, %s10455_s30 }
  0x17   : > { %p338_p1 = scmp.eq.s32.totalorder %s337_s21, 0  ;;  %p351_p2 = scmp.eq.s32.totalorder %s10576_s17, 1 }
  0x18   : > { %p356_p3 = scmp.ne.s32.totalorder %s10455_s30, %s10451_s29  ;;  %p357_p4 = scmp.eq.s32.totalorder %s8799_s18, 1 }
  0x19   : > { %s10591_s22 = scalar_select %p338_p1, %s10459_s15, %s340_s20  }
  0x1a   : > { %p10593_p5 = por %p351_p2, %p350_p0  ;;  %p10597_p6 = por %p357_p4, %p356_p3 }
  0x1b   : > { %14873 = sst [smem:[#allocation15_spill]] %s10591_s22  ;;  %p8800_p7 = scmp.ge.s32.totalorder %s10463_s16, 1 }
  0x1c   : > { %s14874_s23 = scalar_select %p10593_p5, 1, 0 }
  0x1d   : > { %s14875_s24 = scalar_select %p10597_p6, 1, 0 }
  0x1e   : > { %p364_p8 = scmp.lt.s32.totalorder %s10463_s16, 3  ;;  %p14726_p9 = scmp.eq.s32.totalorder %s10576_s17, 0 }
  0x1f   : > { %s14877_s12 = sld [smem:[#allocation101_spill]]  ;;  %s14878_s13 = sld [smem:[#allocation102_spill]] }
  0x20   : > { %p10604_p10 = pnand %p8800_p7, %p364_p8 }
  0x22   : > { %s14876_s25 = scalar_select %p10604_p10, 1, 0 }
  0x23   : > { %p10184_p11 = pneg %p10604_p10 }
  0x25   : > { %s407_s28 = sshll.u32 %s14877_s12, 4  ;;  %s418_s21 = sshll.u32 %s14878_s13, 4  ;;  %s408_s28 = int_to_ptr.vmem [resolvable:$true] %s407_s28  ;;  %s419_s21 = int_to_ptr.vmem [resolvable:$true] %s418_s21 }
  0x26   : > { %p10618_p12 = pnand %p14726_p9, %p10184_p11  ;;  %s10363_s15 = scalar_lea.vmem %s408_s28, 16 }
  0x27   : > { %p10364_p13 = scmp.ne.s32.totalorder %s408_s28, %s10363_s15  ;;  %p10371_p3 = scmp.lt.s32.totalorder %s408_s28, %s408_s28 }
  0x28   : > { %p10365_p0 = pneg %p10618_p12  ;;  %p10372_p4 = scmp.lt.s32.totalorder %s10363_s15, %s10363_s15 }
  0x2a   : > { %p10366_p1 = pnand %p10365_p0, %p10364_p13  ;;  %p10373_p7 = por %p10372_p4, %p10371_p3 }
  0x2c   : > { %p10367_p2 = pneg %p10366_p1 }
  0x2e   : > { %p10374_p8 = pnand %p10373_p7, %p10367_p2 }
  0x30   : > { %10377 = shalt.err (!%p10374_p8)
}
  0x31   : > { %s10465_s26 = smov [#allocation4]   ;;  %s10378_s27 = scalar_lea.vmem %s419_s21, 16 }
  0x32   : > { %10187 = dma.vmem_to_smem (!%p10618_p12), %s408_s28, 16, %s10465_s26, [#allocation6]  }
  0x33   : > { %p10379_p11 = scmp.ne.s32.totalorder %s419_s21, %s10378_s27  ;;  %p10386_p5 = scmp.lt.s32.totalorder %s419_s21, %s419_s21 }
  0x34   : > { %p10387_p10 = scmp.lt.s32.totalorder %s10378_s27, %s10378_s27 }
  0x35   : > { %p10381_p9 = pnand %p10379_p11, %p10365_p0 }
  0x36   : > { %p10388_p13 = por %p10387_p10, %p10386_p5 }
  0x37   : > { %p10382_p6 = pneg %p10381_p9 }
  0x39   : > { %p10389_p1 = pnand %p10388_p13, %p10382_p6 }
  0x3b   : > { %10392 = shalt.err (!%p10389_p1)
}
  0x3c   : > { %s10466_s18 = smov [#allocation7]   ;;  %p14880_p2 = scmp.ne.s32.totalorder %s14876_s25, 0 }
  0x3d   : > { %10190 = dma.vmem_to_smem (!%p10618_p12), %s419_s21, 16, %s10466_s18, [#allocation8]  }
  0x3e   : > { %447 = sbr.rel (%p14880_p2) target bundleno = 2390 (0x956), region = 76 }
  0x45   : > { %p14881_p3 = scmp.eq.s32.totalorder %s10576_s17, 0 }
  0x47   : > { %10438 = dma.done.wait (%p14881_p3), [#allocation6], 16   ;;  %p14882_p4 = pmov %p14881_p3 }
  0x48   : > { %p14883_p9 = pmov %p14881_p3 }
  0x49   : > { %10440 = vsyncadd (%p14882_p4), [#allocation6], 4294967280 }
  0x4a   : > { %10442 = dma.done.wait (%p14883_p9), [#allocation8], 16   ;;  %p14884_p5 = pmov %p14881_p3 }
  0x4c   : > { %10444 = vsyncadd (%p14884_p5), [#allocation8], 4294967280 }
  0x4d   : > { %457 = sfence }
  0x4e   : > { %s14885_s2 = sld [smem:[#allocation91_spill]]  ;;  %vm1578_vm0 = vcmask 1043456   ;;  %vm514_vm1 = vcmask 60416   ;;  %vm517_vm2 = vcmask 57344   ;;  %p503_p6 = scmp.lt.s32.totalorder %s10576_s17, 1  ;;  %v10467_v4 = vmov 0  }
  0x4f   : > { %515 = vst.msk [vmem:[#allocation2] sm:$0xf] %vm514_vm1, %v10467_v4  ;;  %516 = vst.msk [vmem:[#allocation2 + $0x4] sm:$0xf] %vm514_vm1, %v10467_v4  ;;  %vm1092_vm3 = vsmask.f32 3328 }
  0x50   : > { %518 = vst.msk [vmem:[#allocation2 + $0x8] sm:$0x1] %vm517_vm2, %v10467_v4  ;;  %521 = vst.msk [vmem:[#allocation2 + $0x14] sm:$0x1] %vm517_vm2, %v10467_v4  ;;  %s10706_s20 = scalar_select %p503_p6, %s10576_s17, 1  ;;  %vm1529_vm8 = vcmask 64512  }
  0x51   : > { %519 = vst.msk [vmem:[#allocation2 + $0xc] sm:$0xf] %vm514_vm1, %v10467_v4  ;;  %520 = vst.msk [vmem:[#allocation2 + $0x10] sm:$0xf] %vm514_vm1, %v10467_v4  ;;  %vm1093_vm4 = vsmask.f32 7440 }
  0x52   : > { %522 = vst.msk [vmem:[#allocation2 + $0x18] sm:$0xf] %vm514_vm1, %v10467_v4  ;;  %523 = vst.msk [vmem:[#allocation2 + $0x1c] sm:$0xf] %vm514_vm1, %v10467_v4  ;;  %s14747_s27 = sshll.u32 %s10706_s20, 7  ;;  %s14886_s0 = sld [smem:[#allocation90_spill]] }
  0x53   : > { %524 = vst.msk [vmem:[#allocation2 + $0x20] sm:$0x1] %vm517_vm2, %v10467_v4  ;;  %527 = vst.msk [vmem:[#allocation2 + $0x2c] sm:$0x1] %vm517_vm2, %v10467_v4  ;;  %vm602_vm5 = vsmask.f32 256 }
  0x54   : > { %v8812_v0 = vld [vmem:[%s14885_s2 + $0x4] sm:$0xf]  ;;  %v8959_v1 = vld [vmem:[%s14885_s2 + $0x10] sm:$0xf]  ;;  %525 = vst.msk [vmem:[#allocation2 + $0x24] sm:$0xf] %vm514_vm1, %v10467_v4  ;;  %vm10741_vm11 = vmand %vm517_vm2, %vm602_vm5 }
  0x55   : > { %10164 = vmatprep.subr.msk.bf16.mxu1 %vm1578_vm0, %v8812_v0  ;;  %10168 = vmatprep.subr.msk.bf16.mxu0 %vm1578_vm0, %v8959_v1  ;;  %v1580_v2 = vsel %vm1578_vm0, %v8812_v0, 0  ;;  %v3381_v3 = vsel %vm1578_vm0, %v8959_v1, 0  ;;  %526 = vst.msk [vmem:[#allocation2 + $0x28] sm:$0xf] %vm514_vm1, %v10467_v4  ;;  %528 = vst.msk [vmem:[#allocation2 + $0x30] sm:$0xf] %vm514_vm1, %v10467_v4 }
  0x56   : > { %9547 = vmatpush3.bf16.msra.mxu1 %v1580_v2  ;;  %9683 = vmatpush3.bf16.msra.mxu0 %v3381_v3  ;;  %529 = vst.msk [vmem:[#allocation2 + $0x34] sm:$0xf] %vm514_vm1, %v10467_v4  ;;  %531 = vst.msk [vmem:[#allocation2 + $0x3c] sm:$0xf] %vm514_vm1, %v10467_v4  ;;  %v10711_v5 = vld [vmem:[%s14885_s2 + $0x14] sm:$0xf] }
  0x57   : > { %530 = vst.msk [vmem:[#allocation2 + $0x38] sm:$0x1] %vm517_vm2, %v10467_v4  ;;  %533 = vst.msk [vmem:[#allocation2 + $0x44] sm:$0x1] %vm517_vm2, %v10467_v4  ;;  %10169 = vmatprep.subr.msk.bf16.mxu0 %vm1578_vm0, %v10711_v5  ;;  %vm603_vm6 = vsmask.f32 4368 }
  0x58   : > { %532 = vst.msk [vmem:[#allocation2 + $0x40] sm:$0xf] %vm514_vm1, %v10467_v4  ;;  %534 = vst.msk [vmem:[#allocation2 + $0x48] sm:$0xf] %vm514_vm1, %v10467_v4  ;;  %s10721_s28 = scalar_lea.vmem %s14886_s0, %s14747_s27  ;;  %vm927_vm7 = vsmask.f32 7938 }
  0x59   : > { %535 = vst.msk [vmem:[#allocation2 + $0x4c] sm:$0xf] %vm514_vm1, %v10467_v4  ;;  %537 = vst.msk [vmem:[#allocation2 + $0x54] sm:$0xf] %vm514_vm1, %v10467_v4  ;;  %v570_v6 = vld [vmem:[%s10721_s28] sm:$0xf] }
  0x5a   : > { %536 = vst.msk [vmem:[#allocation2 + $0x50] sm:$0x1] %vm517_vm2, %v10467_v4  ;;  %539 = vst.msk [vmem:[#allocation2 + $0x5c] sm:$0x1] %vm517_vm2, %v10467_v4  ;;  %v571_v7 = vld [vmem:[%s10721_s28 + $0x4] sm:$0xf] }
  0x5b   : > { %538 = vst.msk [vmem:[#allocation2 + $0x58] sm:$0xf] %vm514_vm1, %v10467_v4  ;;  %540 = vst.msk [vmem:[#allocation2 + $0x60] sm:$0xf] %vm514_vm1, %v10467_v4  ;;  %v606_v8 = vshrl.u32 %v570_v6, 16  ;;  %v609_v9 = vshll.u32 %v570_v6, 16 }
  0x5c   : > { %541 = vst.msk [vmem:[#allocation2 + $0x64] sm:$0xf] %vm514_vm1, %v10467_v4  ;;  %543 = vst.msk [vmem:[#allocation2 + $0x6c] sm:$0xf] %vm514_vm1, %v10467_v4  ;;  %v614_v10 = vshrl.u32 %v571_v7, 16  ;;  %v617_v11 = vshll.u32 %v571_v7, 16 }
  0x5d   : > { %542 = vst.msk [vmem:[#allocation2 + $0x68] sm:$0x1] %vm517_vm2, %v10467_v4  ;;  %545 = vst.msk [vmem:[#allocation2 + $0x74] sm:$0x1] %vm517_vm2, %v10467_v4  ;;  %v1043_v12 = vld [vmem:[#allocation2] sm:$0xf] }
  0x5e   : > { %544 = vst.msk [vmem:[#allocation2 + $0x70] sm:$0xf] %vm514_vm1, %v10467_v4  ;;  %546 = vst.msk [vmem:[#allocation2 + $0x78] sm:$0xf] %vm514_vm1, %v10467_v4  ;;  %v1044_v13 = vld [vmem:[#allocation2 + $0x4] sm:$0xf] }
  0x5f   : > { %547 = vst.msk [vmem:[#allocation2 + $0x7c] sm:$0xf] %vm514_vm1, %v10467_v4  ;;  %549 = vst.msk [vmem:[#allocation2 + $0x84] sm:$0xf] %vm514_vm1, %v10467_v4  ;;  %v1076_v14 = vld [vmem:[#allocation2 + $0x8] sm:$0x1] }
  0x60   : > { %548 = vst.msk [vmem:[#allocation2 + $0x80] sm:$0x1] %vm517_vm2, %v10467_v4  ;;  %551 = vst.msk [vmem:[#allocation2 + $0x8c] sm:$0x1] %vm517_vm2, %v10467_v4  ;;  %v1096_v15 = vshrl.u32 %v1043_v12, 16  ;;  %v1099_v16 = vshll.u32 %v1043_v12, 16 }
  0x61   : > { %550 = vst.msk [vmem:[#allocation2 + $0x88] sm:$0xf] %vm514_vm1, %v10467_v4  ;;  %552 = vst.msk [vmem:[#allocation2 + $0x90] sm:$0xf] %vm514_vm1, %v10467_v4  ;;  %v1105_v17 = vshll.u32 %v1044_v13, 16  ;;  %v1109_v18 = vshrl.u32 %v1044_v13, 16 }
  0x62   : > { %553 = vst.msk [vmem:[#allocation2 + $0x94] sm:$0xf] %vm514_vm1, %v10467_v4  ;;  %555 = vst.msk [vmem:[#allocation2 + $0x9c] sm:$0xf] %vm514_vm1, %v10467_v4  ;;  %v572_v19 = vld [vmem:[%s10721_s28 + $0x8] sm:$0xf] }
  0x63   : > { %554 = vst.msk [vmem:[#allocation2 + $0x98] sm:$0x1] %vm517_vm2, %v10467_v4  ;;  %557 = vst.msk [vmem:[#allocation2 + $0xa4] sm:$0x1] %vm517_vm2, %v10467_v4  ;;  %v1115_v20 = vshll.u32 %v1076_v14, 16  ;;  %v608_v22 = vrot.slane %v606_v8, 7 }
  0x64   : > { %556 = vst.msk [vmem:[#allocation2 + $0xa0] sm:$0xf] %vm514_vm1, %v10467_v4  ;;  %558 = vst.msk [vmem:[#allocation2 + $0xa8] sm:$0xf] %vm514_vm1, %v10467_v4  ;;  %v616_v23 = vrot.slane %v614_v10, 7  ;;  %v1098_v25 = vrot.slane %v1096_v15, 4 }
  0x65   : > { %559 = vst.msk [vmem:[#allocation2 + $0xac] sm:$0xf] %vm514_vm1, %v10467_v4  ;;  %561 = vst.msk [vmem:[#allocation2 + $0xb4] sm:$0xf] %vm514_vm1, %v10467_v4  ;;  %v573_v24 = vld [vmem:[%s10721_s28 + $0xc] sm:$0xf]  ;;  %v611_v32 = vor.u32 %v609_v9, %v608_v22 }
  0x66   : > { %560 = vst.msk [vmem:[#allocation2 + $0xb0] sm:$0x1] %vm517_vm2, %v10467_v4  ;;  %563 = vst.msk [vmem:[#allocation2 + $0xbc] sm:$0x1] %vm517_vm2, %v10467_v4  ;;  %v1101_v26 = vrot.slane %v1099_v16, 5  ;;  %v1107_v27 = vrot.slane %v1105_v17, 5  ;;  %v619_v34 = vor.u32 %v617_v11, %v616_v23 }
  0x67   : > { %562 = vst.msk [vmem:[#allocation2 + $0xb8] sm:$0xf] %vm514_vm1, %v10467_v4  ;;  %564 = vst.msk [vmem:[#allocation2 + $0xc0] sm:$0xf] %vm514_vm1, %v10467_v4  ;;  %v1111_v28 = vrot.slane %v1109_v18, 4  ;;  %v1117_v31 = vrot.slane %v1115_v20, 5 }
  0x68   : > { %565 = vst.msk [vmem:[#allocation2 + $0xc4] sm:$0xf] %vm514_vm1, %v10467_v4  ;;  %567 = vst.msk [vmem:[#allocation2 + $0xcc] sm:$0xf] %vm514_vm1, %v10467_v4  ;;  %v929_v30 = vld [vmem:[#allocation2 + $0xc] sm:$0xf]  ;;  %v1102_v37 = vor.u32 %v1101_v26, %v1098_v25 }
  0x69   : > { %566 = vst.msk [vmem:[#allocation2 + $0xc8] sm:$0x1] %vm517_vm2, %v10467_v4  ;;  %569 = vst.msk [vmem:[#allocation2 + $0xd4] sm:$0x1] %vm517_vm2, %v10467_v4  ;;  %v612_v33 = vrot.slane %v608_v22, 4  ;;  %v1112_v38 = vor.u32 %v1111_v28, %v1107_v27  ;;  %v621_v39 = vrot.slane %v616_v23, 4 }
  0x6a   : > { %568 = vst.msk [vmem:[#allocation2 + $0xd0] sm:$0xf] %vm514_vm1, %v10467_v4  ;;  %vm10728_vm9 = vmor %vm602_vm5, %vm603_vm6  ;;  %v935_v36 = vld [vmem:[#allocation2 + $0x14] sm:$0x1]  ;;  %v623_v40 = vshrl.u32 %v572_v19, 16  ;;  %v14893_v42 = vmov 0 }
  0x6b   : > { %vm10735_vm10 = vmand %vm514_vm1, %vm927_vm7  ;;  %v574_v41 = vld [vmem:[%s10721_s28 + $0x10] sm:$0xf]  ;;  %v620_v43 = vsel %vm10728_vm9, %v612_v33, %v619_v34  ;;  %v626_v45 = vshll.u32 %v572_v19, 16  ;;  %v631_v46 = vshrl.u32 %v573_v24, 16  ;;  %v1103_v47 = vrot.slane %v1102_v37, 4  ;;  %s14936_s5 = sld [smem:[#allocation94_spill]] }
  0x6c   : > { %vm10748_vm12 = vmor %vm1092_vm3, %vm1093_vm4  ;;  %v930_v44 = vsel %vm10735_vm10, %v611_v32, %v929_v30  ;;  %v1113_v48 = vrot.slane %v1112_v38, 4  ;;  %932 = vst.msk [vmem:[#allocation2 + $0x10] sm:$0xf] %vm514_vm1, %v620_v43  ;;  %v936_v49 = vsel %vm10741_vm11, %v621_v39, %v935_v36  ;;  %v625_v50 = vrot.slane %v623_v40, 7  ;;  %v938_v51 = vld [vmem:[#allocation2 + $0x18] sm:$0xf] }
  0x6d   : > { %v14894_v42 = vsel %vm10748_vm12, 4294967295, %v14893_v42  ;;  %931 = vst [vmem:[#allocation2 + $0xc] sm:$0xf] %v930_v44  ;;  %937 = vst [vmem:[#allocation2 + $0x14] sm:$0x1] %v936_v49  ;;  %v633_v52 = vrot.slane %v631_v46, 7  ;;  %v1108_v57 = vsel %vm10748_vm12, %v1103_v47, %v1107_v27 }
  0x6e   : > { %14895 = vst [vmem:[#allocation16_spill] sm:$0xff] %v14894_v42  ;;  %v634_v53 = vshll.u32 %v573_v24, 16  ;;  %v10760_v54 = vld [vmem:[%s10721_s28 + $0x14] sm:$0xf]  ;;  %v640_v55 = vshrl.u32 %v574_v41, 16  ;;  %v643_v56 = vshll.u32 %v574_v41, 16  ;;  %v1118_v58 = vsel %vm10748_vm12, %v1113_v48, %v1117_v31 }
  0x6f   : > { %v628_v59 = vor.u32 %v626_v45, %v625_v50  ;;  %v629_v60 = vrot.slane %v625_v50, 4  ;;  %v942_v61 = vld [vmem:[#allocation2 + $0x20] sm:$0x1]  ;;  %v10767_v62 = vld [vmem:[%s10721_s28 + $0x18] sm:$0xf]  ;;  %v8813_v63 = vcombine.low %v1108_v57, %v1118_v58  ;;  %v638_v1 = vrot.slane %v633_v52, 4 }
  0x70   : > { %v636_v0 = vor.u32 %v634_v53, %v633_v52  ;;  %v10769_v2 = vrot.slane %v640_v55, 7  ;;  %v648_v4 = vshrl.u32 %v10760_v54, 16  ;;  %v945_v6 = vld [vmem:[#allocation2 + $0x24] sm:$0xf]  ;;  %v657_v10 = vshrl.u32 %v10767_v62, 16  ;;  %s14955_s3 = sld [smem:[#allocation92_spill]] }
  0x71   : > { %v939_v3 = vsel %vm10735_vm10, %v628_v59, %v938_v51  ;;  %9548 = vmatprep.mubr.msk.bf16.mxu1 %vm1529_vm8, %v8813_v63  ;;  %v943_v8 = vsel %vm10741_vm11, %v638_v1, %v942_v61  ;;  %v10784_v11 = vsel %vm1578_vm0, %v10711_v5, 0  ;;  %v651_v14 = vshll.u32 %v10760_v54, 16  ;;  %v10801_v24 = vld [vmem:[%s10721_s28 + $0x1c] sm:$0xf]  ;;  %s14956_s4 = sld [smem:[#allocation93_spill]]  ;;  %s14957_s8 = sld [smem:[#allocation97_spill]] }
  0x72   : > { %v637_v7 = vsel %vm10728_vm9, %v629_v60, %v636_v0  ;;  %940 = vst [vmem:[#allocation2 + $0x18] sm:$0xf] %v939_v3  ;;  %v645_v9 = vor.u32 %v643_v56, %v10769_v2  ;;  %944 = vst [vmem:[#allocation2 + $0x20] sm:$0x1] %v943_v8  ;;  %v646_v12 = vrot.slane %v10769_v2, 4  ;;  %v10787_v13 = vrot.slane %v648_v4, 7 }
  0x73   : > { %941 = vst.msk [vmem:[#allocation2 + $0x1c] sm:$0xf] %vm514_vm1, %v637_v7  ;;  %v10792_v16 = vld [vmem:[#allocation2 + $0x10] sm:$0xf]  ;;  %v10805_v28 = vrot.slane %v657_v10, 7  ;;  %v660_v30 = vshll.u32 %v10767_v62, 16 }
  0x74   : > { %v10790_v15 = vld [vmem:[#allocation2 + $0xc] sm:$0xf]  ;;  %v946_v18 = vsel %vm10735_vm10, %v645_v9, %v945_v6  ;;  %v1077_v19 = vld [vmem:[#allocation2 + $0x14] sm:$0x1]  ;;  %v1129_v22 = vshll.u32 %v10792_v16, 16  ;;  %v1133_v23 = vshrl.u32 %v10792_v16, 16 }
  0x75   : > { %v2850_v17 = vld [vmem:[#allocation2 + $0xc] sm:$0xf]  ;;  %v1120_v20 = vshrl.u32 %v10790_v15, 16  ;;  %v1123_v5 = vshll.u32 %v10790_v15, 16  ;;  %947 = vst [vmem:[#allocation2 + $0x24] sm:$0xf] %v946_v18  ;;  %v662_v2 = vor.u32 %v660_v30, %v10805_v28 }
  0x76   : > { %v1139_v25 = vshll.u32 %v1077_v19, 16  ;;  %v10803_v26 = vld [vmem:[#allocation2 + $0x10] sm:$0xf]  ;;  %v2899_v27 = vshrl.u32 %v2850_v17, 16  ;;  %v1131_v33 = vrot.slane %v1129_v22, 5  ;;  %v1135_v34 = vrot.slane %v1133_v23, 4 }
  0x77   : > { %v1122_v31 = vrot.slane %v1120_v20, 4  ;;  %v1125_v32 = vrot.slane %v1123_v5, 5  ;;  %v10808_v36 = vld [vmem:[#allocation2 + $0x14] sm:$0x1]  ;;  %v2902_v39 = vshll.u32 %v2850_v17, 16  ;;  %v2908_v40 = vshll.u32 %v10803_v26, 16 }
  0x78   : > { %v1141_v37 = vrot.slane %v1139_v25, 5  ;;  %v2901_v38 = vrot.slane %v2899_v27, 4  ;;  %v1136_v43 = vor.u32 %v1135_v34, %v1131_v33  ;;  %v2912_v44 = vshrl.u32 %v10803_v26, 16  ;;  %s14958_s10 = sld [smem:[#allocation99_spill]]  ;;  %s14959_s6 = sld [smem:[#allocation95_spill]] }
  0x79   : > { %v1126_v41 = vor.u32 %v1125_v32, %v1122_v31  ;;  %v2918_v45 = vshll.u32 %v10808_v36, 16  ;;  %v2853_v46 = vld [vmem:[#allocation2 + $0x18] sm:$0xf]  ;;  %v2904_v47 = vrot.slane %v2902_v39, 5  ;;  %v2910_v48 = vrot.slane %v2908_v40, 5  ;;  %s14960_s7 = sld [smem:[#allocation96_spill]] }
  0x7a   : > { %v3642_v49 = vrot.slane %v10803_v26, 5  ;;  %v10814_v50 = vld [vmem:[#allocation2 + $0x1c] sm:$0xf]  ;;  %v665_v51 = vshrl.u32 %v10801_v24, 16  ;;  %v1137_v53 = vrot.slane %v1136_v43, 4  ;;  %v2914_v55 = vrot.slane %v2912_v44, 4 }
  0x7b   : > { %v1127_v52 = vrot.slane %v1126_v41, 4  ;;  %v2920_v56 = vrot.slane %v2918_v45, 5  ;;  %v2905_v57 = vor.u32 %v2904_v47, %v2901_v38  ;;  %v10817_v58 = vld [vmem:[#allocation2 + $0x20] sm:$0x1]  ;;  %v2923_v59 = vshrl.u32 %v2853_v46, 16  ;;  %s14961_s9 = sld [smem:[#allocation98_spill]] }
  0x7c   : > { %v2926_v60 = vshll.u32 %v2853_v46, 16  ;;  %v2932_v61 = vshll.u32 %v10814_v50, 16  ;;  %v1142_v0 = vsel %vm10748_vm12, %v1137_v53, %v1141_v37  ;;  %v2915_v1 = vor.u32 %v2914_v55, %v2910_v48  ;;  %v1047_v9 = vld [vmem:[#allocation2 + $0x18] sm:$0xf]  ;;  %v1048_v25 = vld [vmem:[#allocation2 + $0x1c] sm:$0xf] }
  0x7d   : > { %v1132_v63 = vsel %vm10748_vm12, %v1127_v52, %v1131_v33  ;;  %v2936_v3 = vshrl.u32 %v10814_v50, 16  ;;  %v2906_v6 = vrot.slane %v2905_v57, 4  ;;  %v2925_v7 = vrot.slane %v2923_v59, 4  ;;  %v1078_v33 = vld [vmem:[#allocation2 + $0x20] sm:$0x1]  ;;  %s14962_s11 = sld [smem:[#allocation100_spill]] }
  0x7e   : > { %v8814_v4 = vcombine.low %v1132_v63, %v1142_v0  ;;  %v2928_v8 = vrot.slane %v2926_v60, 5  ;;  %v2916_v10 = vrot.slane %v2915_v1, 4  ;;  %v2934_v17 = vrot.slane %v2932_v61, 5  ;;  %v949_v53 = vld [vmem:[#allocation2 + $0x2c] sm:$0x1]  ;;  %s13130_s26 = sld [smem:[#allocation4 + $0x2]] }
  0x7f   : > { %v2938_v18 = vrot.slane %v2936_v3, 4  ;;  %v2942_v19 = vshll.u32 %v10817_v58, 16  ;;  %v2911_v20 = vsel %vm10748_vm12, %v2906_v6, %v2910_v48  ;;  %v3645_v5 = vrot.slane %v10808_v36, 5  ;;  %v1049_v55 = vld [vmem:[#allocation2 + $0x24] sm:$0xf]  ;;  %s13136_s18 = sld [smem:[#allocation4 + $0x4]] }
  0x80   : > { %9549 = vmatmul.mubr.msk.bf16.vlgmr.msra.gmra.mrb[0].mxu1 %vm1529_vm8, %v8814_v4  ;;  %v2929_v22 = vor.u32 %v2928_v8, %v2925_v7  ;;  %v3649_v23 = vrot.slane %v10814_v50, 5  ;;  %v2921_v27 = vsel %vm10748_vm12, %v2916_v10, %v2920_v56  ;;  %v1144_v34 = vshrl.u32 %v1047_v9, 16  ;;  %v2856_v61 = vld [vmem:[#allocation2 + $0x24] sm:$0xf]  ;;  %s13139_s27 = sld [smem:[#allocation4 + $0x6]]  ;;  %s13147_s15 = sld [smem:[#allocation4 + $0x8]] }
  0x81   : > { %v2939_v31 = vor.u32 %v2938_v18, %v2934_v17  ;;  %v2944_v32 = vrot.slane %v2942_v19, 5  ;;  %v8960_v37 = vcombine.low %v2911_v20, %v2921_v27  ;;  %v3652_v39 = vrot.slane %v10817_v58, 5  ;;  %v578_v19 = vld [vmem:[%s10721_s28 + $0x20] sm:$0xf]  ;;  %s13154_s22 = sld [smem:[#allocation4 + $0xa]]  ;;  %s14752_s25 = smov 126  }
  0x82   : > { %v2930_v38 = vrot.slane %v2929_v22, 4  ;;  %v1147_v40 = vshll.u32 %v1047_v9, 16  ;;  %v1146_v43 = vrot.slane %v1144_v34, 4  ;;  %v1153_v44 = vshll.u32 %v1048_v25, 16  ;;  %s13161_s21 = sld [smem:[#allocation4 + $0xc]]  ;;  %s14757_s0 = smov 123  }
  0x83   : > { %v2940_v41 = vrot.slane %v2939_v31, 4  ;;  %v1157_v45 = vshrl.u32 %v1048_v25, 16  ;;  %9684 = vmatprep.mubr.msk.bf16.mxu0 %vm1529_vm8, %v8960_v37  ;;  %v1163_v48 = vshll.u32 %v1078_v33, 16  ;;  %v653_v52 = vor.u32 %v651_v14, %v10787_v13  ;;  %v579_v31 = vld [vmem:[%s10721_s28 + $0x24] sm:$0xf]  ;;  %s13339_s12 = sld [smem:[#allocation4 + $0x28]] }
  0x84   : > { %v2935_v46 = vsel %vm10748_vm12, %v2930_v38, %v2934_v17  ;;  %v1149_v47 = vrot.slane %v1147_v40, 5  ;;  %v1155_v57 = vrot.slane %v1153_v44, 5  ;;  %v655_v60 = vrot.slane %v10787_v13, 4  ;;  %s13389_s13 = sld [smem:[#allocation4 + $0x32]]  ;;  %s14245_s19 = sld [smem:[#allocation4 + $0x5b]] }
  0x85   : > { %v2945_v56 = vsel %vm10748_vm12, %v2940_v41, %v2944_v32  ;;  %v1159_v59 = vrot.slane %v1157_v45, 4  ;;  %v1165_v1 = vrot.slane %v1163_v48, 5  ;;  %v654_v3 = vsel %vm10728_vm9, %v646_v12, %v653_v52  ;;  %v952_v12 = vld [vmem:[#allocation2 + $0x30] sm:$0xf]  ;;  %p15182_p12 = scmp.ne.s32.totalorder %s14874_s23, 0 }
  0x86   : > { %v8961_v63 = vcombine.low %v2935_v46, %v2945_v56  ;;  %v1150_v0 = vor.u32 %v1149_v47, %v1146_v43  ;;  %948 = vst.msk [vmem:[#allocation2 + $0x28] sm:$0xf] %vm514_vm1, %v654_v3  ;;  %v950_v14 = vsel %vm10741_vm11, %v655_v60, %v949_v53  ;;  %v1168_v4 = vshrl.u32 %v1049_v55, 16 }
  0x87   : > { %v1160_v54 = vor.u32 %v1159_v59, %v1155_v57  ;;  %v1171_v6 = vshll.u32 %v1049_v55, 16  ;;  %951 = vst [vmem:[#allocation2 + $0x2c] sm:$0x1] %v950_v14  ;;  %v2947_v7 = vshrl.u32 %v2856_v61, 16  ;;  %v2950_v8 = vshll.u32 %v2856_v61, 16 }
  0x88   : > { %9685 = vmatmul.mubr.msk.bf16.vlgmr.msra.gmra.mrb[0].mxu0 %vm1529_vm8, %v8961_v63  ;;  %v1151_v13 = vrot.slane %v1150_v0, 4  ;;  %v1170_v10 = vrot.slane %v1168_v4, 4  ;;  %v663_v18 = vrot.slane %v10805_v28, 4  ;;  %v667_v27 = vrot.slane %v665_v51, 7  ;;  %v956_v28 = vld [vmem:[#allocation2 + $0x38] sm:$0x1] }
  0x89   : > { %9717 = vmatpush3.bf16.msra.mxu0 %v10784_v11  ;;  %v1161_v9 = vrot.slane %v1160_v54, 4  ;;  %v1173_v17 = vrot.slane %v1171_v6, 5  ;;  %v2949_v22 = vrot.slane %v2947_v7, 4  ;;  %v2952_v25 = vrot.slane %v2950_v8, 5 }
  0x8a   : > { %v1156_v20 = vsel %vm10748_vm12, %v1151_v13, %v1155_v57  ;;  %v668_v11 = vshll.u32 %v10801_v24, 16  ;;  %v953_v32 = vsel %vm10735_vm10, %v662_v2, %v952_v12  ;;  %v672_v37 = vrot.slane %v667_v27, 4 }
  0x8b   : > { %v1166_v62 = vsel %vm10748_vm12, %v1161_v9, %v1165_v1  ;;  %v1174_v30 = vor.u32 %v1173_v17, %v1170_v10  ;;  %v2953_v34 = vor.u32 %v2952_v25, %v2949_v22  ;;  %954 = vst [vmem:[#allocation2 + $0x30] sm:$0xf] %v953_v32  ;;  %v674_v38 = vshrl.u32 %v578_v19, 16 }
  0x8c   : > { %v8815_v33 = vcombine.low %v1156_v20, %v1166_v62  ;;  %v670_v41 = vor.u32 %v668_v11, %v667_v27  ;;  %v677_v43 = vshll.u32 %v578_v19, 16  ;;  %v682_v51 = vshrl.u32 %v579_v31, 16 }
  0x8d   : > { %v1175_v40 = vrot.slane %v1174_v30, 4  ;;  %v1050_v44 = vld [vmem:[#allocation2 + $0x28] sm:$0xf]  ;;  %v2954_v46 = vrot.slane %v2953_v34, 4  ;;  %v957_v24 = vsel %vm10741_vm11, %v672_v37, %v956_v28  ;;  %v676_v47 = vrot.slane %v674_v38, 7 }
  0x8e   : > { %9552 = vmatprep.mubr.msk.bf16.mxu1 %vm1529_vm8, %v8815_v33  ;;  %v2857_v45 = vld [vmem:[#allocation2 + $0x28] sm:$0xf]  ;;  %v1079_v48 = vld [vmem:[#allocation2 + $0x2c] sm:$0x1]  ;;  %v1177_v52 = vshll.u32 %v1050_v44, 16  ;;  %v1181_v53 = vshrl.u32 %v1050_v44, 16  ;;  %v671_v56 = vsel %vm10728_vm9, %v663_v18, %v670_v41 }
  0x8f   : > { %v2858_v55 = vld [vmem:[#allocation2 + $0x2c] sm:$0x1]  ;;  %958 = vst [vmem:[#allocation2 + $0x38] sm:$0x1] %v957_v24  ;;  %v1187_v57 = vshll.u32 %v1079_v48, 16  ;;  %v2956_v59 = vshll.u32 %v2857_v45, 16  ;;  %v679_v1 = vor.u32 %v677_v43, %v676_v47 }
  0x90   : > { %v2960_v60 = vshrl.u32 %v2857_v45, 16  ;;  %v2966_v61 = vshll.u32 %v2858_v55, 16  ;;  %955 = vst.msk [vmem:[#allocation2 + $0x34] sm:$0xf] %vm514_vm1, %v671_v56  ;;  %v1179_v63 = vrot.slane %v1177_v52, 5  ;;  %v1183_v0 = vrot.slane %v1181_v53, 4 }
  0x91   : > { %v680_v3 = vrot.slane %v676_v47, 4  ;;  %v1189_v54 = vrot.slane %v1187_v57, 5  ;;  %v2958_v14 = vrot.slane %v2956_v59, 5  ;;  %v684_v12 = vrot.slane %v682_v51, 7  ;;  %v963_v53 = vld [vmem:[#allocation2 + $0x44] sm:$0x1] }
  0x92   : > { %v2962_v4 = vrot.slane %v2960_v60, 4  ;;  %v2968_v6 = vrot.slane %v2966_v61, 5  ;;  %v1180_v13 = vsel %vm10748_vm12, %v1175_v40, %v1179_v63  ;;  %v1184_v7 = vor.u32 %v1183_v0, %v1179_v63  ;;  %v2859_v8 = vld [vmem:[#allocation2 + $0x30] sm:$0xf]  ;;  %v580_v60 = vld [vmem:[%s10721_s28 + $0x28] sm:$0xf] }
  0x93   : > { %v1051_v2 = vld [vmem:[#allocation2 + $0x30] sm:$0xf]  ;;  %v685_v9 = vshll.u32 %v579_v31, 16  ;;  %v2959_v10 = vsel %vm10748_vm12, %v2954_v46, %v2958_v14  ;;  %v2971_v18 = vshrl.u32 %v2859_v8, 16  ;;  %v2974_v19 = vshll.u32 %v2859_v8, 16 }
  0x94   : > { %v2963_v17 = vor.u32 %v2962_v4, %v2958_v14  ;;  %v1185_v20 = vrot.slane %v1184_v7, 4  ;;  %v1192_v22 = vshrl.u32 %v1051_v2, 16  ;;  %v1195_v25 = vshll.u32 %v1051_v2, 16  ;;  %v959_v46 = vld [vmem:[#allocation2 + $0x3c] sm:$0xf] }
  0x95   : > { %v687_v27 = vor.u32 %v685_v9, %v684_v12  ;;  %v2973_v11 = vrot.slane %v2971_v18, 4  ;;  %v2976_v32 = vrot.slane %v2974_v19, 5  ;;  %v689_v28 = vrot.slane %v684_v12, 4 }
  0x96   : > { %v2964_v62 = vrot.slane %v2963_v17, 4  ;;  %v2861_v30 = vld [vmem:[#allocation2 + $0x38] sm:$0x1]  ;;  %v1190_v33 = vsel %vm10748_vm12, %v1185_v20, %v1189_v54  ;;  %v1194_v38 = vrot.slane %v1192_v22, 4  ;;  %v10886_v24 = vrot.slane %v3649_v23, 4 }
  0x97   : > { %v2860_v34 = vld [vmem:[#allocation2 + $0x34] sm:$0xf]  ;;  %v2990_v31 = vshll.u32 %v2861_v30, 16  ;;  %v688_v40 = vsel %vm10728_vm9, %v680_v3, %v687_v27  ;;  %v8816_v41 = vcombine.low %v1180_v13, %v1190_v33  ;;  %v2977_v51 = vor.u32 %v2976_v32, %v2973_v11  ;;  %v1080_v45 = vld [vmem:[#allocation2 + $0x38] sm:$0x1] }
  0x98   : > { %v1052_v37 = vld [vmem:[#allocation2 + $0x34] sm:$0xf]  ;;  %v2969_v43 = vsel %vm10748_vm12, %v2964_v62, %v2968_v6  ;;  %v2980_v44 = vshll.u32 %v2860_v34, 16  ;;  %962 = vst.msk [vmem:[#allocation2 + $0x40] sm:$0xf] %vm514_vm1, %v688_v40  ;;  %v2984_v48 = vshrl.u32 %v2860_v34, 16  ;;  %v960_v3 = vsel %vm10735_vm10, %v679_v1, %v959_v46 }
  0x99   : > { %v8962_v47 = vcombine.low %v2959_v10, %v2969_v43  ;;  %v1197_v52 = vrot.slane %v1195_v25, 5  ;;  %9553 = vmatmul.mubr.msk.bf16.gmra.mrb[4].mxu1 %vm1529_vm8, %v8816_v41  ;;  %v2978_v55 = vrot.slane %v2977_v51, 4  ;;  %v1201_v57 = vshll.u32 %v1052_v37, 16  ;;  %v10894_v54 = vld [vmem:[%s10721_s28 + $0x2c] sm:$0xf] }
  0x9a   : > { %v2982_v56 = vrot.slane %v2980_v44, 5  ;;  %v1205_v59 = vshrl.u32 %v1052_v37, 16  ;;  %v2986_v61 = vrot.slane %v2984_v48, 4  ;;  %v1211_v0 = vshll.u32 %v1080_v45, 16  ;;  %961 = vst [vmem:[#allocation2 + $0x3c] sm:$0xf] %v960_v3 }
  0x9b   : > { %9688 = vmatprep.mubr.msk.bf16.mxu0 %vm1529_vm8, %v8962_v47  ;;  %v1198_v63 = vor.u32 %v1197_v52, %v1194_v38  ;;  %v2992_v14 = vrot.slane %v2990_v31, 5  ;;  %v1203_v4 = vrot.slane %v1201_v57, 5  ;;  %v964_v13 = vsel %vm10741_vm11, %v689_v28, %v963_v53  ;;  %v966_v28 = vld [vmem:[#allocation2 + $0x48] sm:$0xf]  ;;  %v582_v52 = vld [vmem:[%s10721_s28 + $0x30] sm:$0xf] }
  0x9c   : > { %v1207_v6 = vrot.slane %v1205_v59, 4  ;;  %v2987_v7 = vor.u32 %v2986_v61, %v2982_v56  ;;  %v1213_v2 = vrot.slane %v1211_v0, 5  ;;  %965 = vst [vmem:[#allocation2 + $0x44] sm:$0x1] %v964_v13  ;;  %v691_v12 = vshrl.u32 %v580_v60, 16 }
  0x9d   : > { %v1199_v8 = vrot.slane %v1198_v63, 4  ;;  %v694_v10 = vshll.u32 %v580_v60, 16  ;;  %v699_v17 = vshrl.u32 %v10894_v54, 16  ;;  %v702_v1 = vshll.u32 %v10894_v54, 16  ;;  %v10917_v60 = vld [vmem:[%s10721_s28 + $0x34] sm:$0xf] }
  0x9e   : > { %v1208_v9 = vor.u32 %v1207_v6, %v1203_v4  ;;  %v2983_v18 = vsel %vm10748_vm12, %v2978_v55, %v2982_v56  ;;  %v2988_v19 = vrot.slane %v2987_v7, 4  ;;  %v10904_v27 = vrot.slane %v691_v12, 7  ;;  %v970_v12 = vld [vmem:[#allocation2 + $0x50] sm:$0x1] }
  0x9f   : > { %v1204_v20 = vsel %vm10748_vm12, %v1199_v8, %v1203_v4  ;;  %v1054_v22 = vld [vmem:[#allocation2 + $0x40] sm:$0xf]  ;;  %vm2083_vm13 = vcmask 1042432   ;;  %vm2084_vm14 = vcmask 1046532   ;;  %v3644_v29 = vrot.slane %v3642_v49, 4 }
  0xa0   : > { %v2863_v25 = vld [vmem:[#allocation2 + $0x40] sm:$0xf]  ;;  %v1209_v62 = vrot.slane %v1208_v9, 4  ;;  %v1225_v30 = vshll.u32 %v1054_v22, 16  ;;  %v1229_v11 = vshrl.u32 %v1054_v22, 16  ;;  %v2993_v33 = vsel %vm10748_vm12, %v2988_v19, %v2992_v14  ;;  %vm11266_vm15 = vmor %vm2083_vm13, %vm2084_vm14 }
  0xa1   : > { %v3004_v32 = vshll.u32 %v2863_v25, 16  ;;  %v3008_v34 = vshrl.u32 %v2863_v25, 16  ;;  %v696_v31 = vor.u32 %v694_v10, %v10904_v27  ;;  %v697_v37 = vrot.slane %v10904_v27, 4  ;;  %v1053_v44 = vld [vmem:[#allocation2 + $0x3c] sm:$0xf] }
  0xa2   : > { %v8963_v38 = vcombine.low %v2983_v18, %v2993_v33  ;;  %v1214_v40 = vsel %vm10748_vm12, %v1209_v62, %v1213_v2  ;;  %v1227_v41 = vrot.slane %v1225_v30, 5  ;;  %v1231_v43 = vrot.slane %v1229_v11, 4  ;;  %v2862_v45 = vld [vmem:[#allocation2 + $0x3c] sm:$0xf] }
  0xa3   : > { %v8817_v51 = vcombine.low %v1204_v20, %v1214_v40  ;;  %v3006_v46 = vrot.slane %v3004_v32, 5  ;;  %v3010_v47 = vrot.slane %v3008_v34, 4  ;;  %v967_v48 = vsel %vm10735_vm10, %v696_v31, %v966_v28  ;;  %v1081_v53 = vld [vmem:[#allocation2 + $0x44] sm:$0x1] }
  0xa4   : > { %9689 = vmatmul.mubr.msk.bf16.gmra.mrb[4].mxu0 %vm1529_vm8, %v8963_v38  ;;  %v1216_v55 = vshrl.u32 %v1053_v44, 16  ;;  %v1219_v56 = vshll.u32 %v1053_v44, 16  ;;  %v1232_v57 = vor.u32 %v1231_v43, %v1227_v41  ;;  %v2864_v59 = vld [vmem:[#allocation2 + $0x44] sm:$0x1]  ;;  %968 = vst [vmem:[#allocation2 + $0x48] sm:$0xf] %v967_v48 }
  0xa5   : > { %9556 = vmatprep.mubr.msk.bf16.mxu1 %vm1529_vm8, %v8817_v51  ;;  %v1235_v61 = vshll.u32 %v1081_v53, 16  ;;  %v2995_v63 = vshrl.u32 %v2862_v45, 16  ;;  %v2998_v0 = vshll.u32 %v2862_v45, 16  ;;  %v3011_v3 = vor.u32 %v3010_v47, %v3006_v46  ;;  %v584_v38 = vld [vmem:[%s10721_s28 + $0x38] sm:$0xf] }
  0xa6   : > { %v1218_v54 = vrot.slane %v1216_v55, 4  ;;  %v1221_v14 = vrot.slane %v1219_v56, 5  ;;  %v1233_v4 = vrot.slane %v1232_v57, 4  ;;  %v3014_v6 = vshll.u32 %v2864_v59, 16  ;;  %v585_v44 = vld [vmem:[%s10721_s28 + $0x3c] sm:$0xf] }
  0xa7   : > { %v1237_v13 = vrot.slane %v1235_v61, 5  ;;  %v2997_v7 = vrot.slane %v2995_v63, 4  ;;  %v3000_v8 = vrot.slane %v2998_v0, 5  ;;  %v3012_v2 = vrot.slane %v3011_v3, 4  ;;  %v977_v57 = vld [vmem:[#allocation2 + $0x5c] sm:$0x1] }
  0xa8   : > { %v1222_v9 = vor.u32 %v1221_v14, %v1218_v54  ;;  %v3016_v10 = vrot.slane %v3014_v6, 5  ;;  %v701_v18 = vrot.slane %v699_v17, 7  ;;  %v708_v19 = vshrl.u32 %v582_v52, 16  ;;  %v973_v17 = vld [vmem:[#allocation2 + $0x54] sm:$0xf] }
  0xa9   : > { %v3001_v20 = vor.u32 %v3000_v8, %v2997_v7  ;;  %v711_v22 = vshll.u32 %v582_v52, 16  ;;  %v716_v25 = vshrl.u32 %v10917_v60, 16  ;;  %v1238_v62 = vsel %vm10748_vm12, %v1233_v4, %v1237_v13 }
  0xaa   : > { %v1223_v27 = vrot.slane %v1222_v9, 4  ;;  %v704_v30 = vor.u32 %v702_v1, %v701_v18  ;;  %v706_v11 = vrot.slane %v701_v18, 4  ;;  %v3017_v28 = vsel %vm10748_vm12, %v3012_v2, %v3016_v10  ;;  %v1075_v10 = vld [vmem:[%s14885_s2] sm:$0xf] }
  0xab   : > { %v3002_v32 = vrot.slane %v3001_v20, 4  ;;  %v2865_v33 = vld [vmem:[#allocation2 + $0x48] sm:$0xf]  ;;  %v710_v31 = vrot.slane %v708_v19, 7  ;;  %v718_v0 = vrot.slane %v716_v25, 7  ;;  %v719_v3 = vshll.u32 %v10917_v60, 16  ;;  %10165 = vmatprep.subr.msk.bf16.mxu1 %vm1578_vm0, %v1075_v10 }
  0xac   : > { %v1055_v34 = vld [vmem:[#allocation2 + $0x48] sm:$0xf]  ;;  %v1228_v40 = vsel %vm10748_vm12, %v1223_v27, %v1227_v41  ;;  %v705_v43 = vsel %vm10728_vm9, %v697_v37, %v704_v30  ;;  %v971_v1 = vsel %vm10741_vm11, %v706_v11, %v970_v12  ;;  %v3019_v51 = vshrl.u32 %v2865_v33, 16  ;;  %v10937_v37 = vld [vmem:[%s10721_s28 + $0x40] sm:$0xf] }
  0xad   : > { %v8818_v45 = vcombine.low %v1228_v40, %v1238_v62  ;;  %v3007_v47 = vsel %vm10748_vm12, %v3002_v32, %v3006_v46  ;;  %969 = vst.msk [vmem:[#allocation2 + $0x4c] sm:$0xf] %vm514_vm1, %v705_v43  ;;  %972 = vst [vmem:[#allocation2 + $0x50] sm:$0x1] %v971_v1  ;;  %v3022_v48 = vshll.u32 %v2865_v33, 16  ;;  %v1240_v52 = vshrl.u32 %v1055_v34, 16 }
  0xae   : > { %v8964_v53 = vcombine.low %v3007_v47, %v3017_v28  ;;  %v3021_v41 = vrot.slane %v3019_v51, 4  ;;  %v1243_v55 = vshll.u32 %v1055_v34, 16  ;;  %v713_v56 = vor.u32 %v711_v22, %v710_v31  ;;  %v9041_v22 = vld [vmem:[%s14885_s2 + $0x18] sm:$0xf] }
  0xaf   : > { %9557 = vmatmul.mubr.msk.bf16.gmra.mrb[8].mxu1 %vm1529_vm8, %v8818_v45  ;;  %v3024_v59 = vrot.slane %v3022_v48, 5  ;;  %v1242_v61 = vrot.slane %v1240_v52, 4  ;;  %v714_v63 = vrot.slane %v710_v31, 4  ;;  %v725_v14 = vshrl.u32 %v584_v38, 16  ;;  %10170 = vmatprep.subr.msk.bf16.mxu0 %vm1578_vm0, %v9041_v22  ;;  %v980_v48 = vld [vmem:[#allocation2 + $0x60] sm:$0xf] }
  0xb0   : > { %9692 = vmatprep.mubr.msk.bf16.mxu0 %vm1529_vm8, %v8964_v53  ;;  %v1245_v46 = vrot.slane %v1243_v55, 5  ;;  %v974_v54 = vsel %vm10735_vm10, %v713_v56, %v973_v17  ;;  %v723_v6 = vrot.slane %v718_v0, 4  ;;  %v728_v13 = vshll.u32 %v584_v38, 16  ;;  %v984_v52 = vld [vmem:[#allocation2 + $0x68] sm:$0x1] }
  0xb1   : > { %v3025_v4 = vor.u32 %v3024_v59, %v3021_v41  ;;  %975 = vst [vmem:[#allocation2 + $0x54] sm:$0xf] %v974_v54  ;;  %v733_v7 = vshrl.u32 %v585_v44, 16  ;;  %v721_v2 = vor.u32 %v719_v3, %v718_v0  ;;  %v727_v12 = vrot.slane %v725_v14, 7 }
  0xb2   : > { %v1246_v8 = vor.u32 %v1245_v46, %v1242_v61  ;;  %v736_v9 = vshll.u32 %v585_v44, 16  ;;  %v978_v60 = vsel %vm10741_vm11, %v723_v6, %v977_v57  ;;  %v742_v20 = vshrl.u32 %v10937_v37, 16 }
  0xb3   : > { %v10947_v18 = vrot.slane %v3025_v4, 4  ;;  %v735_v19 = vrot.slane %v733_v7, 7  ;;  %v722_v30 = vsel %vm10728_vm9, %v714_v63, %v721_v2  ;;  %979 = vst [vmem:[#allocation2 + $0x5c] sm:$0x1] %v978_v60  ;;  %v730_v11 = vor.u32 %v728_v13, %v727_v12 }
  0xb4   : > { %v2866_v25 = vld [vmem:[#allocation2 + $0x4c] sm:$0xf]  ;;  %v2867_v27 = vld [vmem:[#allocation2 + $0x50] sm:$0x1]  ;;  %v8846_v32 = vcombine.low %v10790_v15, %v10792_v16  ;;  %v1247_v17 = vrot.slane %v1246_v8, 4  ;;  %v731_v1 = vrot.slane %v727_v12, 4 }
  0xb5   : > { %v1056_v62 = vld [vmem:[#allocation2 + $0x4c] sm:$0xf]  ;;  %v3028_v28 = vshll.u32 %v2866_v25, 16  ;;  %v3032_v33 = vshrl.u32 %v2866_v25, 16  ;;  %v3038_v34 = vshll.u32 %v2867_v27, 16  ;;  %v738_v47 = vor.u32 %v736_v9, %v735_v19 }
  0xb6   : > { %v1082_v31 = vld [vmem:[#allocation2 + $0x50] sm:$0x1]  ;;  %976 = vst.msk [vmem:[#allocation2 + $0x58] sm:$0xf] %vm514_vm1, %v722_v30  ;;  %v1249_v38 = vshll.u32 %v1056_v62, 16  ;;  %v1253_v40 = vshrl.u32 %v1056_v62, 16 }
  0xb7   : > { %v1259_v43 = vshll.u32 %v1082_v31, 16  ;;  %v3030_v51 = vrot.slane %v3028_v28, 5  ;;  %v3034_v44 = vrot.slane %v3032_v33, 4  ;;  %v3040_v45 = vrot.slane %v3038_v34, 5  ;;  %v10300_v15 = vld [vmem:[#allocation2 + $0x44] sm:$0x1] }
  0xb8   : > { %v1251_v53 = vrot.slane %v1249_v38, 5  ;;  %v1255_v41 = vrot.slane %v1253_v40, 4  ;;  %v1057_v56 = vld [vmem:[#allocation2 + $0x54] sm:$0xf]  ;;  %v740_v57 = vrot.slane %v735_v19, 4  ;;  %v739_v2 = vsel %vm10728_vm9, %v731_v1, %v738_v47 }
  0xb9   : > { %v1261_v55 = vrot.slane %v1259_v43, 5  ;;  %v3031_v59 = vsel %vm10748_vm12, %v10947_v18, %v3030_v51  ;;  %v3035_v61 = vor.u32 %v3034_v44, %v3030_v51  ;;  %v1264_v63 = vshrl.u32 %v1057_v56, 16  ;;  %v2868_v46 = vld [vmem:[#allocation2 + $0x54] sm:$0xf]  ;;  %983 = vst.msk [vmem:[#allocation2 + $0x64] sm:$0xf] %vm514_vm1, %v739_v2 }
  0xba   : > { %v1267_v0 = vshll.u32 %v1057_v56, 16  ;;  %v1252_v3 = vsel %vm10748_vm12, %v1247_v17, %v1251_v53  ;;  %v1256_v54 = vor.u32 %v1255_v41, %v1251_v53  ;;  %v3043_v14 = vshrl.u32 %v2868_v46, 16  ;;  %v1083_v13 = vld [vmem:[#allocation2 + $0x5c] sm:$0x1] }
  0xbb   : > { %v3046_v4 = vshll.u32 %v2868_v46, 16  ;;  %v3036_v6 = vrot.slane %v3035_v61, 4  ;;  %v1266_v7 = vrot.slane %v1264_v63, 4  ;;  %v1283_v10 = vshll.u32 %v1083_v13, 16  ;;  %v2870_v30 = vld [vmem:[#allocation2 + $0x5c] sm:$0x1] }
  0xbc   : > { %v1269_v8 = vrot.slane %v1267_v0, 5  ;;  %v1257_v12 = vrot.slane %v1256_v54, 4  ;;  %v981_v18 = vsel %vm10735_vm10, %v730_v11, %v980_v48  ;;  %v985_v60 = vsel %vm10741_vm11, %v740_v57, %v984_v52 }
  0xbd   : > { %v1058_v9 = vld [vmem:[#allocation2 + $0x58] sm:$0xf]  ;;  %v3041_v19 = vsel %vm10748_vm12, %v3036_v6, %v3040_v45  ;;  %982 = vst [vmem:[#allocation2 + $0x60] sm:$0xf] %v981_v18  ;;  %986 = vst [vmem:[#allocation2 + $0x68] sm:$0x1] %v985_v60 }
  0xbe   : > { %v1270_v22 = vor.u32 %v1269_v8, %v1266_v7  ;;  %v1273_v25 = vshll.u32 %v1058_v9, 16  ;;  %v1277_v27 = vshrl.u32 %v1058_v9, 16  ;;  %v2869_v62 = vld [vmem:[#allocation2 + $0x58] sm:$0xf]  ;;  %v8965_v28 = vcombine.low %v3031_v59, %v3041_v19  ;;  %v587_v18 = vld [vmem:[%s10721_s28 + $0x44] sm:$0xf] }
  0xbf   : > { %v1262_v33 = vsel %vm10748_vm12, %v1257_v12, %v1261_v55  ;;  %v1285_v11 = vrot.slane %v1283_v10, 5  ;;  %v3045_v34 = vrot.slane %v3043_v14, 4  ;;  %v3048_v43 = vrot.slane %v3046_v4, 5 }
  0xc0   : > { %v8819_v31 = vcombine.low %v1252_v3, %v1262_v33  ;;  %v1271_v17 = vrot.slane %v1270_v22, 4  ;;  %v1275_v38 = vrot.slane %v1273_v25, 5  ;;  %v1279_v40 = vrot.slane %v1277_v27, 4  ;;  %9693 = vmatmul.mubr.msk.bf16.gmra.mrb[8].mxu0 %vm1529_vm8, %v8965_v28  ;;  %v2872_v59 = vld [vmem:[#allocation2 + $0x64] sm:$0xf] }
  0xc1   : > { %v3052_v1 = vshll.u32 %v2869_v62, 16  ;;  %v3056_v51 = vshrl.u32 %v2869_v62, 16  ;;  %v3062_v44 = vshll.u32 %v2870_v30, 16  ;;  %v10982_v47 = vrot.slane %v742_v20, 7  ;;  %v1060_v61 = vld [vmem:[#allocation2 + $0x64] sm:$0xf] }
  0xc2   : > { %9560 = vmatprep.mubr.msk.bf16.mxu1 %vm1529_vm8, %v8819_v31  ;;  %v1280_v45 = vor.u32 %v1279_v40, %v1275_v38  ;;  %v745_v48 = vshll.u32 %v10937_v37, 16  ;;  %v3049_v52 = vor.u32 %v3048_v43, %v3045_v34  ;;  %v1276_v56 = vsel %vm10748_vm12, %v1271_v17, %v1275_v38  ;;  %v987_v27 = vld [vmem:[#allocation2 + $0x6c] sm:$0xf] }
  0xc3   : > { %v3054_v53 = vrot.slane %v3052_v1, 5  ;;  %v3058_v41 = vrot.slane %v3056_v51, 4  ;;  %v3064_v55 = vrot.slane %v3062_v44, 5  ;;  %v748_v63 = vrot.slane %v10982_v47, 4 }
  0xc4   : > { %v1281_v57 = vrot.slane %v1280_v45, 4  ;;  %v3050_v0 = vrot.slane %v3049_v52, 4  ;;  %v2871_v3 = vld [vmem:[#allocation2 + $0x60] sm:$0xf]  ;;  %v2873_v20 = vld [vmem:[#allocation2 + $0x68] sm:$0x1]  ;;  %v747_v37 = vor.u32 %v745_v48, %v10982_v47 }
  0xc5   : > { %v3059_v46 = vor.u32 %v3058_v41, %v3054_v53  ;;  %v3076_v54 = vshll.u32 %v2872_v59, 16  ;;  %v3067_v4 = vshrl.u32 %v2871_v3, 16  ;;  %v3070_v6 = vshll.u32 %v2871_v3, 16  ;;  %v1059_v7 = vld [vmem:[#allocation2 + $0x60] sm:$0xf] }
  0xc6   : > { %v1286_v14 = vsel %vm10748_vm12, %v1281_v57, %v1285_v11  ;;  %v3080_v13 = vshrl.u32 %v2872_v59, 16  ;;  %v3055_v2 = vsel %vm10748_vm12, %v3050_v0, %v3054_v53  ;;  %v1084_v10 = vld [vmem:[#allocation2 + $0x68] sm:$0x1]  ;;  %v3086_v25 = vshll.u32 %v2873_v20, 16  ;;  %v589_v57 = vld [vmem:[%s10721_s28 + $0x4c] sm:$0xf] }
  0xc7   : > { %v8820_v8 = vcombine.low %v1276_v56, %v1286_v14  ;;  %v3060_v12 = vrot.slane %v3059_v46, 4  ;;  %v3078_v9 = vrot.slane %v3076_v54, 5  ;;  %v3069_v60 = vrot.slane %v3067_v4, 4  ;;  %v588_v52 = vld [vmem:[%s10721_s28 + $0x48] sm:$0xf] }
  0xc8   : > { %v3072_v19 = vrot.slane %v3070_v6, 5  ;;  %v3082_v22 = vrot.slane %v3080_v13, 4  ;;  %v1288_v30 = vshrl.u32 %v1059_v7, 16  ;;  %v1291_v28 = vshll.u32 %v1059_v7, 16  ;;  %v991_v14 = vld [vmem:[#allocation2 + $0x74] sm:$0x1] }
  0xc9   : > { %9561 = vmatmul.mubr.msk.bf16.gmra.mrb[12].mxu1 %vm1529_vm8, %v8820_v8  ;;  %v3065_v62 = vsel %vm10748_vm12, %v3060_v12, %v3064_v55  ;;  %v1297_v33 = vshll.u32 %v1060_v61, 16  ;;  %v3088_v17 = vrot.slane %v3086_v25, 5  ;;  %v1301_v1 = vshrl.u32 %v1060_v61, 16  ;;  %v590_v6 = vld [vmem:[%s10721_s28 + $0x50] sm:$0xf] }
  0xca   : > { %v8966_v11 = vcombine.low %v3055_v2, %v3065_v62  ;;  %v3073_v34 = vor.u32 %v3072_v19, %v3069_v60  ;;  %v3083_v31 = vor.u32 %v3082_v22, %v3078_v9  ;;  %v1290_v38 = vrot.slane %v1288_v30, 4  ;;  %v994_v22 = vld [vmem:[#allocation2 + $0x78] sm:$0xf]  ;;  %v11017_v25 = vld [vmem:[%s10721_s28 + $0x54] sm:$0xf] }
  0xcb   : > { %v1293_v40 = vrot.slane %v1291_v28, 5  ;;  %v1299_v43 = vrot.slane %v1297_v33, 5  ;;  %v1307_v45 = vshll.u32 %v1084_v10, 16  ;;  %v750_v48 = vshrl.u32 %v587_v18, 16 }
  0xcc   : > { %9696 = vmatprep.mubr.msk.bf16.mxu0 %vm1529_vm8, %v8966_v11  ;;  %v3074_v51 = vrot.slane %v3073_v34, 4  ;;  %v3084_v44 = vrot.slane %v3083_v31, 4  ;;  %v1303_v41 = vrot.slane %v1301_v1, 4  ;;  %v753_v55 = vshll.u32 %v587_v18, 16  ;;  %v998_v34 = vld [vmem:[#allocation2 + $0x80] sm:$0x1] }
  0xcd   : > { %v1294_v53 = vor.u32 %v1293_v40, %v1290_v38  ;;  %v988_v56 = vsel %vm10735_vm10, %v747_v37, %v987_v27  ;;  %v1309_v0 = vrot.slane %v1307_v45, 5  ;;  %v752_v46 = vrot.slane %v750_v48, 7 }
  0xce   : > { %v3079_v59 = vsel %vm10748_vm12, %v3074_v51, %v3078_v9  ;;  %v3089_v61 = vsel %vm10748_vm12, %v3084_v44, %v3088_v17  ;;  %989 = vst [vmem:[#allocation2 + $0x6c] sm:$0xf] %v988_v56  ;;  %v1304_v54 = vor.u32 %v1303_v41, %v1299_v43  ;;  %v759_v4 = vshrl.u32 %v588_v52, 16  ;;  %v1001_v17 = vld [vmem:[#allocation2 + $0x84] sm:$0xf] }
  0xcf   : > { %v8967_v3 = vcombine.low %v3079_v59, %v3089_v61  ;;  %v1295_v20 = vrot.slane %v1294_v53, 4  ;;  %v755_v13 = vor.u32 %v753_v55, %v752_v46  ;;  %v757_v7 = vrot.slane %v752_v46, 4  ;;  %v11030_v53 = vld [vmem:[%s10721_s28 + $0x58] sm:$0xf] }
  0xd0   : > { %v762_v37 = vshll.u32 %v588_v52, 16  ;;  %v767_v8 = vshrl.u32 %v589_v57, 16  ;;  %v1305_v12 = vrot.slane %v1304_v54, 4  ;;  %v761_v9 = vrot.slane %v759_v4, 7 }
  0xd1   : > { %9697 = vmatmul.mubr.msk.bf16.gmra.mrb[12].mxu0 %vm1529_vm8, %v8967_v3  ;;  %v1300_v2 = vsel %vm10748_vm12, %v1295_v20, %v1299_v43  ;;  %v770_v10 = vshll.u32 %v589_v57, 16  ;;  %v756_v18 = vsel %vm10728_vm9, %v748_v63, %v755_v13  ;;  %v992_v60 = vsel %vm10741_vm11, %v757_v7, %v991_v14 }
  0xd2   : > { %v769_v19 = vrot.slane %v767_v8, 7  ;;  %v776_v27 = vshrl.u32 %v590_v6, 16  ;;  %v1310_v62 = vsel %vm10748_vm12, %v1305_v12, %v1309_v0  ;;  %990 = vst.msk [vmem:[#allocation2 + $0x70] sm:$0xf] %vm514_vm1, %v756_v18  ;;  %993 = vst [vmem:[#allocation2 + $0x74] sm:$0x1] %v992_v60  ;;  %v764_v30 = vor.u32 %v762_v37, %v761_v9 }
  0xd3   : > { %v765_v28 = vrot.slane %v761_v9, 4  ;;  %v779_v47 = vshll.u32 %v590_v6, 16  ;;  %v8821_v33 = vcombine.low %v1300_v2, %v1310_v62  ;;  %v784_v1 = vshrl.u32 %v11017_v25, 16 }
  0xd4   : > { %v772_v11 = vor.u32 %v770_v10, %v769_v19  ;;  %v774_v63 = vrot.slane %v769_v19, 4  ;;  %v11022_v31 = vrot.slane %v776_v27, 7  ;;  %v995_v43 = vsel %vm10735_vm10, %v764_v30, %v994_v22 }
  0xd5   : > { %v1061_v38 = vld [vmem:[#allocation2 + $0x6c] sm:$0xf]  ;;  %v787_v51 = vshll.u32 %v11017_v25, 16  ;;  %9564 = vmatprep.mubr.msk.bf16.mxu1 %vm1529_vm8, %v8821_v33  ;;  %996 = vst [vmem:[#allocation2 + $0x78] sm:$0xf] %v995_v43  ;;  %v11039_v3 = vrot.slane %v784_v1, 7 }
  0xd6   : > { %v2874_v40 = vld [vmem:[#allocation2 + $0x6c] sm:$0xf]  ;;  %v1312_v44 = vshrl.u32 %v1061_v38, 16  ;;  %v1315_v45 = vshll.u32 %v1061_v38, 16  ;;  %v773_v41 = vsel %vm10728_vm9, %v765_v28, %v772_v11  ;;  %v999_v55 = vsel %vm10741_vm11, %v774_v63, %v998_v34 }
  0xd7   : > { %v3091_v48 = vshrl.u32 %v2874_v40, 16  ;;  %v3094_v52 = vshll.u32 %v2874_v40, 16  ;;  %v781_v56 = vor.u32 %v779_v47, %v11022_v31  ;;  %v782_v57 = vrot.slane %v11022_v31, 4  ;;  %997 = vst.msk [vmem:[#allocation2 + $0x7c] sm:$0xf] %vm514_vm1, %v773_v41 }
  0xd8   : > { %v1314_v59 = vrot.slane %v1312_v44, 4  ;;  %v1317_v61 = vrot.slane %v1315_v45, 5  ;;  %1000 = vst [vmem:[#allocation2 + $0x80] sm:$0x1] %v999_v55  ;;  %v793_v54 = vshrl.u32 %v11030_v53, 16  ;;  %v796_v14 = vshll.u32 %v11030_v53, 16 }
  0xd9   : > { %v3093_v0 = vrot.slane %v3091_v48, 4  ;;  %v3096_v46 = vrot.slane %v3094_v52, 5  ;;  %v1002_v20 = vsel %vm10735_vm10, %v781_v56, %v1001_v17  ;;  %v1062_v4 = vld [vmem:[#allocation2 + $0x70] sm:$0xf]  ;;  %v1085_v6 = vld [vmem:[#allocation2 + $0x74] sm:$0x1]  ;;  %v789_v44 = vor.u32 %v787_v51, %v11039_v3 }
  0xda   : > { %v1318_v13 = vor.u32 %v1317_v61, %v1314_v59  ;;  %v2875_v7 = vld [vmem:[#allocation2 + $0x70] sm:$0xf]  ;;  %1003 = vst [vmem:[#allocation2 + $0x84] sm:$0xf] %v1002_v20  ;;  %v1321_v8 = vshll.u32 %v1062_v4, 16  ;;  %v1325_v2 = vshrl.u32 %v1062_v4, 16 }
  0xdb   : > { %v3097_v37 = vor.u32 %v3096_v46, %v3093_v0  ;;  %v1331_v12 = vshll.u32 %v1085_v6, 16  ;;  %v2876_v9 = vld [vmem:[#allocation2 + $0x74] sm:$0x1]  ;;  %v3100_v10 = vshll.u32 %v2875_v7, 16  ;;  %v3104_v19 = vshrl.u32 %v2875_v7, 16 }
  0xdc   : > { %v1319_v18 = vrot.slane %v1318_v13, 4  ;;  %v3110_v22 = vshll.u32 %v2876_v9, 16  ;;  %v1323_v25 = vrot.slane %v1321_v8, 5  ;;  %v1327_v27 = vrot.slane %v1325_v2, 4  ;;  %v2877_v28 = vld [vmem:[#allocation2 + $0x78] sm:$0xf] }
  0xdd   : > { %v3098_v60 = vrot.slane %v3097_v37, 4  ;;  %v1333_v62 = vrot.slane %v1331_v12, 5  ;;  %v3102_v30 = vrot.slane %v3100_v10, 5  ;;  %v3106_v47 = vrot.slane %v3104_v19, 4  ;;  %v1063_v34 = vld [vmem:[#allocation2 + $0x78] sm:$0xf] }
  0xde   : > { %v3112_v33 = vrot.slane %v3110_v22, 5  ;;  %v3115_v11 = vshrl.u32 %v2877_v28, 16  ;;  %v3118_v63 = vshll.u32 %v2877_v28, 16  ;;  %v1324_v17 = vsel %vm10748_vm12, %v1319_v18, %v1323_v25  ;;  %v2878_v43 = vld [vmem:[#allocation2 + $0x7c] sm:$0xf] }
  0xdf   : > { %v1328_v38 = vor.u32 %v1327_v27, %v1323_v25  ;;  %v3103_v40 = vsel %vm10748_vm12, %v3098_v60, %v3102_v30  ;;  %v2879_v1 = vld [vmem:[#allocation2 + $0x80] sm:$0x1]  ;;  %v3107_v45 = vor.u32 %v3106_v47, %v3102_v30  ;;  %v3124_v41 = vshll.u32 %v2878_v43, 16  ;;  %v1064_v61 = vld [vmem:[#allocation2 + $0x7c] sm:$0xf] }
  0xe0   : > { %v3117_v48 = vrot.slane %v3115_v11, 4  ;;  %v3120_v52 = vrot.slane %v3118_v63, 5  ;;  %v3128_v56 = vshrl.u32 %v2878_v43, 16  ;;  %v3134_v59 = vshll.u32 %v2879_v1, 16  ;;  %v1086_v6 = vld [vmem:[#allocation2 + $0x80] sm:$0x1] }
  0xe1   : > { %v1329_v55 = vrot.slane %v1328_v38, 4  ;;  %v1336_v0 = vshrl.u32 %v1063_v34, 16  ;;  %v3108_v46 = vrot.slane %v3107_v45, 4  ;;  %v3126_v4 = vrot.slane %v3124_v41, 5  ;;  %v1065_v2 = vld [vmem:[#allocation2 + $0x84] sm:$0xf] }
  0xe2   : > { %v3121_v20 = vor.u32 %v3120_v52, %v3117_v48  ;;  %v1339_v13 = vshll.u32 %v1063_v34, 16  ;;  %v3130_v37 = vrot.slane %v3128_v56, 4  ;;  %v3136_v8 = vrot.slane %v3134_v59, 5  ;;  %v1005_v60 = vld [vmem:[#allocation2 + $0x8c] sm:$0x1] }
  0xe3   : > { %v1334_v7 = vsel %vm10748_vm12, %v1329_v55, %v1333_v62  ;;  %v1338_v51 = vrot.slane %v1336_v0, 4  ;;  %v3113_v9 = vsel %vm10748_vm12, %v3108_v46, %v3112_v33  ;;  %v2880_v19 = vld [vmem:[#allocation2 + $0x84] sm:$0xf]  ;;  %v1345_v27 = vshll.u32 %v1064_v61, 16  ;;  %v593_v48 = vld [vmem:[%s10721_s28 + $0x5c] sm:$0xf] }
  0xe4   : > { %v8822_v12 = vcombine.low %v1324_v17, %v1334_v7  ;;  %v3122_v10 = vrot.slane %v3121_v20, 4  ;;  %v1341_v18 = vrot.slane %v1339_v13, 5  ;;  %v8968_v22 = vcombine.low %v3103_v40, %v3113_v9  ;;  %v11070_v52 = vld [vmem:[%s10721_s28 + $0x60] sm:$0xf]  ;;  %v10322_v42 = vld [vmem:[#allocation2 + $0x70] sm:$0xf] }
  0xe5   : > { %v3131_v25 = vor.u32 %v3130_v37, %v3126_v4  ;;  %v1349_v30 = vshrl.u32 %v1064_v61, 16  ;;  %v1355_v47 = vshll.u32 %v1086_v6, 16  ;;  %v790_v33 = vsel %vm10728_vm9, %v782_v57, %v789_v44 }
  0xe6   : > { %9565 = vmatmul.mubr.msk.bf16.gmra.mrb[16].mxu1 %vm1529_vm8, %v8822_v12  ;;  %v3127_v62 = vsel %vm10748_vm12, %v3122_v10, %v3126_v4  ;;  %v1342_v28 = vor.u32 %v1341_v18, %v1338_v51  ;;  %9700 = vmatprep.mubr.msk.bf16.mxu0 %vm1529_vm8, %v8968_v22  ;;  %v1347_v63 = vrot.slane %v1345_v27, 5  ;;  %v791_v17 = vrot.slane %v11039_v3, 4  ;;  %1004 = vst.msk [vmem:[#allocation2 + $0x88] sm:$0xf] %vm514_vm1, %v790_v33 }
  0xe7   : > { %v3132_v11 = vrot.slane %v3131_v25, 4  ;;  %v1351_v34 = vrot.slane %v1349_v30, 4  ;;  %v1357_v40 = vrot.slane %v1355_v47, 5  ;;  %v1360_v43 = vshrl.u32 %v1065_v2, 16 }
  0xe8   : > { %v1343_v38 = vrot.slane %v1342_v28, 4  ;;  %v1363_v1 = vshll.u32 %v1065_v2, 16  ;;  %v1006_v57 = vsel %vm10741_vm11, %v791_v17, %v1005_v60  ;;  %v3139_v44 = vshrl.u32 %v2880_v19, 16  ;;  %v1008_v2 = vld [vmem:[#allocation2 + $0x90] sm:$0xf] }
  0xe9   : > { %v3137_v31 = vsel %vm10748_vm12, %v3132_v11, %v3136_v8  ;;  %v1352_v45 = vor.u32 %v1351_v34, %v1347_v63  ;;  %1007 = vst [vmem:[#allocation2 + $0x8c] sm:$0x1] %v1006_v57  ;;  %v1362_v55 = vrot.slane %v1360_v43, 4  ;;  %v3142_v0 = vshll.u32 %v2880_v19, 16  ;;  %v596_v57 = vld [vmem:[%s10721_s28 + $0x68] sm:$0xf] }
  0xea   : > { %v8969_v41 = vcombine.low %v3127_v62, %v3137_v31  ;;  %v1348_v3 = vsel %vm10748_vm12, %v1343_v38, %v1347_v63  ;;  %v1365_v56 = vrot.slane %v1363_v1, 5  ;;  %v3141_v61 = vrot.slane %v3139_v44, 4  ;;  %v1012_v62 = vld [vmem:[#allocation2 + $0x98] sm:$0x1] }
  0xeb   : > { %v1353_v59 = vrot.slane %v1352_v45, 4  ;;  %v795_v46 = vrot.slane %v793_v54, 7  ;;  %v801_v4 = vshrl.u32 %v593_v48, 16  ;;  %v804_v6 = vshll.u32 %v593_v48, 16  ;;  %v595_v45 = vld [vmem:[%s10721_s28 + $0x64] sm:$0xf] }
  0xec   : > { %9701 = vmatmul.mubr.msk.bf16.gmra.mrb[16].mxu0 %vm1529_vm8, %v8969_v41  ;;  %v1366_v20 = vor.u32 %v1365_v56, %v1362_v55  ;;  %v810_v13 = vshrl.u32 %v11070_v52, 16  ;;  %v3144_v37 = vrot.slane %v3142_v0, 5  ;;  %v3673_v16 = vrot.slane %v10300_v15, 5  ;;  %v11384_v15 = vld [vmem:[#allocation2 + $0x4c] sm:$0xf] }
  0xed   : > { %v1358_v7 = vsel %vm10748_vm12, %v1353_v59, %v1357_v40  ;;  %v798_v8 = vor.u32 %v796_v14, %v795_v46  ;;  %v799_v51 = vrot.slane %v795_v46, 4  ;;  %v11082_v9 = vld [vmem:[#allocation2 + $0x88] sm:$0xf]  ;;  %v803_v18 = vrot.slane %v801_v4, 7 }
  0xee   : > { %v8823_v12 = vcombine.low %v1348_v3, %v1358_v7  ;;  %v1367_v54 = vrot.slane %v1366_v20, 4  ;;  %v11084_v10 = vld [vmem:[#allocation2 + $0x88] sm:$0xf]  ;;  %v1369_v60 = vshll.u32 %v11082_v9, 16  ;;  %v1373_v19 = vshrl.u32 %v11082_v9, 16 }
  0xef   : > { %v3145_v22 = vor.u32 %v3144_v37, %v3141_v61  ;;  %v3148_v25 = vshll.u32 %v11084_v10, 16  ;;  %v3152_v53 = vshrl.u32 %v11084_v10, 16  ;;  %v806_v14 = vor.u32 %v804_v6, %v803_v18 }
  0xf0   : > { %9568 = vmatprep.mubr.msk.bf16.mxu1 %vm1529_vm8, %v8823_v12  ;;  %v808_v27 = vrot.slane %v803_v18, 4  ;;  %v1009_v30 = vsel %vm10735_vm10, %v798_v8, %v1008_v2  ;;  %v1087_v28 = vld [vmem:[#allocation2 + $0x8c] sm:$0x1]  ;;  %v1371_v47 = vrot.slane %v1369_v60, 5  ;;  %v1375_v33 = vrot.slane %v1373_v19, 4 }
  0xf1   : > { %v11093_v11 = vld [vmem:[#allocation2 + $0x8c] sm:$0x1]  ;;  %1010 = vst [vmem:[#allocation2 + $0x90] sm:$0xf] %v1009_v30  ;;  %v1379_v63 = vshll.u32 %v1087_v28, 16  ;;  %v3146_v34 = vrot.slane %v3145_v22, 4  ;;  %v807_v31 = vsel %vm10728_vm9, %v799_v51, %v806_v14 }
  0xf2   : > { %v3150_v17 = vrot.slane %v3148_v25, 5  ;;  %v3154_v38 = vrot.slane %v3152_v53, 4  ;;  %v1372_v40 = vsel %vm10748_vm12, %v1367_v54, %v1371_v47  ;;  %v1376_v43 = vor.u32 %v1375_v33, %v1371_v47  ;;  %1011 = vst.msk [vmem:[#allocation2 + $0x94] sm:$0xf] %vm514_vm1, %v807_v31  ;;  %v1015_v8 = vld [vmem:[#allocation2 + $0x9c] sm:$0xf] }
  0xf3   : > { %v3158_v1 = vshll.u32 %v11093_v11, 16  ;;  %v1381_v44 = vrot.slane %v1379_v63, 5  ;;  %v1013_v3 = vsel %vm10741_vm11, %v808_v27, %v1012_v62  ;;  %v812_v59 = vrot.slane %v810_v13, 7  ;;  %v1019_v53 = vld [vmem:[#allocation2 + $0xa4] sm:$0x1] }
  0xf4   : > { %v3151_v48 = vsel %vm10748_vm12, %v3146_v34, %v3150_v17  ;;  %v3155_v41 = vor.u32 %v3154_v38, %v3150_v17  ;;  %v1377_v55 = vrot.slane %v1376_v43, 4  ;;  %1014 = vst [vmem:[#allocation2 + $0x98] sm:$0x1] %v1013_v3  ;;  %v813_v61 = vshll.u32 %v11070_v52, 16 }
  0xf5   : > { %v3160_v56 = vrot.slane %v3158_v1, 5  ;;  %v818_v46 = vshrl.u32 %v595_v45, 16  ;;  %v821_v20 = vshll.u32 %v595_v45, 16  ;;  %v827_v4 = vshrl.u32 %v596_v57, 16 }
  0xf6   : > { %v3156_v0 = vrot.slane %v3155_v41, 4  ;;  %v1382_v6 = vsel %vm10748_vm12, %v1377_v55, %v1381_v44  ;;  %v815_v7 = vor.u32 %v813_v61, %v812_v59  ;;  %v816_v37 = vrot.slane %v812_v59, 4  ;;  %v11140_v59 = vld [vmem:[%s10721_s28 + $0x6c] sm:$0xf] }
  0xf7   : > { %v830_v51 = vshll.u32 %v596_v57, 16  ;;  %v8824_v2 = vcombine.low %v1372_v40, %v1382_v6  ;;  %v820_v13 = vrot.slane %v818_v46, 7  ;;  %v11114_v52 = vrot.slane %v827_v4, 7 }
  0xf8   : > { %v3161_v12 = vsel %vm10748_vm12, %v3156_v0, %v3160_v56  ;;  %v2883_v54 = vld [vmem:[#allocation2 + $0x90] sm:$0xf]  ;;  %v1016_v62 = vsel %vm10735_vm10, %v815_v7, %v1015_v8  ;;  %vm6018_vm2 = vcmask 261120   ;;  %vm6159_vm3 = vcmask 1040384  }
  0xf9   : > { %v11112_v18 = vld [vmem:[#allocation2 + $0x90] sm:$0xf]  ;;  %v8970_v60 = vcombine.low %v3151_v48, %v3161_v12  ;;  %v3163_v19 = vshrl.u32 %v2883_v54, 16  ;;  %v3166_v22 = vshll.u32 %v2883_v54, 16  ;;  %9569 = vmatmul.mubr.msk.bf16.gmra.mrb[20].mxu1 %vm1529_vm8, %v8824_v2  ;;  %v823_v27 = vor.u32 %v821_v20, %v820_v13  ;;  %v11122_v28 = vld [vmem:[#allocation2 + $0x94] sm:$0xf] }
  0xfa   : > { %v1384_v25 = vshrl.u32 %v11112_v18, 16  ;;  %v1387_v14 = vshll.u32 %v11112_v18, 16  ;;  %v825_v30 = vrot.slane %v820_v13, 4  ;;  %v11124_v63 = vld [vmem:[#allocation2 + $0x94] sm:$0xf]  ;;  %v832_v34 = vor.u32 %v830_v51, %v11114_v52 }
  0xfb   : > { %9704 = vmatprep.mubr.msk.bf16.mxu0 %vm1529_vm8, %v8970_v60  ;;  %v3165_v47 = vrot.slane %v3163_v19, 4  ;;  %v3168_v33 = vrot.slane %v3166_v22, 5  ;;  %1017 = vst [vmem:[#allocation2 + $0x9c] sm:$0xf] %v1016_v62  ;;  %v11127_v17 = vld [vmem:[#allocation2 + $0x98] sm:$0x1]  ;;  %v824_v1 = vsel %vm10728_vm9, %v816_v37, %v823_v27 }
  0xfc   : > { %v3172_v38 = vshll.u32 %v11122_v28, 16  ;;  %v3176_v40 = vshrl.u32 %v11122_v28, 16  ;;  %v1088_v43 = vld [vmem:[#allocation2 + $0x98] sm:$0x1]  ;;  %v1020_v31 = vsel %vm10741_vm11, %v825_v30, %v1019_v53  ;;  %v3182_v57 = vshll.u32 %v11127_v17, 16 }
  0xfd   : > { %v3169_v45 = vor.u32 %v3168_v33, %v3165_v47  ;;  %v1386_v44 = vrot.slane %v1384_v25, 4  ;;  %v1389_v48 = vrot.slane %v1387_v14, 5  ;;  %1018 = vst.msk [vmem:[#allocation2 + $0xa0] sm:$0xf] %vm514_vm1, %v824_v1  ;;  %1021 = vst [vmem:[#allocation2 + $0xa4] sm:$0x1] %v1020_v31 }
  0xfe   : > { %v3174_v41 = vrot.slane %v3172_v38, 5  ;;  %v3178_v3 = vrot.slane %v3176_v40, 4  ;;  %v1393_v55 = vshll.u32 %v11124_v63, 16  ;;  %v1397_v56 = vshrl.u32 %v11124_v63, 16  ;;  %v1022_v20 = vld [vmem:[#allocation2 + $0xa8] sm:$0xf] }
  0xff   : > { %v3170_v61 = vrot.slane %v3169_v45, 4  ;;  %v1390_v0 = vor.u32 %v1389_v48, %v1386_v44  ;;  %v1403_v46 = vshll.u32 %v1088_v43, 16  ;;  %v3184_v6 = vrot.slane %v3182_v57, 5 }
 0x100   : > { %v3179_v4 = vor.u32 %v3178_v3, %v3174_v41  ;;  %v1395_v7 = vrot.slane %v1393_v55, 5  ;;  %v1399_v37 = vrot.slane %v1397_v56, 4  ;;  %v833_v12 = vrot.slane %v11114_v52, 4 }
 0x101   : > { %v3175_v8 = vsel %vm10748_vm12, %v3170_v61, %v3174_v41  ;;  %v1391_v51 = vrot.slane %v1390_v0, 4  ;;  %v1405_v2 = vrot.slane %v1403_v46, 5  ;;  %v835_v22 = vshrl.u32 %v11140_v59, 16 }
 0x102   : > { %v3180_v54 = vrot.slane %v3179_v4, 4  ;;  %v1400_v13 = vor.u32 %v1399_v37, %v1395_v7  ;;  %v11145_v60 = vld [vmem:[#allocation2 + $0x9c] sm:$0xf]  ;;  %v1023_v25 = vsel %vm10735_vm10, %v832_v34, %v1022_v20  ;;  %v838_v30 = vshll.u32 %v11140_v59, 16 }
 0x103   : > { %v2886_v19 = vld [vmem:[#allocation2 + $0x9c] sm:$0xf]  ;;  %v1408_v53 = vshrl.u32 %v11145_v60, 16  ;;  %v1411_v14 = vshll.u32 %v11145_v60, 16  ;;  %1024 = vst [vmem:[#allocation2 + $0xa8] sm:$0xf] %v1023_v25  ;;  %v1396_v62 = vsel %vm10748_vm12, %v1391_v51, %v1395_v7 }
 0x104   : > { %v3187_v27 = vshrl.u32 %v2886_v19, 16  ;;  %v3185_v52 = vsel %vm10748_vm12, %v3180_v54, %v3184_v6  ;;  %v1401_v47 = vrot.slane %v1400_v13, 4  ;;  %v11157_v33 = vld [vmem:[#allocation2 + $0xa0] sm:$0xf]  ;;  %v1089_v38 = vld [vmem:[#allocation2 + $0xa4] sm:$0x1] }
 0x105   : > { %v3190_v40 = vshll.u32 %v2886_v19, 16  ;;  %v8971_v34 = vcombine.low %v3175_v8, %v3185_v52  ;;  %v1410_v43 = vrot.slane %v1408_v53, 4  ;;  %v1413_v1 = vrot.slane %v1411_v14, 5  ;;  %v11160_v45 = vld [vmem:[#allocation2 + $0xa0] sm:$0xf] }
 0x106   : > { %v1417_v31 = vshll.u32 %v11157_v33, 16  ;;  %v1406_v57 = vsel %vm10748_vm12, %v1401_v47, %v1405_v2  ;;  %v1421_v44 = vshrl.u32 %v11157_v33, 16  ;;  %v1427_v48 = vshll.u32 %v1089_v38, 16  ;;  %v11165_v41 = vld [vmem:[#allocation2 + $0xa4] sm:$0x1] }
 0x107   : > { %v3189_v3 = vrot.slane %v3187_v27, 4  ;;  %9705 = vmatmul.mubr.msk.bf16.gmra.mrb[20].mxu0 %vm1529_vm8, %v8971_v34  ;;  %v8825_v55 = vcombine.low %v1396_v62, %v1406_v57  ;;  %v1414_v56 = vor.u32 %v1413_v1, %v1410_v43  ;;  %v3192_v61 = vrot.slane %v3190_v40, 5  ;;  %v1026_v52 = vld [vmem:[#allocation2 + $0xb0] sm:$0x1]  ;;  %v599_v34 = vld [vmem:[%s10721_s28 + $0x74] sm:$0xf] }
 0x108   : > { %v1419_v59 = vrot.slane %v1417_v31, 5  ;;  %v1423_v0 = vrot.slane %v1421_v44, 4  ;;  %v1429_v46 = vrot.slane %v1427_v48, 5  ;;  %v3196_v20 = vshll.u32 %v11160_v45, 16  ;;  %v598_v62 = vld [vmem:[%s10721_s28 + $0x70] sm:$0xf] }
 0x109   : > { %v3200_v4 = vshrl.u32 %v11160_v45, 16  ;;  %9572 = vmatprep.mubr.msk.bf16.mxu1 %vm1529_vm8, %v8825_v55  ;;  %v1415_v6 = vrot.slane %v1414_v56, 4  ;;  %v3193_v7 = vor.u32 %v3192_v61, %v3189_v3  ;;  %v3206_v37 = vshll.u32 %v11165_v41, 16  ;;  %v600_v44 = vld [vmem:[%s10721_s28 + $0x78] sm:$0xf] }
 0x10a   : > { %v837_v8 = vrot.slane %v835_v22, 7  ;;  %v1424_v51 = vor.u32 %v1423_v0, %v1419_v59  ;;  %v3198_v2 = vrot.slane %v3196_v20, 5  ;;  %v2889_v13 = vld [vmem:[#allocation2 + $0xa8] sm:$0xf]  ;;  %v844_v20 = vshrl.u32 %v598_v62, 16 }
 0x10b   : > { %v3202_v54 = vrot.slane %v3200_v4, 4  ;;  %v11172_v19 = vld [vmem:[#allocation2 + $0xa8] sm:$0xf]  ;;  %v1420_v25 = vsel %vm10748_vm12, %v1415_v6, %v1419_v59  ;;  %v3194_v53 = vrot.slane %v3193_v7, 4  ;;  %v3208_v14 = vrot.slane %v3206_v37, 5 }
 0x10c   : > { %v840_v27 = vor.u32 %v838_v30, %v837_v8  ;;  %v1425_v47 = vrot.slane %v1424_v51, 4  ;;  %v842_v40 = vrot.slane %v837_v8, 4  ;;  %v3211_v22 = vshrl.u32 %v2889_v13, 16 }
 0x10d   : > { %v3203_v38 = vor.u32 %v3202_v54, %v3198_v2  ;;  %v3199_v43 = vsel %vm10748_vm12, %v3194_v53, %v3198_v2  ;;  %v3214_v31 = vshll.u32 %v2889_v13, 16  ;;  %v1432_v57 = vshrl.u32 %v11172_v19, 16 }
 0x10e   : > { %v841_v1 = vsel %vm10728_vm9, %v833_v12, %v840_v27  ;;  %v1430_v30 = vsel %vm10748_vm12, %v1425_v47, %v1429_v46  ;;  %v1027_v3 = vsel %vm10741_vm11, %v842_v40, %v1026_v52  ;;  %v3213_v55 = vrot.slane %v3211_v22, 4  ;;  %v601_v46 = vld [vmem:[%s10721_s28 + $0x7c] sm:$0xf]  ;;  %s14748_s28 = smov 127  }
 0x10f   : > { %v3204_v48 = vrot.slane %v3203_v38, 4  ;;  %1025 = vst.msk [vmem:[#allocation2 + $0xac] sm:$0xf] %vm514_vm1, %v841_v1  ;;  %v8826_v56 = vcombine.low %v1420_v25, %v1430_v30  ;;  %1028 = vst [vmem:[#allocation2 + $0xb0] sm:$0x1] %v1027_v3  ;;  %v3216_v59 = vrot.slane %v3214_v31, 5 }
 0x110   : > { %v1434_v61 = vrot.slane %v1432_v57, 4  ;;  %v1435_v12 = vshll.u32 %v11172_v19, 16  ;;  %v847_v4 = vshll.u32 %v598_v62, 16  ;;  %v852_v6 = vshrl.u32 %v599_v34, 16 }
 0x111   : > { %v3209_v0 = vsel %vm10748_vm12, %v3204_v48, %v3208_v14  ;;  %9573 = vmatmul.mubr.msk.bf16.gmra.mrb[24].mxu1 %vm1529_vm8, %v8826_v56  ;;  %v3217_v37 = vor.u32 %v3216_v59, %v3213_v55  ;;  %v855_v51 = vshll.u32 %v599_v34, 16  ;;  %v846_v2 = vrot.slane %v844_v20, 7  ;;  %v1029_v14 = vld [vmem:[#allocation2 + $0xb4] sm:$0xf] }
 0x112   : > { %v8972_v7 = vcombine.low %v3199_v43, %v3209_v0  ;;  %v1437_v8 = vrot.slane %v1435_v12, 5  ;;  %v854_v54 = vrot.slane %v852_v6, 7  ;;  %v861_v13 = vshrl.u32 %v600_v44, 16  ;;  %v1033_v43 = vld [vmem:[#allocation2 + $0xbc] sm:$0x1] }
 0x113   : > { %v864_v25 = vshll.u32 %v600_v44, 16  ;;  %v11195_v53 = vrot.slane %v3217_v37, 4  ;;  %v869_v52 = vshrl.u32 %v601_v46, 16  ;;  %v872_v62 = vshll.u32 %v601_v46, 16 }
 0x114   : > { %9708 = vmatprep.mubr.msk.bf16.mxu0 %vm1529_vm8, %v8972_v7  ;;  %v1438_v27 = vor.u32 %v1437_v8, %v1434_v61  ;;  %v849_v47 = vor.u32 %v847_v4, %v846_v2  ;;  %v850_v38 = vrot.slane %v846_v2, 4  ;;  %v857_v40 = vor.u32 %v855_v51, %v854_v54  ;;  %v1036_v7 = vld [vmem:[#allocation2 + $0xc0] sm:$0xf] }
 0x115   : > { %v859_v22 = vrot.slane %v854_v54, 4  ;;  %v863_v57 = vrot.slane %v861_v13, 7  ;;  %vm6254_vm4 = vcmask 15360   ;;  %vm6603_vm5 = vcmask 179200  }
 0x116   : > { %v11197_v1 = vld [vmem:[#allocation2 + $0xac] sm:$0xf]  ;;  %v11201_v31 = vrot.slane %v1438_v27, 4  ;;  %v11203_v44 = vld [vmem:[#allocation2 + $0xb0] sm:$0x1]  ;;  %v858_v55 = vsel %vm10728_vm9, %v850_v38, %v857_v40  ;;  %v1030_v56 = vsel %vm10735_vm10, %v849_v47, %v1029_v14  ;;  %v871_v14 = vrot.slane %v869_v52, 7 }
 0x117   : > { %v11199_v34 = vld [vmem:[#allocation2 + $0xac] sm:$0xf]  ;;  %v3220_v30 = vshll.u32 %v11197_v1, 16  ;;  %v3224_v48 = vshrl.u32 %v11197_v1, 16  ;;  %v11207_v3 = vld [vmem:[#allocation2 + $0xb0] sm:$0x1]  ;;  %v1034_v6 = vsel %vm10741_vm11, %v859_v22, %v1033_v43  ;;  %v866_v46 = vor.u32 %v864_v25, %v863_v57 }
 0x118   : > { %14896 = vst [vmem:[#allocation17_spill] sm:$0xff] %v11207_v3  ;;  %v3230_v59 = vshll.u32 %v11203_v44, 16  ;;  %v1441_v61 = vshll.u32 %v11199_v34, 16  ;;  %v1445_v12 = vshrl.u32 %v11199_v34, 16  ;;  %v1451_v0 = vshll.u32 %v11207_v3, 16 }
 0x119   : > { %1031 = vst [vmem:[#allocation2 + $0xb4] sm:$0xf] %v1030_v56  ;;  %1032 = vst.msk [vmem:[#allocation2 + $0xb8] sm:$0xf] %vm514_vm1, %v858_v55  ;;  %v3222_v20 = vrot.slane %v3220_v30, 5  ;;  %v3226_v4 = vrot.slane %v3224_v48, 4  ;;  %v1037_v22 = vsel %vm10735_vm10, %v866_v46, %v1036_v7  ;;  %v874_v30 = vor.u32 %v872_v62, %v871_v14 }
 0x11a   : > { %v3232_v37 = vrot.slane %v3230_v59, 5  ;;  %v1443_v8 = vrot.slane %v1441_v61, 5  ;;  %v1447_v51 = vrot.slane %v1445_v12, 4  ;;  %v1453_v2 = vrot.slane %v1451_v0, 5  ;;  %1035 = vst [vmem:[#allocation2 + $0xbc] sm:$0x1] %v1034_v6 }
 0x11b   : > { %v3223_v54 = vsel %vm10748_vm12, %v11195_v53, %v3222_v20  ;;  %v3227_v13 = vor.u32 %v3226_v4, %v3222_v20  ;;  %v867_v27 = vrot.slane %v863_v57, 4  ;;  %v3576_v47 = vld [vmem:[#allocation2 + $0xc] sm:$0xe]  ;;  %v11226_v38 = vld [vmem:[%s14885_s2 + $0x8] sm:$0xf]  ;;  %v876_v48 = vrot.slane %v871_v14, 4 }
 0x11c   : > { %v1444_v25 = vsel %vm10748_vm12, %v11201_v31, %v1443_v8  ;;  %v1448_v40 = vor.u32 %v1447_v51, %v1443_v8  ;;  %v1040_v43 = vld [vmem:[#allocation2 + $0xc8] sm:$0x1]  ;;  %v10290_v53 = vld [vmem:[%s14885_s2] sm:$0xf]  ;;  %1038 = vst [vmem:[#allocation2 + $0xc0] sm:$0xf] %v1037_v22 }
 0x11d   : > { %v1872_v52 = vsel %vm1578_vm0, %v10290_v53, 0  ;;  %v3228_v57 = vrot.slane %v3227_v13, 4  ;;  %v8992_v31 = vrot.slane %v3576_v47, 9  ;;  %v875_v12 = vsel %vm10728_vm9, %v867_v27, %v874_v30  ;;  %v11251_v20 = vld [vmem:[#allocation2] sm:$0xf] }
 0x11e   : > { %9581 = vmatpush3.bf16.msra.mxu1 %v1872_v52  ;;  %v1449_v55 = vrot.slane %v1448_v40, 4  ;;  %v1041_v0 = vsel %vm10741_vm11, %v876_v48, %v1040_v43  ;;  %v11253_v4 = vld [vmem:[#allocation2 + $0x4] sm:$0xf]  ;;  %1039 = vst.msk [vmem:[#allocation2 + $0xc4] sm:$0xf] %vm514_vm1, %v875_v12  ;;  %v3698_v3 = vrot.slane %v10322_v42, 5 }
 0x11f   : > { %10166 = vmatprep.subr.msk.bf16.mxu1 %vm1578_vm0, %v11226_v38  ;;  %v3233_v56 = vsel %vm10748_vm12, %v3228_v57, %v3232_v37  ;;  %v8845_v6 = vcombine.low %v11251_v20, %v11253_v4  ;;  %1042 = vst [vmem:[#allocation2 + $0xc8] sm:$0x1] %v1041_v0  ;;  %v11280_v14 = vsel %vm11266_vm15, %v8992_v31, %v3642_v49  ;;  %vm6258_vm1 = vcmask 1041408  }
 0x120   : > { %v11243_v59 = vld [vmem:[#allocation2 + $0xb4] sm:$0xf]  ;;  %v11245_v61 = vld [vmem:[#allocation2 + $0xb8] sm:$0xf]  ;;  %v8973_v46 = vcombine.low %v3223_v54, %v3233_v56  ;;  %v1454_v7 = vsel %vm10748_vm12, %v1449_v55, %v1453_v2  ;;  %vm6606_vm6 = vcmask 177152   ;;  %vm6655_vm7 = vcmask 154712  }
 0x121   : > { %v2892_v62 = vld [vmem:[#allocation2 + $0xb4] sm:$0xf]  ;;  %v1456_v37 = vshrl.u32 %v11243_v59, 16  ;;  %v1459_v8 = vshll.u32 %v11243_v59, 16  ;;  %v11261_v21 = vld [vmem:[#allocation2 + $0xb8] sm:$0xf]  ;;  %v8827_v51 = vcombine.low %v1444_v25, %v1454_v7 }
 0x122   : > { %v11270_v54 = vld [vmem:[#allocation2 + $0xbc] sm:$0x1]  ;;  %v1465_v2 = vshll.u32 %v11245_v61, 16  ;;  %v1469_v13 = vshrl.u32 %v11245_v61, 16  ;;  %9709 = vmatmul.mubr.msk.bf16.gmra.mrb[24].mxu0 %vm1529_vm8, %v8973_v46  ;;  %v3235_v22 = vshrl.u32 %v2892_v62, 16  ;;  %v3238_v52 = vshll.u32 %v2892_v62, 16 }
 0x123   : > { %v11274_v27 = vld [vmem:[#allocation2 + $0xbc] sm:$0x1]  ;;  %v1458_v47 = vrot.slane %v1456_v37, 4  ;;  %v1461_v40 = vrot.slane %v1459_v8, 5  ;;  %v1475_v25 = vshll.u32 %v11270_v54, 16  ;;  %9576 = vmatprep.mubr.msk.bf16.mxu1 %vm1529_vm8, %v8827_v51  ;;  %v3244_v57 = vshll.u32 %v11261_v21, 16 }
 0x124   : > { %v1467_v43 = vrot.slane %v1465_v2, 5  ;;  %v1471_v53 = vrot.slane %v1469_v13, 4  ;;  %v3237_v48 = vrot.slane %v3235_v22, 4  ;;  %v3248_v49 = vshrl.u32 %v11261_v21, 16  ;;  %v2895_v55 = vld [vmem:[#allocation2 + $0xc0] sm:$0xf] }
 0x125   : > { %v1462_v30 = vor.u32 %v1461_v40, %v1458_v47  ;;  %v1477_v26 = vrot.slane %v1475_v25, 5  ;;  %v3240_v56 = vrot.slane %v3238_v52, 5  ;;  %v3246_v12 = vrot.slane %v3244_v57, 5  ;;  %v11288_v13 = vld [vmem:[#allocation2 + $0xc4] sm:$0xf] }
 0x126   : > { %v1472_v31 = vor.u32 %v1471_v53, %v1467_v43  ;;  %v3254_v0 = vshll.u32 %v11274_v27, 16  ;;  %v3250_v7 = vrot.slane %v3248_v49, 4  ;;  %v3259_v37 = vshrl.u32 %v2895_v55, 16  ;;  %v11290_v47 = vld [vmem:[#allocation2 + $0xc8] sm:$0x1] }
 0x127   : > { %v1463_v46 = vrot.slane %v1462_v30, 4  ;;  %v3262_v8 = vshll.u32 %v2895_v55, 16  ;;  %v3241_v2 = vor.u32 %v3240_v56, %v3237_v48  ;;  %v3646_v40 = vsel %vm11266_vm15, %v3644_v29, %v3645_v5  ;;  %v3577_v57 = vld [vmem:[#allocation2 + $0x18] sm:$0xe] }
 0x128   : > { %v1473_v51 = vrot.slane %v1472_v31, 4  ;;  %v3256_v62 = vrot.slane %v3254_v0, 5  ;;  %v3251_v22 = vor.u32 %v3250_v7, %v3246_v12  ;;  %v3261_v53 = vrot.slane %v3259_v37, 4 }
 0x129   : > { %v1468_v25 = vsel %vm10748_vm12, %v1463_v46, %v1467_v43  ;;  %v3264_v52 = vrot.slane %v3262_v8, 5  ;;  %v3242_v48 = vrot.slane %v3241_v2, 4  ;;  %v3268_v49 = vshll.u32 %v11288_v13, 16 }
 0x12a   : > { %v1478_v30 = vsel %vm10748_vm12, %v1473_v51, %v1477_v26  ;;  %v3272_v55 = vshrl.u32 %v11288_v13, 16  ;;  %v3252_v36 = vrot.slane %v3251_v22, 4  ;;  %v3278_v5 = vshll.u32 %v11290_v47, 16  ;;  %v3578_v22 = vld [vmem:[#allocation2 + $0x24] sm:$0xe] }
 0x12b   : > { %v8828_v31 = vcombine.low %v1468_v25, %v1478_v30  ;;  %v3265_v56 = vor.u32 %v3264_v52, %v3261_v53  ;;  %v3247_v29 = vsel %vm10748_vm12, %v3242_v48, %v3246_v12  ;;  %v3270_v43 = vrot.slane %v3268_v49, 5  ;;  %v10294_v53 = vld [vmem:[#allocation2 + $0x18] sm:$0xf]  ;;  %v3579_v48 = vld [vmem:[#allocation2 + $0x30] sm:$0xe] }
 0x12c   : > { %v3274_v0 = vrot.slane %v3272_v55, 4  ;;  %v9009_v46 = vcombine.low %v11280_v14, %v3646_v40  ;;  %v3257_v26 = vsel %vm10748_vm12, %v3252_v36, %v3256_v62  ;;  %v8993_v37 = vrot.slane %v3577_v57, 9  ;;  %v10293_v62 = vld [vmem:[#allocation2 + $0x28] sm:$0xf]  ;;  %v10296_v57 = vld [vmem:[#allocation2 + $0x2c] sm:$0x1] }
 0x12d   : > { %9577 = vmatmul.mubr.msk.bf16.gmra.mrb[28].mxu1 %vm1529_vm8, %v8828_v31  ;;  %v3266_v7 = vrot.slane %v3265_v56, 4  ;;  %v8974_v8 = vcombine.low %v3247_v29, %v3257_v26  ;;  %v3280_v2 = vrot.slane %v3278_v5, 5  ;;  %v3653_v14 = vsel %vm11266_vm15, %v10886_v24, %v3652_v39  ;;  %v11327_v39 = vld [vmem:[#allocation2 + $0x1c] sm:$0xf]  ;;  %v10297_v49 = vld [vmem:[#allocation2 + $0x34] sm:$0xf] }
 0x12e   : > { %v3275_v51 = vor.u32 %v3274_v0, %v3270_v43  ;;  %9582 = vmatprep.mubr.msk.bf16.mxu1 %vm1529_vm8, %v8845_v6  ;;  %v3650_v12 = vsel %vm11266_vm15, %v8993_v37, %v3649_v23  ;;  %v3656_v40 = vrot.slane %v10293_v62, 5  ;;  %v8847_v50 = vcombine.low %v10294_v53, %v11327_v39  ;;  %v10298_v31 = vld [vmem:[#allocation2 + $0x40] sm:$0xf]  ;;  %v3580_v56 = vld [vmem:[#allocation2 + $0x3c] sm:$0xe] }
 0x12f   : > { %9712 = vmatprep.mubr.msk.bf16.mxu0 %vm1529_vm8, %v8974_v8  ;;  %v3271_v20 = vsel %vm10748_vm12, %v3266_v7, %v3270_v43  ;;  %v9010_v6 = vcombine.low %v3650_v12, %v3653_v14  ;;  %v8994_v23 = vrot.slane %v3578_v22, 9  ;;  %v3659_v30 = vrot.slane %v10296_v57, 5  ;;  %v10299_v0 = vld [vmem:[#allocation2 + $0x38] sm:$0x1]  ;;  %v11344_v14 = vld [vmem:[#allocation2 + $0x10] sm:$0xf] }
 0x130   : > { %v3276_v25 = vrot.slane %v3275_v51, 4  ;;  %v3658_v52 = vrot.slane %v3656_v40, 4  ;;  %v3663_v55 = vrot.slane %v10297_v49, 5  ;;  %v3670_v36 = vrot.slane %v10298_v31, 5  ;;  %v11341_v51 = vld [vmem:[#allocation2 + $0x28] sm:$0xf] }
 0x131   : > { %v3657_v5 = vsel %vm11266_vm15, %v8994_v23, %v3656_v40  ;;  %v8995_v43 = vrot.slane %v3579_v48, 9  ;;  %v3666_v26 = vrot.slane %v10299_v0, 5  ;;  %v8996_v37 = vrot.slane %v3580_v56, 9  ;;  %v3582_v40 = vld [vmem:[#allocation2 + $0x54] sm:$0xe] }
 0x132   : > { %v3281_v58 = vsel %vm10748_vm12, %v3276_v25, %v3280_v2  ;;  %v3660_v29 = vsel %vm11266_vm15, %v3658_v52, %v3659_v30  ;;  %v3665_v7 = vrot.slane %v3663_v55, 4  ;;  %v3672_v8 = vrot.slane %v3670_v36, 4  ;;  %v3581_v2 = vld [vmem:[#allocation2 + $0x48] sm:$0xe]  ;;  %v11355_v53 = vld [vmem:[#allocation2 + $0x34] sm:$0xf] }
 0x133   : > { %v8975_v24 = vcombine.low %v3271_v20, %v3281_v58  ;;  %v9011_v62 = vcombine.low %v3657_v5, %v3660_v29  ;;  %v10304_v20 = vld [vmem:[%s14885_s2 + $0x18] sm:$0xf]  ;;  %v11353_v22 = vsel %vm11266_vm15, %v8995_v43, %v3663_v55  ;;  %v10305_v58 = vld [vmem:[#allocation2 + $0x30] sm:$0xf]  ;;  %v11364_v57 = vsel %vm11266_vm15, %v8996_v37, %v3670_v36  ;;  %v11373_v49 = vld [vmem:[%s14885_s2 + $0x1c] sm:$0xf] }
 0x134   : > { %v4210_v25 = vsel %vm1578_vm0, %v10304_v20, 0  ;;  %v11360_v52 = vsel %vm11266_vm15, %v3665_v7, %v3666_v26  ;;  %v11368_v30 = vsel %vm11266_vm15, %v3672_v8, %v3673_v16  ;;  %v8997_v48 = vrot.slane %v3581_v2, 9  ;;  %v11375_v55 = vld [vmem:[#allocation2 + $0x14] sm:$0x1]  ;;  %v11380_v36 = vld [vmem:[#allocation2 + $0x40] sm:$0xf] }
 0x135   : > { %9713 = vmatmul.mubr.msk.bf16.gmra.mrb[28].mxu0 %vm1529_vm8, %v8975_v24  ;;  %9583 = vmatmul.mubr.msk.bf16.vlgmr.msra.gmra.mrb[0].mxu1 %vm1529_vm8, %v8846_v32  ;;  %v10301_v32 = vld [vmem:[#allocation2 + $0x24] sm:$0xf]  ;;  %v10307_v24 = vld [vmem:[#allocation2 + $0x4c] sm:$0xf]  ;;  %v10310_v56 = vld [vmem:[#allocation2 + $0x3c] sm:$0xf] }
 0x136   : > { %9718 = vmatprep.mubr.msk.bf16.mxu0 %vm1529_vm8, %v9009_v46  ;;  %9586 = vmatprep.mubr.msk.bf16.mxu1 %vm1529_vm8, %v8847_v50  ;;  %v8848_v46 = vcombine.low %v10301_v32, %v11341_v51  ;;  %v8849_v50 = vcombine.low %v10305_v58, %v11355_v53  ;;  %v3677_v23 = vrot.slane %v10307_v24, 5  ;;  %v8850_v5 = vcombine.low %v10310_v56, %v11380_v36  ;;  %v10311_v43 = vld [vmem:[#allocation2 + $0x58] sm:$0xf]  ;;  %v3588_v26 = vld [vmem:[#allocation2 + $0x9c] sm:$0xe] }
 0x137   : > { %v8998_v29 = vrot.slane %v3582_v40, 9  ;;  %v3684_v0 = vrot.slane %v10311_v43, 5  ;;  %v10312_v7 = vld [vmem:[#allocation2 + $0x50] sm:$0x1]  ;;  %v10313_v8 = vld [vmem:[#allocation2 + $0x48] sm:$0xf]  ;;  %v9013_v58 = vcombine.low %v11364_v57, %v11368_v30  ;;  %v8860_v57 = vcombine.low %v11243_v59, %v11245_v61 }
 0x138   : > { %v3680_v37 = vrot.slane %v10312_v7, 5  ;;  %v11387_v16 = vld [vmem:[#allocation2 + $0x54] sm:$0xf]  ;;  %v11389_v32 = vld [vmem:[#allocation2 + $0x58] sm:$0xf]  ;;  %v3679_v24 = vrot.slane %v3677_v23, 4 }
 0x139   : > { %v11393_v2 = vld [vmem:[#allocation2 + $0x60] sm:$0xe]  ;;  %v11395_v40 = vld [vmem:[#allocation2 + $0x64] sm:$0xf]  ;;  %v10319_v56 = vld [vmem:[#allocation2 + $0x5c] sm:$0x1] }
 0x13a   : > { %v11397_v20 = vld [vmem:[#allocation2 + $0x60] sm:$0xf]  ;;  %v3687_v43 = vrot.slane %v10319_v56, 5  ;;  %v3589_v7 = vld [vmem:[#allocation2 + $0xa8] sm:$0xe]  ;;  %v3743_v42 = vrot.slane %v11274_v27, 5 }
 0x13b   : > { %v11419_v30 = vld [vmem:[#allocation2 + $0x64] sm:$0xf]  ;;  %v3590_v31 = vld [vmem:[#allocation2 + $0xb4] sm:$0xe]  ;;  %v10321_v12 = vld [vmem:[#allocation2 + $0x68] sm:$0x1] }
 0x13c   : > { %v3691_v56 = vrot.slane %v11419_v30, 5  ;;  %v3591_v30 = vld [vmem:[#allocation2 + $0xc0] sm:$0xe]  ;;  %vm6794_vm9 = vcmask 1042434   ;;  %vm6796_vm10 = vcmask 1043459   ;;  %vm6798_vm11 = vcmask 1044484  }
 0x13d   : > { %9719 = vmatmul.mubr.msk.bf16.vlgmr.msra.gmra.mrb[0].mxu0 %vm1529_vm8, %v9010_v6  ;;  %9587 = vmatmul.mubr.msk.bf16.gmra.mrb[4].mxu1 %vm1529_vm8, %v8848_v46  ;;  %v8851_v6 = vcombine.low %v10313_v8, %v11384_v15  ;;  %v11410_v8 = vsel %vm11266_vm15, %v8997_v48, %v3677_v23  ;;  %v3726_v46 = vrot.slane %v11160_v45, 5  ;;  %v3694_v23 = vrot.slane %v10321_v12, 5 }
 0x13e   : > { %9751 = vmatpush3.bf16.msra.mxu0 %v4210_v25  ;;  %9722 = vmatprep.mubr.msk.bf16.mxu0 %vm1529_vm8, %v9011_v62  ;;  %v9012_v25 = vcombine.low %v11353_v22, %v11360_v52  ;;  %v9004_v62 = vrot.slane %v3588_v26, 9  ;;  %v3729_v22 = vrot.slane %v11165_v41, 5  ;;  %v3686_v52 = vrot.slane %v3684_v0, 4 }
 0x13f   : > { %9590 = vmatprep.mubr.msk.bf16.mxu1 %vm1529_vm8, %v8849_v50  ;;  %10171 = vmatprep.subr.msk.bf16.mxu0 %vm1578_vm0, %v11373_v49  ;;  %v11416_v50 = vsel %vm11266_vm15, %v8998_v29, %v3684_v0  ;;  %v3728_v45 = vrot.slane %v3726_v46, 4  ;;  %v9005_v41 = vrot.slane %v3589_v7, 9  ;;  %v3681_v29 = vsel %vm11266_vm15, %v3679_v24, %v3680_v37  ;;  %v2036_v24 = vld [vmem:[#allocation2 + $0xc] sm:$0xe] }
 0x140   : > { %v11424_v48 = vsel %vm11266_vm15, %v9004_v62, %v3726_v46  ;;  %v3733_v0 = vrot.slane %v11197_v1, 5  ;;  %v3736_v26 = vrot.slane %v11203_v44, 5  ;;  %v9006_v62 = vrot.slane %v3590_v31, 9  ;;  %v11456_v7 = vld [vmem:[%s14885_s2 + $0xc] sm:$0xf] }
 0x141   : > { %v11434_v12 = vsel %vm11266_vm15, %v3728_v45, %v3729_v22  ;;  %v3740_v46 = vrot.slane %v11261_v21, 5  ;;  %v3688_v27 = vsel %vm11266_vm15, %v3686_v52, %v3687_v43  ;;  %v3584_v22 = vld [vmem:[#allocation2 + $0x6c] sm:$0xe]  ;;  %v2297_v45 = vsel %vm1578_vm0, %v11226_v38, 0 }
 0x142   : > { %v9021_v1 = vcombine.low %v11424_v48, %v11434_v12  ;;  %v11443_v44 = vsel %vm11266_vm15, %v9005_v41, %v3733_v0  ;;  %v3735_v37 = vrot.slane %v3733_v0, 4  ;;  %9615 = vmatpush3.bf16.msra.mxu1 %v2297_v45  ;;  %v9014_v0 = vcombine.low %v11410_v8, %v3681_v29  ;;  %v10323_v8 = vld [vmem:[#allocation2 + $0x74] sm:$0x1]  ;;  %v10332_v48 = vld [vmem:[#allocation2 + $0x20] sm:$0x1] }
 0x143   : > { %v11450_v21 = vsel %vm11266_vm15, %v9006_v62, %v3740_v46  ;;  %v3742_v31 = vrot.slane %v3740_v46, 4  ;;  %v14899_v38 = vrot.slane %v11344_v14, 5  ;;  %10167 = vmatprep.subr.msk.bf16.mxu1 %vm1578_vm0, %v11456_v7  ;;  %v9015_v62 = vcombine.low %v11416_v50, %v3688_v27 }
 0x144   : > { %v3693_v46 = vrot.slane %v3691_v56, 4  ;;  %v3701_v29 = vrot.slane %v10323_v8, 5  ;;  %v14901_v50 = vrot.slane %v11375_v55, 5  ;;  %v10325_v8 = vld [vmem:[#allocation2 + $0x6c] sm:$0xf]  ;;  %v2105_v12 = vrot.slane %v10332_v48, 5 }
 0x145   : > { %9723 = vmatmul.mubr.msk.bf16.gmra.mrb[4].mxu0 %vm1529_vm8, %v9012_v25  ;;  %9591 = vmatmul.mubr.msk.bf16.gmra.mrb[8].mxu1 %vm1529_vm8, %v8850_v5  ;;  %v9007_v5 = vrot.slane %v3591_v30, 9  ;;  %v3747_v25 = vrot.slane %v11288_v13, 5  ;;  %v11471_v41 = vsel %vm11266_vm15, %v3742_v31, %v3743_v42  ;;  %v2097_v30 = vrot.slane %v14899_v38, 4  ;;  %v2045_v48 = vld [vmem:[#allocation2 + $0x78] sm:$0xe] }
 0x146   : > { %9726 = vmatprep.mubr.msk.bf16.mxu0 %vm1529_vm8, %v9013_v58  ;;  %9594 = vmatprep.mubr.msk.bf16.mxu1 %vm1529_vm8, %v8851_v6  ;;  %v11462_v6 = vsel %vm11266_vm15, %v3735_v37, %v3736_v26  ;;  %v3750_v58 = vrot.slane %v11290_v47, 5  ;;  %v9023_v47 = vcombine.low %v11450_v21, %v11471_v41  ;;  %v8878_v26 = vrot.slane %v2036_v24, 9  ;;  %v10246_v41 = vld [vmem:[#allocation2 + $0x18] sm:$0xff]  }
 0x147   : > { %v9022_v13 = vcombine.low %v11443_v44, %v11462_v6  ;;  %v11475_v43 = vsel %vm11266_vm15, %v9007_v5, %v3747_v25  ;;  %v3749_v52 = vrot.slane %v3747_v25, 4  ;;  %v9000_v37 = vrot.slane %v3584_v22, 9  ;;  %v2039_v6 = vld [vmem:[#allocation2 + $0x30] sm:$0xe] }
 0x148   : > { %v3700_v31 = vrot.slane %v3698_v3, 4  ;;  %v14900_v5 = vmov %v14899_v38  ;;  %v11501_v27 = vsel %vm11266_vm15, %v2097_v30, %v14901_v50  ;;  %v14902_v22 = vcombine.low %v11387_v16, %v11389_v32  ;;  %v10324_v16 = vld [vmem:[#allocation2 + $0x7c] sm:$0xf] }
 0x149   : > { %v11487_v42 = vsel %vm11266_vm15, %v3749_v52, %v3750_v58  ;;  %v11495_v25 = vsel %vm11266_vm15, %v8878_v26, %v14900_v5  ;;  %v14903_v58 = vrot.slane %v11393_v2, 9  ;;  %v3695_v45 = vsel %vm11266_vm15, %v3693_v46, %v3694_v23  ;;  %v3585_v2 = vld [vmem:[#allocation2 + $0x78] sm:$0xe]  ;;  %v11526_v23 = vld [vmem:[#allocation2 + $0x70] sm:$0xf] }
 0x14a   : > { %v9024_v24 = vcombine.low %v11475_v43, %v11487_v42  ;;  %v8895_v14 = vcombine.low %v11495_v25, %v11501_v27  ;;  %v14904_v52 = vcombine.low %v11397_v20, %v11395_v40  ;;  %v3699_v26 = vsel %vm11266_vm15, %v9000_v37, %v3698_v3  ;;  %v10327_v46 = vld [vmem:[#allocation2 + $0x78] sm:$0xf]  ;;  %v11529_v5 = vld [vmem:[#allocation2 + $0x7c] sm:$0xf]  ;;  %v2044_v42 = vld [vmem:[#allocation2 + $0x6c] sm:$0xe] }
 0x14b   : > { %v3692_v55 = vsel %vm11266_vm15, %v14903_v58, %v3691_v56  ;;  %v3702_v38 = vsel %vm11266_vm15, %v3700_v31, %v3701_v29  ;;  %v3712_v30 = vrot.slane %v11084_v10, 5  ;;  %v3586_v56 = vld [vmem:[#allocation2 + $0x84] sm:$0xe]  ;;  %v8854_v20 = vcombine.low %v10325_v8, %v11526_v23  ;;  %v10329_v58 = vld [vmem:[#allocation2 + $0x80] sm:$0x1] }
 0x14c   : > { %v8855_v50 = vcombine.low %v10327_v46, %v11529_v5  ;;  %v9001_v3 = vrot.slane %v3585_v2, 9  ;;  %v3708_v31 = vrot.slane %v10329_v58, 5  ;;  %v9002_v29 = vrot.slane %v3586_v56, 9  ;;  %v10330_v56 = vld [vmem:[#allocation2 + $0x84] sm:$0xf] }
 0x14d   : > { %9727 = vmatmul.mubr.msk.bf16.gmra.mrb[8].mxu0 %vm1529_vm8, %v9014_v0  ;;  %9595 = vmatmul.mubr.msk.bf16.gmra.mrb[12].mxu1 %vm1529_vm8, %v14902_v22  ;;  %v3705_v0 = vrot.slane %v10324_v16, 5  ;;  %v9017_v22 = vcombine.low %v3699_v26, %v3702_v38  ;;  %v3715_v10 = vrot.slane %v11093_v11, 5  ;;  %v3719_v16 = vrot.slane %v11122_v28, 5  ;;  %v3587_v38 = vld [vmem:[#allocation2 + $0x90] sm:$0xe] }
 0x14e   : > { %9730 = vmatprep.mubr.msk.bf16.mxu0 %vm1529_vm8, %v9015_v62  ;;  %9598 = vmatprep.mubr.msk.bf16.mxu1 %vm1529_vm8, %v14904_v52  ;;  %v9016_v62 = vcombine.low %v3692_v55, %v3695_v45  ;;  %v3714_v52 = vrot.slane %v3712_v30, 4  ;;  %v3713_v26 = vsel %vm11266_vm15, %v9002_v29, %v3712_v30  ;;  %v2088_v30 = vrot.slane %v11253_v4, 5  ;;  %v10331_v58 = vld [vmem:[#allocation2 + $0x8] sm:$0x1] }
 0x14f   : > { %v3707_v37 = vrot.slane %v3705_v0, 4  ;;  %v3706_v55 = vsel %vm11266_vm15, %v9001_v3, %v3705_v0  ;;  %v8857_v0 = vcombine.low %v11112_v18, %v11124_v63  ;;  %v3721_v46 = vrot.slane %v3719_v16, 4  ;;  %v2050_v18 = vld [vmem:[#allocation2 + $0xb4] sm:$0xe]  ;;  %v2035_v63 = vld [vmem:[#allocation2] sm:$0xe] }
 0x150   : > { %v3716_v11 = vsel %vm11266_vm15, %v3714_v52, %v3715_v10  ;;  %v8892_v3 = vrot.slane %v2050_v18, 9  ;;  %v8859_v29 = vcombine.low %v11172_v19, %v11199_v34  ;;  %v8877_v52 = vrot.slane %v2035_v63, 9  ;;  %v2041_v63 = vld [vmem:[#allocation2 + $0x48] sm:$0xe] }
 0x151   : > { %v3709_v45 = vsel %vm11266_vm15, %v3707_v37, %v3708_v31  ;;  %v9019_v8 = vcombine.low %v3713_v26, %v3716_v11  ;;  %v2193_v37 = vrot.slane %v11245_v61, 5  ;;  %v2091_v31 = vrot.slane %v10331_v58, 5  ;;  %v2037_v26 = vld [vmem:[#allocation2 + $0x18] sm:$0xe]  ;;  %v10333_v61 = vld [vmem:[#allocation2 + $0x2c] sm:$0x1] }
 0x152   : > { %v9018_v2 = vcombine.low %v3706_v55, %v3709_v45  ;;  %v2090_v10 = vrot.slane %v2088_v30, 4  ;;  %v2196_v4 = vrot.slane %v11270_v54, 5  ;;  %v2089_v19 = vsel %vm11266_vm15, %v8877_v52, %v2088_v30  ;;  %v10247_v52 = vld [vmem:[#allocation2 + $0x24] sm:$0xff]  }
 0x153   : > { %v11566_v55 = vsel %vm11266_vm15, %v8892_v3, %v2193_v37  ;;  %v2195_v45 = vrot.slane %v2193_v37, 4  ;;  %v2123_v21 = vrot.slane %v11380_v36, 5  ;;  %v2655_v36 = vsel %vm1578_vm0, %v11456_v7, 0  ;;  %v2043_v37 = vld [vmem:[#allocation2 + $0x60] sm:$0xe] }
 0x154   : > { %v2092_v54 = vsel %vm11266_vm15, %v2090_v10, %v2091_v31  ;;  %v2137_v3 = vrot.slane %v11389_v32, 5  ;;  %v8883_v7 = vrot.slane %v2041_v63, 9  ;;  %v2144_v43 = vrot.slane %v11395_v40, 5  ;;  %v10336_v31 = vld [vmem:[#allocation2 + $0x50] sm:$0x1] }
 0x155   : > { %9731 = vmatmul.mubr.msk.bf16.gmra.mrb[12].mxu0 %vm1529_vm8, %v9016_v62  ;;  %9599 = vmatmul.mubr.msk.bf16.gmra.mrb[16].mxu1 %vm1529_vm8, %v8854_v20  ;;  %v8856_v62 = vcombine.low %v10330_v56, %v11082_v9  ;;  %v9003_v20 = vrot.slane %v3587_v38, 9  ;;  %v8894_v11 = vcombine.low %v2089_v19, %v2092_v54  ;;  %v8879_v38 = vrot.slane %v2037_v26, 9  ;;  %v10248_v26 = vld [vmem:[#allocation2 + $0x30] sm:$0xff]  }
 0x156   : > { %9734 = vmatprep.mubr.msk.bf16.mxu0 %vm1529_vm8, %v9017_v22  ;;  %9602 = vmatprep.mubr.msk.bf16.mxu1 %vm1529_vm8, %v8855_v50  ;;  %v3722_v50 = vrot.slane %v11127_v17, 5  ;;  %v8858_v17 = vcombine.low %v11145_v60, %v11157_v33  ;;  %v11573_v60 = vsel %vm11266_vm15, %v2195_v45, %v2196_v4  ;;  %v2109_v56 = vrot.slane %v11341_v51, 5  ;;  %v10337_v45 = vld [vmem:[#allocation2 + $0x5c] sm:$0x1] }
 0x157   : > { %v3720_v28 = vsel %vm11266_vm15, %v9003_v20, %v3719_v16  ;;  %v8909_v33 = vcombine.low %v11566_v55, %v11573_v60  ;;  %v2102_v16 = vrot.slane %v11327_v39, 5  ;;  %v2125_v30 = vrot.slane %v2123_v21, 4 }
 0x158   : > { %v3723_v9 = vsel %vm11266_vm15, %v3721_v46, %v3722_v50  ;;  %v2111_v59 = vrot.slane %v2109_v56, 4  ;;  %v10334_v46 = vld [vmem:[#allocation2 + $0x38] sm:$0x1]  ;;  %v2151_v32 = vrot.slane %v11526_v23, 5  ;;  %v2139_v10 = vrot.slane %v2137_v3, 4 }
 0x159   : > { %v9020_v22 = vcombine.low %v3720_v28, %v3723_v9  ;;  %v2103_v51 = vsel %vm11266_vm15, %v8879_v38, %v2102_v16  ;;  %v2119_v50 = vrot.slane %v10334_v46, 5  ;;  %v10335_v9 = vld [vmem:[#allocation2 + $0x44] sm:$0x1]  ;;  %v2140_v4 = vrot.slane %v10337_v45, 5  ;;  %v10338_v38 = vld [vmem:[#allocation2 + $0x68] sm:$0x1] }
 0x15a   : > { %v2126_v18 = vrot.slane %v10335_v9, 5  ;;  %v8885_v19 = vrot.slane %v2043_v37, 9  ;;  %v8886_v54 = vrot.slane %v2044_v42, 9  ;;  %v2048_v45 = vld [vmem:[#allocation2 + $0x9c] sm:$0xe]  ;;  %vm6802_vm13 = vcmask 1046534  }
 0x15b   : > { %vm6804_vm14 = vcmask 1047559  }
 0x15d   : > { %9735 = vmatmul.mubr.msk.bf16.gmra.mrb[16].mxu0 %vm1529_vm8, %v9018_v2  ;;  %9603 = vmatmul.mubr.msk.bf16.gmra.mrb[20].mxu1 %vm1529_vm8, %v8856_v62  ;;  %v2104_v2 = vrot.slane %v2102_v16, 4  ;;  %v2040_v62 = vld [vmem:[#allocation2 + $0x3c] sm:$0xe]  ;;  %v4936_v16 = vsel %vm1578_vm0, %v11373_v49, 0 }
 0x15e   : > { %9738 = vmatprep.mubr.msk.bf16.mxu0 %vm1529_vm8, %v9019_v8  ;;  %9606 = vmatprep.mubr.msk.bf16.mxu1 %vm1529_vm8, %v8857_v0  ;;  %v8881_v8 = vrot.slane %v2039_v6, 9  ;;  %v8882_v28 = vrot.slane %v2040_v62, 9  ;;  %v11665_v62 = vsel %vm11266_vm15, %v8885_v19, %v2144_v43 }
 0x15f   : > { %v2106_v44 = vsel %vm11266_vm15, %v2104_v2, %v2105_v12  ;;  %v2147_v2 = vrot.slane %v10338_v38, 5  ;;  %v2153_v12 = vrot.slane %v2151_v32, 4 }
 0x160   : > { %v11632_v27 = vsel %vm11266_vm15, %v8882_v28, %v2123_v21  ;;  %v11669_v21 = vsel %vm11266_vm15, %v8886_v54, %v2151_v32  ;;  %v4408_v28 = vld [vmem:[#allocation2 + $0x24] sm:$0xf] }
 0x161   : > { %v4478_v42 = vshrl.u32 %v4408_v28, 16 }
 0x165   : > { %9739 = vmatmul.mubr.msk.bf16.gmra.mrb[20].mxu0 %vm1529_vm8, %v9020_v22  ;;  %9607 = vmatmul.mubr.msk.bf16.gmra.mrb[24].mxu1 %vm1529_vm8, %v8858_v17  ;;  %v2130_v22 = vrot.slane %v11384_v15, 5  ;;  %v2042_v17 = vld [vmem:[#allocation2 + $0x54] sm:$0xe] }
 0x166   : > { %9742 = vmatprep.mubr.msk.bf16.mxu0 %vm1529_vm8, %v9021_v1  ;;  %9610 = vmatprep.mubr.msk.bf16.mxu1 %vm1529_vm8, %v8859_v29  ;;  %v2038_v1 = vld [vmem:[#allocation2 + $0x24] sm:$0xe]  ;;  %v2133_v29 = vrot.slane %v10336_v31, 5  ;;  %v8884_v40 = vrot.slane %v2042_v17, 9 }
 0x167   : > { %v8880_v39 = vrot.slane %v2038_v1, 9  ;;  %v2132_v58 = vrot.slane %v2130_v22, 4  ;;  %v10339_v1 = vld [vmem:[#allocation2 + $0x74] sm:$0x1]  ;;  %v2131_v49 = vsel %vm11266_vm15, %v8883_v7, %v2130_v22  ;;  %v4409_v22 = vld [vmem:[#allocation2 + $0x28] sm:$0xf] }
 0x168   : > { %v10249_v7 = vld [vmem:[#allocation2 + $0x3c] sm:$0xff]   ;;  %v4491_v31 = vshrl.u32 %v4409_v22, 16 }
 0x169   : > { %v2110_v0 = vsel %vm11266_vm15, %v8880_v39, %v2109_v56  ;;  %v2154_v56 = vrot.slane %v10339_v1, 5  ;;  %v2158_v39 = vrot.slane %v11529_v5, 5  ;;  %v11655_v5 = vld [vmem:[%s14885_s2 + $0x20] sm:$0xf]  ;;  %v10344_v1 = vld [vmem:[#allocation2 + $0x98] sm:$0x1] }
 0x16a   : > { %s14759_s2 = smov 122  }
 0x16b   : > { %v11679_v9 = vsel %vm11266_vm15, %v2153_v12, %v2154_v56  ;;  %v2175_v56 = vrot.slane %v10344_v1, 5 }
 0x16d   : > { %9743 = vmatmul.mubr.msk.bf16.gmra.mrb[24].mxu0 %vm1529_vm8, %v9022_v13  ;;  %9611 = vmatmul.mubr.msk.bf16.gmra.mrb[28].mxu1 %vm1529_vm8, %v8860_v57  ;;  %v2116_v13 = vrot.slane %v11355_v53, 5  ;;  %v2112_v57 = vrot.slane %v10333_v61, 5  ;;  %v11650_v61 = vsel %vm11266_vm15, %v8884_v40, %v2137_v3 }
 0x16e   : > { %9746 = vmatprep.mubr.msk.bf16.mxu0 %vm1529_vm8, %v9023_v47  ;;  %9616 = vmatprep.mubr.msk.bf16.mxu1 %vm1529_vm8, %v8894_v11  ;;  %v8896_v47 = vcombine.low %v2103_v51, %v2106_v44  ;;  %v2146_v11 = vrot.slane %v2144_v43, 4  ;;  %v2046_v51 = vld [vmem:[#allocation2 + $0x84] sm:$0xe]  ;;  %v10340_v44 = vld [vmem:[#allocation2 + $0x88] sm:$0xf] }
 0x16f   : > { %v2118_v20 = vrot.slane %v2116_v13, 4  ;;  %v2113_v53 = vsel %vm11266_vm15, %v2111_v59, %v2112_v57  ;;  %v2117_v15 = vsel %vm11266_vm15, %v8881_v8, %v2116_v13  ;;  %v2165_v6 = vrot.slane %v10340_v44, 5 }
 0x170   : > { %v2134_v59 = vsel %vm11266_vm15, %v2132_v58, %v2133_v29  ;;  %v11661_v57 = vsel %vm11266_vm15, %v2139_v10, %v2140_v4  ;;  %v8887_v8 = vrot.slane %v2045_v48, 9  ;;  %v4487_v58 = vshll.u32 %v4409_v22, 16  ;;  %v4407_v4 = vld [vmem:[#allocation2 + $0x20] sm:$0x1] }
 0x171   : > { %v2120_v25 = vsel %vm11266_vm15, %v2118_v20, %v2119_v50  ;;  %v10341_v20 = vld [vmem:[#allocation2 + $0x80] sm:$0x1]  ;;  %v8888_v50 = vrot.slane %v2046_v51, 9  ;;  %v2167_v63 = vrot.slane %v2165_v6, 4  ;;  %v8900_v37 = vcombine.low %v2131_v49, %v2134_v59 }
 0x172   : > { %v8898_v23 = vcombine.low %v2117_v15, %v2120_v25  ;;  %v2161_v46 = vrot.slane %v10341_v20, 5  ;;  %v8901_v43 = vcombine.low %v11650_v61, %v11661_v57  ;;  %v10250_v25 = vld [vmem:[#allocation2 + $0x48] sm:$0xff]   ;;  %v11689_v32 = vsel %vm11266_vm15, %v8887_v8, %v2158_v39  ;;  %v10345_v59 = vld [vmem:[#allocation2 + $0xa0] sm:$0xf] }
 0x173   : > { %v8903_v29 = vcombine.low %v11669_v21, %v11679_v9  ;;  %v4480_v48 = vrot.slane %v4478_v42, 4  ;;  %v11711_v51 = vrot.slane %v4487_v58, 5  ;;  %v4493_v44 = vrot.slane %v4491_v31, 4  ;;  %v2049_v8 = vld [vmem:[#allocation2 + $0xa8] sm:$0xe] }
 0x174   : > { %v4414_v31 = vld [vmem:[#allocation2 + $0x3c] sm:$0xf] }
 0x175   : > { %9747 = vmatmul.mubr.msk.bf16.gmra.mrb[28].mxu0 %vm1529_vm8, %v9024_v24  ;;  %9617 = vmatmul.mubr.msk.bf16.vlgmr.msra.gmra.mrb[0].mxu1 %vm1529_vm8, %v8895_v14  ;;  %v8897_v24 = vcombine.low %v2110_v0, %v2113_v53  ;;  %v11637_v14 = vsel %vm11266_vm15, %v2125_v30, %v2126_v18  ;;  %v11674_v0 = vsel %vm11266_vm15, %v2146_v11, %v2147_v2  ;;  %v2160_v18 = vrot.slane %v2158_v39, 4  ;;  %v10342_v53 = vld [vmem:[#allocation2 + $0x8c] sm:$0x1]  ;;  %v10343_v11 = vld [vmem:[#allocation2 + $0x94] sm:$0xf] }
 0x176   : > { %9752 = vmatprep.mubr.msk.bf16.mxu0 %vm1529_vm8, %v10246_v41  ;;  %9620 = vmatprep.mubr.msk.bf16.mxu1 %vm1529_vm8, %v8896_v47  ;;  %v8899_v13 = vcombine.low %v11632_v27, %v11637_v14  ;;  %v4405_v41 = vld [vmem:[#allocation2 + $0x18] sm:$0xf]  ;;  %v4406_v47 = vld [vmem:[#allocation2 + $0x1c] sm:$0xf]  ;;  %v2168_v30 = vrot.slane %v10342_v53, 5  ;;  %v8902_v27 = vcombine.low %v11665_v62, %v11674_v0  ;;  %v2172_v38 = vrot.slane %v10343_v11, 5 }
 0x177   : > { %9649 = vmatpush3.bf16.msra.mxu1 %v2655_v36  ;;  %v4454_v36 = vshrl.u32 %v4405_v41, 16  ;;  %v4457_v17 = vshll.u32 %v4405_v41, 16  ;;  %v4463_v3 = vshll.u32 %v4406_v47, 16  ;;  %v4467_v15 = vshrl.u32 %v4406_v47, 16  ;;  %v2047_v14 = vld [vmem:[#allocation2 + $0x90] sm:$0xe] }
 0x178   : > { %v11695_v40 = vsel %vm11266_vm15, %v2160_v18, %v2161_v46  ;;  %v11703_v10 = vsel %vm11266_vm15, %v2167_v63, %v2168_v30  ;;  %v4410_v2 = vld [vmem:[#allocation2 + $0x2c] sm:$0x1]  ;;  %v8890_v39 = vrot.slane %v2048_v45, 9  ;;  %v2179_v41 = vrot.slane %v10345_v59, 5  ;;  %v10251_v18 = vld [vmem:[#allocation2 + $0x54] sm:$0xff]  }
 0x179   : > { %v4456_v19 = vrot.slane %v4454_v36, 4  ;;  %v4459_v54 = vrot.slane %v4457_v17, 5  ;;  %v2186_v47 = vrot.slane %v11199_v34, 5  ;;  %v2174_v53 = vrot.slane %v2172_v38, 4  ;;  %v10252_v36 = vld [vmem:[#allocation2 + $0x60] sm:$0xff]  }
 0x17a   : > { %v11725_v17 = vsel %vm11266_vm15, %v8890_v39, %v2179_v41  ;;  %v10346_v34 = vld [vmem:[#allocation2 + $0xa4] sm:$0x1]  ;;  %v2181_v42 = vrot.slane %v2179_v41, 4  ;;  %v4526_v61 = vshrl.u32 %v4414_v31, 16  ;;  %v4529_v57 = vshll.u32 %v4414_v31, 16 }
 0x17b   : > { %v4460_v20 = vor.u32 %v4459_v54, %v4456_v19  ;;  %v4417_v41 = vld [vmem:[#allocation2 + $0x48] sm:$0xf] }
 0x17d   : > { %9753 = vmatmul.mubr.msk.bf16.vlgmr.msra.gmra.mrb[0].mxu0 %vm1529_vm8, %v10247_v52  ;;  %9621 = vmatmul.mubr.msk.bf16.gmra.mrb[4].mxu1 %vm1529_vm8, %v8897_v24  ;;  %v4481_v24 = vshll.u32 %v4408_v28, 16  ;;  %v11699_v52 = vsel %vm11266_vm15, %v8888_v50, %v2165_v6  ;;  %v4411_v6 = vld [vmem:[#allocation2 + $0x30] sm:$0xf]  ;;  %v4473_v50 = vshll.u32 %v4407_v4, 16  ;;  %v4497_v28 = vshll.u32 %v4410_v2, 16 }
 0x17e   : > { %9785 = vmatpush3.bf16.msra.mxu0 %v4936_v16  ;;  %9756 = vmatprep.mubr.msk.bf16.mxu0 %vm1529_vm8, %v10248_v26  ;;  %v11705_v16 = vrot.slane %v4463_v3, 5  ;;  %v4469_v26 = vrot.slane %v4467_v15, 4  ;;  %v8905_v49 = vcombine.low %v11699_v52, %v11703_v10  ;;  %v4502_v22 = vshrl.u32 %v4411_v6, 16 }
 0x17f   : > { %9624 = vmatprep.mubr.msk.bf16.mxu1 %vm1529_vm8, %v8898_v23  ;;  %10172 = vmatprep.subr.msk.bf16.mxu0 %vm1578_vm0, %v11655_v5  ;;  %v8889_v23 = vrot.slane %v2047_v14, 9  ;;  %v4483_v12 = vrot.slane %v4481_v24, 5  ;;  %v2182_v3 = vrot.slane %v10346_v34, 5  ;;  %v4494_v15 = vor.u32 %v4493_v44, %v11711_v51  ;;  %v14905_v14 = vld [vmem:[#allocation17_spill] sm:$0xff] }
 0x180   : > { %v4470_v46 = vor.u32 %v4469_v26, %v11705_v16  ;;  %v8891_v24 = vrot.slane %v2049_v8, 9  ;;  %v2189_v58 = vrot.slane %v14905_v14, 5  ;;  %v4461_v45 = vrot.slane %v4460_v20, 4  ;;  %v11731_v26 = vld [vmem:[#allocation2 + $0x40] sm:$0xf]  ;;  %v10253_v8 = vld [vmem:[#allocation2 + $0x6c] sm:$0xff]  }
 0x181   : > { %v11721_v63 = vsel %vm11266_vm15, %v8889_v23, %v2172_v38  ;;  %v4484_v30 = vor.u32 %v4483_v12, %v4480_v48  ;;  %v4475_v19 = vrot.slane %v4473_v50, 5  ;;  %v4499_v54 = vrot.slane %v4497_v28, 5  ;;  %v11745_v12 = vld [vmem:[#allocation2 + $0x38] sm:$0x1]  ;;  %v11776_v28 = vld [vmem:[#allocation2 + $0x4c] sm:$0xf] }
 0x182   : > { %v4471_v4 = vrot.slane %v4470_v46, 4  ;;  %v4504_v11 = vrot.slane %v4502_v22, 4  ;;  %v4495_v48 = vrot.slane %v4494_v15, 4  ;;  %v11753_v39 = vsel %vm11266_vm15, %v2181_v42, %v2182_v3 }
 0x183   : > { %v4485_v23 = vrot.slane %v4484_v30, 4  ;;  %v4535_v44 = vshll.u32 %v11731_v26, 16  ;;  %v4539_v62 = vshrl.u32 %v11731_v26, 16  ;;  %v11759_v0 = vsel %vm11266_vm15, %v8891_v24, %v2186_v47 }
 0x184   : > { %v4476_v59 = vsel %vm10748_vm12, %v4471_v4, %v4475_v19  ;;  %v4521_v50 = vshll.u32 %v11745_v12, 16  ;;  %v4528_v30 = vrot.slane %v4526_v61, 4  ;;  %v4531_v22 = vrot.slane %v4529_v57, 5  ;;  %v11805_v4 = vld [vmem:[#allocation2 + $0x58] sm:$0xf]  ;;  %v10255_v61 = vld [vmem:[#allocation2 + $0x84] sm:$0xff]  }
 0x185   : > { %9757 = vmatmul.mubr.msk.bf16.gmra.mrb[4].mxu0 %vm1529_vm8, %v10249_v7  ;;  %9625 = vmatmul.mubr.msk.bf16.gmra.mrb[8].mxu1 %vm1529_vm8, %v8899_v13  ;;  %v8904_v13 = vcombine.low %v11689_v32, %v11695_v40  ;;  %v11728_v7 = vld [vmem:[#allocation2 + $0x34] sm:$0xf]  ;;  %v4490_v20 = vsel %vm10748_vm12, %v4485_v23, %v11711_v51  ;;  %v11782_v34 = vrot.slane %v4535_v44, 5  ;;  %v4541_v3 = vrot.slane %v4539_v62, 4  ;;  %v4423_v19 = vld [vmem:[#allocation2 + $0x60] sm:$0xf] }
 0x186   : > { %9760 = vmatprep.mubr.msk.bf16.mxu0 %vm1529_vm8, %v10250_v25  ;;  %9628 = vmatprep.mubr.msk.bf16.mxu1 %vm1529_vm8, %v8900_v37  ;;  %v4505_v37 = vshll.u32 %v4411_v6, 16  ;;  %v2188_v25 = vrot.slane %v2186_v47, 4  ;;  %v4511_v38 = vshll.u32 %v11728_v7, 16  ;;  %v4515_v2 = vshrl.u32 %v11728_v7, 16 }
 0x187   : > { %v4550_v51 = vshrl.u32 %v4417_v41, 16  ;;  %v4553_v15 = vshll.u32 %v4417_v41, 16  ;;  %v8907_v42 = vcombine.low %v11725_v17, %v11753_v39  ;;  %v4563_v31 = vshrl.u32 %v11776_v28, 16 }
 0x188   : > { %v4507_v1 = vrot.slane %v4505_v37, 5  ;;  %v11773_v46 = vrot.slane %v4511_v38, 5  ;;  %v4517_v47 = vrot.slane %v4515_v2, 4  ;;  %v4542_v23 = vor.u32 %v4541_v3, %v11782_v34  ;;  %v11819_v2 = vld [vmem:[#allocation2 + $0x64] sm:$0xf] }
 0x189   : > { %v4555_v38 = vrot.slane %v4553_v15, 5  ;;  %v4565_v57 = vrot.slane %v4563_v31, 4  ;;  %v4598_v44 = vshrl.u32 %v4423_v19, 16  ;;  %v4601_v62 = vshll.u32 %v4423_v19, 16  ;;  %v11836_v15 = vld [vmem:[#allocation2 + $0x70] sm:$0xf] }
 0x18a   : > { %v4518_v9 = vor.u32 %v4517_v47, %v11773_v46 }
 0x18b   : > { %v4600_v31 = vrot.slane %v4598_v44, 4  ;;  %v10258_v44 = vld [vmem:[#allocation2 + $0xa8] sm:$0xff]  }
 0x18c   : > { %v4519_v41 = vrot.slane %v4518_v9, 4 }
 0x18d   : > { %9761 = vmatmul.mubr.msk.bf16.gmra.mrb[8].mxu0 %vm1529_vm8, %v10251_v18  ;;  %9629 = vmatmul.mubr.msk.bf16.gmra.mrb[12].mxu1 %vm1529_vm8, %v8901_v43  ;;  %v11749_v43 = vsel %vm11266_vm15, %v2174_v53, %v2175_v56  ;;  %v4466_v56 = vsel %vm10748_vm12, %v4461_v45, %v11705_v16  ;;  %v10254_v18 = vld [vmem:[#allocation2 + $0x78] sm:$0xff]   ;;  %v4500_v16 = vsel %vm10748_vm12, %v4495_v48, %v4499_v54  ;;  %v4420_v45 = vld [vmem:[#allocation2 + $0x54] sm:$0xf]  ;;  %v11821_v48 = vld [vmem:[#allocation2 + $0x50] sm:$0x1] }
 0x18e   : > { %9764 = vmatprep.mubr.msk.bf16.mxu0 %vm1529_vm8, %v10252_v36  ;;  %9632 = vmatprep.mubr.msk.bf16.mxu1 %vm1529_vm8, %v8902_v27  ;;  %v11763_v27 = vsel %vm11266_vm15, %v2188_v25, %v2189_v58  ;;  %v4508_v53 = vor.u32 %v4507_v1, %v4504_v11  ;;  %v11780_v36 = vld [vmem:[#allocation2 + $0x44] sm:$0x1]  ;;  %v8906_v37 = vcombine.low %v11721_v63, %v11749_v43  ;;  %v4559_v25 = vshll.u32 %v11776_v28, 16 }
 0x18f   : > { %v8908_v24 = vcombine.low %v11759_v0, %v11763_v27  ;;  %v11796_v14 = vcombine.low %v4466_v56, %v4476_v59  ;;  %v11798_v58 = vcombine.low %v4490_v20, %v4500_v16  ;;  %v11802_v63 = vsel %vm1578_vm0, %v11655_v5, 0  ;;  %v10256_v56 = vld [vmem:[#allocation2 + $0x90] sm:$0xff]   ;;  %v5143_v27 = vld [vmem:[#allocation2 + $0xa8] sm:$0xe] }
 0x190   : > { %v11812_v21 = vrot.slane %v4508_v53, 4  ;;  %v4545_v5 = vshll.u32 %v11780_v36, 16  ;;  %v4532_v54 = vor.u32 %v4531_v22, %v4528_v30  ;;  %v4552_v11 = vrot.slane %v4550_v51, 4  ;;  %v4426_v53 = vld [vmem:[#allocation2 + $0x6c] sm:$0xf] }
 0x191   : > { %v11823_v32 = vrot.slane %v4559_v25, 5  ;;  %v4574_v40 = vshrl.u32 %v4420_v45, 16  ;;  %v4583_v1 = vshll.u32 %v11805_v4, 16  ;;  %v4587_v43 = vshrl.u32 %v11805_v4, 16 }
 0x192   : > { %v4514_v59 = vsel %vm10748_vm12, %v11812_v21, %v11773_v46  ;;  %v4611_v20 = vshrl.u32 %v11819_v2, 16  ;;  %v4533_v47 = vrot.slane %v4532_v54, 4  ;;  %v4569_v16 = vshll.u32 %v11821_v48, 16  ;;  %v11846_v21 = vld [vmem:[#allocation2 + $0x5c] sm:$0x1] }
 0x193   : > { %v4543_v30 = vrot.slane %v4542_v23, 4  ;;  %v4576_v22 = vrot.slane %v4574_v40, 4  ;;  %v11834_v51 = vrot.slane %v4583_v1, 5  ;;  %v4566_v46 = vor.u32 %v4565_v57, %v11823_v32  ;;  %v4429_v1 = vld [vmem:[#allocation2 + $0x78] sm:$0xf] }
 0x194   : > { %v4589_v25 = vrot.slane %v4587_v43, 4  ;;  %v4622_v19 = vshrl.u32 %v4426_v53, 16  ;;  %v4625_v54 = vshll.u32 %v4426_v53, 16  ;;  %v4538_v10 = vsel %vm10748_vm12, %v4533_v47, %v11782_v34 }
 0x195   : > { %9765 = vmatmul.mubr.msk.bf16.gmra.mrb[12].mxu0 %vm1529_vm8, %v10253_v8  ;;  %9633 = vmatmul.mubr.msk.bf16.gmra.mrb[16].mxu1 %vm1529_vm8, %v8903_v29  ;;  %v11815_v29 = vrot.slane %v4521_v50, 5  ;;  %v4607_v8 = vshll.u32 %v11819_v2, 16  ;;  %v4547_v50 = vrot.slane %v4545_v5, 5  ;;  %v4613_v5 = vrot.slane %v4611_v20, 4  ;;  %v11866_v20 = vld [vmem:[#allocation2 + $0x74] sm:$0x1] }
 0x196   : > { %9768 = vmatprep.mubr.msk.bf16.mxu0 %vm1529_vm8, %v10254_v18  ;;  %9636 = vmatprep.mubr.msk.bf16.mxu1 %vm1529_vm8, %v8904_v13  ;;  %v4577_v13 = vshll.u32 %v4420_v45, 16  ;;  %v4556_v18 = vor.u32 %v4555_v38, %v4552_v11  ;;  %v4603_v45 = vrot.slane %v4601_v62, 5  ;;  %v4631_v23 = vshll.u32 %v11836_v15, 16 }
 0x197   : > { %v11848_v9 = vrot.slane %v4607_v8, 5  ;;  %v4524_v52 = vsel %vm10748_vm12, %v4519_v41, %v11815_v29  ;;  %v4548_v11 = vsel %vm10748_vm12, %v4543_v30, %v4547_v50  ;;  %v4571_v40 = vrot.slane %v4569_v16, 5 }
 0x198   : > { %v4579_v3 = vrot.slane %v4577_v13, 5  ;;  %v4557_v38 = vrot.slane %v4556_v18, 4  ;;  %v4567_v57 = vrot.slane %v4566_v46, 4  ;;  %v4590_v29 = vor.u32 %v4589_v25, %v11834_v51  ;;  %v11879_v46 = vld [vmem:[#allocation2 + $0x7c] sm:$0xf] }
 0x199   : > { %v4593_v43 = vshll.u32 %v11846_v21, 16  ;;  %v4604_v34 = vor.u32 %v4603_v45, %v4600_v31  ;;  %v4614_v62 = vor.u32 %v4613_v5, %v11848_v9  ;;  %v4624_v41 = vrot.slane %v4622_v19, 4  ;;  %v11904_v19 = vld [vmem:[#allocation2 + $0x88] sm:$0xf] }
 0x19a   : > { %v4580_v13 = vor.u32 %v4579_v3, %v4576_v22  ;;  %v4627_v8 = vrot.slane %v4625_v54, 5  ;;  %v11868_v47 = vrot.slane %v4631_v23, 5  ;;  %v4646_v18 = vshrl.u32 %v4429_v1, 16 }
 0x19b   : > { %v4649_v16 = vshll.u32 %v4429_v1, 16  ;;  %v11870_v53 = vcombine.low %v4514_v59, %v4524_v52  ;;  %v11872_v30 = vcombine.low %v4538_v10, %v4548_v11  ;;  %v4562_v22 = vsel %vm10748_vm12, %v4557_v38, %v11823_v32  ;;  %v4432_v32 = vld [vmem:[#allocation2 + $0x84] sm:$0xf]  ;;  %v5133_v11 = vld [vmem:[#allocation2 + $0x30] sm:$0xe]  ;;  %v10259_v38 = vld [vmem:[#allocation2 + $0xb4] sm:$0xff]  }
 0x19c   : > { %v11877_v3 = vrot.slane %v4580_v13, 4  ;;  %v4572_v59 = vsel %vm10748_vm12, %v4567_v57, %v4571_v40  ;;  %v11888_v25 = vrot.slane %v4590_v29, 4  ;;  %v11890_v31 = vrot.slane %v4593_v43, 5  ;;  %v10260_v40 = vld [vmem:[#allocation2 + $0xc0] sm:$0xff]   ;;  %v10262_v29 = vld [vmem:[#allocation2 + $0xc] sm:$0xff]  }
 0x19d   : > { %9769 = vmatmul.mubr.msk.bf16.gmra.mrb[16].mxu0 %vm1529_vm8, %v10255_v61  ;;  %9637 = vmatmul.mubr.msk.bf16.gmra.mrb[20].mxu1 %vm1529_vm8, %v8905_v49  ;;  %v11856_v49 = vld [vmem:[#allocation2 + $0x68] sm:$0x1]  ;;  %v10257_v61 = vld [vmem:[#allocation2 + $0x9c] sm:$0xff]   ;;  %v11892_v45 = vrot.slane %v4604_v34, 4  ;;  %v11899_v17 = vrot.slane %v4614_v62, 4  ;;  %v4641_v5 = vshll.u32 %v11866_v20, 16  ;;  %v11912_v0 = vcombine.low %v4562_v22, %v4572_v59 }
 0x19e   : > { %9772 = vmatprep.mubr.msk.bf16.mxu0 %vm1529_vm8, %v10256_v56  ;;  %9640 = vmatprep.mubr.msk.bf16.mxu1 %vm1529_vm8, %v8906_v37  ;;  %v4635_v37 = vshrl.u32 %v11836_v15, 16  ;;  %v4617_v56 = vshll.u32 %v11856_v49, 16  ;;  %v11907_v52 = vrot.slane %v4646_v18, 4  ;;  %v11909_v10 = vrot.slane %v4649_v16, 5  ;;  %v12065_v13 = vld [vmem:[#allocation2 + $0xa4] sm:$0x1] }
 0x19f   : > { %v4655_v23 = vshll.u32 %v11879_v46, 16  ;;  %v4679_v57 = vshll.u32 %v11904_v19, 16  ;;  %v4683_v62 = vshrl.u32 %v11904_v19, 16  ;;  %v9109_v18 = vrot.slane %v5133_v11, 9 }
 0x1a0   : > { %v4637_v50 = vrot.slane %v4635_v37, 4  ;;  %v11901_v39 = vrot.slane %v4617_v56, 5  ;;  %v4670_v37 = vshrl.u32 %v4432_v32, 16  ;;  %v5134_v56 = vld [vmem:[#allocation2 + $0x3c] sm:$0xe]  ;;  %v5211_v59 = vrot.slane %v11728_v7, 5 }
 0x1a1   : > { %v11961_v7 = vrot.slane %v4683_v62, 4  ;;  %v5221_v60 = vrot.slane %v11780_v36, 5  ;;  %v5137_v62 = vld [vmem:[#allocation2 + $0x60] sm:$0xe]  ;;  %v10263_v36 = vld [vmem:[#allocation2 + $0x18] sm:$0xff]  }
 0x1a2   : > { %v4638_v54 = vor.u32 %v4637_v50, %v11868_v47  ;;  %v11941_v50 = vrot.slane %v4655_v23, 5  ;;  %v11945_v22 = vrot.slane %v4670_v37, 4  ;;  %v9110_v23 = vrot.slane %v5134_v56, 9  ;;  %v5136_v37 = vld [vmem:[#allocation2 + $0x54] sm:$0xe]  ;;  %v10261_v56 = vld [vmem:[#allocation2 + $0xcc] sm:$0xff]  }
 0x1a3   : > { %v5213_v55 = vrot.slane %v5211_v59, 4 }
 0x1a5   : > { %9773 = vmatmul.mubr.msk.bf16.gmra.mrb[20].mxu0 %vm1529_vm8, %v10257_v61  ;;  %9641 = vmatmul.mubr.msk.bf16.gmra.mrb[24].mxu1 %vm1529_vm8, %v8907_v42  ;;  %v4628_v42 = vor.u32 %v4627_v8, %v4624_v41  ;;  %v4673_v61 = vshll.u32 %v4432_v32, 16  ;;  %v11937_v41 = vrot.slane %v4638_v54, 4  ;;  %v5214_v32 = vrot.slane %v11745_v12, 5 }
 0x1a6   : > { %9776 = vmatprep.mubr.msk.bf16.mxu0 %vm1529_vm8, %v10258_v44  ;;  %9644 = vmatprep.mubr.msk.bf16.mxu1 %vm1529_vm8, %v8908_v24  ;;  %v4659_v24 = vshrl.u32 %v11879_v46, 16  ;;  %v11934_v44 = vrot.slane %v4641_v5, 5  ;;  %v11956_v54 = vrot.slane %v4679_v57, 5  ;;  %v11965_v12 = vsel %vm11266_vm15, %v9109_v18, %v5211_v59  ;;  %v5140_v18 = vld [vmem:[#allocation2 + $0x84] sm:$0xe] }
 0x1a7   : > { %v11932_v34 = vrot.slane %v4628_v42, 4  ;;  %v5135_v42 = vld [vmem:[#allocation2 + $0x48] sm:$0xe]  ;;  %v11954_v5 = vrot.slane %v4673_v61, 5  ;;  %v5228_v61 = vrot.slane %v11821_v48, 5  ;;  %v9112_v57 = vrot.slane %v5136_v37, 9 }
 0x1a8   : > { %v11943_v16 = vrot.slane %v4659_v24, 4  ;;  %v5218_v24 = vrot.slane %v11731_v26, 5  ;;  %v9111_v26 = vrot.slane %v5135_v42, 9  ;;  %v5138_v42 = vld [vmem:[#allocation2 + $0x6c] sm:$0xe]  ;;  %v10264_v48 = vld [vmem:[#allocation2 + $0x24] sm:$0xff]  }
 0x1a9   : > { %v5235_v37 = vrot.slane %v11846_v21, 5  ;;  %v5246_v21 = vrot.slane %v11836_v15, 5  ;;  %v12023_v15 = vld [vmem:[#allocation2 + $0x8c] sm:$0x1] }
 0x1aa   : > { %v5220_v11 = vrot.slane %v5218_v24, 4 }
 0x1ac   : > { %v11983_v59 = vsel %vm11266_vm15, %v5220_v11, %v5221_v60  ;;  %v9113_v60 = vrot.slane %v5137_v62, 9  ;;  %v5239_v11 = vrot.slane %v11819_v2, 5  ;;  %v12036_v2 = vld [vmem:[#allocation2 + $0x94] sm:$0xf] }
 0x1ad   : > { %9777 = vmatmul.mubr.msk.bf16.gmra.mrb[24].mxu0 %vm1529_vm8, %v10259_v38  ;;  %9645 = vmatmul.mubr.msk.bf16.gmra.mrb[28].mxu1 %vm1529_vm8, %v8909_v33  ;;  %v11970_v33 = vsel %vm11266_vm15, %v9110_v23, %v5218_v24  ;;  %v5225_v38 = vrot.slane %v11776_v28, 5  ;;  %v5267_v1 = vrot.slane %v12036_v2, 5 }
 0x1ae   : > { %9780 = vmatprep.mubr.msk.bf16.mxu0 %vm1529_vm8, %v10260_v40  ;;  %9650 = vmatprep.mubr.msk.bf16.mxu1 %vm1529_vm8, %v10262_v29  ;;  %v11975_v40 = vsel %vm11266_vm15, %v5213_v55, %v5214_v32  ;;  %v5232_v29 = vrot.slane %v11805_v4, 5  ;;  %v5241_v62 = vrot.slane %v5239_v11, 4 }
 0x1af   : > { %v11987_v28 = vsel %vm11266_vm15, %v9111_v26, %v5225_v38  ;;  %v5227_v32 = vrot.slane %v5225_v38, 4  ;;  %v5242_v26 = vrot.slane %v11856_v49, 5  ;;  %v5139_v38 = vld [vmem:[#allocation2 + $0x78] sm:$0xe]  ;;  %v12017_v49 = vsel %vm11266_vm15, %v9113_v60, %v5239_v11  ;;  %v10265_v11 = vld [vmem:[#allocation2 + $0x30] sm:$0xff]  }
 0x1b0   : > { %v11993_v23 = vsel %vm11266_vm15, %v9112_v57, %v5232_v29  ;;  %v5234_v24 = vrot.slane %v5232_v29, 4  ;;  %v9114_v29 = vrot.slane %v5138_v42, 9  ;;  %14909 = vst [vmem:[#allocation18_spill] sm:$0xff] %v12017_v49  ;;  %v9115_v42 = vrot.slane %v5139_v38, 9 }
 0x1b1   : > { %14907 = vst [vmem:[#allocation17_spill] sm:$0xff] %v11993_v23  ;;  %v11998_v55 = vsel %vm11266_vm15, %v5227_v32, %v5228_v61  ;;  %v12011_v61 = vld [vmem:[#allocation2 + $0x80] sm:$0x1]  ;;  %v5249_v32 = vrot.slane %v11866_v20, 5  ;;  %v9116_v60 = vrot.slane %v5140_v18, 9 }
 0x1b2   : > { %v12006_v57 = vsel %vm11266_vm15, %v5234_v24, %v5235_v37  ;;  %v5253_v24 = vrot.slane %v11879_v46, 5  ;;  %v12032_v37 = vsel %vm11266_vm15, %v5241_v62, %v5242_v26  ;;  %v5256_v20 = vrot.slane %v12011_v61, 5  ;;  %v12048_v18 = vld [vmem:[#allocation2 + $0x98] sm:$0x1] }
 0x1b3   : > { %14908 = vst [vmem:[#allocation16_spill] sm:$0xff] %v12006_v57  ;;  %14911 = vst [vmem:[#allocation20_spill] sm:$0xff] %v12032_v37  ;;  %v5270_v43 = vrot.slane %v12048_v18, 5 }
 0x1b4   : > { %v12046_v46 = vsel %vm11266_vm15, %v9115_v42, %v5253_v24  ;;  %v5255_v26 = vrot.slane %v5253_v24, 4 }
 0x1b5   : > { %9781 = vmatmul.mubr.msk.bf16.gmra.mrb[28].mxu0 %vm1529_vm8, %v10261_v56  ;;  %9651 = vmatmul.mubr.msk.bf16.vlgmr.msra.gmra.mrb[0].mxu1 %vm1529_vm8, %v10263_v36  ;;  %v12027_v56 = vsel %vm11266_vm15, %v9114_v29, %v5246_v21  ;;  %v5248_v36 = vrot.slane %v5246_v21, 4  ;;  %14913 = vst [vmem:[#allocation22_spill] sm:$0xff] %v12046_v46  ;;  %v5142_v21 = vld [vmem:[#allocation2 + $0x9c] sm:$0xe]  ;;  %v12119_v46 = vld [vmem:[#allocation2 + $0xc8] sm:$0x1] }
 0x1b6   : > { %9786 = vmatprep.mubr.msk.bf16.mxu0 %vm1529_vm8, %v11796_v14  ;;  %9654 = vmatprep.mubr.msk.bf16.mxu1 %vm1529_vm8, %v10264_v48  ;;  %14910 = vst [vmem:[#allocation19_spill] sm:$0xff] %v12027_v56  ;;  %v5260_v14 = vrot.slane %v11904_v19, 5  ;;  %v5141_v48 = vld [vmem:[#allocation2 + $0x90] sm:$0xe]  ;;  %v12050_v19 = vld [vmem:[#allocation2 + $0xa0] sm:$0xf]  ;;  %v12061_v42 = vsel %vm11266_vm15, %v5255_v26, %v5256_v20 }
 0x1b7   : > { %v12042_v38 = vsel %vm11266_vm15, %v5248_v36, %v5249_v32  ;;  %v5263_v32 = vrot.slane %v12023_v15, 5  ;;  %v10266_v36 = vld [vmem:[#allocation2 + $0x3c] sm:$0xff]   ;;  %14915 = vst [vmem:[#allocation24_spill] sm:$0xff] %v12061_v42  ;;  %v9117_v24 = vrot.slane %v5141_v48, 9  ;;  %v9118_v62 = vrot.slane %v5142_v21, 9 }
 0x1b8   : > { %14912 = vst [vmem:[#allocation21_spill] sm:$0xff] %v12042_v38  ;;  %v12056_v29 = vsel %vm11266_vm15, %v9116_v60, %v5260_v14  ;;  %v5262_v4 = vrot.slane %v5260_v14, 4  ;;  %v5274_v8 = vrot.slane %v12050_v19, 5  ;;  %v5144_v20 = vld [vmem:[#allocation2 + $0xb4] sm:$0xe]  ;;  %v5269_v60 = vrot.slane %v5267_v1, 4 }
 0x1b9   : > { %14914 = vst [vmem:[#allocation23_spill] sm:$0xff] %v12056_v29  ;;  %v12074_v26 = vld [vmem:[#allocation2 + $0xac] sm:$0xf]  ;;  %v12076_v48 = vld [vmem:[#allocation2 + $0xb8] sm:$0xf]  ;;  %v12082_v56 = vsel %vm11266_vm15, %v9117_v24, %v5267_v1  ;;  %v5277_v42 = vrot.slane %v12065_v13, 5 }
 0x1ba   : > { %v12071_v14 = vsel %vm11266_vm15, %v5262_v4, %v5263_v32  ;;  %14917 = vst [vmem:[#allocation26_spill] sm:$0xff] %v12082_v56  ;;  %v12088_v4 = vld [vmem:[#allocation2 + $0xb0] sm:$0x1]  ;;  %v12092_v21 = vsel %vm11266_vm15, %v9118_v62, %v5274_v8  ;;  %v5276_v32 = vrot.slane %v5274_v8, 4  ;;  %v9119_v38 = vrot.slane %v5143_v27, 9  ;;  %v10267_v27 = vld [vmem:[#allocation2 + $0x48] sm:$0xff]  }
 0x1bb   : > { %14916 = vst [vmem:[#allocation25_spill] sm:$0xff] %v12071_v14  ;;  %14918 = vst [vmem:[#allocation27_spill] sm:$0xff] %v12092_v21  ;;  %v5281_v14 = vrot.slane %v12074_v26, 5  ;;  %v5284_v1 = vrot.slane %v12088_v4, 5  ;;  %v5288_v24 = vrot.slane %v12076_v48, 5  ;;  %v5298_v49 = vrot.slane %v12119_v46, 5 }
 0x1bc   : > { %v5145_v62 = vld [vmem:[#allocation2 + $0xc0] sm:$0xe]  ;;  %v12105_v8 = vld [vmem:[#allocation2 + $0xbc] sm:$0x1]  ;;  %v12117_v29 = vld [vmem:[#allocation2 + $0xc4] sm:$0xf] }
 0x1bd   : > { %9787 = vmatmul.mubr.msk.bf16.vlgmr.msra.gmra.mrb[0].mxu0 %vm1529_vm8, %v11798_v58  ;;  %9655 = vmatmul.mubr.msk.bf16.gmra.mrb[4].mxu1 %vm1529_vm8, %v10265_v11  ;;  %v12100_v58 = vsel %vm11266_vm15, %v5269_v60, %v5270_v43  ;;  %v9120_v11 = vrot.slane %v5144_v20, 9  ;;  %v12115_v43 = vsel %vm11266_vm15, %v9119_v38, %v5281_v14  ;;  %v5283_v60 = vrot.slane %v5281_v14, 4  ;;  %v5146_v20 = vld [vmem:[#allocation2 + $0xcc] sm:$0xe]  ;;  %v12128_v56 = vld [vmem:[#allocation2 + $0xd0] sm:$0xf] }
 0x1be   : > { %9819 = vmatpush3.bf16.msra.mxu0 %v11802_v63  ;;  %9790 = vmatprep.mubr.msk.bf16.mxu0 %vm1529_vm8, %v11870_v53  ;;  %14919 = vst [vmem:[#allocation28_spill] sm:$0xff] %v12100_v58  ;;  %v12111_v53 = vsel %vm11266_vm15, %v5276_v32, %v5277_v42  ;;  %v5290_v58 = vrot.slane %v5288_v24, 4  ;;  %v5291_v42 = vrot.slane %v12105_v8, 5  ;;  %v10268_v32 = vld [vmem:[#allocation2 + $0x54] sm:$0xff]   ;;  %v9121_v14 = vrot.slane %v5145_v62, 9 }
 0x1bf   : > { %9658 = vmatprep.mubr.msk.bf16.mxu1 %vm1529_vm8, %v10266_v36  ;;  %14920 = vst [vmem:[#allocation29_spill] sm:$0xff] %v12111_v53  ;;  %v12125_v63 = vsel %vm11266_vm15, %v9120_v11, %v5288_v24  ;;  %v12132_v38 = vsel %vm11266_vm15, %v5283_v60, %v5284_v1  ;;  %v5295_v37 = vrot.slane %v12117_v29, 5  ;;  %v4435_v36 = vld [vmem:[#allocation2 + $0x90] sm:$0xf]  ;;  %v12136_v53 = vld [vmem:[#allocation2 + $0xd4] sm:$0x1]  ;;  %v14922_v11 = vor.u32 %v11909_v10, %v11907_v52 }
 0x1c0   : > { %14921 = vst [vmem:[#allocation30_spill] sm:$0xff] %v12132_v38  ;;  %v12142_v24 = vsel %vm11266_vm15, %v5290_v58, %v5291_v42  ;;  %v9122_v21 = vrot.slane %v5146_v20, 9  ;;  %v5302_v57 = vrot.slane %v12128_v56, 5  ;;  %v5305_v23 = vrot.slane %v12136_v53, 5  ;;  %v14930_v35 = vld [vmem:[#allocation17_spill] sm:$0xff] }
 0x1c1   : > { %v12149_v62 = vsel %vm11266_vm15, %v9121_v14, %v5295_v37  ;;  %v5297_v60 = vrot.slane %v5295_v37, 4  ;;  %v12155_v38 = vrot.slane %v14922_v11, 4  ;;  %v4665_v58 = vshll.u32 %v12011_v61, 16  ;;  %v10270_v11 = vld [vmem:[#allocation2 + $0x6c] sm:$0xff]  }
 0x1c2   : > { %v12160_v20 = vsel %vm11266_vm15, %v9122_v21, %v5302_v57  ;;  %v5304_v42 = vrot.slane %v5302_v57, 4  ;;  %v4662_v37 = vor.u32 %v11943_v16, %v11941_v50  ;;  %v4694_v14 = vshrl.u32 %v4435_v36, 16  ;;  %v4438_v21 = vld [vmem:[#allocation2 + $0x9c] sm:$0xf] }
 0x1c3   : > { %v4697_v1 = vshll.u32 %v4435_v36, 16  ;;  %v12169_v52 = vsel %vm11266_vm15, %v5297_v60, %v5298_v49  ;;  %v4703_v10 = vshll.u32 %v12036_v2, 16  ;;  %v4676_v61 = vor.u32 %v11954_v5, %v11945_v22  ;;  %v10269_v5 = vld [vmem:[#allocation2 + $0x60] sm:$0xff]  }
 0x1c4   : > { %v9138_v57 = vcombine.low %v12149_v62, %v12169_v52  ;;  %v12180_v16 = vsel %vm11266_vm15, %v5304_v42, %v5305_v23  ;;  %v4686_v49 = vor.u32 %v11961_v7, %v11956_v54  ;;  %v14924_v23 = vsel %vm10748_vm12, %v11877_v3, %v11834_v51 }
 0x1c5   : > { %9791 = vmatmul.mubr.msk.bf16.gmra.mrb[4].mxu0 %vm1529_vm8, %v11872_v30  ;;  %9659 = vmatmul.mubr.msk.bf16.gmra.mrb[8].mxu1 %vm1529_vm8, %v10267_v27  ;;  %v4707_v30 = vshrl.u32 %v12036_v2, 16  ;;  %v9139_v27 = vcombine.low %v12160_v20, %v12180_v16  ;;  %v14923_v2 = vsel %vm10748_vm12, %v11888_v25, %v11890_v31  ;;  %v14925_v7 = vsel %vm10748_vm12, %v11899_v17, %v11901_v39  ;;  %v4441_v39 = vld [vmem:[#allocation2 + $0xa8] sm:$0xf] }
 0x1c6   : > { %9794 = vmatprep.mubr.msk.bf16.mxu0 %vm1529_vm8, %v11912_v0  ;;  %9662 = vmatprep.mubr.msk.bf16.mxu1 %vm1529_vm8, %v10268_v32  ;;  %v4689_v0 = vshll.u32 %v12023_v15, 16  ;;  %v9080_v22 = vcombine.low %v14924_v23, %v14923_v2  ;;  %v14926_v15 = vsel %vm10748_vm12, %v11892_v45, %v11848_v9  ;;  %v4634_v25 = vsel %vm10748_vm12, %v11932_v34, %v11868_v47 }
 0x1c7   : > { %v9081_v36 = vcombine.low %v14926_v15, %v14925_v7  ;;  %v4644_v51 = vsel %vm10748_vm12, %v11937_v41, %v11934_v44  ;;  %v4663_v3 = vrot.slane %v4662_v37, 4  ;;  %v4667_v31 = vrot.slane %v4665_v58, 5  ;;  %v10271_v7 = vld [vmem:[#allocation2 + $0x78] sm:$0xff]  }
 0x1c8   : > { %v4696_v32 = vrot.slane %v4694_v14, 4  ;;  %v4699_v17 = vrot.slane %v4697_v1, 5  ;;  %v12217_v60 = vrot.slane %v4703_v10, 5  ;;  %v4709_v9 = vrot.slane %v4707_v30, 4 }
 0x1c9   : > { %v4718_v45 = vshrl.u32 %v4438_v21, 16  ;;  %v4721_v42 = vshll.u32 %v4438_v21, 16  ;;  %v4658_v47 = vsel %vm10748_vm12, %v12155_v38, %v11941_v50  ;;  %v4677_v34 = vrot.slane %v4676_v61, 4 }
 0x1ca   : > { %v4687_v2 = vrot.slane %v4686_v49, 4  ;;  %v4691_v23 = vrot.slane %v4689_v0, 5  ;;  %v4727_v44 = vshll.u32 %v12050_v19, 16  ;;  %v4731_v41 = vshrl.u32 %v12050_v19, 16 }
 0x1cb   : > { %v4742_v1 = vshrl.u32 %v4441_v39, 16  ;;  %v4745_v58 = vshll.u32 %v4441_v39, 16  ;;  %v4668_v37 = vsel %vm10748_vm12, %v4663_v3, %v4667_v31  ;;  %v4713_v14 = vshll.u32 %v12048_v18, 16 }
 0x1cc   : > { %v4751_v50 = vshll.u32 %v12074_v26, 16  ;;  %v4755_v38 = vshrl.u32 %v12074_v26, 16  ;;  %v4700_v19 = vor.u32 %v4699_v17, %v4696_v32  ;;  %v4710_v10 = vor.u32 %v4709_v9, %v12217_v60  ;;  %v4444_v32 = vld [vmem:[#allocation2 + $0xb4] sm:$0xf] }
 0x1cd   : > { %9795 = vmatmul.mubr.msk.bf16.gmra.mrb[8].mxu0 %vm1529_vm8, %v9080_v22  ;;  %9663 = vmatmul.mubr.msk.bf16.gmra.mrb[12].mxu1 %vm1529_vm8, %v10269_v5  ;;  %v4720_v30 = vrot.slane %v4718_v45, 4  ;;  %v4723_v61 = vrot.slane %v4721_v42, 5  ;;  %v9082_v49 = vcombine.low %v4634_v25, %v4644_v51  ;;  %v4682_v0 = vsel %vm10748_vm12, %v4677_v34, %v11956_v54  ;;  %v10272_v25 = vld [vmem:[#allocation2 + $0x84] sm:$0xff]  }
 0x1ce   : > { %9798 = vmatprep.mubr.msk.bf16.mxu0 %vm1529_vm8, %v9081_v36  ;;  %9666 = vmatprep.mubr.msk.bf16.mxu1 %vm1529_vm8, %v10270_v11  ;;  %v4692_v18 = vsel %vm10748_vm12, %v4687_v2, %v4691_v23  ;;  %v12240_v21 = vrot.slane %v4727_v44, 5  ;;  %v4733_v26 = vrot.slane %v4731_v41, 4  ;;  %v4744_v22 = vrot.slane %v4742_v1, 4  ;;  %v4447_v2 = vld [vmem:[#allocation2 + $0xc0] sm:$0xf] }
 0x1cf   : > { %v4747_v5 = vrot.slane %v4745_v58, 5  ;;  %v9083_v15 = vcombine.low %v4658_v47, %v4668_v37  ;;  %v4715_v36 = vrot.slane %v4713_v14, 5  ;;  %v12242_v3 = vrot.slane %v4751_v50, 5 }
 0x1d0   : > { %v4757_v31 = vrot.slane %v4755_v38, 4  ;;  %v4701_v51 = vrot.slane %v4700_v19, 4  ;;  %v4711_v17 = vrot.slane %v4710_v10, 4  ;;  %v4724_v39 = vor.u32 %v4723_v61, %v4720_v30  ;;  %v10273_v61 = vld [vmem:[#allocation2 + $0x90] sm:$0xff]  }
 0x1d1   : > { %v4737_v54 = vshll.u32 %v12065_v13, 16  ;;  %v9084_v11 = vcombine.low %v4682_v0, %v4692_v18  ;;  %v4734_v9 = vor.u32 %v4733_v26, %v12240_v21  ;;  %v4748_v45 = vor.u32 %v4747_v5, %v4744_v22  ;;  %v10274_v22 = vld [vmem:[#allocation2 + $0x9c] sm:$0xff]  }
 0x1d2   : > { %v4761_v42 = vshll.u32 %v12088_v4, 16  ;;  %v4766_v34 = vshrl.u32 %v4444_v32, 16  ;;  %v4758_v47 = vor.u32 %v4757_v31, %v12242_v3  ;;  %v4769_v23 = vshll.u32 %v4444_v32, 16  ;;  %v4450_v31 = vld [vmem:[#allocation2 + $0xcc] sm:$0xf] }
 0x1d3   : > { %v4775_v44 = vshll.u32 %v12076_v48, 16  ;;  %v4779_v41 = vshrl.u32 %v12076_v48, 16  ;;  %v4706_v13 = vsel %vm10748_vm12, %v4701_v51, %v12217_v60  ;;  %v4716_v4 = vsel %vm10748_vm12, %v4711_v17, %v4715_v36 }
 0x1d4   : > { %v4725_v1 = vrot.slane %v4724_v39, 4  ;;  %v4739_v58 = vrot.slane %v4737_v54, 5  ;;  %v4790_v37 = vshrl.u32 %v4447_v2, 16  ;;  %v4793_v14 = vshll.u32 %v4447_v2, 16 }
 0x1d5   : > { %9799 = vmatmul.mubr.msk.bf16.gmra.mrb[12].mxu0 %vm1529_vm8, %v9082_v49  ;;  %9667 = vmatmul.mubr.msk.bf16.gmra.mrb[16].mxu1 %vm1529_vm8, %v10271_v7  ;;  %v4799_v50 = vshll.u32 %v12117_v29, 16  ;;  %v4803_v38 = vshrl.u32 %v12117_v29, 16  ;;  %v4735_v48 = vrot.slane %v4734_v9, 4  ;;  %v4749_v19 = vrot.slane %v4748_v45, 4 }
 0x1d6   : > { %9802 = vmatprep.mubr.msk.bf16.mxu0 %vm1529_vm8, %v9083_v15  ;;  %9670 = vmatprep.mubr.msk.bf16.mxu1 %vm1529_vm8, %v10272_v25  ;;  %v4763_v10 = vrot.slane %v4761_v42, 5  ;;  %v4768_v30 = vrot.slane %v4766_v34, 4  ;;  %v4759_v49 = vrot.slane %v4758_v47, 4  ;;  %v4771_v0 = vrot.slane %v4769_v23, 5  ;;  %v10275_v47 = vld [vmem:[#allocation2 + $0xa8] sm:$0xff]  }
 0x1d7   : > { %v4777_v18 = vrot.slane %v4775_v44, 5  ;;  %v4781_v60 = vrot.slane %v4779_v41, 4  ;;  %v9085_v26 = vcombine.low %v4706_v13, %v4716_v4  ;;  %v4792_v5 = vrot.slane %v4790_v37, 4  ;;  %v10276_v13 = vld [vmem:[#allocation2 + $0xb4] sm:$0xff]  }
 0x1d8   : > { %v4795_v7 = vrot.slane %v4793_v14, 5  ;;  %v4801_v15 = vrot.slane %v4799_v50, 5  ;;  %v4805_v36 = vrot.slane %v4803_v38, 4  ;;  %v4730_v29 = vsel %vm10748_vm12, %v4725_v1, %v12240_v21 }
 0x1d9   : > { %v4740_v32 = vsel %vm10748_vm12, %v4735_v48, %v4739_v58  ;;  %v4754_v25 = vsel %vm10748_vm12, %v4749_v19, %v12242_v3  ;;  %v4764_v51 = vsel %vm10748_vm12, %v4759_v49, %v4763_v10  ;;  %v4772_v17 = vor.u32 %v4771_v0, %v4768_v30  ;;  %v10347_v49 = vld [vmem:[#allocation2 + $0x1c] sm:$0xf] }
 0x1da   : > { %v4782_v39 = vor.u32 %v4781_v60, %v4777_v18  ;;  %v4785_v54 = vshll.u32 %v12105_v8, 16  ;;  %v4814_v21 = vshrl.u32 %v4450_v31, 16  ;;  %v4817_v9 = vshll.u32 %v4450_v31, 16 }
 0x1db   : > { %v4823_v45 = vshll.u32 %v12128_v56, 16  ;;  %v4827_v3 = vshrl.u32 %v12128_v56, 16  ;;  %v4806_v42 = vor.u32 %v4805_v36, %v4801_v15  ;;  %v4809_v34 = vshll.u32 %v12119_v46, 16 }
 0x1dc   : > { %v9086_v2 = vcombine.low %v4730_v29, %v4740_v32  ;;  %v9087_v23 = vcombine.low %v4754_v25, %v4764_v51  ;;  %v4773_v44 = vrot.slane %v4772_v17, 4  ;;  %v4783_v41 = vrot.slane %v4782_v39, 4  ;;  %v10348_v32 = vld [vmem:[#allocation2 + $0x20] sm:$0x1]  ;;  %v10349_v51 = vld [vmem:[#allocation2 + $0x28] sm:$0xf] }
 0x1dd   : > { %9803 = vmatmul.mubr.msk.bf16.gmra.mrb[16].mxu0 %vm1529_vm8, %v9084_v11  ;;  %9671 = vmatmul.mubr.msk.bf16.gmra.mrb[20].mxu1 %vm1529_vm8, %v10273_v61  ;;  %v4796_v11 = vor.u32 %v4795_v7, %v4792_v5  ;;  %v4787_v8 = vrot.slane %v4785_v54, 5  ;;  %v4816_v4 = vrot.slane %v4814_v21, 4  ;;  %v4819_v1 = vrot.slane %v4817_v9, 5  ;;  %v5132_v21 = vld [vmem:[#allocation2 + $0x24] sm:$0xe] }
 0x1de   : > { %9806 = vmatprep.mubr.msk.bf16.mxu0 %vm1529_vm8, %v9085_v26  ;;  %9674 = vmatprep.mubr.msk.bf16.mxu1 %vm1529_vm8, %v10274_v22  ;;  %v4825_v58 = vrot.slane %v4823_v45, 5  ;;  %v4829_v37 = vrot.slane %v4827_v3, 4  ;;  %v4807_v50 = vrot.slane %v4806_v42, 4  ;;  %v4811_v38 = vrot.slane %v4809_v34, 5  ;;  %v10277_v26 = vld [vmem:[#allocation2 + $0xc0] sm:$0xff]  }
 0x1df   : > { %v4797_v14 = vrot.slane %v4796_v11, 4  ;;  %v4778_v56 = vsel %vm10748_vm12, %v4773_v44, %v4777_v18  ;;  %v4788_v46 = vsel %vm10748_vm12, %v4783_v41, %v4787_v8  ;;  %v4820_v48 = vor.u32 %v4819_v1, %v4816_v4  ;;  %v5131_v18 = vld [vmem:[#allocation2 + $0x18] sm:$0xe]  ;;  %v10350_v42 = vld [vmem:[#allocation2 + $0x2c] sm:$0x1] }
 0x1e0   : > { %v4830_v19 = vor.u32 %v4829_v37, %v4825_v58  ;;  %v4833_v10 = vshll.u32 %v12136_v53, 16  ;;  %v4812_v61 = vsel %vm10748_vm12, %v4807_v50, %v4811_v38  ;;  %v5197_v0 = vrot.slane %v10347_v49, 5  ;;  %v14931_v8 = vld [vmem:[#allocation16_spill] sm:$0xff]  ;;  %v14933_v4 = vld [vmem:[#allocation18_spill] sm:$0xff]  ;;  %v14943_v50 = vld [vmem:[#allocation23_spill] sm:$0xff] }
 0x1e1   : > { %v4802_v30 = vsel %vm10748_vm12, %v4797_v14, %v4801_v15  ;;  %v9088_v60 = vcombine.low %v4778_v56, %v4788_v46  ;;  %v4821_v5 = vrot.slane %v4820_v48, 4  ;;  %v9107_v31 = vrot.slane %v5131_v18, 9  ;;  %v14934_v1 = vld [vmem:[#allocation20_spill] sm:$0xff]  ;;  %v14944_v38 = vld [vmem:[#allocation25_spill] sm:$0xff]  ;;  %v14946_v46 = vld [vmem:[#allocation26_spill] sm:$0xff] }
 0x1e2   : > { %v9089_v22 = vcombine.low %v4802_v30, %v4812_v61  ;;  %v4831_v7 = vrot.slane %v4830_v19, 4  ;;  %v4835_v36 = vrot.slane %v4833_v10, 5  ;;  %v5199_v29 = vrot.slane %v5197_v0, 4  ;;  %v14947_v48 = vld [vmem:[#allocation28_spill] sm:$0xff]  ;;  %v14949_v10 = vld [vmem:[#allocation27_spill] sm:$0xff]  ;;  %v14950_v30 = vld [vmem:[#allocation29_spill] sm:$0xff] }
 0x1e3   : > { %v5200_v25 = vrot.slane %v10348_v32, 5  ;;  %v4826_v53 = vsel %vm10748_vm12, %v4821_v5, %v4825_v58  ;;  %v5204_v17 = vrot.slane %v10349_v51, 5  ;;  %v5198_v39 = vsel %vm11266_vm15, %v9107_v31, %v5197_v0  ;;  %v14941_v58 = vld [vmem:[#allocation24_spill] sm:$0xff]  ;;  %v14952_v49 = vld [vmem:[#allocation30_spill] sm:$0xff] }
 0x1e4   : > { %v4836_v15 = vsel %vm10748_vm12, %v4831_v7, %v4835_v36  ;;  %v9108_v3 = vrot.slane %v5132_v21, 9  ;;  %v5207_v34 = vrot.slane %v10350_v42, 5  ;;  %v14928_v44 = vcombine.low %v11970_v33, %v11983_v59  ;;  %v5727_v33 = vld [vmem:[%s14936_s5] sm:$0xf]  ;;  %v14938_v59 = vld [vmem:[#allocation21_spill] sm:$0xff]  ;;  %s14998_s5 = smov 126  }
 0x1e5   : > { %9807 = vmatmul.mubr.msk.bf16.gmra.mrb[20].mxu0 %vm1529_vm8, %v9086_v2  ;;  %9675 = vmatmul.mubr.msk.bf16.gmra.mrb[24].mxu1 %vm1529_vm8, %v10275_v47  ;;  %v5201_v54 = vsel %vm11266_vm15, %v5199_v29, %v5200_v25  ;;  %v9090_v9 = vcombine.low %v4826_v53, %v4836_v15  ;;  %v5206_v11 = vrot.slane %v5204_v17, 4  ;;  %v14929_v41 = vcombine.low %v11987_v28, %v11998_v55  ;;  %v14940_v55 = vld [vmem:[#allocation22_spill] sm:$0xff] }
 0x1e6   : > { %9810 = vmatprep.mubr.msk.bf16.mxu0 %vm1529_vm8, %v9087_v23  ;;  %9678 = vmatprep.mubr.msk.bf16.mxu1 %vm1529_vm8, %v10276_v13  ;;  %v9124_v45 = vcombine.low %v5198_v39, %v5201_v54  ;;  %v5205_v6 = vsel %vm11266_vm15, %v9108_v3, %v5204_v17  ;;  %v14927_v23 = vcombine.low %v11965_v12, %v11975_v40  ;;  %v14937_v40 = vld [vmem:[#allocation19_spill] sm:$0xff]  ;;  %v5777_v14 = vsel %vm1578_vm0, %v5727_v33, 0 }
 0x1e7   : > { %v5208_v2 = vsel %vm11266_vm15, %v5206_v11, %v5207_v34  ;;  %v14932_v13 = vcombine.low %v14930_v35, %v14931_v8  ;;  %v14935_v12 = vcombine.low %v14933_v4, %v14934_v1  ;;  %10173 = vmatprep.subr.msk.bf16.mxu1 %vm1578_vm0, %v5727_v33  ;;  %v14939_v28 = vcombine.low %v14937_v40, %v14938_v59 }
 0x1e8   : > { %v9125_v47 = vcombine.low %v5205_v6, %v5208_v2  ;;  %v14942_v37 = vcombine.low %v14940_v55, %v14941_v58  ;;  %9853 = vmatpush3.bf16.msra.mxu1 %v5777_v14  ;;  %v14945_v56 = vcombine.low %v14943_v50, %v14944_v38  ;;  %v14948_v19 = vcombine.low %v14946_v46, %v14947_v48  ;;  %v12422_v2 = vld [vmem:[%s14955_s3] ss:$0 sm:$0xff]  ;;  %s13220_s3 = sld [smem:[#allocation4 + $0x16]] }
 0x1e9   : > { %v14951_v61 = vcombine.low %v14949_v10, %v14950_v30  ;;  %v14953_v0 = vcombine.low %v12115_v43, %v14952_v49  ;;  %v14954_v18 = vcombine.low %v12125_v63, %v12142_v24  ;;  %vm10469_vm0 = vmmov 0  }
 0x1ea   : > { %vm6800_vm12 = vcmask 1045509   ;;  %vm6815_vm15 = vcmask 154648  }
 0x1ed   : > { %9811 = vmatmul.mubr.msk.bf16.gmra.mrb[24].mxu0 %vm1529_vm8, %v9088_v60  ;;  %9679 = vmatmul.mubr.msk.bf16.gmra.mrb[28].mxu1 %vm1529_vm8, %v10277_v26 }
 0x1ee   : > { %9814 = vmatprep.mubr.msk.bf16.mxu0 %vm1529_vm8, %v9089_v22 }
 0x1f5   : > { %9815 = vmatmul.mubr.msk.bf16.gmra.mrb[28].mxu0 %vm1529_vm8, %v9090_v9 }
 0x1f6   : > { %9820 = vmatprep.mubr.msk.bf16.mxu0 %vm1529_vm8, %v9124_v45 }
 0x1fd   : > { %9821 = vmatmul.mubr.msk.bf16.vlgmr.msra.gmra.mrb[0].mxu0 %vm1529_vm8, %v9125_v47 }
 0x1fe   : > { %9824 = vmatprep.mubr.msk.bf16.mxu0 %vm1529_vm8, %v14927_v23 }
 0x205   : > { %9825 = vmatmul.mubr.msk.bf16.gmra.mrb[4].mxu0 %vm1529_vm8, %v14928_v44  ;;  %v12427_v44 = vld [vmem:[%s14956_s4] ss:$0 sm:$0xff]  ;;  %s14997_s4 = smov 127  }
 0x206   : > { %9828 = vmatprep.mubr.msk.bf16.mxu0 %vm1529_vm8, %v14929_v41 }
 0x20d   : > { %9829 = vmatmul.mubr.msk.bf16.gmra.mrb[8].mxu0 %vm1529_vm8, %v14932_v13 }
 0x20e   : > { %9832 = vmatprep.mubr.msk.bf16.mxu0 %vm1529_vm8, %v14935_v12 }
 0x215   : > { %9833 = vmatmul.mubr.msk.bf16.gmra.mrb[12].mxu0 %vm1529_vm8, %v14939_v28 }
 0x216   : > { %9836 = vmatprep.mubr.msk.bf16.mxu0 %vm1529_vm8, %v14942_v37 }
 0x21d   : > { %9837 = vmatmul.mubr.msk.bf16.gmra.mrb[16].mxu0 %vm1529_vm8, %v14945_v56 }
 0x21e   : > { %9840 = vmatprep.mubr.msk.bf16.mxu0 %vm1529_vm8, %v14948_v19 }
 0x225   : > { %9841 = vmatmul.mubr.msk.bf16.gmra.mrb[20].mxu0 %vm1529_vm8, %v14951_v61 }
 0x226   : > { %9844 = vmatprep.mubr.msk.bf16.mxu0 %vm1529_vm8, %v14953_v0 }
 0x22d   : > { %9845 = vmatmul.mubr.msk.bf16.gmra.mrb[24].mxu0 %vm1529_vm8, %v14954_v18 }
 0x22e   : > { %9848 = vmatprep.mubr.msk.bf16.mxu0 %vm1529_vm8, %v9138_v57 }
 0x235   : > { %9849 = vmatmul.mubr.msk.bf16.gmra.mrb[28].mxu0 %vm1529_vm8, %v9139_v27 }
 0x288   : > { %v9652_v60 = vpop.f32.mrb[0].mxu1 }
 0x289   : > { %v2691_v26 = vpop.f32.mrb[1].mxu1 }
 0x28a   : > { %v9653_v43 = vpop.f32.mrb[2].mxu1 }
 0x28b   : > { %v2694_v22 = vpop.f32.mrb[3].mxu1 }
 0x290   : > { %v9656_v5 = vpop.f32.mrb[4].mxu1 }
 0x291   : > { %v2707_v7 = vpop.f32.mrb[5].mxu1 }
 0x292   : > { %v9657_v36 = vpop.f32.mrb[6].mxu1 }
 0x293   : > { %v2710_v63 = vpop.f32.mrb[7].mxu1 }
 0x298   : > { %v12371_v24 = vpop.f32.mrb[8].mxu1 }
 0x299   : > { %v12373_v31 = vpop.f32.mrb[9].mxu1 }
 0x29a   : > { %v12375_v62 = vpop.f32.mrb[10].mxu1 }
 0x29b   : > { %v12377_v52 = vpop.f32.mrb[11].mxu1 }
 0x2a0   : > { %v12379_v57 = vpop.f32.mrb[12].mxu1 }
 0x2a1   : > { %v12381_v20 = vpop.f32.mrb[13].mxu1 }
 0x2a2   : > { %v12383_v16 = vpop.f32.mrb[14].mxu1 }
 0x2a3   : > { %v12385_v27 = vpop.f32.mrb[15].mxu1 }
 0x2a8   : > { %v12387_v29 = vpop.f32.mrb[16].mxu1 }
 0x2a9   : > { %v12389_v32 = vpop.f32.mrb[17].mxu1 }
 0x2aa   : > { %v12391_v25 = vpop.f32.mrb[18].mxu1 }
 0x2ab   : > { %v12393_v53 = vpop.f32.mrb[19].mxu1 }
 0x2b0   : > { %v12395_v15 = vpop.f32.mrb[20].mxu1 }
 0x2b1   : > { %v12397_v51 = vpop.f32.mrb[21].mxu1 }
 0x2b2   : > { %v12399_v17 = vpop.f32.mrb[22].mxu1 }
 0x2b3   : > { %v12401_v39 = vpop.f32.mrb[23].mxu1 }
 0x2b8   : > { %v12403_v54 = vpop.f32.mrb[24].mxu1 }
 0x2b9   : > { %v12405_v21 = vpop.f32.mrb[25].mxu1 }
 0x2ba   : > { %v12407_v9 = vpop.f32.mrb[26].mxu1 }
 0x2bb   : > { %v12409_v45 = vpop.f32.mrb[27].mxu1 }
 0x2c0   : > { %v12411_v3 = vpop.f32.mrb[28].mxu1 }
 0x2c1   : > { %v12413_v11 = vpop.f32.mrb[29].mxu1 }
 0x2c2   : > { %v12415_v42 = vpop.f32.mrb[30].mxu1 }
 0x2c3   : > { %v12417_v34 = vpop.f32.mrb[31].mxu1 }
 0x2d0   : > { %v9822_v6 = vpop.f32.mrb[0].mxu0 }
 0x2d1   : > { %v9908_v47 = vadd.f32 %v9822_v6, %v9652_v60  ;;  %v5442_v23 = vpop.f32.mrb[1].mxu0 }
 0x2d2   : > { %v9909_v41 = vadd.f32 %v5442_v23, %v2691_v26  ;;  %v9823_v35 = vpop.f32.mrb[2].mxu0 }
 0x2d3   : > { %v5610_v8 = vmul.f32 %v9908_v47, %v12422_v2  ;;  %v9910_v13 = vadd.f32 %v9823_v35, %v9653_v43  ;;  %v5445_v4 = vpop.f32.mrb[3].mxu0 }
 0x2d4   : > { %v5608_v1 = vmul.f32 %v9909_v41, %v12422_v2  ;;  %v9911_v12 = vadd.f32 %v5445_v4, %v2694_v22 }
 0x2d5   : > { %v5649_v33 = vadd.f32 %v12427_v44, %v5610_v8  ;;  %v5611_v40 = vmul.f32 %v9910_v13, %v12422_v2 }
 0x2d6   : > { %v5647_v59 = vadd.f32 %v12427_v44, %v5608_v1  ;;  %v5609_v28 = vmul.f32 %v9911_v12, %v12422_v2 }
 0x2d7   : > { %v5650_v55 = vadd.f32 %v12427_v44, %v5611_v40  ;;  %v5681_v14 = vmax.f32 %v5649_v33, 0.0 }
 0x2d8   : > { %v5648_v58 = vadd.f32 %v12427_v44, %v5609_v28  ;;  %v9826_v37 = vpop.f32.mrb[4].mxu0  ;;  %v5679_v46 = vmax.f32 %v5647_v59, 0.0 }
 0x2d9   : > { %v5682_v50 = vmax.f32 %v5650_v55, 0.0  ;;  %v9912_v38 = vadd.f32 %v9826_v37, %v9656_v5  ;;  %v5458_v56 = vpop.f32.mrb[5].mxu0 }
 0x2da   : > { %v5680_v48 = vmax.f32 %v5648_v58, 0.0  ;;  %v9913_v19 = vadd.f32 %v5458_v56, %v2707_v7  ;;  %v9827_v10 = vpop.f32.mrb[6].mxu0 }
 0x2db   : > { %v5712_v30 = vpack.c.bf16 %v5682_v50, %v5681_v14  ;;  %v5614_v61 = vmul.f32 %v9912_v38, %v12422_v2  ;;  %v9914_v49 = vadd.f32 %v9827_v10, %v9657_v36  ;;  %v5461_v0 = vpop.f32.mrb[7].mxu0 }
 0x2dc   : > { %v5711_v18 = vpack.c.bf16 %v5680_v48, %v5679_v46  ;;  %v5612_v60 = vmul.f32 %v9913_v19, %v12422_v2  ;;  %v9915_v26 = vadd.f32 %v5461_v0, %v2710_v63 }
 0x2dd   : > { %v5653_v43 = vadd.f32 %v12427_v44, %v5614_v61  ;;  %v5615_v22 = vmul.f32 %v9914_v49, %v12422_v2 }
 0x2de   : > { %v5651_v5 = vadd.f32 %v12427_v44, %v5612_v60  ;;  %v5613_v6 = vmul.f32 %v9915_v26, %v12422_v2  ;;  %9854 = vmatprep.mubr.msk.bf16.mxu1 %vm1529_vm8, %v5711_v18 }
 0x2df   : > { %v5654_v7 = vadd.f32 %v12427_v44, %v5615_v22  ;;  %9855 = vmatmul.mubr.msk.bf16.vlgmr.msra.gmra.mrb[32].mxu1 %vm1529_vm8, %v5712_v30  ;;  %v5685_v23 = vmax.f32 %v5653_v43, 0.0 }
 0x2e0   : > { %v5652_v36 = vadd.f32 %v12427_v44, %v5613_v6  ;;  %v9830_v47 = vpop.f32.mrb[8].mxu0  ;;  %v5683_v8 = vmax.f32 %v5651_v5, 0.0 }
 0x2e1   : > { %v5686_v41 = vmax.f32 %v5654_v7, 0.0  ;;  %v9916_v63 = vadd.f32 %v9830_v47, %v12371_v24  ;;  %v5474_v35 = vpop.f32.mrb[9].mxu0 }
 0x2e2   : > { %v5684_v13 = vmax.f32 %v5652_v36, 0.0  ;;  %v9917_v4 = vadd.f32 %v5474_v35, %v12373_v31  ;;  %v9831_v1 = vpop.f32.mrb[10].mxu0 }
 0x2e3   : > { %v5714_v12 = vpack.c.bf16 %v5686_v41, %v5685_v23  ;;  %v5618_v33 = vmul.f32 %v9916_v63, %v12422_v2  ;;  %v9918_v40 = vadd.f32 %v9831_v1, %v12375_v62  ;;  %v5477_v59 = vpop.f32.mrb[11].mxu0 }
 0x2e4   : > { %v5713_v28 = vpack.c.bf16 %v5684_v13, %v5683_v8  ;;  %v5616_v55 = vmul.f32 %v9917_v4, %v12422_v2  ;;  %v9919_v58 = vadd.f32 %v5477_v59, %v12377_v52 }
 0x2e5   : > { %v5657_v37 = vadd.f32 %v12427_v44, %v5618_v33  ;;  %v5619_v24 = vmul.f32 %v9918_v40, %v12422_v2 }
 0x2e6   : > { %v5655_v14 = vadd.f32 %v12427_v44, %v5616_v55  ;;  %v5617_v31 = vmul.f32 %v9919_v58, %v12422_v2  ;;  %9858 = vmatprep.mubr.msk.bf16.mxu1 %vm1529_vm8, %v5713_v28 }
 0x2e7   : > { %v5658_v50 = vadd.f32 %v12427_v44, %v5619_v24  ;;  %9859 = vmatmul.mubr.msk.bf16.gmra.mrb[36].mxu1 %vm1529_vm8, %v5714_v12  ;;  %v5689_v56 = vmax.f32 %v5657_v37, 0.0 }
 0x2e8   : > { %v5656_v62 = vadd.f32 %v12427_v44, %v5617_v31  ;;  %v9834_v38 = vpop.f32.mrb[12].mxu0  ;;  %v5687_v19 = vmax.f32 %v5655_v14, 0.0 }
 0x2e9   : > { %v5690_v46 = vmax.f32 %v5658_v50, 0.0  ;;  %v9920_v52 = vadd.f32 %v9834_v38, %v12379_v57  ;;  %v5490_v48 = vpop.f32.mrb[13].mxu0 }
 0x2ea   : > { %v5688_v10 = vmax.f32 %v5656_v62, 0.0  ;;  %v9921_v30 = vadd.f32 %v5490_v48, %v12381_v20  ;;  %v9835_v61 = vpop.f32.mrb[14].mxu0 }
 0x2eb   : > { %v5716_v49 = vpack.c.bf16 %v5690_v46, %v5689_v56  ;;  %v5622_v0 = vmul.f32 %v9920_v52, %v12422_v2  ;;  %v9922_v18 = vadd.f32 %v9835_v61, %v12383_v16  ;;  %v5493_v60 = vpop.f32.mrb[15].mxu0 }
 0x2ec   : > { %v5715_v26 = vpack.c.bf16 %v5688_v10, %v5687_v19  ;;  %v5620_v43 = vmul.f32 %v9921_v30, %v12422_v2  ;;  %v9923_v22 = vadd.f32 %v5493_v60, %v12385_v27 }
 0x2ed   : > { %v5661_v5 = vadd.f32 %v12427_v44, %v5622_v0  ;;  %v5623_v57 = vmul.f32 %v9922_v18, %v12422_v2 }
 0x2ee   : > { %v5659_v6 = vadd.f32 %v12427_v44, %v5620_v43  ;;  %v5621_v20 = vmul.f32 %v9923_v22, %v12422_v2  ;;  %9862 = vmatprep.mubr.msk.bf16.mxu1 %vm1529_vm8, %v5715_v26 }
 0x2ef   : > { %v5662_v7 = vadd.f32 %v12427_v44, %v5623_v57  ;;  %9863 = vmatmul.mubr.msk.bf16.gmra.mrb[40].mxu1 %vm1529_vm8, %v5716_v49  ;;  %v5693_v47 = vmax.f32 %v5661_v5, 0.0 }
 0x2f0   : > { %v5660_v16 = vadd.f32 %v12427_v44, %v5621_v20  ;;  %v9838_v36 = vpop.f32.mrb[16].mxu0  ;;  %v5691_v63 = vmax.f32 %v5659_v6, 0.0 }
 0x2f1   : > { %v5694_v23 = vmax.f32 %v5662_v7, 0.0  ;;  %v9924_v27 = vadd.f32 %v9838_v36, %v12387_v29  ;;  %v5506_v41 = vpop.f32.mrb[17].mxu0 }
 0x2f2   : > { %v5692_v35 = vmax.f32 %v5660_v16, 0.0  ;;  %v9925_v8 = vadd.f32 %v5506_v41, %v12389_v32  ;;  %v9839_v13 = vpop.f32.mrb[18].mxu0 }
 0x2f3   : > { %v5718_v4 = vpack.c.bf16 %v5694_v23, %v5693_v47  ;;  %v5626_v1 = vmul.f32 %v9924_v27, %v12422_v2  ;;  %v9926_v12 = vadd.f32 %v9839_v13, %v12391_v25  ;;  %v5509_v33 = vpop.f32.mrb[19].mxu0 }
 0x2f4   : > { %v5717_v40 = vpack.c.bf16 %v5692_v35, %v5691_v63  ;;  %v5624_v59 = vmul.f32 %v9925_v8, %v12422_v2  ;;  %v9927_v28 = vadd.f32 %v5509_v33, %v12393_v53 }
 0x2f5   : > { %v5665_v55 = vadd.f32 %v12427_v44, %v5626_v1  ;;  %v5627_v29 = vmul.f32 %v9926_v12, %v12422_v2 }
 0x2f6   : > { %v5663_v58 = vadd.f32 %v12427_v44, %v5624_v59  ;;  %v5625_v32 = vmul.f32 %v9927_v28, %v12422_v2  ;;  %9866 = vmatprep.mubr.msk.bf16.mxu1 %vm1529_vm8, %v5717_v40 }
 0x2f7   : > { %v5666_v37 = vadd.f32 %v12427_v44, %v5627_v29  ;;  %9867 = vmatmul.mubr.msk.bf16.gmra.mrb[44].mxu1 %vm1529_vm8, %v5718_v4  ;;  %v5697_v14 = vmax.f32 %v5665_v55, 0.0 }
 0x2f8   : > { %v5664_v25 = vadd.f32 %v12427_v44, %v5625_v32  ;;  %v9842_v24 = vpop.f32.mrb[20].mxu0  ;;  %v5695_v62 = vmax.f32 %v5663_v58, 0.0 }
 0x2f9   : > { %v5698_v31 = vmax.f32 %v5666_v37, 0.0  ;;  %v9928_v53 = vadd.f32 %v9842_v24, %v12395_v15  ;;  %v5522_v50 = vpop.f32.mrb[21].mxu0 }
 0x2fa   : > { %v5696_v38 = vmax.f32 %v5664_v25, 0.0  ;;  %v9929_v56 = vadd.f32 %v5522_v50, %v12397_v51  ;;  %v9843_v46 = vpop.f32.mrb[22].mxu0 }
 0x2fb   : > { %v5720_v52 = vpack.c.bf16 %v5698_v31, %v5697_v14  ;;  %v5630_v48 = vmul.f32 %v9928_v53, %v12422_v2  ;;  %v9930_v19 = vadd.f32 %v9843_v46, %v12399_v17  ;;  %v5525_v10 = vpop.f32.mrb[23].mxu0 }
 0x2fc   : > { %v5719_v30 = vpack.c.bf16 %v5696_v38, %v5695_v62  ;;  %v5628_v61 = vmul.f32 %v9929_v56, %v12422_v2  ;;  %v9931_v49 = vadd.f32 %v5525_v10, %v12401_v39  ;;  %v6163_v10 = vld [vmem:[%s14957_s8 + $0x10] sm:$0xff] }
 0x2fd   : > { %v5669_v0 = vadd.f32 %v12427_v44, %v5630_v48  ;;  %v5631_v15 = vmul.f32 %v9930_v19, %v12422_v2  ;;  %v6162_v48 = vld [vmem:[%s14957_s8 + $0x8] sm:$0xff]  ;;  %v10468_v19 = vmov 0.0|0.0  }
 0x2fe   : > { %v5667_v18 = vadd.f32 %v12427_v44, %v5628_v61  ;;  %v5629_v51 = vmul.f32 %v9931_v49, %v12422_v2  ;;  %9870 = vmatprep.mubr.msk.bf16.mxu1 %vm1529_vm8, %v5719_v30  ;;  %9902 = vmatprep.subr.bf16.mxu0 %v10468_v19  ;;  %v6164_v30 = vld [vmem:[%s14957_s8 + $0x18] sm:$0xff]  ;;  %v10470_v49 = vmov 0.0  }
 0x2ff   : > { %v5670_v60 = vadd.f32 %v12427_v44, %v5631_v15  ;;  %9871 = vmatmul.mubr.msk.bf16.gmra.mrb[48].mxu1 %vm1529_vm8, %v5720_v52  ;;  %v5701_v43 = vmax.f32 %v5669_v0, 0.0  ;;  %v9906_v61 = vpack.c.bf16 %v6164_v30, %v6163_v10  ;;  %9894 = vmatprep.mubr.msk.f32.mxu0 %vm10469_vm0, %v10470_v49  ;;  %v6246_v0 = vld [vmem:[%s14958_s10] sm:$0x3]  ;;  %6604 = vst.msk [vmem:[#allocation3] sm:$0xff] %vm6603_vm5, %v10470_v49  ;;  %6605 = vst.msk [vmem:[#allocation3 + $0x8] sm:$0xff] %vm6603_vm5, %v10470_v49  ;;  %s15003_s10 = smov 122  }
 0x300   : > { %v5668_v17 = vadd.f32 %v12427_v44, %v5629_v51  ;;  %v9846_v26 = vpop.f32.mrb[24].mxu0  ;;  %v5699_v57 = vmax.f32 %v5667_v18, 0.0  ;;  %9897 = vmatprep.subr.mxu1 %v10470_v49  ;;  %v12554_v15 = vld [vmem:[%s14959_s6] ss:$0 sm:$0xff]  ;;  %6608 = vst.msk [vmem:[#allocation3 + $0x18] sm:$0xff] %vm6603_vm5, %v10470_v49  ;;  %6609 = vst.msk [vmem:[#allocation3 + $0x20] sm:$0xff] %vm6603_vm5, %v10470_v49 }
 0x301   : > { %v5702_v22 = vmax.f32 %v5670_v60, 0.0  ;;  %v9932_v39 = vadd.f32 %v9846_v26, %v12403_v54  ;;  %v5538_v5 = vpop.f32.mrb[25].mxu0  ;;  %9898 = vmatpush3.msk.msra.mxu1 %vm6258_vm1, %v6246_v0  ;;  %v12559_v51 = vld [vmem:[%s14960_s7] ss:$0 sm:$0xff]  ;;  %6607 = vst.msk [vmem:[#allocation3 + $0x10] sm:$0x3f] %vm6606_vm6, %v10470_v49 }
 0x302   : > { %v5700_v6 = vmax.f32 %v5668_v17, 0.0  ;;  %v9933_v20 = vadd.f32 %v5538_v5, %v12405_v21  ;;  %v9847_v7 = vpop.f32.mrb[26].mxu0  ;;  %6610 = vst.msk [vmem:[#allocation3 + $0x28] sm:$0x3f] %vm6606_vm6, %v10470_v49  ;;  %s13237_s6 = sld [smem:[#allocation4 + $0x1a]]  ;;  %s14999_s7 = smov 125  }
 0x303   : > { %v5722_v16 = vpack.c.bf16 %v5702_v22, %v5701_v43  ;;  %v5634_v36 = vmul.f32 %v9932_v39, %v12422_v2  ;;  %v9934_v47 = vadd.f32 %v9847_v7, %v12407_v9  ;;  %v5541_v23 = vpop.f32.mrb[27].mxu0 }
 0x304   : > { %v5721_v27 = vpack.c.bf16 %v5700_v6, %v5699_v57  ;;  %v5632_v41 = vmul.f32 %v9933_v20, %v12422_v2  ;;  %v9935_v63 = vadd.f32 %v5541_v23, %v12409_v45 }
 0x305   : > { %v5673_v35 = vadd.f32 %v12427_v44, %v5634_v36  ;;  %v5635_v54 = vmul.f32 %v9934_v47, %v12422_v2 }
 0x306   : > { %v5671_v8 = vadd.f32 %v12427_v44, %v5632_v41  ;;  %v5633_v21 = vmul.f32 %v9935_v63, %v12422_v2  ;;  %9874 = vmatprep.mubr.msk.bf16.mxu1 %vm1529_vm8, %v5721_v27 }
 0x307   : > { %v5674_v13 = vadd.f32 %v12427_v44, %v5635_v54  ;;  %9875 = vmatmul.mubr.msk.bf16.gmra.mrb[52].mxu1 %vm1529_vm8, %v5722_v16  ;;  %v5705_v1 = vmax.f32 %v5673_v35, 0.0 }
 0x308   : > { %v5672_v9 = vadd.f32 %v12427_v44, %v5633_v21  ;;  %v9850_v4 = vpop.f32.mrb[28].mxu0  ;;  %v5703_v40 = vmax.f32 %v5671_v8, 0.0 }
 0x309   : > { %v5706_v12 = vmax.f32 %v5674_v13, 0.0  ;;  %v9936_v45 = vadd.f32 %v9850_v4, %v12411_v3  ;;  %v5554_v33 = vpop.f32.mrb[29].mxu0 }
 0x30a   : > { %v5704_v59 = vmax.f32 %v5672_v9, 0.0  ;;  %v9937_v28 = vadd.f32 %v5554_v33, %v12413_v11  ;;  %v9851_v55 = vpop.f32.mrb[30].mxu0 }
 0x30b   : > { %v5724_v29 = vpack.c.bf16 %v5706_v12, %v5705_v1  ;;  %v5638_v58 = vmul.f32 %v9936_v45, %v12422_v2  ;;  %v9938_v32 = vadd.f32 %v9851_v55, %v12415_v42  ;;  %v5557_v37 = vpop.f32.mrb[31].mxu0 }
 0x30c   : > { %v5723_v25 = vpack.c.bf16 %v5704_v59, %v5703_v40  ;;  %v5636_v24 = vmul.f32 %v9937_v28, %v12422_v2  ;;  %v9939_v14 = vadd.f32 %v5557_v37, %v12417_v34 }
 0x30d   : > { %v5677_v31 = vadd.f32 %v12427_v44, %v5638_v58  ;;  %v5639_v3 = vmul.f32 %v9938_v32, %v12422_v2 }
 0x30e   : > { %v5675_v53 = vadd.f32 %v12427_v44, %v5636_v24  ;;  %v5637_v11 = vmul.f32 %v9939_v14, %v12422_v2  ;;  %9878 = vmatprep.mubr.msk.bf16.mxu1 %vm1529_vm8, %v5723_v25  ;;  %v6161_v2 = vld [vmem:[%s14957_s8] sm:$0xff]  ;;  %s13243_s8 = sld [smem:[#allocation4 + $0x1e]] }
 0x30f   : > { %v5678_v50 = vadd.f32 %v12427_v44, %v5639_v3  ;;  %9879 = vmatmul.mubr.msk.bf16.gmra.mrb[56].mxu1 %vm1529_vm8, %v5724_v29  ;;  %v5709_v62 = vmax.f32 %v5677_v31, 0.0 }
 0x310   : > { %v5676_v42 = vadd.f32 %v12427_v44, %v5637_v11  ;;  %v5707_v56 = vmax.f32 %v5675_v53, 0.0  ;;  %v9903_v44 = vpack.c.bf16 %v6162_v48, %v6161_v2 }
 0x311   : > { %v5710_v38 = vmax.f32 %v5678_v50, 0.0 }
 0x312   : > { %v5708_v34 = vmax.f32 %v5676_v42, 0.0  ;;  %9904 = vmatpush3.bf16.msra.mxu0 %v9903_v44 }
 0x313   : > { %v5726_v46 = vpack.c.bf16 %v5710_v38, %v5709_v62  ;;  %9905 = vmatprep.subr.bf16.mxu0 %v10468_v19 }
 0x314   : > { %v5725_v52 = vpack.c.bf16 %v5708_v34, %v5707_v56 }
 0x316   : > { %9882 = vmatprep.mubr.msk.bf16.mxu1 %vm1529_vm8, %v5725_v52  ;;  %9907 = vmatpush3.bf16.msra.mxu0 %v9906_v61 }
 0x317   : > { %9883 = vmatmul.mubr.msk.bf16.gmra.mrb[60].mxu1 %vm1529_vm8, %v5726_v46  ;;  %vm6792_vm8 = vcmask 1041409  }
 0x318   : > { %9899 = vmatprep.mubr.msk.f32.mxu1 %vm10469_vm0, %v10470_v49 }
 0x3b2   : > { %v9856_v18 = vpop.f32.mrb[32].mxu1 }
 0x3b3   : > { %v5813_v60 = vpop.f32.mrb[33].mxu1  ;;  %v5949_v17 = vmul.f32 %v9856_v18, %v12554_v15 }
 0x3b4   : > { %v5947_v26 = vmul.f32 %v12554_v15, %v5813_v60  ;;  %v9857_v43 = vpop.f32.mrb[34].mxu1 }
 0x3b5   : > { %v5816_v22 = vpop.f32.mrb[35].mxu1  ;;  %v5950_v5 = vmul.f32 %v9857_v43, %v12554_v15  ;;  %v12569_v6 = vadd.f32 %v12559_v51, %v5949_v17 }
 0x3b6   : > { %v12564_v39 = vadd.f32 %v12559_v51, %v5947_v26  ;;  %v5948_v57 = vmul.f32 %v12554_v15, %v5816_v22 }
 0x3b7   : > { %v12577_v16 = vadd.f32 %v12559_v51, %v5950_v5  ;;  %v6022_v41 = vsel %vm6018_vm2, %v12569_v6, 0.0 }
 0x3b8   : > { %v12572_v20 = vadd.f32 %v12559_v51, %v5948_v57  ;;  %v6019_v7 = vsel %vm6018_vm2, %v12564_v39, 0.0 }
 0x3b9   : > { %v6024_v13 = vsel %vm6018_vm2, %v12577_v16, 0.0 }
 0x3ba   : > { %v6020_v36 = vsel %vm6018_vm2, %v12572_v20, 0.0  ;;  %v9860_v47 = vpop.f32.mrb[36].mxu1 }
 0x3bb   : > { %v6021_v23 = vadd.f32 %v6020_v36, %v6019_v7  ;;  %v5829_v27 = vpop.f32.mrb[37].mxu1  ;;  %v5953_v63 = vmul.f32 %v9860_v47, %v12554_v15 }
 0x3bc   : > { %v5951_v35 = vmul.f32 %v12554_v15, %v5829_v27  ;;  %v9861_v54 = vpop.f32.mrb[38].mxu1 }
 0x3bd   : > { %v6023_v8 = vadd.f32 %v6022_v41, %v6021_v23  ;;  %v5832_v21 = vpop.f32.mrb[39].mxu1  ;;  %v5954_v4 = vmul.f32 %v9861_v54, %v12554_v15  ;;  %v12593_v45 = vadd.f32 %v12559_v51, %v5953_v63 }
 0x3be   : > { %v12588_v9 = vadd.f32 %v12559_v51, %v5951_v35  ;;  %v5952_v1 = vmul.f32 %v12554_v15, %v5832_v21 }
 0x3bf   : > { %v6025_v12 = vadd.f32 %v6024_v13, %v6023_v8  ;;  %v12601_v28 = vadd.f32 %v12559_v51, %v5954_v4  ;;  %v6030_v37 = vsel %vm6018_vm2, %v12593_v45, 0.0  ;;  %v6092_v4 = vsel %vm6018_vm2, %v12569_v6, -inf }
 0x3c0   : > { %v6026_v33 = vsel %vm6018_vm2, %v12588_v9, 0.0  ;;  %v12598_v40 = vadd.f32 %v12559_v51, %v5952_v1  ;;  %v6090_v1 = vsel %vm6018_vm2, %v12564_v39, -inf }
 0x3c1   : > { %v6027_v59 = vadd.f32 %v6026_v33, %v6025_v12  ;;  %v6032_v53 = vsel %vm6018_vm2, %v12601_v28, 0.0 }
 0x3c2   : > { %v6028_v55 = vsel %vm6018_vm2, %v12598_v40, 0.0  ;;  %v9864_v29 = vpop.f32.mrb[40].mxu1 }
 0x3c3   : > { %v6029_v58 = vadd.f32 %v6028_v55, %v6027_v59  ;;  %v5845_v32 = vpop.f32.mrb[41].mxu1  ;;  %v5957_v25 = vmul.f32 %v9864_v29, %v12554_v15 }
 0x3c4   : > { %v5955_v24 = vmul.f32 %v12554_v15, %v5845_v32  ;;  %v9865_v14 = vpop.f32.mrb[42].mxu1  ;;  %v6098_v32 = vsel %vm6018_vm2, %v12593_v45, -inf }
 0x3c5   : > { %v6031_v31 = vadd.f32 %v6030_v37, %v6029_v58  ;;  %v5848_v3 = vpop.f32.mrb[43].mxu1  ;;  %v5958_v50 = vmul.f32 %v9865_v14, %v12554_v15  ;;  %v12617_v38 = vadd.f32 %v12559_v51, %v5957_v25  ;;  %v6094_v37 = vsel %vm6018_vm2, %v12588_v9, -inf }
 0x3c6   : > { %v12612_v11 = vadd.f32 %v12559_v51, %v5955_v24  ;;  %v5956_v42 = vmul.f32 %v12554_v15, %v5848_v3  ;;  %v6100_v25 = vsel %vm6018_vm2, %v12601_v28, -inf  ;;  %v6096_v14 = vsel %vm6018_vm2, %v12598_v40, -inf }
 0x3c7   : > { %v6033_v62 = vadd.f32 %v6032_v53, %v6031_v31  ;;  %v12625_v52 = vadd.f32 %v12559_v51, %v5958_v50  ;;  %v6038_v10 = vsel %vm6018_vm2, %v12617_v38, 0.0  ;;  %v6093_v50 = vsel %vm6018_vm2, %v12577_v16, -inf }
 0x3c8   : > { %v6034_v56 = vsel %vm6018_vm2, %v12612_v11, 0.0  ;;  %v12622_v34 = vadd.f32 %v12559_v51, %v5956_v42  ;;  %v6091_v42 = vsel %vm6018_vm2, %v12572_v20, -inf }
 0x3c9   : > { %v6035_v46 = vadd.f32 %v6034_v56, %v6033_v62  ;;  %v6040_v17 = vsel %vm6018_vm2, %v12625_v52, 0.0  ;;  %v6106_v62 = vsel %vm6018_vm2, %v12617_v38, -inf }
 0x3ca   : > { %v6036_v2 = vsel %vm6018_vm2, %v12622_v34, 0.0  ;;  %v9868_v48 = vpop.f32.mrb[44].mxu1 }
 0x3cb   : > { %v6037_v19 = vadd.f32 %v6036_v2, %v6035_v46  ;;  %v5861_v44 = vpop.f32.mrb[45].mxu1  ;;  %v5961_v30 = vmul.f32 %v9868_v48, %v12554_v15  ;;  %v6099_v46 = vmax.f32 %v6092_v4, %v6098_v32  ;;  %v6102_v2 = vsel %vm6018_vm2, %v12612_v11, -inf }
 0x3cc   : > { %v5959_v61 = vmul.f32 %v12554_v15, %v5861_v44  ;;  %v9869_v0 = vpop.f32.mrb[46].mxu1 }
 0x3cd   : > { %v6039_v18 = vadd.f32 %v6038_v10, %v6037_v19  ;;  %v5864_v60 = vpop.f32.mrb[47].mxu1  ;;  %v5962_v43 = vmul.f32 %v9869_v0, %v12554_v15  ;;  %v12641_v57 = vadd.f32 %v12559_v51, %v5961_v30  ;;  %v6095_v10 = vmax.f32 %v6090_v1, %v6094_v37 }
 0x3ce   : > { %v12636_v26 = vadd.f32 %v12559_v51, %v5959_v61  ;;  %v5960_v22 = vmul.f32 %v12554_v15, %v5864_v60  ;;  %v6101_v30 = vmax.f32 %v6093_v50, %v6100_v25  ;;  %v6097_v61 = vmax.f32 %v6091_v42, %v6096_v14 }
 0x3cf   : > { %v6041_v5 = vadd.f32 %v6040_v17, %v6039_v18  ;;  %v12649_v23 = vadd.f32 %v12559_v51, %v5962_v43  ;;  %v6046_v54 = vsel %vm6018_vm2, %v12641_v57, 0.0  ;;  %v6107_v60 = vmax.f32 %v6099_v46, %v6106_v62 }
 0x3d0   : > { %v6042_v7 = vsel %vm6018_vm2, %v12636_v26, 0.0  ;;  %v12646_v36 = vadd.f32 %v12559_v51, %v5960_v22  ;;  %v6110_v4 = vsel %vm6018_vm2, %v12636_v26, -inf }
 0x3d1   : > { %v6043_v47 = vadd.f32 %v6042_v7, %v6041_v5  ;;  %v6048_v59 = vsel %vm6018_vm2, %v12649_v23, 0.0  ;;  %v6103_v7 = vmax.f32 %v6095_v10, %v6102_v2  ;;  %v6116_v1 = vsel %vm6018_vm2, %v12649_v23, -inf }
 0x3d2   : > { %v6044_v27 = vsel %vm6018_vm2, %v12646_v36, 0.0  ;;  %v9872_v41 = vpop.f32.mrb[48].mxu1 }
 0x3d3   : > { %v6045_v63 = vadd.f32 %v6044_v27, %v6043_v47  ;;  %v5877_v35 = vpop.f32.mrb[49].mxu1  ;;  %v5965_v8 = vmul.f32 %v9872_v41, %v12554_v15  ;;  %v6108_v47 = vsel %vm6018_vm2, %v12625_v52, -inf  ;;  %v6104_v27 = vsel %vm6018_vm2, %v12622_v34, -inf }
 0x3d4   : > { %v5963_v21 = vmul.f32 %v12554_v15, %v5877_v35  ;;  %v9873_v13 = vpop.f32.mrb[50].mxu1  ;;  %v6109_v32 = vmax.f32 %v6101_v30, %v6108_v47  ;;  %v6105_v37 = vmax.f32 %v6097_v61, %v6104_v27 }
 0x3d5   : > { %v6047_v12 = vadd.f32 %v6046_v54, %v6045_v63  ;;  %v5880_v33 = vpop.f32.mrb[51].mxu1  ;;  %v5966_v29 = vmul.f32 %v9873_v13, %v12554_v15  ;;  %v12677_v31 = vadd.f32 %v12559_v51, %v5965_v8  ;;  %v6114_v13 = vsel %vm6018_vm2, %v12641_v57, -inf }
 0x3d6   : > { %v12664_v55 = vadd.f32 %v12559_v51, %v5963_v21  ;;  %v5964_v58 = vmul.f32 %v12554_v15, %v5880_v33  ;;  %v6112_v33 = vsel %vm6018_vm2, %v12646_v36, -inf  ;;  %v6115_v14 = vmax.f32 %v6107_v60, %v6114_v13 }
 0x3d7   : > { %v6049_v24 = vadd.f32 %v6048_v59, %v6047_v12  ;;  %v12693_v48 = vadd.f32 %v12559_v51, %v5966_v29  ;;  %v6054_v17 = vsel %vm6018_vm2, %v12677_v31, 0.0  ;;  %v6122_v25 = vsel %vm6018_vm2, %v12677_v31, -inf }
 0x3d8   : > { %v6050_v3 = vsel %vm6018_vm2, %v12664_v55, 0.0  ;;  %v12682_v53 = vadd.f32 %v12559_v51, %v5964_v58  ;;  %v6117_v46 = vmax.f32 %v6109_v32, %v6116_v1  ;;  %v6113_v2 = vmax.f32 %v6105_v37, %v6112_v33 }
 0x3d9   : > { %v6051_v56 = vadd.f32 %v6050_v3, %v6049_v24  ;;  %v6056_v35 = vsel %vm6018_vm2, %v12693_v48, 0.0  ;;  %v6118_v3 = vsel %vm6018_vm2, %v12664_v55, -inf  ;;  %v6123_v10 = vmax.f32 %v6115_v14, %v6122_v25 }
 0x3da   : > { %v6052_v19 = vsel %vm6018_vm2, %v12682_v53, 0.0  ;;  %v9876_v44 = vpop.f32.mrb[52].mxu1 }
 0x3db   : > { %v6053_v0 = vadd.f32 %v6052_v19, %v6051_v56  ;;  %v5893_v18 = vpop.f32.mrb[53].mxu1  ;;  %v5969_v43 = vmul.f32 %v9876_v44, %v12554_v15  ;;  %v6111_v56 = vmax.f32 %v6103_v7, %v6110_v4  ;;  %v6120_v7 = vsel %vm6018_vm2, %v12682_v53, -inf }
 0x3dc   : > { %v5967_v22 = vmul.f32 %v12554_v15, %v5893_v18  ;;  %v9877_v5 = vpop.f32.mrb[54].mxu1 }
 0x3dd   : > { %v6055_v41 = vadd.f32 %v6054_v17, %v6053_v0  ;;  %v5896_v63 = vpop.f32.mrb[55].mxu1  ;;  %v5970_v8 = vmul.f32 %v9877_v5, %v12554_v15  ;;  %v12721_v59 = vadd.f32 %v12559_v51, %v5969_v43  ;;  %v6119_v60 = vmax.f32 %v6111_v56, %v6118_v3 }
 0x3de   : > { %v12708_v54 = vadd.f32 %v12559_v51, %v5967_v22  ;;  %v5968_v21 = vmul.f32 %v12554_v15, %v5896_v63  ;;  %v6124_v17 = vsel %vm6018_vm2, %v12693_v48, -inf }
 0x3df   : > { %v6057_v12 = vadd.f32 %v6056_v35, %v6055_v41  ;;  %v12733_v50 = vadd.f32 %v12559_v51, %v5970_v8  ;;  %v6062_v30 = vsel %vm6018_vm2, %v12721_v59, 0.0  ;;  %v6130_v63 = vsel %vm6018_vm2, %v12721_v59, -inf }
 0x3e0   : > { %v6058_v29 = vsel %vm6018_vm2, %v12708_v54, 0.0  ;;  %v12726_v58 = vadd.f32 %v12559_v51, %v5968_v21  ;;  %v6126_v35 = vsel %vm6018_vm2, %v12708_v54, -inf  ;;  %v6125_v33 = vmax.f32 %v6117_v46, %v6124_v17 }
 0x3e1   : > { %v6059_v24 = vadd.f32 %v6058_v29, %v6057_v12  ;;  %v6064_v47 = vsel %vm6018_vm2, %v12733_v50, 0.0  ;;  %v6132_v8 = vsel %vm6018_vm2, %v12733_v50, -inf  ;;  %v6121_v29 = vmax.f32 %v6113_v2, %v6120_v7 }
 0x3e2   : > { %v6060_v42 = vsel %vm6018_vm2, %v12726_v58, 0.0  ;;  %v9880_v62 = vpop.f32.mrb[56].mxu1  ;;  %v6128_v13 = vsel %vm6018_vm2, %v12726_v58, -inf  ;;  %v6131_v25 = vmax.f32 %v6123_v10, %v6130_v63 }
 0x3e3   : > { %v6061_v19 = vadd.f32 %v6060_v42, %v6059_v24  ;;  %v5909_v44 = vpop.f32.mrb[57].mxu1  ;;  %v5973_v61 = vmul.f32 %v9880_v62, %v12554_v15  ;;  %v6127_v24 = vmax.f32 %v6119_v60, %v6126_v35  ;;  %v6133_v42 = vmax.f32 %v6125_v33, %v6132_v8 }
 0x3e4   : > { %v5971_v0 = vmul.f32 %v12554_v15, %v5909_v44  ;;  %v9881_v18 = vpop.f32.mrb[58].mxu1  ;;  %v6129_v62 = vmax.f32 %v6121_v29, %v6128_v13 }
 0x3e5   : > { %v6063_v43 = vadd.f32 %v6062_v30, %v6061_v19  ;;  %v5974_v22 = vmul.f32 %v9881_v18, %v12554_v15  ;;  %v5912_v5 = vpop.f32.mrb[59].mxu1  ;;  %v12761_v4 = vadd.f32 %v12559_v51, %v5973_v61 }
 0x3e6   : > { %v12749_v27 = vadd.f32 %v12559_v51, %v5971_v0  ;;  %v5972_v41 = vmul.f32 %v12554_v15, %v5912_v5 }
 0x3e7   : > { %v6065_v21 = vadd.f32 %v6064_v47, %v6063_v43  ;;  %v12769_v37 = vadd.f32 %v12559_v51, %v5974_v22  ;;  %v6070_v46 = vsel %vm6018_vm2, %v12761_v4, 0.0  ;;  %v6138_v2 = vsel %vm6018_vm2, %v12761_v4, -inf }
 0x3e8   : > { %v6066_v1 = vsel %vm6018_vm2, %v12749_v27, 0.0  ;;  %v12766_v12 = vadd.f32 %v12559_v51, %v5972_v41  ;;  %v6134_v10 = vsel %vm6018_vm2, %v12749_v27, -inf  ;;  %v6139_v41 = vmax.f32 %v6131_v25, %v6138_v2 }
 0x3e9   : > { %v6067_v32 = vadd.f32 %v6066_v1, %v6065_v21  ;;  %v6140_v0 = vsel %vm6018_vm2, %v12769_v37, -inf  ;;  %v6072_v22 = vsel %vm6018_vm2, %v12769_v37, 0.0  ;;  %v6135_v29 = vmax.f32 %v6127_v24, %v6134_v10 }
 0x3ea   : > { %v6068_v14 = vsel %vm6018_vm2, %v12766_v12, 0.0  ;;  %v9884_v3 = vpop.f32.mrb[60].mxu1  ;;  %v6136_v5 = vsel %vm6018_vm2, %v12766_v12, -inf  ;;  %v6141_v21 = vmax.f32 %v6133_v42, %v6140_v0 }
 0x3eb   : > { %v6069_v56 = vadd.f32 %v6068_v14, %v6067_v32  ;;  %v5977_v19 = vmul.f32 %v9884_v3, %v12554_v15  ;;  %v5925_v44 = vpop.f32.mrb[61].mxu1 }
 0x3ec   : > { %v5975_v30 = vmul.f32 %v12554_v15, %v5925_v44  ;;  %v9885_v61 = vpop.f32.mrb[62].mxu1 }
 0x3ed   : > { %v6071_v18 = vadd.f32 %v6070_v46, %v6069_v56  ;;  %v12784_v60 = vadd.f32 %v12559_v51, %v5977_v19  ;;  %v5978_v17 = vmul.f32 %v9885_v61, %v12554_v15  ;;  %v5928_v43 = vpop.f32.mrb[63].mxu1 }
 0x3ee   : > { %v12792_v7 = vadd.f32 %v12559_v51, %v5975_v30  ;;  %v5976_v47 = vmul.f32 %v12554_v15, %v5928_v43  ;;  %v6137_v15 = vmax.f32 %v6129_v62, %v6136_v5 }
 0x3ef   : > { %v6146_v63 = vsel %vm6018_vm2, %v12784_v60, -inf  ;;  %v6073_v35 = vadd.f32 %v6072_v22, %v6071_v18  ;;  %v12798_v8 = vadd.f32 %v12559_v51, %v5978_v17 }
 0x3f0   : > { %v6074_v13 = vsel %vm6018_vm2, %v12792_v7, 0.0  ;;  %v6142_v1 = vsel %vm6018_vm2, %v12792_v7, -inf  ;;  %v12805_v33 = vadd.f32 %v12559_v51, %v5976_v47  ;;  %v6147_v14 = vmax.f32 %v6139_v41, %v6146_v63 }
 0x3f1   : > { %v6075_v32 = vadd.f32 %v6074_v13, %v6073_v35  ;;  %v6148_v25 = vsel %vm6018_vm2, %v12798_v8, -inf  ;;  %v6143_v19 = vmax.f32 %v6135_v29, %v6142_v1  ;;  %v6078_v51 = vsel %vm6018_vm2, %v12784_v60, 0.0 }
 0x3f2   : > { %v6149_v3 = vmax.f32 %v6141_v21, %v6148_v25  ;;  %v6076_v42 = vsel %vm6018_vm2, %v12805_v33, 0.0  ;;  %v6144_v56 = vsel %vm6018_vm2, %v12805_v33, -inf  ;;  %v6080_v10 = vsel %vm6018_vm2, %v12798_v8, 0.0 }
 0x3f3   : > { %v6077_v44 = vadd.f32 %v6076_v42, %v6075_v32  ;;  %v6145_v46 = vmax.f32 %v6137_v15, %v6144_v56  ;;  %v9176_v15 = vld [vmem:[%s14961_s9] ss:$0 sm:$0xff]  ;;  %s15000_s9 = smov 124  }
 0x3f4   : > { %v6151_v24 = vmax.f32 %v6147_v14, %v6149_v3  ;;  %v9178_v42 = vld [vmem:[%s14962_s11] ss:$0 sm:$0xff]  ;;  %s13323_s11 = sld [smem:[#allocation4]] }
 0x3f5   : > { %v6079_v62 = vadd.f32 %v6078_v51, %v6077_v44  ;;  %v6150_v2 = vmax.f32 %v6143_v19, %v6145_v46 }
 0x3f7   : > { %v6081_v30 = vadd.f32 %v6080_v10, %v6079_v62  ;;  %v6152_v61 = vmax.f32 %v6150_v2, %v6151_v24  ;;  %v6342_v10 = vlaneseq }
 0x3f9   : > { %v6082_v0 = vrot.slane %v6081_v30, 4  ;;  %v6153_v18 = vrot.slane %v6152_v61, 4 }
 0x3fb   : > { %v6083_v17 = vadd.f32 %v6082_v0, %v6081_v30  ;;  %v6154_v43 = vmax.f32 %v6152_v61, %v6153_v18  ;;  %v12825_v30 = vshrl.u32 %v6342_v10, 7 }
 0x3fd   : > { %v6084_v22 = vrot.slane %v6083_v17, 2  ;;  %v6155_v5 = vrot.slane %v6154_v43, 2  ;;  %14963 = vst [vmem:[#allocation17_spill] sm:$0xff] %v12825_v30  ;;  %v12828_v61 = vsub.s32 0, %v12825_v30 }
 0x3ff   : > { %v6085_v47 = vadd.f32 %v6084_v22, %v6083_v17  ;;  %v6156_v41 = vmax.f32 %v6154_v43, %v6155_v5  ;;  %14964 = vst [vmem:[#allocation16_spill] sm:$0xff] %v12828_v61 }
 0x401   : > { %v6086_v63 = vrot.slane %v6085_v47, 1  ;;  %v6157_v35 = vrot.slane %v6156_v41, 1 }
 0x403   : > { %v6087_v21 = vadd.f32 %v6086_v63, %v6085_v47  ;;  %v6158_v1 = vmax.f32 %v6156_v41, %v6157_v35 }
 0x405   : > { %v6089_v13 = vmul.f32 0.00390625, %v6087_v21 }
 0x407   : > { %v6160_v29 = vsel %vm6159_vm3, %v6089_v13, %v6158_v1 }
 0x408   : > { %9895 = vmatmul.mubr.msk.f32.vlgmr.msra.gmra.mrb[32].mxu0 %vm6018_vm2, %v6160_v29 }
 0x4db   : > { %v6241_v32 = vpop.f32.mrb[32].mxu0 }
 0x4dc   : > { %v6242_v25 = vadd.f32 %v9176_v15, %v6241_v32  ;;  %v9896_v14 = vpop.f32.mrb[33].mxu0 }
 0x4de   : > { %v6245_v3 = vmax.f32 %v6242_v25, 0.0 }
 0x4e0   : > { %9900 = vmatmul.mubr.msk.f32.vlgmr.msra.gmra.mrb[64].mxu1 %vm6254_vm4, %v6245_v3 }
 0x5b3   : > { %v6328_v56 = vpop.f32.mrb[64].mxu1 }
 0x5b4   : > { %v6329_v19 = vadd.f32 %v9178_v42, %v6328_v56  ;;  %v9901_v44 = vpop.f32.mrb[65].mxu1 }
 0x5b6   : > { %v6333_v46 = vrot.slane %v6329_v19, 1 }
 0x5b8   : > { %v6335_v51 = vadd.f32 %v6333_v46, %v6329_v19 }
 0x5ba   : > { %v9181_v24 = vmul.f32 -1.442695, %v6335_v51 }
 0x5bc   : > { %10278 = vpow2.f32 %v9181_v24 }
 0x5c6   : > { %v10279_v62 = vpop.eup %10278 }
 0x5c7   : > { %v6339_v2 = vadd.f32 1.0, %v10279_v62 }
 0x5c9   : > { %10280 = vrcp.f32 %v6339_v2 }
 0x5d3   : > { %v10281_v0 = vpop.eup %10280 }
 0x5d4   : > { %v12831_v18 = vrot.slane %v10281_v0, %v12828_v61 }
 0x5d6   : > { %v12835_v17 = vmul.f32 %v12831_v18, %v12569_v6  ;;  %v12839_v43 = vmul.f32 %v12831_v18, %v12564_v39  ;;  %v12847_v47 = vmul.f32 %v12831_v18, %v12577_v16  ;;  %v12851_v41 = vmul.f32 %v12831_v18, %v12572_v20 }
 0x5d7   : > { %v12859_v63 = vmul.f32 %v12831_v18, %v12598_v40  ;;  %v12863_v16 = vmul.f32 %v12831_v18, %v12588_v9  ;;  %v12871_v21 = vmul.f32 %v12831_v18, %v12601_v28  ;;  %v12875_v40 = vmul.f32 %v12831_v18, %v12593_v45 }
 0x5d8   : > { %14965 = vst [vmem:[#allocation18_spill] sm:$0xff] %v12835_v17  ;;  %14966 = vst [vmem:[#allocation20_spill] sm:$0xff] %v12839_v43  ;;  %v6384_v22 = vsel %vm6018_vm2, %v12835_v17, -inf  ;;  %v6378_v5 = vsel %vm6018_vm2, %v12839_v43, -inf  ;;  %v6387_v39 = vsel %vm6018_vm2, %v12847_v47, -inf  ;;  %v6381_v6 = vsel %vm6018_vm2, %v12851_v41, -inf }
 0x5d9   : > { %14967 = vst [vmem:[#allocation19_spill] sm:$0xff] %v12847_v47  ;;  %14968 = vst [vmem:[#allocation21_spill] sm:$0xff] %v12851_v41  ;;  %6385 = vmax.xlane.f32.xlu1 %v6384_v22  ;;  %6379 = vmax.xlane.f32.xlu0 %v6378_v5  ;;  %v6393_v20 = vsel %vm6018_vm2, %v12859_v63, -inf  ;;  %v6390_v35 = vsel %vm6018_vm2, %v12863_v16, -inf  ;;  %v6399_v9 = vsel %vm6018_vm2, %v12871_v21, -inf  ;;  %v6396_v13 = vsel %vm6018_vm2, %v12875_v40, -inf }
 0x5da   : > { %14969 = vst [vmem:[#allocation22_spill] sm:$0xff] %v12859_v63  ;;  %14970 = vst [vmem:[#allocation24_spill] sm:$0xff] %v12863_v16  ;;  %v12883_v1 = vmul.f32 %v12831_v18, %v12622_v34  ;;  %v12887_v28 = vmul.f32 %v12831_v18, %v12612_v11  ;;  %v12895_v15 = vmul.f32 %v12831_v18, %v12625_v52 }
 0x5db   : > { %14971 = vst [vmem:[#allocation23_spill] sm:$0xff] %v12871_v21  ;;  %14972 = vst [vmem:[#allocation25_spill] sm:$0xff] %v12875_v40  ;;  %v12899_v34 = vmul.f32 %v12831_v18, %v12617_v38  ;;  %v12907_v25 = vmul.f32 %v12831_v18, %v12646_v36  ;;  %v12911_v52 = vmul.f32 %v12831_v18, %v12636_v26 }
 0x5dc   : > { %14973 = vst [vmem:[#allocation26_spill] sm:$0xff] %v12883_v1  ;;  %14974 = vst [vmem:[#allocation28_spill] sm:$0xff] %v12887_v28  ;;  %v6405_v45 = vsel %vm6018_vm2, %v12883_v1, -inf  ;;  %v6402_v29 = vsel %vm6018_vm2, %v12887_v28, -inf  ;;  %v6411_v11 = vsel %vm6018_vm2, %v12895_v15, -inf  ;;  %v12919_v3 = vmul.f32 %v12831_v18, %v12649_v23 }
 0x5dd   : > { %6388 = vmax.xlane.f32.xlu1 %v6387_v39  ;;  %6382 = vmax.xlane.f32.xlu0 %v6381_v6  ;;  %14975 = vst [vmem:[#allocation27_spill] sm:$0xff] %v12895_v15  ;;  %14976 = vst [vmem:[#allocation29_spill] sm:$0xff] %v12899_v34  ;;  %v6408_v32 = vsel %vm6018_vm2, %v12899_v34, -inf  ;;  %v6417_v38 = vsel %vm6018_vm2, %v12907_v25, -inf  ;;  %v6414_v14 = vsel %vm6018_vm2, %v12911_v52, -inf  ;;  %v12923_v36 = vmul.f32 %v12831_v18, %v12641_v57 }
 0x5de   : > { %14977 = vst [vmem:[#allocation30_spill] sm:$0xff] %v12907_v25  ;;  %14978 = vst [vmem:[#allocation31_spill] sm:$0xff] %v12911_v52  ;;  %v6423_v26 = vsel %vm6018_vm2, %v12919_v3, -inf  ;;  %v12931_v56 = vmul.f32 %v12831_v18, %v12682_v53  ;;  %v12935_v23 = vmul.f32 %v12831_v18, %v12664_v55  ;;  %v12943_v44 = vmul.f32 %v12831_v18, %v12693_v48 }
 0x5df   : > { %14979 = vst [vmem:[#allocation32_spill] sm:$0xff] %v12919_v3  ;;  %14980 = vst [vmem:[#allocation33_spill] sm:$0xff] %v12923_v36  ;;  %v6420_v42 = vsel %vm6018_vm2, %v12923_v36, -inf  ;;  %v12947_v53 = vmul.f32 %v12831_v18, %v12677_v31  ;;  %v12955_v51 = vmul.f32 %v12831_v18, %v12726_v58  ;;  %v12959_v48 = vmul.f32 %v12831_v18, %v12708_v54 }
 0x5e0   : > { %14981 = vst [vmem:[#allocation34_spill] sm:$0xff] %v12931_v56  ;;  %14982 = vst [vmem:[#allocation35_spill] sm:$0xff] %v12935_v23  ;;  %v6429_v57 = vsel %vm6018_vm2, %v12931_v56, -inf  ;;  %v6426_v19 = vsel %vm6018_vm2, %v12935_v23, -inf  ;;  %v6435_v55 = vsel %vm6018_vm2, %v12943_v44, -inf  ;;  %v12967_v62 = vmul.f32 %v12831_v18, %v12733_v50 }
 0x5e1   : > { %6394 = vmax.xlane.f32.xlu1 %v6393_v20  ;;  %6391 = vmax.xlane.f32.xlu0 %v6390_v35  ;;  %14983 = vst [vmem:[#allocation36_spill] sm:$0xff] %v12943_v44  ;;  %14984 = vst [vmem:[#allocation37_spill] sm:$0xff] %v12947_v53  ;;  %v6432_v46 = vsel %vm6018_vm2, %v12947_v53, -inf  ;;  %v6441_v31 = vsel %vm6018_vm2, %v12955_v51, -inf  ;;  %v6438_v24 = vsel %vm6018_vm2, %v12959_v48, -inf  ;;  %v12971_v58 = vmul.f32 %v12831_v18, %v12721_v59 }
 0x5e2   : > { %14985 = vst [vmem:[#allocation38_spill] sm:$0xff] %v12955_v51  ;;  %14986 = vst [vmem:[#allocation39_spill] sm:$0xff] %v12959_v48  ;;  %v6447_v54 = vsel %vm6018_vm2, %v12967_v62, -inf  ;;  %v12979_v0 = vmul.f32 %v12831_v18, %v12766_v12  ;;  %v12983_v50 = vmul.f32 %v12831_v18, %v12749_v27  ;;  %v12995_v27 = vmul.f32 %v12831_v18, %v12769_v37 }
 0x5e3   : > { %14987 = vst [vmem:[#allocation40_spill] sm:$0xff] %v12967_v62  ;;  %14988 = vst [vmem:[#allocation41_spill] sm:$0xff] %v12971_v58  ;;  %v6444_v2 = vsel %vm6018_vm2, %v12971_v58, -inf  ;;  %v12999_v22 = vmul.f32 %v12831_v18, %v12761_v4  ;;  %v13007_v6 = vmul.f32 %v12831_v18, %v12805_v33  ;;  %v13011_v37 = vmul.f32 %v12831_v18, %v12792_v7 }
 0x5e4   : > { %14989 = vst [vmem:[#allocation42_spill] sm:$0xff] %v12979_v0  ;;  %14990 = vst [vmem:[#allocation43_spill] sm:$0xff] %v12983_v50  ;;  %v6453_v59 = vsel %vm6018_vm2, %v12979_v0, -inf  ;;  %v6450_v12 = vsel %vm6018_vm2, %v12983_v50, -inf  ;;  %v6459_v5 = vsel %vm6018_vm2, %v12995_v27, -inf  ;;  %v13019_v35 = vmul.f32 %v12831_v18, %v12798_v8 }
 0x5e5   : > { %6400 = vmax.xlane.f32.xlu1 %v6399_v9  ;;  %6397 = vmax.xlane.f32.xlu0 %v6396_v13  ;;  %14991 = vst [vmem:[#allocation44_spill] sm:$0xff] %v12995_v27  ;;  %14992 = vst [vmem:[#allocation45_spill] sm:$0xff] %v12999_v22  ;;  %v6456_v39 = vsel %vm6018_vm2, %v12999_v22, -inf  ;;  %v6465_v4 = vsel %vm6018_vm2, %v13007_v6, -inf  ;;  %v6462_v20 = vsel %vm6018_vm2, %v13011_v37, -inf  ;;  %v13023_v33 = vmul.f32 %v12831_v18, %v12784_v60 }
 0x5e6   : > { %14993 = vst [vmem:[#allocation46_spill] sm:$0xff] %v13007_v6  ;;  %14994 = vst [vmem:[#allocation47_spill] sm:$0xff] %v13011_v37  ;;  %v6471_v7 = vsel %vm6018_vm2, %v13019_v35, -inf  ;;  %v6477_v13 = vsel %vm6018_vm2, %v12851_v41, 0.0  ;;  %v6474_v8 = vsel %vm6018_vm2, %v12839_v43, 0.0  ;;  %v6483_v60 = vsel %vm6018_vm2, %v12847_v47, 0.0 }
 0x5e7   : > { %14995 = vst [vmem:[#allocation48_spill] sm:$0xff] %v13019_v35  ;;  %14996 = vst [vmem:[#allocation49_spill] sm:$0xff] %v13023_v33  ;;  %v6468_v9 = vsel %vm6018_vm2, %v13023_v33, -inf  ;;  %v6480_v18 = vsel %vm6018_vm2, %v12835_v17, 0.0  ;;  %v6513_v49 = vsel %vm6018_vm2, %v12907_v25, 0.0 }
 0x5e9   : > { %6406 = vmax.xlane.f32.xlu1 %v6405_v45  ;;  %6403 = vmax.xlane.f32.xlu0 %v6402_v29  ;;  %v6489_v45 = vsel %vm6018_vm2, %v12859_v63, 0.0  ;;  %v6486_v29 = vsel %vm6018_vm2, %v12863_v16, 0.0 }
 0x5ed   : > { %6412 = vmax.xlane.f32.xlu1 %v6411_v11  ;;  %6409 = vmax.xlane.f32.xlu0 %v6408_v32  ;;  %v6495_v11 = vsel %vm6018_vm2, %v12871_v21, 0.0  ;;  %v6492_v32 = vsel %vm6018_vm2, %v12875_v40, 0.0 }
 0x5f1   : > { %6418 = vmax.xlane.f32.xlu1 %v6417_v38  ;;  %6415 = vmax.xlane.f32.xlu0 %v6414_v14  ;;  %v6501_v38 = vsel %vm6018_vm2, %v12883_v1, 0.0  ;;  %v6498_v14 = vsel %vm6018_vm2, %v12887_v28, 0.0 }
 0x5f5   : > { %6424 = vmax.xlane.f32.xlu1 %v6423_v26  ;;  %6421 = vmax.xlane.f32.xlu0 %v6420_v42  ;;  %v6507_v26 = vsel %vm6018_vm2, %v12895_v15, 0.0  ;;  %v6504_v42 = vsel %vm6018_vm2, %v12899_v34, 0.0 }
 0x5f9   : > { %6430 = vmax.xlane.f32.xlu1 %v6429_v57  ;;  %6427 = vmax.xlane.f32.xlu0 %v6426_v19  ;;  %v6510_v57 = vsel %vm6018_vm2, %v12911_v52, 0.0  ;;  %v6519_v19 = vsel %vm6018_vm2, %v12919_v3, 0.0 }
 0x5fd   : > { %6436 = vmax.xlane.f32.xlu1 %v6435_v55  ;;  %6433 = vmax.xlane.f32.xlu0 %v6432_v46  ;;  %v6516_v55 = vsel %vm6018_vm2, %v12923_v36, 0.0  ;;  %v6525_v46 = vsel %vm6018_vm2, %v12931_v56, 0.0 }
 0x601   : > { %6442 = vmax.xlane.f32.xlu1 %v6441_v31  ;;  %6439 = vmax.xlane.f32.xlu0 %v6438_v24  ;;  %v6522_v31 = vsel %vm6018_vm2, %v12935_v23, 0.0  ;;  %v6531_v24 = vsel %vm6018_vm2, %v12943_v44, 0.0 }
 0x605   : > { %6448 = vmax.xlane.f32.xlu1 %v6447_v54  ;;  %6445 = vmax.xlane.f32.xlu0 %v6444_v2  ;;  %v6528_v54 = vsel %vm6018_vm2, %v12947_v53, 0.0  ;;  %v6537_v2 = vsel %vm6018_vm2, %v12955_v51, 0.0 }
 0x609   : > { %6454 = vmax.xlane.f32.xlu1 %v6453_v59  ;;  %6451 = vmax.xlane.f32.xlu0 %v6450_v12  ;;  %v6534_v59 = vsel %vm6018_vm2, %v12959_v48, 0.0  ;;  %v6543_v12 = vsel %vm6018_vm2, %v12967_v62, 0.0 }
 0x60d   : > { %6460 = vmax.xlane.f32.xlu1 %v6459_v5  ;;  %6457 = vmax.xlane.f32.xlu0 %v6456_v39  ;;  %v6540_v5 = vsel %vm6018_vm2, %v12971_v58, 0.0  ;;  %v6549_v39 = vsel %vm6018_vm2, %v12979_v0, 0.0 }
 0x611   : > { %6466 = vmax.xlane.f32.xlu1 %v6465_v4  ;;  %6463 = vmax.xlane.f32.xlu0 %v6462_v20  ;;  %v6546_v4 = vsel %vm6018_vm2, %v12983_v50, 0.0  ;;  %v6555_v20 = vsel %vm6018_vm2, %v12995_v27, 0.0 }
 0x615   : > { %6472 = vmax.xlane.f32.xlu1 %v6471_v7  ;;  %6469 = vmax.xlane.f32.xlu0 %v6468_v9  ;;  %v6552_v7 = vsel %vm6018_vm2, %v12999_v22, 0.0  ;;  %v6561_v9 = vsel %vm6018_vm2, %v13007_v6, 0.0 }
 0x619   : > { %6478 = vadd.xlane.f32.xlu1 %v6477_v13  ;;  %6475 = vadd.xlane.f32.xlu0 %v6474_v8  ;;  %v6558_v13 = vsel %vm6018_vm2, %v13011_v37, 0.0  ;;  %v6567_v8 = vsel %vm6018_vm2, %v13019_v35, 0.0 }
 0x61d   : > { %6484 = vadd.xlane.f32.xlu1 %v6483_v60  ;;  %6481 = vadd.xlane.f32.xlu0 %v6480_v18  ;;  %v6564_v60 = vsel %vm6018_vm2, %v13023_v33, 0.0 }
 0x621   : > { %6490 = vadd.xlane.f32.xlu1 %v6489_v45  ;;  %6487 = vadd.xlane.f32.xlu0 %v6486_v29 }
 0x625   : > { %6496 = vadd.xlane.f32.xlu1 %v6495_v11  ;;  %6493 = vadd.xlane.f32.xlu0 %v6492_v32 }
 0x629   : > { %6502 = vadd.xlane.f32.xlu1 %v6501_v38  ;;  %6499 = vadd.xlane.f32.xlu0 %v6498_v14  ;;  %v6644_v14 = vand.u32 127, %v6342_v10 }
 0x62d   : > { %6508 = vadd.xlane.f32.xlu1 %v6507_v26  ;;  %6505 = vadd.xlane.f32.xlu0 %v6504_v42  ;;  %v6650_v26 = vadd.s32 4294967285, %v6644_v14 }
 0x631   : > { %6514 = vadd.xlane.f32.xlu1 %v6513_v49  ;;  %6511 = vadd.xlane.f32.xlu0 %v6510_v57  ;;  %v6645_v57 = vadd.s32 4294967293, %v6644_v14 }
 0x635   : > { %6520 = vadd.xlane.f32.xlu1 %v6519_v19  ;;  %6517 = vadd.xlane.f32.xlu0 %v6516_v55  ;;  %v13097_v19 = vsub.s32 %v6650_v26, %v12825_v30 }
 0x639   : > { %6526 = vadd.xlane.f32.xlu1 %v6525_v46  ;;  %6523 = vadd.xlane.f32.xlu0 %v6522_v31  ;;  %v13100_v31 = vsub.s32 %v6645_v57, %v12825_v30 }
 0x63d   : > { %6532 = vadd.xlane.f32.xlu1 %v6531_v24  ;;  %6529 = vadd.xlane.f32.xlu0 %v6528_v54 }
 0x641   : > { %6538 = vadd.xlane.f32.xlu1 %v6537_v2  ;;  %6535 = vadd.xlane.f32.xlu0 %v6534_v59 }
 0x645   : > { %6544 = vadd.xlane.f32.xlu1 %v6543_v12  ;;  %6541 = vadd.xlane.f32.xlu0 %v6540_v5 }
 0x649   : > { %6550 = vadd.xlane.f32.xlu1 %v6549_v39  ;;  %6547 = vadd.xlane.f32.xlu0 %v6546_v4 }
 0x64d   : > { %6556 = vadd.xlane.f32.xlu1 %v6555_v20  ;;  %6553 = vadd.xlane.f32.xlu0 %v6552_v7 }
 0x651   : > { %6562 = vadd.xlane.f32.xlu1 %v6561_v9  ;;  %6559 = vadd.xlane.f32.xlu0 %v6558_v13 }
 0x655   : > { %6568 = vadd.xlane.f32.xlu1 %v6567_v8  ;;  %6565 = vadd.xlane.f32.xlu0 %v6564_v60 }
 0x666   : > { %v6386_v18 = vpop.xlane.xlu1 %6385  ;;  %v6380_v45 = vpop.xlane.xlu0 %6379 }
 0x667   : > { %v6660_v5 = vrot.slane %v6386_v18, %v13100_v31  ;;  %v6649_v39 = vrot.slane %v6380_v45, %v13100_v31 }
 0x66a   : > { %v6389_v29 = vpop.xlane.xlu1 %6388  ;;  %v6383_v11 = vpop.xlane.xlu0 %6382 }
 0x66b   : > { %v6664_v24 = vrot.slane %v6389_v29, %v13097_v19  ;;  %v6654_v54 = vrot.slane %v6383_v11, %v13097_v19 }
 0x66d   : > { %v6665_v13 = vsel %vm6655_vm7, %v6664_v24, %v6660_v5  ;;  %v6656_v8 = vsel %vm6655_vm7, %v6654_v54, %v6649_v39 }
 0x66e   : > { %v6395_v32 = vpop.xlane.xlu1 %6394  ;;  %v6392_v38 = vpop.xlane.xlu0 %6391  ;;  %v6793_v26 = vsel %vm6792_vm8, %v6665_v13, %v6656_v8  ;;  %v7030_v8 = vstv %s13130_s26  ;;  %s13249_s26 = sld [smem:[#allocation4 + $0x20]] }
 0x66f   : > { %v6673_v2 = vrot.slane %v6395_v32, %v13097_v19  ;;  %v6669_v10 = vrot.slane %v6392_v38, %v13100_v31 }
 0x671   : > { %v6674_v18 = vsel %vm6655_vm7, %v6673_v2, %v6669_v10 }
 0x672   : > { %v6401_v42 = vpop.xlane.xlu1 %6400  ;;  %v6398_v49 = vpop.xlane.xlu0 %6397 }
 0x673   : > { %v6682_v4 = vrot.slane %v6401_v42, %v13097_v19  ;;  %v6678_v20 = vrot.slane %v6398_v49, %v13100_v31  ;;  %v6795_v49 = vsel %vm6794_vm9, %v6674_v18, %v6793_v26  ;;  %v7086_v26 = vstv %s13139_s27  ;;  %s13274_s27 = sld [smem:[#allocation4 + $0x22]] }
 0x675   : > { %v6683_v32 = vsel %vm6655_vm7, %v6682_v4, %v6678_v20 }
 0x676   : > { %v6407_v55 = vpop.xlane.xlu1 %6406  ;;  %v6404_v46 = vpop.xlane.xlu0 %6403 }
 0x677   : > { %v6691_v7 = vrot.slane %v6407_v55, %v13097_v19  ;;  %v6687_v9 = vrot.slane %v6404_v46, %v13100_v31  ;;  %v6797_v55 = vsel %vm6796_vm10, %v6683_v32, %v6795_v49 }
 0x679   : > { %v6692_v42 = vsel %vm6655_vm7, %v6691_v7, %v6687_v9 }
 0x67a   : > { %v6413_v59 = vpop.xlane.xlu1 %6412  ;;  %v6410_v12 = vpop.xlane.xlu0 %6409  ;;  %v6799_v2 = vsel %vm6798_vm11, %v6692_v42, %v6797_v55  ;;  %v14754_v55 = vstv %s13147_s15 }
 0x67b   : > { %v6700_v60 = vrot.slane %v6413_v59, %v13097_v19  ;;  %v6696_v29 = vrot.slane %v6410_v12, %v13100_v31 }
 0x67d   : > { %v6701_v57 = vsel %vm6655_vm7, %v6700_v60, %v6696_v29 }
 0x67e   : > { %v6419_v45 = vpop.xlane.xlu1 %6418  ;;  %v6416_v11 = vpop.xlane.xlu0 %6415  ;;  %v6801_v12 = vsel %vm6800_vm12, %v6701_v57, %v6799_v2 }
 0x67f   : > { %v6709_v38 = vrot.slane %v6419_v45, %v13097_v19  ;;  %v6705_v14 = vrot.slane %v6416_v11, %v13100_v31  ;;  %v7058_v11 = vstv %s13136_s18  ;;  %s15001_s18 = smov 123  }
 0x681   : > { %v6710_v46 = vsel %vm6655_vm7, %v6709_v38, %v6705_v14 }
 0x682   : > { %v6425_v24 = vpop.xlane.xlu1 %6424  ;;  %v6422_v54 = vpop.xlane.xlu0 %6421  ;;  %v6803_v5 = vsel %vm6802_vm13, %v6710_v46, %v6801_v12 }
 0x683   : > { %v6718_v10 = vrot.slane %v6425_v24, %v13097_v19  ;;  %v6714_v59 = vrot.slane %v6422_v54, %v13100_v31 }
 0x685   : > { %v6719_v39 = vsel %vm6655_vm7, %v6718_v10, %v6714_v59 }
 0x686   : > { %v6805_v4 = vsel %vm6804_vm14, %v6719_v39, %v6803_v5  ;;  %v6431_v20 = vpop.xlane.xlu1 %6430  ;;  %v6428_v7 = vpop.xlane.xlu0 %6427 }
 0x687   : > { %6816 = vst.msk [vmem:[#allocation3 + $0x3] sm:$0xff] %vm6815_vm15, %v6805_v4  ;;  %v6727_v54 = vrot.slane %v6431_v20, %v13097_v19  ;;  %v6723_v2 = vrot.slane %v6428_v7, %v13100_v31 }
 0x68a   : > { %v6437_v9 = vpop.xlane.xlu1 %6436  ;;  %v6434_v13 = vpop.xlane.xlu0 %6433 }
 0x68b   : > { %v6736_v46 = vrot.slane %v6437_v9, %v13097_v19  ;;  %v6732_v24 = vrot.slane %v6434_v13, %v13100_v31 }
 0x68d   : > { %v6737_v7 = vsel %vm6655_vm7, %v6736_v46, %v6732_v24 }
 0x68e   : > { %v13141_v60 = vld [vmem:[#allocation3] sm:$0xff]  ;;  %v6443_v29 = vpop.xlane.xlu1 %6442  ;;  %v6440_v18 = vpop.xlane.xlu0 %6439 }
 0x68f   : > { %v7031_v45 = vmul.f32 %v7030_v8, %v13141_v60  ;;  %v7059_v14 = vmul.f32 %v7058_v11, %v13141_v60  ;;  %v7087_v57 = vmul.f32 %v7086_v26, %v13141_v60  ;;  %v6745_v10 = vrot.slane %v6443_v29, %v13097_v19 }
 0x690   : > { %v6741_v59 = vrot.slane %v6440_v18, %v13100_v31  ;;  %v7115_v9 = vmul.f32 %v14754_v55, %v13141_v60 }
 0x691   : > { %7035 = vrot.lane.b32.xlu0 %v7031_v45, %s14748_s28  ;;  %s14750_s28 = smov 125   ;;  %v7142_v45 = vstv %s13154_s22  ;;  %s13315_s22 = sld [smem:[#allocation4 + $0x26]] }
 0x692   : > { %v6449_v32 = vpop.xlane.xlu1 %6448  ;;  %v6446_v38 = vpop.xlane.xlu0 %6445  ;;  %v7143_v46 = vmul.f32 %v7142_v45, %v13141_v60 }
 0x693   : > { %v6754_v39 = vrot.slane %v6449_v32, %v13097_v19  ;;  %v6750_v4 = vrot.slane %v6446_v38, %v13100_v31  ;;  %v6728_v32 = vsel %vm6655_vm7, %v6727_v54, %v6723_v2  ;;  %v6746_v38 = vsel %vm6655_vm7, %v6745_v10, %v6741_v59 }
 0x694   : > { %v6806_v24 = vsel %vm6792_vm8, %v6737_v7, %v6728_v32 }
 0x695   : > { %7063 = vrot.lane.b32.xlu0 %v7059_v14, %s14752_s25  ;;  %s14755_s25 = smov 124   ;;  %v6807_v54 = vsel %vm6794_vm9, %v6746_v38, %v6806_v24 }
 0x696   : > { %v6455_v42 = vpop.xlane.xlu1 %6454  ;;  %v6452_v49 = vpop.xlane.xlu0 %6451 }
 0x697   : > { %v6763_v13 = vrot.slane %v6455_v42, %v13097_v19  ;;  %v6759_v20 = vrot.slane %v6452_v49, %v13100_v31  ;;  %v6755_v49 = vsel %vm6655_vm7, %v6754_v39, %v6750_v4 }
 0x698   : > { %v6808_v10 = vsel %vm6796_vm10, %v6755_v49, %v6807_v54 }
 0x699   : > { %7091 = vrot.lane.b32.xlu0 %v7087_v57, %s14750_s28  ;;  %s13178_s28 = sld [smem:[#allocation4 + $0x10]] }
 0x69a   : > { %v6461_v12 = vpop.xlane.xlu1 %6460  ;;  %v6458_v5 = vpop.xlane.xlu0 %6457 }
 0x69b   : > { %v6772_v29 = vrot.slane %v6461_v12, %v13097_v19  ;;  %v6768_v18 = vrot.slane %v6458_v5, %v13100_v31  ;;  %v6764_v12 = vsel %vm6655_vm7, %v6763_v13, %v6759_v20  ;;  %v14765_v5 = vstv %s13161_s21 }
 0x69c   : > { %v7171_v7 = vmul.f32 %v14765_v5, %v13141_v60 }
 0x69d   : > { %7119 = vrot.lane.b32.xlu0 %v7115_v9, %s14755_s25  ;;  %s13195_s25 = sld [smem:[#allocation4 + $0x12]]  ;;  %v6773_v2 = vsel %vm6655_vm7, %v6772_v29, %v6768_v18  ;;  %v6809_v9 = vsel %vm6798_vm11, %v6764_v12, %v6808_v10  ;;  %v7197_v18 = vld [vmem:[#allocation3 + $0x1] sm:$0xff] }
 0x69e   : > { %v6467_v14 = vpop.xlane.xlu1 %6466  ;;  %v6464_v42 = vpop.xlane.xlu0 %6463  ;;  %v6810_v29 = vsel %vm6800_vm12, %v6773_v2, %v6809_v9 }
 0x69f   : > { %v6781_v57 = vrot.slane %v6467_v14, %v13097_v19  ;;  %v6777_v55 = vrot.slane %v6464_v42, %v13100_v31  ;;  %v14764_v32 = vstv %s13178_s28 }
 0x6a1   : > { %7147 = vrot.lane.b32.xlu0 %v7143_v46, %s14757_s0  ;;  %v6782_v59 = vsel %vm6655_vm7, %v6781_v57, %v6777_v55  ;;  %s13210_s0 = sld [smem:[#allocation4 + $0x14]]  ;;  %v7215_v57 = vmul.f32 %v14764_v32, %v7197_v18 }
 0x6a2   : > { %v6473_v39 = vpop.xlane.xlu1 %6472  ;;  %v6470_v4 = vpop.xlane.xlu0 %6469  ;;  %v6811_v55 = vsel %vm6802_vm13, %v6782_v59, %v6810_v29 }
 0x6a3   : > { %v6790_v13 = vrot.slane %v6473_v39, %v13097_v19  ;;  %v6786_v20 = vrot.slane %v6470_v4, %v13100_v31  ;;  %v14763_v46 = vstv %s13195_s25 }
 0x6a4   : > { %v7243_v54 = vmul.f32 %v14763_v46, %v7197_v18 }
 0x6a5   : > { %v6791_v38 = vsel %vm6655_vm7, %v6790_v13, %v6786_v20  ;;  %7175 = vrot.lane.b32.xlu0 %v7171_v7, %s14759_s2  ;;  %s13226_s2 = sld [smem:[#allocation4 + $0x18]]  ;;  %v14761_v13 = vstv %s13220_s3 }
 0x6a6   : > { %v6812_v14 = vsel %vm6804_vm14, %v6791_v38, %v6811_v55  ;;  %v6479_v42 = vpop.xlane.xlu1 %6478  ;;  %v6476_v49 = vpop.xlane.xlu0 %6475  ;;  %v7299_v29 = vmul.f32 %v14761_v13, %v7197_v18 }
 0x6a7   : > { %6817 = vst.msk [vmem:[#allocation3 + $0xb] sm:$0xff] %vm6815_vm15, %v6812_v14  ;;  %v14762_v2 = vstv %s13210_s0  ;;  %v6572_v46 = vmul.f32 0.03125, %v6479_v42  ;;  %v6571_v32 = vmul.f32 0.03125, %v6476_v49 }
 0x6a8   : > { %v7271_v4 = vmul.f32 %v14762_v2, %v7197_v18 }
 0x6a9   : > { %7219 = vrot.lane.b32.xlu0 %v7215_v57, %s14997_s4 }
 0x6aa   : > { %v6485_v24 = vpop.xlane.xlu1 %6484  ;;  %v6482_v12 = vpop.xlane.xlu0 %6481 }
 0x6ab   : > { %v6574_v38 = vmul.f32 0.03125, %v6485_v24  ;;  %v6573_v14 = vmul.f32 0.03125, %v6482_v12 }
 0x6ad   : > { %7247 = vrot.lane.b32.xlu0 %v7243_v54, %s14998_s5  ;;  %v6866_v24 = vrot.slane %v6574_v38, %v13097_v19  ;;  %v6862_v12 = vrot.slane %v6573_v14, %v13100_v31  ;;  %v15002_v14 = vstv %s13147_s15  ;;  %s13294_s15 = sld [smem:[#allocation4 + $0x24]] }
 0x6ae   : > { %v13229_v10 = vld [vmem:[#allocation3 + $0x8] sm:$0xff]  ;;  %v6491_v59 = vpop.xlane.xlu1 %6490  ;;  %v6488_v39 = vpop.xlane.xlu0 %6487 }
 0x6af   : > { %v7032_v9 = vmul.f32 %v7030_v8, %v13229_v10  ;;  %v7060_v55 = vmul.f32 %v7058_v11, %v13229_v10  ;;  %v14766_v8 = vstv %s13226_s2  ;;  %v6575_v13 = vmul.f32 0.03125, %v6488_v39 }
 0x6b0   : > { %v7088_v2 = vmul.f32 %v7086_v26, %v13229_v10  ;;  %v14767_v11 = vstv %s13237_s6 }
 0x6b1   : > { %7275 = vrot.lane.b32.xlu0 %v7271_v4, %s14999_s7  ;;  %7037 = vrot.lane.b32.xlu1 %v7032_v9, %s14997_s4  ;;  %v7327_v4 = vmul.f32 %v14766_v8, %v7197_v18  ;;  %v6576_v9 = vmul.f32 0.03125, %v6491_v59  ;;  %v7355_v49 = vmul.f32 %v14767_v11, %v7197_v18  ;;  %v6871_v38 = vrot.slane %v6575_v13, %v13100_v31 }
 0x6b2   : > { %v6497_v20 = vpop.xlane.xlu1 %6496  ;;  %v6494_v7 = vpop.xlane.xlu0 %6493 }
 0x6b3   : > { %v6578_v5 = vmul.f32 0.03125, %v6497_v20  ;;  %v13265_v20 = vld [vmem:[#allocation3 + $0x2] sm:$0xff] }
 0x6b5   : > { %7303 = vrot.lane.b32.xlu0 %v7299_v29, %s15000_s9  ;;  %7065 = vrot.lane.b32.xlu1 %v7060_v55, %s14998_s5  ;;  %v6577_v29 = vmul.f32 0.03125, %v6494_v7  ;;  %v14774_v7 = vstv %s13243_s8  ;;  %v6884_v18 = vrot.slane %v6578_v5, %v13097_v19 }
 0x6b6   : > { %v6503_v57 = vpop.xlane.xlu1 %6502  ;;  %v6500_v54 = vpop.xlane.xlu0 %6499 }
 0x6b7   : > { %v6580_v59 = vmul.f32 0.03125, %v6503_v57  ;;  %v6579_v39 = vmul.f32 0.03125, %v6500_v54  ;;  %v7116_v57 = vmul.f32 %v15002_v14, %v13229_v10 }
 0x6b9   : > { %7331 = vrot.lane.b32.xlu0 %v7327_v4, %s15001_s18  ;;  %7093 = vrot.lane.b32.xlu1 %v7088_v2, %s14999_s7  ;;  %v6875_v4 = vrot.slane %v6576_v9, %v13097_v19  ;;  %v6857_v2 = vrot.slane %v6572_v46, %v13097_v19  ;;  %v6867_v9 = vsel %vm6655_vm7, %v6866_v24, %v6862_v12 }
 0x6ba   : > { %v6509_v26 = vpop.xlane.xlu1 %6508  ;;  %v6506_v55 = vpop.xlane.xlu0 %6505  ;;  %v6893_v13 = vrot.slane %v6580_v59, %v13097_v19  ;;  %v6889_v14 = vrot.slane %v6579_v39, %v13100_v31  ;;  %v7144_v12 = vmul.f32 %v7142_v45, %v13229_v10 }
 0x6bb   : > { %v6582_v8 = vmul.f32 0.03125, %v6509_v26  ;;  %v6581_v42 = vmul.f32 0.03125, %v6506_v55  ;;  %v6853_v26 = vrot.slane %v6571_v32, %v13100_v31  ;;  %v6880_v55 = vrot.slane %v6577_v29, %v13100_v31 }
 0x6bc   : > { %v7399_v32 = vmul.f32 %v14774_v7, %v13265_v20  ;;  %v6876_v24 = vsel %vm6655_vm7, %v6875_v4, %v6871_v38  ;;  %v15004_v38 = vstv %s13249_s26 }
 0x6bd   : > { %7359 = vrot.lane.b32.xlu0 %v7355_v49, %s15003_s10  ;;  %7121 = vrot.lane.b32.xlu1 %v7116_v57, %s15000_s9  ;;  %v6902_v46 = vrot.slane %v6582_v8, %v13097_v19  ;;  %v6898_v5 = vrot.slane %v6581_v42, %v13100_v31  ;;  %v6858_v59 = vsel %vm6655_vm7, %v6857_v2, %v6853_v26 }
 0x6be   : > { %v6515_v11 = vpop.xlane.xlu1 %6514  ;;  %v6512_v54 = vpop.xlane.xlu0 %6511  ;;  %v6885_v39 = vsel %vm6655_vm7, %v6884_v18, %v6880_v55  ;;  %v6894_v42 = vsel %vm6655_vm7, %v6893_v13, %v6889_v14  ;;  %v14773_v14 = vstv %s13274_s27 }
 0x6bf   : > { %v6584_v29 = vmul.f32 0.03125, %v6515_v11  ;;  %v6583_v49 = vmul.f32 0.03125, %v6512_v54  ;;  %v6994_v11 = vsel %vm6792_vm8, %v6867_v9, %v6858_v59  ;;  %v7427_v54 = vmul.f32 %v15004_v38, %v13265_v20 }
 0x6c0   : > { %v6995_v2 = vsel %vm6794_vm9, %v6876_v24, %v6994_v11  ;;  %v6903_v26 = vsel %vm6655_vm7, %v6902_v46, %v6898_v5  ;;  %v15005_v9 = vstv %s13161_s21  ;;  %v13321_v5 = vld [vmem:[#allocation3 + $0x9] sm:$0xff]  ;;  %s13326_s21 = sld [smem:[#allocation4 + $0x1]]  ;;  %v7455_v11 = vmul.f32 %v14773_v14, %v13265_v20 }
 0x6c1   : > { %v6911_v57 = vrot.slane %v6584_v29, %v13097_v19  ;;  %v6907_v8 = vrot.slane %v6583_v49, %v13100_v31  ;;  %7403 = vrot.lane.b32.xlu0 %v7399_v32, %s14997_s4  ;;  %7149 = vrot.lane.b32.xlu1 %v7144_v12, %s15001_s18  ;;  %v6996_v29 = vsel %vm6796_vm10, %v6885_v39, %v6995_v2  ;;  %v14772_v38 = vstv %s13294_s15 }
 0x6c2   : > { %v6521_v45 = vpop.xlane.xlu1 %6520  ;;  %v6518_v4 = vpop.xlane.xlu0 %6517  ;;  %v7172_v13 = vmul.f32 %v15005_v9, %v13229_v10  ;;  %v6997_v49 = vsel %vm6798_vm11, %v6894_v42, %v6996_v29  ;;  %v14771_v29 = vstv %s13315_s22 }
 0x6c3   : > { %v6586_v18 = vmul.f32 0.03125, %v6521_v45  ;;  %v6585_v55 = vmul.f32 0.03125, %v6518_v4  ;;  %v6912_v32 = vsel %vm6655_vm7, %v6911_v57, %v6907_v8  ;;  %v6998_v12 = vsel %vm6800_vm12, %v6903_v26, %v6997_v49 }
 0x6c4   : > { %v6999_v57 = vsel %vm6802_vm13, %v6912_v32, %v6998_v12  ;;  %v15006_v45 = vstv %s13178_s28  ;;  %v7483_v26 = vmul.f32 %v14772_v38, %v13265_v20  ;;  %s13351_s28 = sld [smem:[#allocation4 + $0x2c]]  ;;  %v14770_v32 = vstv %s13323_s11 }
 0x6c5   : > { %v6920_v24 = vrot.slane %v6586_v18, %v13097_v19  ;;  %v6916_v46 = vrot.slane %v6585_v55, %v13100_v31  ;;  %7431 = vrot.lane.b32.xlu0 %v7427_v54, %s14998_s5  ;;  %7177 = vrot.lane.b32.xlu1 %v7172_v13, %s15003_s10  ;;  %v7216_v4 = vmul.f32 %v15006_v45, %v13321_v5  ;;  %v15007_v18 = vstv %s13195_s25  ;;  %s13366_s25 = sld [smem:[#allocation4 + $0x2e]] }
 0x6c6   : > { %v6527_v59 = vpop.xlane.xlu1 %6526  ;;  %v6524_v39 = vpop.xlane.xlu0 %6523  ;;  %v7244_v55 = vmul.f32 %v15007_v18, %v13321_v5  ;;  %v14768_v9 = vstv %s13326_s21  ;;  %v15008_v12 = vstv %s13210_s0  ;;  %s13381_s0 = sld [smem:[#allocation4 + $0x30]] }
 0x6c7   : > { %v6921_v8 = vsel %vm6655_vm7, %v6920_v24, %v6916_v46  ;;  %v7511_v24 = vmul.f32 %v14771_v29, %v13265_v20  ;;  %v6588_v14 = vmul.f32 0.03125, %v6527_v59  ;;  %v6587_v7 = vmul.f32 0.03125, %v6524_v39 }
 0x6c8   : > { %v7000_v42 = vsel %vm6804_vm14, %v6921_v8, %v6999_v57  ;;  %v7272_v57 = vmul.f32 %v15008_v12, %v13321_v5  ;;  %v14769_v8 = vstv %s13339_s12  ;;  %v13386_v12 = vld [vmem:[#allocation3 + $0x3] sm:$0xff] }
 0x6c9   : > { %7011 = vst.msk [vmem:[#allocation3 + $0x1b] sm:$0xff] %vm6815_vm15, %v7000_v42  ;;  %7459 = vrot.lane.b32.xlu0 %v7455_v11, %s14999_s7  ;;  %7221 = vrot.lane.b32.xlu1 %v7216_v4, %s14997_s4  ;;  %v7017_v11 = vmul.f32 %v14770_v32, %v13141_v60  ;;  %v7539_v18 = vmul.f32 %v14769_v8, %v13265_v20  ;;  %v15009_v60 = vstv %s13220_s3  ;;  %s13436_s3 = sld [smem:[#allocation4 + $0x36]] }
 0x6ca   : > { %v6533_v54 = vpop.xlane.xlu1 %6532  ;;  %v6530_v2 = vpop.xlane.xlu0 %6529 }
 0x6cb   : > { %v15011_v59 = vstv %s13366_s25 }
 0x6cc   : > { %v7611_v39 = vmul.f32 %v15011_v59, %v13386_v12 }
 0x6cd   : > { %7487 = vrot.lane.b32.xlu0 %v7483_v26, %s15000_s9  ;;  %7249 = vrot.lane.b32.xlu1 %v7244_v55, %s14998_s5  ;;  %v7300_v55 = vmul.f32 %v15009_v60, %v13321_v5  ;;  %v15010_v60 = vstv %s13226_s2  ;;  %s13414_s2 = sld [smem:[#allocation4 + $0x34]] }
 0x6ce   : > { %v6539_v13 = vpop.xlane.xlu1 %6538  ;;  %v6536_v49 = vpop.xlane.xlu0 %6535  ;;  %v7328_v29 = vmul.f32 %v15010_v60, %v13321_v5 }
 0x6cf   : > { %v6592_v8 = vmul.f32 0.03125, %v6539_v13  ;;  %v6591_v32 = vmul.f32 0.03125, %v6536_v49 }
 0x6d0   : > { %v13360_v46 = vld [vmem:[#allocation3 + $0x18] sm:$0xff] }
 0x6d1   : > { %v7025_v42 = vmul.f32 %v14768_v9, %v13360_v46  ;;  %7515 = vrot.lane.b32.xlu0 %v7511_v24, %s15001_s18  ;;  %7277 = vrot.lane.b32.xlu1 %v7272_v57, %s14999_s7  ;;  %v14775_v24 = vstv %s13351_s28  ;;  %v6590_v57 = vmul.f32 0.03125, %v6533_v54  ;;  %v13797_v44 = vld [vmem:[#allocation3 + $0x1a] sm:$0xff] }
 0x6d2   : > { %v6545_v45 = vpop.xlane.xlu1 %6544  ;;  %v6542_v4 = vpop.xlane.xlu0 %6541  ;;  %v7583_v20 = vmul.f32 %v14775_v24, %v13386_v12  ;;  %v13908_v47 = vld [vmem:[#allocation3 + $0x1b] sm:$0xff] }
 0x6d3   : > { %v13376_v26 = vadd.f32 %v7025_v42, %v7017_v11  ;;  %v6589_v11 = vmul.f32 0.03125, %v6530_v2  ;;  %v6593_v54 = vmul.f32 0.03125, %v6542_v4  ;;  %v6938_v2 = vrot.slane %v6590_v57, %v13097_v19 }
 0x6d4   : > { %v6947_v4 = vrot.slane %v6592_v8, %v13097_v19  ;;  %v15012_v57 = vstv %s13237_s6  ;;  %v13421_v8 = vld [vmem:[#allocation3 + $0xa] sm:$0xff]  ;;  %s13457_s6 = sld [smem:[#allocation4 + $0x3a]] }
 0x6d5   : > { %7543 = vrot.lane.b32.xlu0 %v7539_v18, %s15003_s10  ;;  %7305 = vrot.lane.b32.xlu1 %v7300_v55, %s15000_s9  ;;  %v6594_v18 = vmul.f32 0.03125, %v6545_v45  ;;  %v6934_v55 = vrot.slane %v6589_v11, %v13100_v31  ;;  %v14777_v45 = vstv %s13381_s0  ;;  %v7356_v11 = vmul.f32 %v15012_v57, %v13321_v5 }
 0x6d6   : > { %v6551_v42 = vpop.xlane.xlu1 %6550  ;;  %v6548_v9 = vpop.xlane.xlu0 %6547 }
 0x6d7   : > { %v6596_v13 = vmul.f32 0.03125, %v6551_v42  ;;  %v6595_v49 = vmul.f32 0.03125, %v6548_v9  ;;  %v6925_v9 = vrot.slane %v6587_v7, %v13100_v31  ;;  %v7639_v7 = vmul.f32 %v14777_v45, %v13386_v12 }
 0x6d9   : > { %7587 = vrot.lane.b32.xlu0 %v7583_v20, %s14997_s4  ;;  %7333 = vrot.lane.b32.xlu1 %v7328_v29, %s15001_s18  ;;  %v6943_v20 = vrot.slane %v6591_v32, %v13100_v31  ;;  %v6929_v29 = vrot.slane %v6588_v14, %v13097_v19  ;;  %v6939_v32 = vsel %vm6655_vm7, %v6938_v2, %v6934_v55  ;;  %v15013_v55 = vstv %s13243_s8  ;;  %s13475_s8 = sld [smem:[#allocation4 + $0x3c]] }
 0x6da   : > { %v6557_v60 = vpop.xlane.xlu1 %6556  ;;  %v6554_v24 = vpop.xlane.xlu0 %6553  ;;  %v6965_v5 = vrot.slane %v6596_v13, %v13097_v19  ;;  %v6961_v59 = vrot.slane %v6595_v49, %v13100_v31  ;;  %v7400_v13 = vmul.f32 %v15013_v55, %v13421_v8 }
 0x6db   : > { %v6598_v38 = vmul.f32 0.03125, %v6557_v60  ;;  %v6597_v33 = vmul.f32 0.03125, %v6554_v24  ;;  %v6956_v24 = vrot.slane %v6594_v18, %v13097_v19  ;;  %v6952_v60 = vrot.slane %v6593_v54, %v13100_v31 }
 0x6dc   : > { %v6948_v2 = vsel %vm6655_vm7, %v6947_v4, %v6943_v20  ;;  %v6930_v49 = vsel %vm6655_vm7, %v6929_v29, %v6925_v9  ;;  %v6966_v4 = vsel %vm6655_vm7, %v6965_v5, %v6961_v59  ;;  %v15014_v29 = vstv %s13389_s13 }
 0x6dd   : > { %7615 = vrot.lane.b32.xlu0 %v7611_v39, %s14998_s5  ;;  %7361 = vrot.lane.b32.xlu1 %v7356_v11, %s15003_s10  ;;  %v6974_v18 = vrot.slane %v6598_v38, %v13097_v19  ;;  %v6970_v54 = vrot.slane %v6597_v33, %v13100_v31  ;;  %v6957_v11 = vsel %vm6655_vm7, %v6956_v24, %v6952_v60  ;;  %v15015_v5 = vstv %s13249_s26  ;;  %s13487_s26 = sld [smem:[#allocation4 + $0x3e]] }
 0x6de   : > { %v6563_v14 = vpop.xlane.xlu1 %6562  ;;  %v6560_v57 = vpop.xlane.xlu0 %6559  ;;  %v7001_v38 = vsel %vm6792_vm8, %v6939_v32, %v6930_v49  ;;  %v7667_v9 = vmul.f32 %v15014_v29, %v13386_v12  ;;  %v7428_v59 = vmul.f32 %v15015_v5, %v13421_v8  ;;  %v7766_v29 = vstv %s13457_s6  ;;  %s13625_s6 = sld [smem:[#allocation4 + $0xb]] }
 0x6df   : > { %v6600_v39 = vmul.f32 0.03125, %v6563_v14  ;;  %v6599_v42 = vmul.f32 0.03125, %v6560_v57  ;;  %v7002_v24 = vsel %vm6794_vm9, %v6948_v2, %v7001_v38  ;;  %v6975_v60 = vsel %vm6655_vm7, %v6974_v18, %v6970_v54 }
 0x6e1   : > { %v6983_v45 = vrot.slane %v6600_v39, %v13097_v19  ;;  %v6979_v33 = vrot.slane %v6599_v42, %v13100_v31  ;;  %7643 = vrot.lane.b32.xlu0 %v7639_v7, %s14999_s7  ;;  %7405 = vrot.lane.b32.xlu1 %v7400_v13, %s14997_s4  ;;  %v7003_v7 = vsel %vm6796_vm10, %v6957_v11, %v7002_v24  ;;  %v7694_v39 = vstv %s13414_s2  ;;  %s13604_s2 = sld [smem:[#allocation4 + $0x7]] }
 0x6e2   : > { %v6569_v20 = vpop.xlane.xlu1 %6568  ;;  %v6566_v14 = vpop.xlane.xlu0 %6565  ;;  %v7004_v55 = vsel %vm6798_vm11, %v6966_v4, %v7003_v7  ;;  %v7695_v49 = vmul.f32 %v7694_v39, %v13386_v12  ;;  %v15016_v11 = vstv %s13274_s27  ;;  %v15017_v4 = vstv %s13294_s15  ;;  %s13499_s27 = sld [smem:[#allocation4 + $0x40]]  ;;  %s13517_s15 = sld [smem:[#allocation4 + $0x42]] }
 0x6e3   : > { %v6602_v57 = vmul.f32 0.03125, %v6569_v20  ;;  %v6601_v42 = vmul.f32 0.03125, %v6566_v14  ;;  %v6984_v32 = vsel %vm6655_vm7, %v6983_v45, %v6979_v33  ;;  %v7005_v2 = vsel %vm6800_vm12, %v6975_v60, %v7004_v55  ;;  %v7749_v14 = vld [vmem:[#allocation3 + $0x4] sm:$0xff] }
 0x6e4   : > { %v7006_v45 = vsel %vm6802_vm13, %v6984_v32, %v7005_v2  ;;  %v7722_v33 = vstv %s13436_s3  ;;  %v7484_v20 = vmul.f32 %v15017_v4, %v13421_v8  ;;  %v15020_v32 = vstv %s13326_s21  ;;  %s13551_s21 = sld [smem:[#allocation4 + $0x4c]]  ;;  %s13613_s3 = sld [smem:[#allocation4 + $0x9]] }
 0x6e5   : > { %v6992_v18 = vrot.slane %v6602_v57, %v13097_v19  ;;  %v6988_v54 = vrot.slane %v6601_v42, %v13100_v31  ;;  %7671 = vrot.lane.b32.xlu0 %v7667_v9, %s15000_s9  ;;  %7433 = vrot.lane.b32.xlu1 %v7428_v59, %s14998_s5  ;;  %v7456_v31 = vmul.f32 %v15016_v11, %v13421_v8  ;;  %v7794_v57 = vstv %s13475_s8  ;;  %s13639_s8 = sld [smem:[#allocation4 + $0xd]] }
 0x6e6   : > { %v7723_v38 = vmul.f32 %v7722_v33, %v13386_v12  ;;  %v7767_v9 = vmul.f32 %v7766_v29, %v7749_v14  ;;  %v15018_v12 = vstv %s13315_s22  ;;  %v15019_v42 = vstv %s13323_s11  ;;  %s13524_s11 = sld [smem:[#allocation4 + $0x44]]  ;;  %s13540_s22 = sld [smem:[#allocation4 + $0x4a]] }
 0x6e7   : > { %v6993_v13 = vsel %vm6655_vm7, %v6992_v18, %v6988_v54  ;;  %v7512_v60 = vmul.f32 %v15018_v12, %v13421_v8  ;;  %v7018_v7 = vmul.f32 %v15019_v42, %v13229_v10  ;;  %v7795_v55 = vmul.f32 %v7794_v57, %v7749_v14  ;;  %v7566_v10 = vld [vmem:[#allocation3 + $0xb] sm:$0xff] }
 0x6e8   : > { %v7007_v19 = vsel %vm6804_vm14, %v6993_v13, %v7006_v45  ;;  %v15021_v18 = vstv %s13339_s12  ;;  %v7822_v2 = vstv %s13487_s26  ;;  %v15022_v13 = vstv %s13351_s28  ;;  %s13531_s12 = sld [smem:[#allocation4 + $0x48]]  ;;  %s13653_s26 = sld [smem:[#allocation4 + $0x56]] }
 0x6e9   : > { %7012 = vst.msk [vmem:[#allocation3 + $0x23] sm:$0xff] %vm6815_vm15, %v7007_v19  ;;  %7699 = vrot.lane.b32.xlu0 %v7695_v49, %s15001_s18  ;;  %7461 = vrot.lane.b32.xlu1 %v7456_v31, %s14999_s7  ;;  %v7540_v54 = vmul.f32 %v15021_v18, %v13421_v8  ;;  %v7823_v45 = vmul.f32 %v7822_v2, %v7749_v14  ;;  %v7850_v19 = vstv %s13499_s27  ;;  %v15023_v11 = vstv %s13366_s25  ;;  %s13573_s28 = sld [smem:[#allocation4 + $0x50]]  ;;  %s13584_s25 = sld [smem:[#allocation4 + $0x52]] }
 0x6ea   : > { %v7584_v49 = vmul.f32 %v15022_v13, %v7566_v10  ;;  %v7851_v8 = vmul.f32 %v7850_v19, %v7749_v14  ;;  %v7612_v31 = vmul.f32 %v15023_v11, %v7566_v10  ;;  %v8006_v11 = vstv %s13551_s21  ;;  %s13667_s27 = sld [smem:[#allocation4 + $0x11]] }
 0x6eb   : > { %s13727_s21 = sld [smem:[#allocation4 + $0x19]]  ;;  %v15030_v48 = vstv %s13604_s2  ;;  %v15032_v53 = vstv %s13613_s3  ;;  %v15036_v3 = vstv %s13639_s8 }
 0x6ec   : > { %v7906_v12 = vstv %s13524_s11  ;;  %s13699_s11 = sld [smem:[#allocation4 + $0x15]] }
 0x6ed   : > { %7727 = vrot.lane.b32.xlu0 %v7723_v38, %s15003_s10  ;;  %7489 = vrot.lane.b32.xlu1 %v7484_v20, %s15000_s9  ;;  %v7878_v38 = vstv %s13517_s15  ;;  %v15024_v20 = vstv %s13381_s0  ;;  %v7907_v42 = vmul.f32 %v7906_v12, %v7749_v14  ;;  %s13595_s0 = sld [smem:[#allocation4 + $0x5]]  ;;  %s13683_s15 = sld [smem:[#allocation4 + $0x13]] }
 0x6ee   : > { %v7879_v4 = vmul.f32 %v7878_v38, %v7749_v14  ;;  %v7696_v14 = vmul.f32 %v7694_v39, %v7566_v10  ;;  %v7750_v39 = vld [vmem:[#allocation3 + $0xc] sm:$0xff] }
 0x6f0   : > { %v13493_v24 = vld [vmem:[#allocation3 + $0x20] sm:$0xff]  ;;  %v14790_v35 = vstv %s13667_s27 }
 0x6f1   : > { %v7026_v5 = vmul.f32 %v15020_v32, %v13493_v24  ;;  %7771 = vrot.lane.b32.xlu0 %v7767_v9, %s14997_s4  ;;  %7517 = vrot.lane.b32.xlu1 %v7512_v60, %s15001_s18  ;;  %v7640_v9 = vmul.f32 %v15024_v20, %v7566_v10  ;;  %v7768_v20 = vmul.f32 %v7766_v29, %v7750_v39 }
 0x6f2   : > { %v14795_v50 = vstv %s13699_s11  ;;  %v7186_v52 = vmul.f32 %v15036_v3, %v13493_v24  ;;  %v15038_v3 = vstv %s13653_s26  ;;  %v15045_v16 = vstv %s13699_s11  ;;  %s13911_s11 = sld [smem:[#allocation4 + $0x31]] }
 0x6f3   : > { %v13509_v59 = vadd.f32 %v7026_v5, %v7018_v7  ;;  %v15025_v7 = vstv %s13389_s13  ;;  %v7933_v5 = vld [vmem:[#allocation3 + $0x5] sm:$0xff]  ;;  %s13562_s13 = sld [smem:[#allocation4 + $0x4e]]  ;;  %v14793_v6 = vstv %s13683_s15  ;;  %v15028_v58 = vstv %s13595_s0 }
 0x6f4   : > { %v7668_v32 = vmul.f32 %v15025_v7, %v7566_v10  ;;  %v14784_v7 = vstv %s13573_s28  ;;  %v15042_v40 = vstv %s13683_s15  ;;  %s13894_s15 = sld [smem:[#allocation4 + $0x2f]] }
 0x6f5   : > { %7799 = vrot.lane.b32.xlu0 %v7795_v55, %s14998_s5  ;;  %7545 = vrot.lane.b32.xlu1 %v7540_v54, %s15003_s10  ;;  %v7950_v55 = vstv %s13531_s12  ;;  %s9184_s12 = sld [smem:[#allocation4 + $0x3]] }
 0x6f6   : > { %v7951_v54 = vmul.f32 %v7950_v55, %v7933_v5 }
 0x6f9   : > { %7827 = vrot.lane.b32.xlu0 %v7823_v45, %s14999_s7  ;;  %7589 = vrot.lane.b32.xlu1 %v7584_v49, %s14997_s4  ;;  %v7978_v45 = vstv %s13540_s22  ;;  %s13713_s22 = sld [smem:[#allocation4 + $0x17]] }
 0x6fa   : > { %v7979_v49 = vmul.f32 %v7978_v45, %v7933_v5  ;;  %v14836_v30 = vstv %s13894_s15 }
 0x6fd   : > { %7855 = vrot.lane.b32.xlu0 %v7851_v8, %s15000_s9  ;;  %7617 = vrot.lane.b32.xlu1 %v7612_v31, %s14998_s5  ;;  %v7724_v8 = vmul.f32 %v7722_v33, %v7566_v10 }
 0x6ff   : > { %v15048_v17 = vstv %s13713_s22 }
 0x701   : > { %7883 = vrot.lane.b32.xlu0 %v7879_v4, %s15001_s18  ;;  %7645 = vrot.lane.b32.xlu1 %v7640_v9, %s14999_s7  ;;  %v8007_v4 = vmul.f32 %v8006_v11, %v7933_v5  ;;  %v8034_v9 = vstv %s13562_s13  ;;  %s13740_s13 = sld [smem:[#allocation4 + $0x1b]] }
 0x702   : > { %v8035_v10 = vmul.f32 %v8034_v9, %v7933_v5 }
 0x703   : > { %v13544_v60 = vpop.permute.xlu0 %7035 }
 0x705   : > { %7911 = vrot.lane.b32.xlu0 %v7907_v42, %s15003_s10  ;;  %7673 = vrot.lane.b32.xlu1 %v7668_v32, %s15000_s9  ;;  %v7796_v42 = vmul.f32 %v7794_v57, %v7750_v39  ;;  %v8063_v32 = vmul.f32 %v14784_v7, %v7933_v5  ;;  %v13696_v7 = vld [vmem:[#allocation3 + $0x19] sm:$0xff] }
 0x707   : > { %v13555_v18 = vpop.permute.xlu0 %7063  ;;  %v14802_v62 = vstv %s13740_s13  ;;  %v15054_v61 = vstv %s13740_s13  ;;  %s13973_s13 = sld [smem:[#allocation4 + $0x5c]] }
 0x709   : > { %7955 = vrot.lane.b32.xlu0 %v7951_v54, %s14997_s4  ;;  %7701 = vrot.lane.b32.xlu1 %v7696_v14, %s15001_s18  ;;  %v7824_v54 = vmul.f32 %v7822_v2, %v7750_v39  ;;  %v14782_v14 = vstv %s13584_s25 }
 0x70b   : > { %v13566_v13 = vpop.permute.xlu0 %7091 }
 0x70d   : > { %7983 = vrot.lane.b32.xlu0 %v7979_v49, %s14998_s5  ;;  %7729 = vrot.lane.b32.xlu1 %v7724_v8, %s15003_s10  ;;  %v8091_v49 = vmul.f32 %v14782_v14, %v7933_v5  ;;  %v7852_v8 = vmul.f32 %v7850_v19, %v7750_v39  ;;  %v13680_v14 = vld [vmem:[#allocation3 + $0x6] sm:$0xff] }
 0x70f   : > { %v13577_v31 = vpop.permute.xlu0 %7119 }
 0x711   : > { %8011 = vrot.lane.b32.xlu0 %v8007_v4, %s14999_s7  ;;  %7773 = vrot.lane.b32.xlu1 %v7768_v20, %s14997_s4  ;;  %v14781_v4 = vstv %s13595_s0  ;;  %s13783_s0 = sld [smem:[#allocation4 + $0x21]] }
 0x712   : > { %v7073_v20 = vmul.f32 %v14781_v4, %v13360_v46 }
 0x713   : > { %v13588_v33 = vpop.permute.xlu0 %7147 }
 0x715   : > { %8039 = vrot.lane.b32.xlu0 %v8035_v10, %s15000_s9  ;;  %7801 = vrot.lane.b32.xlu1 %v7796_v42, %s14998_s5  ;;  %v7880_v10 = vmul.f32 %v7878_v38, %v7750_v39  ;;  %v14779_v42 = vstv %s13604_s2  ;;  %v14778_v38 = vstv %s13613_s3  ;;  %s13800_s2 = sld [smem:[#allocation4 + $0x23]]  ;;  %s13815_s3 = sld [smem:[#allocation4 + $0x25]] }
 0x716   : > { %v7101_v5 = vmul.f32 %v14779_v42, %v13360_v46 }
 0x717   : > { %v13599_v29 = vpop.permute.xlu0 %7175  ;;  %v14812_v36 = vstv %s13783_s0 }
 0x719   : > { %8067 = vrot.lane.b32.xlu0 %v8063_v32, %s15001_s18  ;;  %7829 = vrot.lane.b32.xlu1 %v7824_v54, %s14999_s7  ;;  %v7908_v54 = vmul.f32 %v7906_v12, %v7750_v39  ;;  %v14780_v39 = vstv %s13625_s6 }
 0x71b   : > { %v13608_v57 = vpop.permute.xlu0 %7219  ;;  %v14819_v34 = vstv %s13815_s3 }
 0x71d   : > { %8095 = vrot.lane.b32.xlu0 %v8091_v49, %s15003_s10  ;;  %7857 = vrot.lane.b32.xlu1 %v7852_v8, %s15000_s9  ;;  %v7934_v49 = vld [vmem:[#allocation3 + $0xd] sm:$0xff] }
 0x71e   : > { %v7952_v12 = vmul.f32 %v7950_v55, %v7934_v49  ;;  %v7980_v42 = vmul.f32 %v7978_v45, %v7934_v49  ;;  %v14783_v55 = vstv %s13639_s8  ;;  %v8008_v4 = vmul.f32 %v8006_v11, %v7934_v49  ;;  %s13847_s8 = sld [smem:[#allocation4 + $0x29]] }
 0x71f   : > { %v13617_v2 = vpop.permute.xlu0 %7247  ;;  %v14786_v45 = vstv %s13653_s26  ;;  %v8036_v11 = vmul.f32 %v8034_v9, %v7934_v49  ;;  %v15026_v9 = vstv %s13573_s28  ;;  %s13753_s28 = sld [smem:[#allocation4 + $0x58]]  ;;  %s13864_s26 = sld [smem:[#allocation4 + $0x5a]] }
 0x720   : > { %v8064_v37 = vmul.f32 %v15026_v9, %v7934_v49  ;;  %v7044_v9 = vstv %s9184_s12  ;;  %s13926_s12 = sld [smem:[#allocation4 + $0x33]] }
 0x721   : > { %7077 = vrot.lane.b32.xlu0 %v7073_v20, %s14998_s5  ;;  %7885 = vrot.lane.b32.xlu1 %v7880_v10, %s15001_s18  ;;  %v7129_v20 = vmul.f32 %v14778_v38, %v13360_v46  ;;  %v7045_v0 = vmul.f32 %v7044_v9, %v13360_v46 }
 0x723   : > { %v13629_v19 = vpop.permute.xlu0 %7275  ;;  %v13634_v32 = vpop.permute.xlu1 %7037 }
 0x724   : > { %v14825_v21 = vstv %s13847_s8 }
 0x725   : > { %7105 = vrot.lane.b32.xlu0 %v7101_v5, %s14999_s7  ;;  %7913 = vrot.lane.b32.xlu1 %v7908_v54, %s15003_s10  ;;  %v7157_v54 = vmul.f32 %v14780_v39, %v13360_v46  ;;  %v14806_v51 = vstv %s13753_s28  ;;  %v14829_v63 = vstv %s13864_s26 }
 0x727   : > { %v13643_v8 = vpop.permute.xlu0 %7303  ;;  %v13648_v10 = vpop.permute.xlu1 %7065 }
 0x729   : > { %7133 = vrot.lane.b32.xlu0 %v7129_v20, %s15000_s9  ;;  %7957 = vrot.lane.b32.xlu1 %v7952_v12, %s14997_s4  ;;  %v7185_v12 = vmul.f32 %v14783_v55, %v13360_v46  ;;  %v14799_v46 = vstv %s13727_s21 }
 0x72b   : > { %v13657_v5 = vpop.permute.xlu0 %7331  ;;  %v13662_v38 = vpop.permute.xlu1 %7093 }
 0x72d   : > { %7161 = vrot.lane.b32.xlu0 %v7157_v54, %s15001_s18  ;;  %7985 = vrot.lane.b32.xlu1 %v7980_v42, %s14998_s5  ;;  %v8135_v54 = vmul.f32 %v14786_v45, %v13680_v14 }
 0x72f   : > { %v13671_v20 = vpop.permute.xlu0 %7359  ;;  %v13676_v39 = vpop.permute.xlu1 %7121 }
 0x731   : > { %7189 = vrot.lane.b32.xlu0 %v7185_v12, %s15003_s10  ;;  %8013 = vrot.lane.b32.xlu1 %v8008_v4, %s14999_s7  ;;  %v7229_v12 = vmul.f32 %v14790_v35, %v13696_v7  ;;  %v15027_v35 = vstv %s13584_s25  ;;  %s13768_s25 = sld [smem:[#allocation4 + $0x1f]] }
 0x732   : > { %v8092_v27 = vmul.f32 %v15027_v35, %v7934_v49  ;;  %v14796_v35 = vstv %s13713_s22  ;;  %s13941_s22 = sld [smem:[#allocation4 + $0x35]] }
 0x733   : > { %v13687_v42 = vpop.permute.xlu0 %7403  ;;  %v13692_v55 = vpop.permute.xlu1 %7149  ;;  %v7313_v49 = vmul.f32 %v14796_v35, %v13696_v7 }
 0x735   : > { %8139 = vrot.lane.b32.xlu0 %v8135_v54, %s14997_s4  ;;  %8041 = vrot.lane.b32.xlu1 %v8036_v11, %s15000_s9  ;;  %v7257_v11 = vmul.f32 %v14793_v6, %v13696_v7 }
 0x737   : > { %v13703_v4 = vpop.permute.xlu0 %7431  ;;  %v13708_v45 = vpop.permute.xlu1 %7177  ;;  %v14809_v23 = vstv %s13768_s25 }
 0x739   : > { %7233 = vrot.lane.b32.xlu0 %v7229_v12, %s14997_s4  ;;  %8069 = vrot.lane.b32.xlu1 %v8064_v37, %s15001_s18  ;;  %v7285_v12 = vmul.f32 %v14795_v50, %v13696_v7  ;;  %v7046_v50 = vmul.f32 %v7044_v9, %v13493_v24  ;;  %v7074_v9 = vmul.f32 %v15028_v58, %v13493_v24 }
 0x73a   : > { %v7102_v58 = vmul.f32 %v15030_v48, %v13493_v24  ;;  %v7130_v48 = vmul.f32 %v15032_v53, %v13493_v24  ;;  %v15034_v53 = vstv %s13625_s6  ;;  %s13830_s6 = sld [smem:[#allocation4 + $0x27]] }
 0x73b   : > { %v13717_v54 = vpop.permute.xlu0 %7459  ;;  %v13722_v22 = vpop.permute.xlu1 %7221  ;;  %v7158_v56 = vmul.f32 %v15034_v53, %v13493_v24  ;;  %v14815_v53 = vstv %s13800_s2 }
 0x73d   : > { %7261 = vrot.lane.b32.xlu0 %v7257_v11, %s14998_s5  ;;  %8097 = vrot.lane.b32.xlu1 %v8092_v27, %s15003_s10 }
 0x73f   : > { %v13731_v37 = vpop.permute.xlu0 %7487  ;;  %v13736_v6 = vpop.permute.xlu1 %7249 }
 0x740   : > { %v14822_v1 = vstv %s13830_s6 }
 0x741   : > { %7289 = vrot.lane.b32.xlu0 %v7285_v12, %s14999_s7  ;;  %7049 = vrot.lane.b32.xlu1 %v7045_v0, %s14997_s4  ;;  %v7341_v12 = vmul.f32 %v14799_v46, %v13696_v7 }
 0x743   : > { %v13744_v27 = vpop.permute.xlu0 %7515  ;;  %v13749_v11 = vpop.permute.xlu1 %7277 }
 0x745   : > { %7317 = vrot.lane.b32.xlu0 %v7313_v49, %s15000_s9  ;;  %7051 = vrot.lane.b32.xlu1 %v7046_v50, %s14997_s4  ;;  %v7369_v49 = vmul.f32 %v14802_v62, %v13696_v7 }
 0x747   : > { %v13757_v0 = vpop.permute.xlu0 %7543  ;;  %v13762_v35 = vpop.permute.xlu1 %7305 }
 0x749   : > { %7345 = vrot.lane.b32.xlu0 %v7341_v12, %s15001_s18  ;;  %7079 = vrot.lane.b32.xlu1 %v7074_v9, %s14998_s5  ;;  %v8163_v9 = vmul.f32 %v14806_v51, %v13680_v14 }
 0x74b   : > { %v13772_v50 = vpop.permute.xlu0 %7587  ;;  %v13777_v46 = vpop.permute.xlu1 %7333 }
 0x74c   : > { %15029 = vst [vmem:[#allocation50_spill] sm:$0xff] %v13772_v50 }
 0x74d   : > { %7373 = vrot.lane.b32.xlu0 %v7369_v49, %s15003_s10  ;;  %7107 = vrot.lane.b32.xlu1 %v7102_v58, %s14999_s7  ;;  %v7413_v58 = vmul.f32 %v14809_v23, %v13797_v44 }
 0x74f   : > { %v13787_v12 = vpop.permute.xlu0 %7615  ;;  %v13792_v62 = vpop.permute.xlu1 %7361 }
 0x750   : > { %15031 = vst [vmem:[#allocation51_spill] sm:$0xff] %v13787_v12 }
 0x751   : > { %8167 = vrot.lane.b32.xlu0 %v8163_v9, %s14998_s5  ;;  %7135 = vrot.lane.b32.xlu1 %v7130_v48, %s15000_s9  ;;  %v7441_v48 = vmul.f32 %v14812_v36, %v13797_v44  ;;  %v7469_v36 = vmul.f32 %v14815_v53, %v13797_v44  ;;  %v7497_v53 = vmul.f32 %v14819_v34, %v13797_v44 }
 0x753   : > { %v13804_v49 = vpop.permute.xlu0 %7643  ;;  %v13809_v51 = vpop.permute.xlu1 %7405 }
 0x754   : > { %15033 = vst [vmem:[#allocation52_spill] sm:$0xff] %v13804_v49 }
 0x755   : > { %7417 = vrot.lane.b32.xlu0 %v7413_v58, %s14997_s4  ;;  %7163 = vrot.lane.b32.xlu1 %v7158_v56, %s15001_s18  ;;  %v13833_v58 = vld [vmem:[#allocation3 + $0xe] sm:$0xff] }
 0x756   : > { %v8136_v24 = vmul.f32 %v15038_v3, %v13833_v58  ;;  %v15040_v3 = vstv %s13667_s27  ;;  %s13879_s27 = sld [smem:[#allocation4 + $0x2d]] }
 0x757   : > { %v13819_v9 = vpop.permute.xlu0 %7671  ;;  %v13824_v23 = vpop.permute.xlu1 %7433 }
 0x758   : > { %15035 = vst [vmem:[#allocation53_spill] sm:$0xff] %v13819_v9 }
 0x759   : > { %7445 = vrot.lane.b32.xlu0 %v7441_v48, %s14998_s5  ;;  %7191 = vrot.lane.b32.xlu1 %v7186_v52, %s15003_s10  ;;  %v13850_v48 = vld [vmem:[#allocation3 + $0x21] sm:$0xff] }
 0x75a   : > { %v7230_v28 = vmul.f32 %v15040_v3, %v13850_v48  ;;  %v7258_v3 = vmul.f32 %v15042_v40, %v13850_v48  ;;  %v7286_v40 = vmul.f32 %v15045_v16, %v13850_v48  ;;  %v7314_v16 = vmul.f32 %v15048_v17, %v13850_v48 }
 0x75b   : > { %v13836_v56 = vpop.permute.xlu0 %7699  ;;  %v13841_v25 = vpop.permute.xlu1 %7461  ;;  %v15051_v17 = vstv %s13727_s21  ;;  %s13956_s21 = sld [smem:[#allocation4 + $0x37]] }
 0x75c   : > { %15037 = vst [vmem:[#allocation54_spill] sm:$0xff] %v13836_v56  ;;  %v14833_v43 = vstv %s13879_s27  ;;  %v7342_v41 = vmul.f32 %v15051_v17, %v13850_v48  ;;  %v7370_v17 = vmul.f32 %v15054_v61, %v13850_v48 }
 0x75d   : > { %7473 = vrot.lane.b32.xlu0 %v7469_v36, %s14999_s7  ;;  %8141 = vrot.lane.b32.xlu1 %v8136_v24, %s14997_s4  ;;  %v7525_v24 = vmul.f32 %v14822_v1, %v13797_v44 }
 0x75f   : > { %v13853_v52 = vpop.permute.xlu0 %7727  ;;  %v13858_v15 = vpop.permute.xlu1 %7489 }
 0x760   : > { %15039 = vst [vmem:[#allocation55_spill] sm:$0xff] %v13853_v52 }
 0x761   : > { %7501 = vrot.lane.b32.xlu0 %v7497_v53, %s15000_s9  ;;  %7235 = vrot.lane.b32.xlu1 %v7230_v28, %s14997_s4  ;;  %v7553_v53 = vmul.f32 %v14825_v21, %v13797_v44 }
 0x763   : > { %v13868_v36 = vpop.permute.xlu0 %7771  ;;  %v13873_v34 = vpop.permute.xlu1 %7517 }
 0x764   : > { %15041 = vst [vmem:[#allocation56_spill] sm:$0xff] %v13868_v36  ;;  %v14839_v36 = vstv %s13941_s22 }
 0x765   : > { %7529 = vrot.lane.b32.xlu0 %v7525_v24, %s15001_s18  ;;  %7263 = vrot.lane.b32.xlu1 %v7258_v3, %s14998_s5  ;;  %v8191_v3 = vmul.f32 %v14829_v63, %v13680_v14 }
 0x767   : > { %v13883_v28 = vpop.permute.xlu0 %7799  ;;  %v13888_v1 = vpop.permute.xlu1 %7545 }
 0x768   : > { %15043 = vst [vmem:[#allocation57_spill] sm:$0xff] %v13883_v28  ;;  %15044 = vst [vmem:[#allocation58_spill] sm:$0xff] %v13888_v1 }
 0x769   : > { %7557 = vrot.lane.b32.xlu0 %v7553_v53, %s15003_s10  ;;  %7291 = vrot.lane.b32.xlu1 %v7286_v40, %s14999_s7  ;;  %v7597_v40 = vmul.f32 %v14833_v43, %v13908_v47 }
 0x76b   : > { %v13898_v24 = vpop.permute.xlu0 %7827  ;;  %v13903_v21 = vpop.permute.xlu1 %7589 }
 0x76c   : > { %15046 = vst [vmem:[#allocation59_spill] sm:$0xff] %v13898_v24  ;;  %15047 = vst [vmem:[#allocation60_spill] sm:$0xff] %v13903_v21  ;;  %v14838_v24 = vstv %s13926_s12 }
 0x76d   : > { %8195 = vrot.lane.b32.xlu0 %v8191_v3, %s14999_s7  ;;  %7319 = vrot.lane.b32.xlu1 %v7314_v16, %s15000_s9  ;;  %v7625_v16 = vmul.f32 %v14836_v30, %v13908_v47 }
 0x76f   : > { %v13915_v53 = vpop.permute.xlu0 %7855  ;;  %v13920_v63 = vpop.permute.xlu1 %7617 }
 0x770   : > { %15049 = vst [vmem:[#allocation61_spill] sm:$0xff] %v13915_v53  ;;  %15050 = vst [vmem:[#allocation62_spill] sm:$0xff] %v13920_v63  ;;  %v14837_v53 = vstv %s13911_s11 }
 0x771   : > { %7601 = vrot.lane.b32.xlu0 %v7597_v40, %s14997_s4  ;;  %7347 = vrot.lane.b32.xlu1 %v7342_v41, %s15001_s18  ;;  %v7653_v40 = vmul.f32 %v14837_v53, %v13908_v47  ;;  %v7681_v53 = vmul.f32 %v14838_v24, %v13908_v47 }
 0x773   : > { %v13930_v3 = vpop.permute.xlu0 %7883  ;;  %v13935_v43 = vpop.permute.xlu1 %7645 }
 0x774   : > { %15052 = vst [vmem:[#allocation63_spill] sm:$0xff] %v13930_v3  ;;  %15053 = vst [vmem:[#allocation64_spill] sm:$0xff] %v13935_v43  ;;  %v15057_v3 = vstv %s13753_s28  ;;  %s13988_s28 = sld [smem:[#allocation4 + $0x3b]] }
 0x775   : > { %7629 = vrot.lane.b32.xlu0 %v7625_v16, %s14998_s5  ;;  %7375 = vrot.lane.b32.xlu1 %v7370_v17, %s15003_s10  ;;  %v8164_v61 = vmul.f32 %v15057_v3, %v13833_v58  ;;  %v13959_v16 = vld [vmem:[#allocation3 + $0x22] sm:$0xff]  ;;  %v15060_v3 = vstv %s13768_s25  ;;  %s14003_s25 = sld [smem:[#allocation4 + $0x3d]] }
 0x776   : > { %v7414_v28 = vmul.f32 %v15060_v3, %v13959_v16 }
 0x777   : > { %v13945_v41 = vpop.permute.xlu0 %7911  ;;  %v13950_v30 = vpop.permute.xlu1 %7673 }
 0x778   : > { %15055 = vst [vmem:[#allocation65_spill] sm:$0xff] %v13945_v41  ;;  %15056 = vst [vmem:[#allocation66_spill] sm:$0xff] %v13950_v30 }
 0x779   : > { %7657 = vrot.lane.b32.xlu0 %v7653_v40, %s14999_s7  ;;  %8169 = vrot.lane.b32.xlu1 %v8164_v61, %s14998_s5  ;;  %v7709_v61 = vmul.f32 %v14839_v36, %v13908_v47 }
 0x77a   : > { %v14842_v52 = vstv %s13988_s28  ;;  %v15095_v12 = vstv %s13988_s28  ;;  %s14223_s28 = sld [smem:[#allocation4 + $0x59]] }
 0x77b   : > { %v13962_v17 = vpop.permute.xlu0 %7955  ;;  %v13967_v41 = vpop.permute.xlu1 %7701 }
 0x77c   : > { %15058 = vst [vmem:[#allocation67_spill] sm:$0xff] %v13962_v17  ;;  %15059 = vst [vmem:[#allocation68_spill] sm:$0xff] %v13967_v41  ;;  %v15063_v17 = vstv %s13783_s0  ;;  %v14840_v41 = vstv %s13956_s21  ;;  %s14020_s0 = sld [smem:[#allocation4 + $0x3f]] }
 0x77d   : > { %7685 = vrot.lane.b32.xlu0 %v7681_v53, %s15000_s9  ;;  %7419 = vrot.lane.b32.xlu1 %v7414_v28, %s14997_s4  ;;  %v7442_v3 = vmul.f32 %v15063_v17, %v13959_v16  ;;  %v7737_v53 = vmul.f32 %v14840_v41, %v13908_v47 }
 0x77f   : > { %v13977_v40 = vpop.permute.xlu0 %7983  ;;  %v13982_v24 = vpop.permute.xlu1 %7729 }
 0x780   : > { %15061 = vst [vmem:[#allocation69_spill] sm:$0xff] %v13977_v40  ;;  %15062 = vst [vmem:[#allocation70_spill] sm:$0xff] %v13982_v24  ;;  %v15066_v40 = vstv %s13800_s2  ;;  %v14841_v24 = vstv %s13973_s13  ;;  %s14035_s2 = sld [smem:[#allocation4 + $0x41]] }
 0x781   : > { %7713 = vrot.lane.b32.xlu0 %v7709_v61, %s15001_s18  ;;  %7447 = vrot.lane.b32.xlu1 %v7442_v3, %s14998_s5  ;;  %v7470_v17 = vmul.f32 %v15066_v40, %v13959_v16  ;;  %v8219_v3 = vmul.f32 %v14841_v24, %v13680_v14 }
 0x783   : > { %v13992_v28 = vpop.permute.xlu0 %8011  ;;  %v13997_v36 = vpop.permute.xlu1 %7773 }
 0x784   : > { %15064 = vst [vmem:[#allocation71_spill] sm:$0xff] %v13992_v28  ;;  %15065 = vst [vmem:[#allocation72_spill] sm:$0xff] %v13997_v36  ;;  %v15069_v28 = vstv %s13815_s3  ;;  %v14017_v36 = vld [vmem:[#allocation3 + $0x1c] sm:$0xff]  ;;  %s14050_s3 = sld [smem:[#allocation4 + $0x43]] }
 0x785   : > { %7741 = vrot.lane.b32.xlu0 %v7737_v53, %s15003_s10  ;;  %7475 = vrot.lane.b32.xlu1 %v7470_v17, %s14999_s7  ;;  %v7498_v40 = vmul.f32 %v15069_v28, %v13959_v16  ;;  %15070 = vst [vmem:[#allocation75_spill] sm:$0xff] %v14017_v36  ;;  %v7781_v17 = vmul.f32 %v14842_v52, %v14017_v36  ;;  %v15073_v28 = vstv %s13830_s6  ;;  %s14065_s6 = sld [smem:[#allocation4 + $0x45]] }
 0x787   : > { %v14007_v61 = vpop.permute.xlu0 %8039  ;;  %v14012_v41 = vpop.permute.xlu1 %7801 }
 0x788   : > { %15067 = vst [vmem:[#allocation73_spill] sm:$0xff] %v14007_v61  ;;  %15068 = vst [vmem:[#allocation74_spill] sm:$0xff] %v14012_v41  ;;  %v7526_v61 = vmul.f32 %v15073_v28, %v13959_v16  ;;  %v14843_v41 = vstv %s14003_s25 }
 0x789   : > { %8223 = vrot.lane.b32.xlu0 %v8219_v3, %s15000_s9  ;;  %7503 = vrot.lane.b32.xlu1 %v7498_v40, %s15000_s9  ;;  %v7809_v40 = vmul.f32 %v14843_v41, %v14017_v36 }
 0x78a   : > { %v14846_v56 = vstv %s14050_s3 }
 0x78b   : > { %v14024_v53 = vpop.permute.xlu0 %8067  ;;  %v14029_v24 = vpop.permute.xlu1 %7829  ;;  %v14847_v43 = vstv %s14065_s6 }
 0x78c   : > { %15071 = vst [vmem:[#allocation76_spill] sm:$0xff] %v14024_v53  ;;  %15072 = vst [vmem:[#allocation77_spill] sm:$0xff] %v14029_v24  ;;  %v15076_v53 = vstv %s13847_s8  ;;  %v14844_v24 = vstv %s14020_s0  ;;  %s14082_s8 = sld [smem:[#allocation4 + $0x5e]] }
 0x78d   : > { %7785 = vrot.lane.b32.xlu0 %v7781_v17, %s14997_s4  ;;  %7531 = vrot.lane.b32.xlu1 %v7526_v61, %s15001_s18  ;;  %v7554_v28 = vmul.f32 %v15076_v53, %v13959_v16  ;;  %v7837_v17 = vmul.f32 %v14844_v24, %v14017_v36 }
 0x78f   : > { %v14039_v3 = vpop.permute.xlu0 %8095  ;;  %v14044_v52 = vpop.permute.xlu1 %7857 }
 0x790   : > { %15074 = vst [vmem:[#allocation78_spill] sm:$0xff] %v14039_v3  ;;  %15075 = vst [vmem:[#allocation79_spill] sm:$0xff] %v14044_v52  ;;  %v15078_v3 = vstv %s13864_s26  ;;  %v14845_v52 = vstv %s14035_s2  ;;  %s14097_s26 = sld [smem:[#allocation4 + $0x49]] }
 0x791   : > { %7813 = vrot.lane.b32.xlu0 %v7809_v40, %s14998_s5  ;;  %7559 = vrot.lane.b32.xlu1 %v7554_v28, %s15003_s10  ;;  %v8192_v53 = vmul.f32 %v15078_v3, %v13833_v58  ;;  %v14068_v40 = vld [vmem:[#allocation3 + $0x23] sm:$0xff]  ;;  %v7865_v24 = vmul.f32 %v14845_v52, %v14017_v36  ;;  %v15081_v3 = vstv %s13879_s27  ;;  %s14112_s27 = sld [smem:[#allocation4 + $0x4b]] }
 0x792   : > { %15079 = vst [vmem:[#allocation81_spill] sm:$0xff] %v14068_v40  ;;  %v7598_v30 = vmul.f32 %v15081_v3, %v14068_v40  ;;  %v14849_v9 = vstv %s14082_s8 }
 0x793   : > { %v14054_v61 = vpop.permute.xlu0 %7077  ;;  %v14059_v41 = vpop.permute.xlu1 %7885 }
 0x794   : > { %15077 = vst [vmem:[#allocation80_spill] sm:$0xff] %v14059_v41 }
 0x795   : > { %7841 = vrot.lane.b32.xlu0 %v7837_v17, %s14999_s7  ;;  %8197 = vrot.lane.b32.xlu1 %v8192_v53, %s14999_s7  ;;  %v7893_v53 = vmul.f32 %v14846_v56, %v14017_v36 }
 0x796   : > { %v14850_v63 = vstv %s14097_s26 }
 0x797   : > { %v14071_v28 = vpop.permute.xlu0 %7105  ;;  %v14076_v41 = vpop.permute.xlu1 %7913  ;;  %v14851_v49 = vstv %s14112_s27 }
 0x798   : > { %15080 = vst [vmem:[#allocation82_spill] sm:$0xff] %v14076_v41  ;;  %v15083_v41 = vstv %s13894_s15  ;;  %s14129_s15 = sld [smem:[#allocation4 + $0x4d]] }
 0x799   : > { %7869 = vrot.lane.b32.xlu0 %v7865_v24, %s15000_s9  ;;  %7603 = vrot.lane.b32.xlu1 %v7598_v30, %s14997_s4  ;;  %v7626_v3 = vmul.f32 %v15083_v41, %v14068_v40  ;;  %v7921_v24 = vmul.f32 %v14847_v43, %v14017_v36  ;;  %v14126_v36 = vld [vmem:[#allocation3 + $0x1d] sm:$0xff] }
 0x79b   : > { %v14086_v17 = vpop.permute.xlu0 %7133  ;;  %v14091_v52 = vpop.permute.xlu1 %7957 }
 0x79c   : > { %15082 = vst [vmem:[#allocation83_spill] sm:$0xff] %v14091_v52  ;;  %v15085_v52 = vstv %s13911_s11  ;;  %s14144_s11 = sld [smem:[#allocation4 + $0x4f]] }
 0x79d   : > { %7897 = vrot.lane.b32.xlu0 %v7893_v53, %s15001_s18  ;;  %7631 = vrot.lane.b32.xlu1 %v7626_v3, %s14998_s5  ;;  %v7654_v41 = vmul.f32 %v15085_v52, %v14068_v40  ;;  %v8247_v3 = vmul.f32 %v14849_v9, %v13680_v14 }
 0x79f   : > { %v14101_v30 = vpop.permute.xlu0 %7161  ;;  %v14106_v56 = vpop.permute.xlu1 %7985 }
 0x7a0   : > { %15084 = vst [vmem:[#allocation84_spill] sm:$0xff] %v14106_v56  ;;  %v15087_v56 = vstv %s13926_s12  ;;  %s14159_s12 = sld [smem:[#allocation4 + $0x51]] }
 0x7a1   : > { %7925 = vrot.lane.b32.xlu0 %v7921_v24, %s15003_s10  ;;  %7659 = vrot.lane.b32.xlu1 %v7654_v41, %s14999_s7  ;;  %v7682_v52 = vmul.f32 %v15087_v56, %v14068_v40  ;;  %v7965_v41 = vmul.f32 %v14850_v63, %v14126_v36  ;;  %v15090_v56 = vstv %s13941_s22  ;;  %s14174_s22 = sld [smem:[#allocation4 + $0x53]] }
 0x7a2   : > { %v14854_v21 = vstv %s14144_s11 }
 0x7a3   : > { %v14116_v53 = vpop.permute.xlu0 %7189  ;;  %v14121_v43 = vpop.permute.xlu1 %8013 }
 0x7a4   : > { %15086 = vst [vmem:[#allocation85_spill] sm:$0xff] %v14121_v43  ;;  %v7710_v43 = vmul.f32 %v15090_v56, %v14068_v40  ;;  %v14852_v56 = vstv %s14129_s15 }
 0x7a5   : > { %8251 = vrot.lane.b32.xlu0 %v8247_v3, %s15001_s18  ;;  %7687 = vrot.lane.b32.xlu1 %v7682_v52, %s15000_s9  ;;  %v7993_v52 = vmul.f32 %v14851_v49, %v14126_v36 }
 0x7a7   : > { %v14133_v24 = vpop.permute.xlu0 %8139  ;;  %v14138_v9 = vpop.permute.xlu1 %8041 }
 0x7a8   : > { %15088 = vst [vmem:[#allocation86_spill] sm:$0xff] %v14133_v24  ;;  %15089 = vst [vmem:[#allocation87_spill] sm:$0xff] %v14138_v9  ;;  %v15092_v24 = vstv %s13956_s21  ;;  %s14191_s21 = sld [smem:[#allocation4 + $0x60]] }
 0x7a9   : > { %7969 = vrot.lane.b32.xlu0 %v7965_v41, %s14997_s4  ;;  %7715 = vrot.lane.b32.xlu1 %v7710_v43, %s15001_s18  ;;  %v7738_v9 = vmul.f32 %v15092_v24, %v14068_v40  ;;  %v8021_v41 = vmul.f32 %v14852_v56, %v14126_v36 }
 0x7ab   : > { %v14148_v3 = vpop.permute.xlu0 %7233  ;;  %v14153_v63 = vpop.permute.xlu1 %8069 }
 0x7ac   : > { %15091 = vst [vmem:[#allocation88_spill] sm:$0xff] %v14153_v63  ;;  %v15094_v63 = vstv %s13973_s13  ;;  %s14207_s13 = sld [smem:[#allocation4 + $0x57]] }
 0x7ad   : > { %7997 = vrot.lane.b32.xlu0 %v7993_v52, %s14998_s5  ;;  %7743 = vrot.lane.b32.xlu1 %v7738_v9, %s15003_s10  ;;  %v8220_v24 = vmul.f32 %v15094_v63, %v13833_v58  ;;  %v14177_v52 = vld [vmem:[#allocation3 + $0x24] sm:$0xff]  ;;  %v7041_v9 = vadd.f32 %v13544_v60, %v13376_v26  ;;  %v8049_v63 = vmul.f32 %v14854_v21, %v14126_v36 }
 0x7ae   : > { %v7782_v40 = vmul.f32 %v15095_v12, %v14177_v52  ;;  %v7042_v26 = vadd.f32 %v13634_v32, %v13509_v59 }
 0x7af   : > { %v14163_v43 = vpop.permute.xlu0 %7261  ;;  %v14168_v49 = vpop.permute.xlu1 %8097 }
 0x7b0   : > { %15093 = vst [vmem:[#allocation89_spill] sm:$0xff] %v14168_v49 }
 0x7b1   : > { %8025 = vrot.lane.b32.xlu0 %v8021_v41, %s14999_s7  ;;  %8225 = vrot.lane.b32.xlu1 %v8220_v24, %s15000_s9  ;;  %v14855_v41 = vstv %s14159_s12 }
 0x7b2   : > { %v8077_v12 = vmul.f32 %v14855_v41, %v14126_v36  ;;  %v15097_v41 = vstv %s14020_s0  ;;  %s14237_s0 = sld [smem:[#allocation4 + $0xf]] }
 0x7b3   : > { %v14182_v56 = vpop.permute.xlu0 %7289  ;;  %v7050_v49 = vpop.permute.xlu1 %7049 }
 0x7b4   : > { %v7055_v50 = vadd.f32 %v7050_v49, %v7041_v9  ;;  %v15096_v49 = vstv %s14003_s25  ;;  %s14227_s25 = sld [smem:[#allocation4 + $0xe]] }
 0x7b5   : > { %8053 = vrot.lane.b32.xlu0 %v8049_v63, %s15000_s9  ;;  %7787 = vrot.lane.b32.xlu1 %v7782_v40, %s14997_s4  ;;  %v7810_v9 = vmul.f32 %v15096_v49, %v14177_v52  ;;  %v8104_v63 = vstv %s14174_s22 }
 0x7b6   : > { %v7069_v60 = vadd.f32 %v13555_v18, %v7055_v50  ;;  %v8105_v50 = vmul.f32 %v8104_v63, %v14126_v36 }
 0x7b7   : > { %v14198_v24 = vpop.permute.xlu0 %7317  ;;  %v7052_v21 = vpop.permute.xlu1 %7051 }
 0x7b8   : > { %v7083_v40 = vadd.f32 %v14054_v61, %v7069_v60  ;;  %v7056_v1 = vadd.f32 %v7052_v21, %v7042_v26  ;;  %v7838_v61 = vmul.f32 %v15097_v41, %v14177_v52  ;;  %v8274_v21 = vstv %s14191_s21 }
 0x7b9   : > { %8081 = vrot.lane.b32.xlu0 %v8077_v12, %s15001_s18  ;;  %7815 = vrot.lane.b32.xlu1 %v7810_v9, %s14998_s5  ;;  %v8275_v41 = vmul.f32 %v8274_v21, %v13680_v14  ;;  %v15098_v12 = vstv %s14035_s2  ;;  %s14261_s2 = sld [smem:[#allocation4 + $0x5d]] }
 0x7ba   : > { %v7097_v59 = vadd.f32 %v13566_v13, %v7083_v40  ;;  %v7070_v18 = vadd.f32 %v13648_v10, %v7056_v1  ;;  %v7866_v9 = vmul.f32 %v15098_v12, %v14177_v52  ;;  %v14242_v40 = vld [vmem:[#allocation3 + $0x1e] sm:$0xff] }
 0x7bb   : > { %v14214_v32 = vpop.permute.xlu0 %7345  ;;  %v7080_v49 = vpop.permute.xlu1 %7079 }
 0x7bc   : > { %v7111_v26 = vadd.f32 %v14071_v28, %v7097_v59  ;;  %v7084_v13 = vadd.f32 %v7080_v49, %v7070_v18  ;;  %v8148_v59 = vstv %s14207_s13 }
 0x7bd   : > { %8109 = vrot.lane.b32.xlu0 %v8105_v50, %s15003_s10  ;;  %7843 = vrot.lane.b32.xlu1 %v7838_v61, %s14999_s7  ;;  %v8149_v49 = vmul.f32 %v8148_v59, %v14242_v40 }
 0x7be   : > { %v7125_v1 = vadd.f32 %v13577_v31, %v7111_v26  ;;  %v7098_v10 = vadd.f32 %v13662_v38, %v7084_v13  ;;  %v8176_v13 = vstv %s14223_s28  ;;  %s500_s28 = sand.u32 1, %s10455_s30  }
 0x7bf   : > { %v14232_v60 = vpop.permute.xlu0 %7373  ;;  %v7108_v28 = vpop.permute.xlu1 %7107  ;;  %v8177_v12 = vmul.f32 %v8176_v13, %v14242_v40 }
 0x7c0   : > { %v7139_v31 = vadd.f32 %v14086_v17, %v7125_v1  ;;  %v7112_v38 = vadd.f32 %v7108_v28, %v7098_v10  ;;  %v15099_v17 = vstv %s14050_s3  ;;  %s14279_s3 = sld [smem:[#allocation4 + $0x5f]] }
 0x7c1   : > { %8279 = vrot.lane.b32.xlu0 %v8275_v41, %s15003_s10  ;;  %7871 = vrot.lane.b32.xlu1 %v7866_v9, %s15000_s9  ;;  %v7894_v26 = vmul.f32 %v15099_v17, %v14177_v52  ;;  %v7208_v9 = vstv %s14237_s0  ;;  %s9289_s0 = sshll.u32 %s10576_s17, 12  ;;  %s14669_s17 = scalar_lea.sflag [#allocation5], %s500_s28 }
 0x7c2   : > { %v7153_v14 = vadd.f32 %v13588_v33, %v7139_v31  ;;  %v7126_v18 = vadd.f32 %v13676_v39, %v7112_v38  ;;  %v7200_v39 = vstv %s14227_s25  ;;  %s8807_s25 = sshll.u32 %s500_s28, 8 }
 0x7c3   : > { %v14252_v50 = vpop.permute.xlu0 %8167  ;;  %v7136_v61 = vpop.permute.xlu1 %7135 }
 0x7c4   : > { %v7167_v33 = vadd.f32 %v14101_v30, %v7153_v14  ;;  %v7140_v1 = vadd.f32 %v7136_v61, %v7126_v18  ;;  %v15100_v30 = vstv %s14065_s6  ;;  %v8204_v14 = vstv %s14245_s19  ;;  %v10351_v18 = vld [vmem:[#allocation3 + $0x1] sm:$0xff]  ;;  %s14295_s6 = sld [smem:[#allocation4 + $0x61]]  ;;  %s9252_s19 = sld [smem:[#allocation4 + $0x47]] }
 0x7c5   : > { %8153 = vrot.lane.b32.xlu0 %v8149_v49, %s14997_s4  ;;  %7899 = vrot.lane.b32.xlu1 %v7894_v26, %s15001_s18  ;;  %v7922_v38 = vmul.f32 %v15100_v30, %v14177_v52  ;;  %v7209_v61 = vmul.f32 %v7208_v9, %v13696_v7  ;;  %v10352_v7 = vld [vmem:[#allocation3 + $0x9] sm:$0xff] }
 0x7c6   : > { %v7181_v10 = vadd.f32 %v13599_v29, %v7167_v33  ;;  %v7154_v41 = vadd.f32 %v13692_v55, %v7140_v1  ;;  %v7201_v29 = vmul.f32 %v10351_v18, %v7200_v39  ;;  %v8205_v1 = vmul.f32 %v8204_v14, %v14242_v40 }
 0x7c7   : > { %v14269_v28 = vpop.permute.xlu0 %7417  ;;  %v7164_v31 = vpop.permute.xlu1 %7163  ;;  %v15101_v18 = vstv %s14082_s8  ;;  %s14343_s8 = sld [smem:[#allocation4 + $0x1c]] }
 0x7c8   : > { %v7195_v55 = vadd.f32 %v14116_v53, %v7181_v10  ;;  %v7168_v49 = vadd.f32 %v7164_v31, %v7154_v41  ;;  %v8248_v53 = vmul.f32 %v15101_v18, %v13833_v58  ;;  %v8232_v10 = vstv %s14261_s2 }
 0x7c9   : > { %8181 = vrot.lane.b32.xlu0 %v8177_v12, %s14998_s5  ;;  %7927 = vrot.lane.b32.xlu1 %v7922_v38, %s15003_s10  ;;  %v7202_v12 = vmul.f32 %v10352_v7, %v7200_v39  ;;  %v8233_v39 = vmul.f32 %v8232_v10, %v14242_v40  ;;  %v15103_v7 = vstv %s14112_s27  ;;  %s9266_s27 = sld [smem:[#allocation4 + $0x55]] }
 0x7ca   : > { %v7203_v17 = vadd.f32 %v7201_v29, %v7195_v55  ;;  %v7182_v26 = vadd.f32 %v13708_v45, %v7168_v49  ;;  %v14298_v45 = vld [vmem:[#allocation3 + $0x25] sm:$0xff]  ;;  %v7210_v29 = vmul.f32 %v7208_v9, %v13850_v48 }
 0x7cb   : > { %v14286_v33 = vpop.permute.xlu0 %7445  ;;  %v7192_v30 = vpop.permute.xlu1 %7191 }
 0x7cc   : > { %v7211_v41 = vadd.f32 %v7209_v61, %v7203_v17  ;;  %v7196_v31 = vadd.f32 %v7192_v30, %v7182_v26  ;;  %v15102_v17 = vstv %s14097_s26  ;;  %s14350_s26 = sld [smem:[#allocation4 + $0x1d]] }
 0x7cd   : > { %8209 = vrot.lane.b32.xlu0 %v8205_v1, %s14999_s7  ;;  %8253 = vrot.lane.b32.xlu1 %v8248_v53, %s15001_s18  ;;  %v7966_v26 = vmul.f32 %v15102_v17, %v14298_v45  ;;  %v8260_v1 = vstv %s14279_s3  ;;  %v15104_v17 = vstv %s14129_s15  ;;  %s8301_s15 = sld [smem:[#allocation7]] }
 0x7ce   : > { %v7225_v38 = vadd.f32 %v13608_v57, %v7211_v41  ;;  %v7204_v55 = vadd.f32 %v7202_v12, %v7196_v31  ;;  %v8261_v53 = vmul.f32 %v8260_v1, %v14242_v40  ;;  %v8288_v12 = vstv %s14295_s6 }
 0x7cf   : > { %v14303_v49 = vpop.permute.xlu0 %7473  ;;  %v14308_v61 = vpop.permute.xlu1 %8141 }
 0x7d0   : > { %v7239_v30 = vadd.f32 %v14148_v3, %v7225_v38  ;;  %v7212_v18 = vadd.f32 %v7210_v29, %v7204_v55  ;;  %v7994_v3 = vmul.f32 %v15103_v7, %v14298_v45  ;;  %v8289_v55 = vmul.f32 %v8288_v12, %v14242_v40 }
 0x7d1   : > { %8237 = vrot.lane.b32.xlu0 %v8233_v39, %s15000_s9  ;;  %7971 = vrot.lane.b32.xlu1 %v7966_v26, %s14997_s4  ;;  %v8022_v26 = vmul.f32 %v15104_v17, %v14298_v45 }
 0x7d2   : > { %v7253_v57 = vadd.f32 %v13617_v2, %v7239_v30  ;;  %v7226_v48 = vadd.f32 %v13722_v22, %v7212_v18 }
 0x7d3   : > { %v14319_v9 = vpop.permute.xlu0 %7501  ;;  %v7236_v41 = vpop.permute.xlu1 %7235 }
 0x7d4   : > { %v7267_v31 = vadd.f32 %v14163_v43, %v7253_v57  ;;  %v7240_v38 = vadd.f32 %v7236_v41, %v7226_v48 }
 0x7d5   : > { %8265 = vrot.lane.b32.xlu0 %v8261_v53, %s15001_s18  ;;  %7999 = vrot.lane.b32.xlu1 %v7994_v3, %s14998_s5 }
 0x7d6   : > { %v7281_v2 = vadd.f32 %v13629_v19, %v7267_v31  ;;  %v7254_v22 = vadd.f32 %v13736_v6, %v7240_v38  ;;  %v15106_v31 = vstv %s14159_s12  ;;  %s15149_s12 = sshll.u32 %s10706_s20, 7  ;;  %s14551_s20 = scalar_lea.vmem [#allocation9], %s8807_s25 }
 0x7d7   : > { %v14333_v29 = vpop.permute.xlu0 %7529  ;;  %v7264_v39 = vpop.permute.xlu1 %7263  ;;  %v8078_v38 = vmul.f32 %v15106_v31, %v14298_v45  ;;  %s14539_s13 = scalar_lea.vmem %s14711_s1, %s15149_s12  ;;  %s8703_s2 = sshll.u32 %s14551_s20, 4  ;;  %s14661_s2 = int_to_ptr.vmem [resolvable:$true] %s8703_s2 }
 0x7d8   : > { %v7295_v43 = vadd.f32 %v14182_v56, %v7281_v2  ;;  %v7268_v30 = vadd.f32 %v7264_v39, %v7254_v22  ;;  %v15105_v56 = vstv %s14144_s11  ;;  %s9279_s11 = sld [smem:[#allocation7 + $0x1]] }
 0x7d9   : > { %8293 = vrot.lane.b32.xlu0 %v8289_v55, %s15003_s10  ;;  %8027 = vrot.lane.b32.xlu1 %v8022_v26, %s14999_s7  ;;  %v8050_v48 = vmul.f32 %v15105_v56, %v14298_v45  ;;  %v7384_v55 = vstv %s14343_s8  ;;  %v8106_v26 = vmul.f32 %v8104_v63, %v14298_v45  ;;  %s14659_s8 = scalar_lea.hbm %s14724_s14, %s9289_s0 }
 0x7da   : > { %v7309_v6 = vadd.f32 %v13643_v8, %v7295_v43  ;;  %v7282_v19 = vadd.f32 %v13749_v11, %v7268_v30  ;;  %v10353_v43 = vld [vmem:[#allocation3 + $0x2] sm:$0xff] }
 0x7db   : > { %v14348_v18 = vpop.permute.xlu0 %7557  ;;  %v7292_v57 = vpop.permute.xlu1 %7291  ;;  %v7385_v30 = vmul.f32 %v10353_v43, %v7384_v55 }
 0x7dc   : > { %v7323_v53 = vadd.f32 %v14198_v24, %v7309_v6  ;;  %v7296_v41 = vadd.f32 %v7292_v57, %v7282_v19 }
 0x7dd   : > { %8055 = vrot.lane.b32.xlu1 %v8050_v48, %s15000_s9  ;;  %v8276_v48 = vmul.f32 %v8274_v21, %v13833_v58 }
 0x7de   : > { %v7337_v8 = vadd.f32 %v13657_v5, %v7323_v53  ;;  %v7310_v7 = vadd.f32 %v13762_v35, %v7296_v41  ;;  %v7392_v35 = vstv %s14350_s26  ;;  %v10354_v53 = vld [vmem:[#allocation3 + $0xa] sm:$0xff]  ;;  %s10393_s26 = scalar_lea.vmem %s14661_s2, 4096 }
 0x7df   : > { %v14359_v11 = vpop.permute.xlu0 %8195  ;;  %v7320_v3 = vpop.permute.xlu1 %7319  ;;  %v7393_v19 = vmul.f32 %v7392_v35, %v13797_v44  ;;  %v7386_v41 = vmul.f32 %v10354_v53, %v7384_v55  ;;  %p10394_p10 = scmp.ne.s32.totalorder %s14661_s2, %s10393_s26 }
 0x7e0   : > { %v7351_v2 = vadd.f32 %v14214_v32, %v7337_v8  ;;  %v7324_v22 = vadd.f32 %v7320_v3, %v7310_v7  ;;  %v7394_v7 = vmul.f32 %v7392_v35, %v13959_v16 }
 0x7e1   : > { %8083 = vrot.lane.b32.xlu1 %v8078_v38, %s15001_s18  ;;  %p10395_p0 = pnand %p10394_p10, %p15182_p12 }
 0x7e2   : > { %v7365_v24 = vadd.f32 %v13671_v20, %v7351_v2  ;;  %v7338_v39 = vadd.f32 %v13777_v46, %v7324_v22 }
 0x7e3   : > { %v14369_v5 = vpop.permute.xlu0 %7601  ;;  %v7348_v17 = vpop.permute.xlu1 %7347  ;;  %p10396_p7 = pneg %p10395_p0 }
 0x7e4   : > { %v7379_v32 = vadd.f32 %v14232_v60, %v7365_v24  ;;  %v7352_v6 = vadd.f32 %v7348_v17, %v7338_v39  ;;  %v14384_v60 = vld [vmem:[#allocation3 + $0x26] sm:$0xff] }
 0x7e5   : > { %8111 = vrot.lane.b32.xlu1 %v8106_v26, %s15003_s10  ;;  %v8150_v58 = vmul.f32 %v8148_v59, %v14384_v60  ;;  %v8178_v55 = vmul.f32 %v8176_v13, %v14384_v60 }
 0x7e6   : > { %v7387_v20 = vadd.f32 %v7385_v30, %v7379_v32  ;;  %v7366_v46 = vadd.f32 %v13792_v62, %v7352_v6  ;;  %v8262_v6 = vmul.f32 %v8260_v1, %v14384_v60 }
 0x7e7   : > { %v14379_v57 = vpop.permute.xlu0 %7629  ;;  %v7376_v56 = vpop.permute.xlu1 %7375 }
 0x7e8   : > { %v7395_v63 = vadd.f32 %v7393_v19, %v7387_v20  ;;  %v7380_v8 = vadd.f32 %v7376_v56, %v7366_v46 }
 0x7e9   : > { %8281 = vrot.lane.b32.xlu1 %v8276_v48, %s15003_s10  ;;  %v8290_v48 = vmul.f32 %v8288_v12, %v14384_v60  ;;  %v15108_v12 = vld [vmem:[#allocation50_spill] sm:$0xff] }
 0x7ea   : > { %v7409_v44 = vadd.f32 %v13687_v42, %v7395_v63  ;;  %v7388_v62 = vadd.f32 %v7386_v41, %v7380_v8  ;;  %v10355_v63 = vld [vmem:[#allocation3 + $0x3] sm:$0xff] }
 0x7eb   : > { %v14389_v3 = vpop.permute.xlu0 %7657  ;;  %v14391_v31 = vpop.permute.xlu1 %8169 }
 0x7ec   : > { %v7423_v21 = vadd.f32 %v14269_v28, %v7409_v44  ;;  %v7396_v38 = vadd.f32 %v7394_v7, %v7388_v62 }
 0x7ed   : > { %8155 = vrot.lane.b32.xlu1 %v8150_v58, %s14997_s4  ;;  %s14415_s4 = sld [smem:[#allocation4 + $0x2a]]  ;;  %v10356_v58 = vld [vmem:[#allocation3 + $0xb] sm:$0xff] }
 0x7ee   : > { %v7437_v2 = vadd.f32 %v13703_v4, %v7423_v21  ;;  %v7410_v42 = vadd.f32 %v13809_v51, %v7396_v38  ;;  %v8206_v51 = vmul.f32 %v8204_v14, %v14384_v60  ;;  %v8234_v14 = vmul.f32 %v8232_v10, %v14384_v60 }
 0x7ef   : > { %v14400_v22 = vpop.permute.xlu0 %7685  ;;  %v7420_v16 = vpop.permute.xlu1 %7419 }
 0x7f0   : > { %v7451_v24 = vadd.f32 %v14286_v33, %v7437_v2  ;;  %v7424_v39 = vadd.f32 %v7420_v16, %v7410_v42  ;;  %v15109_v16 = vld [vmem:[#allocation81_spill] sm:$0xff] }
 0x7f1   : > { %8183 = vrot.lane.b32.xlu1 %v8178_v55, %s14998_s5  ;;  %s14422_s5 = sld [smem:[#allocation4 + $0x2b]] }
 0x7f2   : > { %v7465_v59 = vadd.f32 %v13717_v54, %v7451_v24  ;;  %v7438_v28 = vadd.f32 %v13824_v23, %v7424_v39 }
 0x7f3   : > { %v14409_v35 = vpop.permute.xlu0 %7713  ;;  %v7448_v4 = vpop.permute.xlu1 %7447  ;;  %v7568_v20 = vstv %s14415_s4  ;;  %s10477_s4 = smov [#allocation9]  }
 0x7f4   : > { %v7479_v17 = vadd.f32 %v14303_v49, %v7465_v59  ;;  %v7452_v26 = vadd.f32 %v7448_v4, %v7438_v28  ;;  %v7569_v53 = vmul.f32 %v10355_v63, %v7568_v20  ;;  %v7570_v21 = vmul.f32 %v10356_v58, %v7568_v20  ;;  %v15110_v59 = vld [vmem:[#allocation51_spill] sm:$0xff]  ;;  %v15111_v4 = vld [vmem:[#allocation60_spill] sm:$0xff] }
 0x7f5   : > { %8211 = vrot.lane.b32.xlu1 %v8206_v51, %s14999_s7  ;;  %s9237_s7 = sld [smem:[#allocation4 + $0x38]] }
 0x7f6   : > { %v7493_v13 = vadd.f32 %v13731_v37, %v7479_v17  ;;  %v7466_v54 = vadd.f32 %v13841_v25, %v7452_v26 }
 0x7f7   : > { %v14420_v23 = vpop.permute.xlu0 %7741  ;;  %v7476_v33 = vpop.permute.xlu1 %7475 }
 0x7f8   : > { %v7507_v49 = vadd.f32 %v14319_v9, %v7493_v13  ;;  %v7480_v43 = vadd.f32 %v7476_v33, %v7466_v54  ;;  %v15112_v54 = vld [vmem:[#allocation52_spill] sm:$0xff] }
 0x7f9   : > { %8239 = vrot.lane.b32.xlu1 %v8234_v14, %s15000_s9  ;;  %v15113_v14 = vld [vmem:[#allocation62_spill] sm:$0xff]  ;;  %s14466_s9 = sld [smem:[#allocation4 + $0x39]] }
 0x7fa   : > { %v7521_v37 = vadd.f32 %v13744_v27, %v7507_v49  ;;  %v7494_v30 = vadd.f32 %v13858_v15, %v7480_v43  ;;  %v7576_v27 = vstv %s14422_s5  ;;  %s10397_s5 = sshll.u32 %s10477_s4, 4  ;;  %s10398_s5 = int_to_ptr.vmem [resolvable:$false] %s10397_s5 }
 0x7fb   : > { %v14431_v25 = vpop.permute.xlu0 %8223  ;;  %v7504_v32 = vpop.permute.xlu1 %7503  ;;  %v7577_v8 = vmul.f32 %v7576_v27, %v13908_v47  ;;  %p10400_p8 = scmp.lt.s32.totalorder %s14661_s2, %s10398_s5 }
 0x7fc   : > { %v7535_v19 = vadd.f32 %v14333_v29, %v7521_v37  ;;  %v7508_v10 = vadd.f32 %v7504_v32, %v7494_v30 }
 0x7fd   : > { %8267 = vrot.lane.b32.xlu1 %v8262_v6, %s15001_s18  ;;  %s9265_s18 = sld [smem:[#allocation4 + $0x54]] }
 0x7fe   : > { %v7549_v9 = vadd.f32 %v13757_v0, %v7535_v19  ;;  %v7522_v46 = vadd.f32 %v13873_v34, %v7508_v10  ;;  %v15107_v0 = vld [vmem:[#allocation58_spill] sm:$0xff]  ;;  %v15115_v19 = vld [vmem:[#allocation64_spill] sm:$0xff] }
 0x7ff   : > { %v14441_v56 = vpop.permute.xlu0 %7785  ;;  %v7532_v15 = vpop.permute.xlu1 %7531 }
 0x800   : > { %v7563_v1 = vadd.f32 %v14348_v18, %v7549_v9  ;;  %v7536_v29 = vadd.f32 %v7532_v15, %v7522_v46  ;;  %v7578_v18 = vmul.f32 %v7576_v27, %v15109_v16  ;;  %v15116_v27 = vld [vmem:[#allocation54_spill] sm:$0xff] }
 0x801   : > { %8295 = vrot.lane.b32.xlu1 %v8290_v48, %s15003_s10  ;;  %v15117_v48 = vld [vmem:[#allocation66_spill] sm:$0xff]  ;;  %s9251_s10 = sld [smem:[#allocation4 + $0x46]] }
 0x802   : > { %v7571_v41 = vadd.f32 %v7569_v53, %v7563_v1  ;;  %v7550_v44 = vadd.f32 %v15107_v0, %v7536_v29  ;;  %v7752_v29 = vstv %s9237_s7  ;;  %v15119_v0 = vld [vmem:[#allocation68_spill] sm:$0xff]  ;;  %s10399_s7 = scalar_lea.vmem %s10398_s5, 8192 }
 0x803   : > { %v7560_v34 = vpop.permute.xlu1 %7559  ;;  %v14451_v7 = vpop.permute.xlu0 %7813  ;;  %p10401_p11 = scmp.lt.s32.totalorder %s10399_s7, %s10393_s26 }
 0x804   : > { %v7579_v62 = vadd.f32 %v7577_v8, %v7571_v41  ;;  %v7564_v38 = vadd.f32 %v7560_v34, %v7550_v44  ;;  %v15118_v41 = vld [vmem:[#allocation55_spill] sm:$0xff]  ;;  %v7760_v34 = vstv %s14466_s9 }
 0x805   : > { %p10402_p13 = por %p10401_p11, %p10400_p8 }
 0x806   : > { %v7593_v2 = vadd.f32 %v15108_v12, %v7579_v62  ;;  %v7572_v42 = vadd.f32 %v7570_v21, %v7564_v38  ;;  %v10357_v21 = vld [vmem:[#allocation3 + $0x4] sm:$0xff] }
 0x807   : > { %v14455_v55 = vpop.permute.xlu1 %8197  ;;  %v7842_v47 = vpop.permute.xlu0 %7841  ;;  %p10403_p1 = pnand %p10402_p13, %p10396_p7 }
 0x808   : > { %v7607_v24 = vadd.f32 %v14369_v5, %v7593_v2  ;;  %v7580_v39 = vadd.f32 %v7578_v18, %v7572_v42  ;;  %v15114_v5 = vld [vmem:[#allocation53_spill] sm:$0xff]  ;;  %v15120_v42 = vld [vmem:[#allocation75_spill] sm:$0xff]  ;;  %v15121_v18 = vld [vmem:[#allocation70_spill] sm:$0xff] }
 0x809   : > { %v7761_v16 = vmul.f32 %v7760_v34, %v15120_v42  ;;  %v15132_v42 = vld [vmem:[#allocation80_spill] sm:$0xff] }
 0x80a   : > { %v7621_v28 = vadd.f32 %v15110_v59, %v7607_v24  ;;  %v7594_v51 = vadd.f32 %v15111_v4, %v7580_v39  ;;  %v10358_v59 = vld [vmem:[#allocation3 + $0xc] sm:$0xff] }
 0x80b   : > { %v7604_v17 = vpop.permute.xlu1 %7603  ;;  %v7870_v43 = vpop.permute.xlu0 %7869 }
 0x80c   : > { %v7635_v26 = vadd.f32 %v14379_v57, %v7621_v28  ;;  %v7608_v13 = vadd.f32 %v7604_v17, %v7594_v51  ;;  %v7754_v28 = vmul.f32 %v10358_v59, %v7752_v29  ;;  %v15122_v17 = vld [vmem:[#allocation56_spill] sm:$0xff] }
 0x80e   : > { %v7649_v33 = vadd.f32 %v15112_v54, %v7635_v26  ;;  %v7622_v49 = vadd.f32 %v15113_v14, %v7608_v13  ;;  %v7762_v54 = vmul.f32 %v7760_v34, %v14177_v52 }
 0x80f   : > { %v7632_v37 = vpop.permute.xlu1 %7631  ;;  %v7898_v46 = vpop.permute.xlu0 %7897 }
 0x810   : > { %v7663_v30 = vadd.f32 %v14389_v3, %v7649_v33  ;;  %v7636_v32 = vadd.f32 %v7632_v37, %v7622_v49  ;;  %v15123_v49 = vld [vmem:[#allocation57_spill] sm:$0xff] }
 0x812   : > { %v7677_v6 = vadd.f32 %v15114_v5, %v7663_v30  ;;  %v7650_v10 = vadd.f32 %v15115_v19, %v7636_v32  ;;  %v15124_v30 = vld [vmem:[#allocation72_spill] sm:$0xff] }
 0x813   : > { %v7660_v20 = vpop.permute.xlu1 %7659  ;;  %v7926_v62 = vpop.permute.xlu0 %7925 }
 0x814   : > { %v7691_v57 = vadd.f32 %v14400_v22, %v7677_v6  ;;  %v7664_v9 = vadd.f32 %v7660_v20, %v7650_v10  ;;  %v7753_v22 = vmul.f32 %v10357_v21, %v7752_v29  ;;  %v15125_v20 = vld [vmem:[#allocation59_spill] sm:$0xff] }
 0x816   : > { %v7705_v15 = vadd.f32 %v15116_v27, %v7691_v57  ;;  %v7678_v63 = vadd.f32 %v15117_v48, %v7664_v9  ;;  %v15126_v9 = vld [vmem:[#allocation74_spill] sm:$0xff] }
 0x817   : > { %v7688_v53 = vpop.permute.xlu1 %7687  ;;  %v14478_v51 = vpop.permute.xlu0 %8251 }
 0x818   : > { %v7719_v3 = vadd.f32 %v14409_v35, %v7705_v15  ;;  %v7692_v1 = vadd.f32 %v7688_v53, %v7678_v63 }
 0x81a   : > { %v7733_v8 = vadd.f32 %v15118_v41, %v7719_v3  ;;  %v7706_v44 = vadd.f32 %v15119_v0, %v7692_v1  ;;  %v15128_v3 = vld [vmem:[#allocation77_spill] sm:$0xff]  ;;  %v15129_v0 = vld [vmem:[#allocation63_spill] sm:$0xff] }
 0x81b   : > { %v7716_v58 = vpop.permute.xlu1 %7715  ;;  %v7970_v5 = vpop.permute.xlu0 %7969 }
 0x81c   : > { %v7747_v38 = vadd.f32 %v14420_v23, %v7733_v8  ;;  %v7720_v12 = vadd.f32 %v7716_v58, %v7706_v44  ;;  %v15130_v44 = vld [vmem:[#allocation79_spill] sm:$0xff] }
 0x81e   : > { %v7755_v2 = vadd.f32 %v7753_v22, %v7747_v38  ;;  %v7734_v24 = vadd.f32 %v15121_v18, %v7720_v12  ;;  %v15131_v12 = vld [vmem:[#allocation65_spill] sm:$0xff]  ;;  %v7944_v18 = vstv %s9252_s19 }
 0x81f   : > { %v7744_v35 = vpop.permute.xlu1 %7743  ;;  %v7998_v63 = vpop.permute.xlu0 %7997 }
 0x820   : > { %v7763_v39 = vadd.f32 %v7761_v16, %v7755_v2  ;;  %v7748_v4 = vadd.f32 %v7744_v35, %v7734_v24  ;;  %v10359_v35 = vld [vmem:[#allocation3 + $0x5] sm:$0xff] }
 0x822   : > { %v7777_v26 = vadd.f32 %v15122_v17, %v7763_v39  ;;  %v7756_v13 = vadd.f32 %v7754_v28, %v7748_v4  ;;  %v7945_v17 = vmul.f32 %v7944_v18, %v14126_v36  ;;  %v15136_v36 = vld [vmem:[#allocation83_spill] sm:$0xff] }
 0x823   : > { %v14482_v33 = vpop.permute.xlu1 %8225  ;;  %v8026_v58 = vpop.permute.xlu0 %8025 }
 0x824   : > { %v7791_v23 = vadd.f32 %v14441_v56, %v7777_v26  ;;  %v7764_v14 = vadd.f32 %v7762_v54, %v7756_v13  ;;  %v15127_v56 = vld [vmem:[#allocation61_spill] sm:$0xff]  ;;  %v15133_v26 = vld [vmem:[#allocation82_spill] sm:$0xff] }
 0x826   : > { %v7805_v37 = vadd.f32 %v15123_v49, %v7791_v23  ;;  %v7778_v32 = vadd.f32 %v15124_v30, %v7764_v14  ;;  %v10360_v23 = vld [vmem:[#allocation3 + $0xd] sm:$0xff] }
 0x827   : > { %v7788_v6 = vpop.permute.xlu1 %7787  ;;  %v8054_v28 = vpop.permute.xlu0 %8053 }
 0x828   : > { %v7819_v19 = vadd.f32 %v14451_v7, %v7805_v37  ;;  %v7792_v10 = vadd.f32 %v7788_v6, %v7778_v32  ;;  %v15134_v37 = vld [vmem:[#allocation67_spill] sm:$0xff]  ;;  %v7946_v6 = vmul.f32 %v7944_v18, %v14298_v45 }
 0x82a   : > { %v7833_v57 = vadd.f32 %v15125_v20, %v7819_v19  ;;  %v7806_v27 = vadd.f32 %v15126_v9, %v7792_v10 }
 0x82b   : > { %v7816_v15 = vpop.permute.xlu1 %7815  ;;  %v8082_v19 = vpop.permute.xlu0 %8081 }
 0x82c   : > { %v7847_v52 = vadd.f32 %v7842_v47, %v7833_v57  ;;  %v7820_v48 = vadd.f32 %v7816_v15, %v7806_v27  ;;  %v7936_v47 = vstv %s9251_s10  ;;  %v15135_v57 = vld [vmem:[#allocation69_spill] sm:$0xff] }
 0x82d   : > { %v7937_v39 = vmul.f32 %v10359_v35, %v7936_v47  ;;  %v7938_v14 = vmul.f32 %v10360_v23, %v7936_v47  ;;  %v15143_v35 = vld [vmem:[#allocation78_spill] sm:$0xff] }
 0x82e   : > { %v7861_v53 = vadd.f32 %v15127_v56, %v7847_v52  ;;  %v7834_v1 = vadd.f32 %v15128_v3, %v7820_v48 }
 0x82f   : > { %v7844_v29 = vpop.permute.xlu1 %7843  ;;  %v8110_v56 = vpop.permute.xlu0 %8109 }
 0x830   : > { %v7875_v41 = vadd.f32 %v7870_v43, %v7861_v53  ;;  %v7848_v8 = vadd.f32 %v7844_v29, %v7834_v1  ;;  %v15137_v53 = vld [vmem:[#allocation71_spill] sm:$0xff]  ;;  %v15138_v1 = vld [vmem:[#allocation84_spill] sm:$0xff] }
 0x832   : > { %v7889_v7 = vadd.f32 %v15129_v0, %v7875_v41  ;;  %v7862_v34 = vadd.f32 %v15130_v44, %v7848_v8  ;;  %v15139_v0 = vld [vmem:[#allocation73_spill] sm:$0xff] }
 0x833   : > { %v7872_v21 = vpop.permute.xlu1 %7871 }
 0x834   : > { %v7903_v22 = vadd.f32 %v7898_v46, %v7889_v7  ;;  %v7876_v38 = vadd.f32 %v7872_v21, %v7862_v34  ;;  %v8280_v34 = vpop.permute.xlu0 %8279 }
 0x836   : > { %v7917_v2 = vadd.f32 %v15131_v12, %v7903_v22  ;;  %v7890_v16 = vadd.f32 %v15132_v42, %v7876_v38  ;;  %v15142_v12 = vld [vmem:[#allocation87_spill] sm:$0xff] }
 0x837   : > { %v7900_v24 = vpop.permute.xlu1 %7899 }
 0x838   : > { %v7931_v59 = vadd.f32 %v7926_v62, %v7917_v2  ;;  %v7904_v43 = vadd.f32 %v7900_v24, %v7890_v16  ;;  %v8120_v24 = vstv %s9265_s18 }
 0x83a   : > { %v7939_v4 = vadd.f32 %v7937_v39, %v7931_v59  ;;  %v7918_v13 = vadd.f32 %v15133_v26, %v7904_v43  ;;  %v15144_v59 = vld [vmem:[#allocation88_spill] sm:$0xff]  ;;  %v10361_v26 = vld [vmem:[#allocation3 + $0x6] sm:$0xff] }
 0x83b   : > { %v7928_v54 = vpop.permute.xlu1 %7927 }
 0x83c   : > { %v7947_v46 = vadd.f32 %v7945_v17, %v7939_v4  ;;  %v7932_v49 = vadd.f32 %v7928_v54, %v7918_v13  ;;  %v8128_v4 = vstv %s9266_s27  ;;  %v8121_v13 = vmul.f32 %v10361_v26, %v8120_v24 }
 0x83d   : > { %v8129_v23 = vmul.f32 %v8128_v4, %v14242_v40 }
 0x83e   : > { %v7961_v30 = vadd.f32 %v15134_v37, %v7947_v46  ;;  %v7940_v32 = vadd.f32 %v7938_v14, %v7932_v49  ;;  %v15145_v14 = vld [vmem:[#allocation89_spill] sm:$0xff] }
 0x83f   : > { %v14500_v10 = vpop.permute.xlu1 %8253 }
 0x840   : > { %v7975_v62 = vadd.f32 %v7970_v5, %v7961_v30  ;;  %v7948_v20 = vadd.f32 %v7946_v6, %v7940_v32  ;;  %v15140_v5 = vld [vmem:[#allocation85_spill] sm:$0xff]  ;;  %v10362_v6 = vld [vmem:[#allocation3 + $0xe] sm:$0xff] }
 0x842   : > { %v7989_v9 = vadd.f32 %v15135_v57, %v7975_v62  ;;  %v7962_v27 = vadd.f32 %v15136_v36, %v7948_v20  ;;  %v15146_v20 = vld [vmem:[#allocation86_spill] sm:$0xff]  ;;  %v8130_v36 = vmul.f32 %v8128_v4, %v14384_v60 }
 0x843   : > { %v7972_v15 = vpop.permute.xlu1 %7971 }
 0x844   : > { %v8003_v52 = vadd.f32 %v7998_v63, %v7989_v9  ;;  %v7976_v48 = vadd.f32 %v7972_v15, %v7962_v27  ;;  %v15141_v63 = vld [vmem:[#allocation76_spill] sm:$0xff] }
 0x846   : > { %v8017_v3 = vadd.f32 %v15137_v53, %v8003_v52  ;;  %v7990_v29 = vadd.f32 %v15138_v1, %v7976_v48 }
 0x847   : > { %v8000_v41 = vpop.permute.xlu1 %7999 }
 0x848   : > { %v8031_v8 = vadd.f32 %v8026_v58, %v8017_v3  ;;  %v8004_v45 = vadd.f32 %v8000_v41, %v7990_v29  ;;  %v8154_v58 = vpop.permute.xlu0 %8153 }
 0x84a   : > { %v8045_v7 = vadd.f32 %v15139_v0, %v8031_v8  ;;  %v8018_v44 = vadd.f32 %v15140_v5, %v8004_v45 }
 0x84b   : > { %v8028_v21 = vpop.permute.xlu1 %8027 }
 0x84c   : > { %v8059_v22 = vadd.f32 %v8054_v28, %v8045_v7  ;;  %v8032_v38 = vadd.f32 %v8028_v21, %v8018_v44  ;;  %v8182_v37 = vpop.permute.xlu0 %8181 }
 0x84e   : > { %v8073_v47 = vadd.f32 %v15141_v63, %v8059_v22  ;;  %v8046_v2 = vadd.f32 %v15142_v12, %v8032_v38  ;;  %v8302_v63 = vstv %s8301_s15 }
 0x84f   : > { %v8056_v42 = vpop.permute.xlu1 %8055 }
 0x850   : > { %v8087_v16 = vadd.f32 %v8082_v19, %v8073_v47  ;;  %v8060_v18 = vadd.f32 %v8056_v42, %v8046_v2  ;;  %v8122_v19 = vmul.f32 %v10362_v6, %v8120_v24  ;;  %v8210_v48 = vpop.permute.xlu0 %8209  ;;  %v8306_v42 = vstv %s9279_s11 }
 0x852   : > { %v8101_v39 = vadd.f32 %v15143_v35, %v8087_v16  ;;  %v8074_v43 = vadd.f32 %v15144_v59, %v8060_v18 }
 0x853   : > { %v8084_v17 = vpop.permute.xlu1 %8083 }
 0x854   : > { %v8115_v54 = vadd.f32 %v8110_v56, %v8101_v39  ;;  %v8088_v28 = vadd.f32 %v8084_v17, %v8074_v43  ;;  %v8238_v8 = vpop.permute.xlu0 %8237 }
 0x856   : > { %v8123_v46 = vadd.f32 %v8121_v13, %v8115_v54  ;;  %v8102_v49 = vadd.f32 %v15145_v14, %v8088_v28  ;;  %v15147_v13 = vld [vmem:[#allocation16_spill] sm:$0xff]  ;;  %v15148_v28 = vld [vmem:[#allocation17_spill] sm:$0xff] }
 0x857   : > { %v8112_v30 = vpop.permute.xlu1 %8111 }
 0x858   : > { %v8131_v32 = vadd.f32 %v8129_v23, %v8123_v46  ;;  %v8116_v62 = vadd.f32 %v8112_v30, %v8102_v49  ;;  %v8266_v21 = vpop.permute.xlu0 %8265  ;;  %v8334_v46 = vsub.s32 1, %v15148_v28  ;;  %v8345_v23 = vsub.s32 2, %v15148_v28 }
 0x859   : > { %v8356_v49 = vsub.s32 3, %v15148_v28 }
 0x85a   : > { %v8145_v57 = vadd.f32 %v15146_v20, %v8131_v32  ;;  %v8124_v9 = vadd.f32 %v8122_v19, %v8116_v62  ;;  %v8367_v32 = vsub.s32 4, %v15148_v28  ;;  %v8378_v62 = vsub.s32 5, %v15148_v28 }
 0x85b   : > { %v8282_v27 = vpop.permute.xlu1 %8281 }
 0x85c   : > { %v8159_v15 = vadd.f32 %v8154_v58, %v8145_v57  ;;  %v8132_v52 = vadd.f32 %v8130_v36, %v8124_v9  ;;  %v8294_v47 = vpop.permute.xlu0 %8293  ;;  %v8389_v57 = vsub.s32 6, %v15148_v28  ;;  %v8400_v36 = vsub.s32 7, %v15148_v28 }
 0x85e   : > { %v8173_v56 = vadd.f32 %v14252_v50, %v8159_v15  ;;  %v8146_v40 = vadd.f32 %v14308_v61, %v8132_v52 }
 0x85f   : > { %v8156_v53 = vpop.permute.xlu1 %8155 }
 0x860   : > { %v8187_v3 = vadd.f32 %v8182_v37, %v8173_v56  ;;  %v8160_v1 = vadd.f32 %v8156_v53, %v8146_v40 }
 0x862   : > { %v8201_v29 = vadd.f32 %v14359_v11, %v8187_v3  ;;  %v8174_v41 = vadd.f32 %v14391_v31, %v8160_v1 }
 0x863   : > { %v8184_v45 = vpop.permute.xlu1 %8183 }
 0x864   : > { %v8215_v0 = vadd.f32 %v8210_v48, %v8201_v29  ;;  %v8188_v7 = vadd.f32 %v8184_v45, %v8174_v41  ;;  %v9291_v41 = vld [vmem:[%s14539_s13] sm:$0xff]  }
 0x865   : > { %v9292_v45 = vunpack.c.l.bf16 %v9291_v41 }
 0x866   : > { %v8229_v60 = vadd.f32 %v14431_v25, %v8215_v0  ;;  %v8202_v5 = vadd.f32 %v14455_v55, %v8188_v7 }
 0x867   : > { %v8212_v44 = vpop.permute.xlu1 %8211 }
 0x868   : > { %v8243_v50 = vadd.f32 %v8238_v8, %v8229_v60  ;;  %v8216_v22 = vadd.f32 %v8212_v44, %v8202_v5  ;;  %v9293_v8 = vunpack.c.h.bf16 %v9291_v41  ;;  %v9354_v60 = vld [vmem:[%s14539_s13 + $0x8] sm:$0xff]   ;;  %v15150_v5 = vld [vmem:[#allocation21_spill] sm:$0xff] }
 0x86a   : > { %v8257_v61 = vadd.f32 %v14478_v51, %v8243_v50  ;;  %v8230_v31 = vadd.f32 %v14482_v33, %v8216_v22  ;;  %v15151_v50 = vld [vmem:[#allocation20_spill] sm:$0xff] }
 0x86b   : > { %v8240_v12 = vpop.permute.xlu1 %8239 }
 0x86c   : > { %v8271_v38 = vadd.f32 %v8266_v21, %v8257_v61  ;;  %v8244_v16 = vadd.f32 %v8240_v12, %v8230_v31 }
 0x86e   : > { %v8285_v11 = vadd.f32 %v8280_v34, %v8271_v38  ;;  %v8258_v24 = vadd.f32 %v14500_v10, %v8244_v16  ;;  %v9297_v38 = vunpack.c.h.bf16 %v9354_v60  ;;  %v15153_v16 = vld [vmem:[#allocation18_spill] sm:$0xff] }
 0x86f   : > { %v8268_v58 = vpop.permute.xlu1 %8267 }
 0x870   : > { %v8299_v2 = vadd.f32 %v8294_v47, %v8285_v11  ;;  %v8272_v35 = vadd.f32 %v8268_v58, %v8258_v24  ;;  %v9296_v11 = vunpack.c.l.bf16 %v9354_v60  ;;  %v9355_v47 = vld [vmem:[%s14539_s13 + $0x10] sm:$0xff]  }
 0x871   : > { %v9301_v58 = vunpack.c.h.bf16 %v9355_v47 }
 0x872   : > { %v8303_v25 = vmul.f32 %v8302_v63, %v8299_v2  ;;  %v8286_v51 = vadd.f32 %v8282_v27, %v8272_v35  ;;  %v9300_v35 = vunpack.c.l.bf16 %v9355_v47 }
 0x873   : > { %v8296_v39 = vpop.permute.xlu1 %8295 }
 0x874   : > { %v8307_v55 = vadd.f32 %v8306_v42, %v8303_v25  ;;  %v8300_v34 = vadd.f32 %v8296_v39, %v8286_v51 }
 0x876   : > { %v9280_v18 = vmul.f32 -1.442695, %v8307_v55  ;;  %v8304_v33 = vmul.f32 %v8302_v63, %v8300_v34 }
 0x878   : > { %10282 = vpow2.f32 %v9280_v18  ;;  %v8308_v4 = vadd.f32 %v8306_v42, %v8304_v33  ;;  %v15152_v42 = vld [vmem:[#allocation19_spill] sm:$0xff]  ;;  %v15154_v33 = vld [vmem:[#allocation22_spill] sm:$0xff] }
 0x87a   : > { %v9281_v17 = vmul.f32 -1.442695, %v8308_v4 }
 0x882   : > { %v10283_v59 = vpop.eup %10282 }
 0x883   : > { %v8315_v43 = vadd.f32 1.0, %v10283_v59  ;;  %v9356_v59 = vld [vmem:[%s14539_s13 + $0x18] sm:$0xff]  }
 0x884   : > { %v9305_v28 = vunpack.c.h.bf16 %v9356_v59 }
 0x885   : > { %10284 = vrcp.f32 %v8315_v43 }
 0x886   : > { %10286 = vpow2.f32 %v9281_v17  ;;  %v15155_v17 = vld [vmem:[#allocation24_spill] sm:$0xff] }
 0x88f   : > { %v10285_v26 = vpop.eup %10284 }
 0x890   : > { %v8324_v54 = vrot.slane %v10285_v26, %v15147_v13  ;;  %v8335_v10 = vrot.slane %v10285_v26, %v8334_v46  ;;  %v8346_v14 = vrot.slane %v10285_v26, %v8345_v23  ;;  %v10287_v37 = vpop.eup %10286  ;;  %v8357_v30 = vrot.slane %v10285_v26, %v8356_v49 }
 0x891   : > { %v8316_v6 = vadd.f32 1.0, %v10287_v37  ;;  %v8368_v19 = vrot.slane %v10285_v26, %v8367_v32  ;;  %v8379_v20 = vrot.slane %v10285_v26, %v8378_v62  ;;  %v8390_v9 = vrot.slane %v10285_v26, %v8389_v57 }
 0x892   : > { %8330 = vbcast.lane.b32.xlu1 %v8324_v54, 264  ;;  %8326 = vbcast.lane.b32.xlu0 %v8324_v54, 256  ;;  %v8401_v27 = vrot.slane %v10285_v26, %v8400_v36 }
 0x893   : > { %10288 = vrcp.f32 %v8316_v6  ;;  %v15157_v6 = vld [vmem:[#allocation25_spill] sm:$0xff] }
 0x896   : > { %8341 = vbcast.lane.b32.xlu1 %v8335_v10, 264  ;;  %8337 = vbcast.lane.b32.xlu0 %v8335_v10, 256 }
 0x89a   : > { %8352 = vbcast.lane.b32.xlu1 %v8346_v14, 264  ;;  %8348 = vbcast.lane.b32.xlu0 %v8346_v14, 256  ;;  %v9357_v14 = vld [vmem:[%s14539_s13 + $0x20] sm:$0xff]  }
 0x89d   : > { %v10289_v15 = vpop.eup %10288 }
 0x89e   : > { %8363 = vbcast.lane.b32.xlu1 %v8357_v30, 264  ;;  %8359 = vbcast.lane.b32.xlu0 %v8357_v30, 256  ;;  %v8412_v52 = vrot.slane %v10289_v15, %v15147_v13  ;;  %v8423_v48 = vrot.slane %v10289_v15, %v8334_v46  ;;  %v8434_v56 = vrot.slane %v10289_v15, %v8345_v23  ;;  %v9304_v46 = vunpack.c.l.bf16 %v9356_v59  ;;  %v15156_v30 = vld [vmem:[#allocation23_spill] sm:$0xff] }
 0x89f   : > { %v8445_v40 = vrot.slane %v10289_v15, %v8356_v49  ;;  %v8456_v53 = vrot.slane %v10289_v15, %v8367_v32  ;;  %v8467_v3 = vrot.slane %v10289_v15, %v8378_v62  ;;  %v8478_v1 = vrot.slane %v10289_v15, %v8389_v57 }
 0x8a0   : > { %v8489_v29 = vrot.slane %v10289_v15, %v8400_v36  ;;  %v9309_v57 = vunpack.c.h.bf16 %v9357_v14  ;;  %v9358_v15 = vld [vmem:[%s14539_s13 + $0x28] sm:$0xff]  }
 0x8a1   : > { %v9313_v41 = vunpack.c.h.bf16 %v9358_v15 }
 0x8a2   : > { %8374 = vbcast.lane.b32.xlu1 %v8368_v19, 264  ;;  %8370 = vbcast.lane.b32.xlu0 %v8368_v19, 256 }
 0x8a6   : > { %8385 = vbcast.lane.b32.xlu1 %v8379_v20, 264  ;;  %8381 = vbcast.lane.b32.xlu0 %v8379_v20, 256 }
 0x8aa   : > { %8396 = vbcast.lane.b32.xlu1 %v8390_v9, 264  ;;  %8392 = vbcast.lane.b32.xlu0 %v8390_v9, 256  ;;  %v9308_v9 = vunpack.c.l.bf16 %v9357_v14 }
 0x8ae   : > { %8407 = vbcast.lane.b32.xlu1 %v8401_v27, 264  ;;  %8403 = vbcast.lane.b32.xlu0 %v8401_v27, 256 }
 0x8b2   : > { %8418 = vbcast.lane.b32.xlu1 %v8412_v52, 264  ;;  %8414 = vbcast.lane.b32.xlu0 %v8412_v52, 256 }
 0x8b6   : > { %8429 = vbcast.lane.b32.xlu1 %v8423_v48, 264  ;;  %8425 = vbcast.lane.b32.xlu0 %v8423_v48, 256 }
 0x8ba   : > { %8440 = vbcast.lane.b32.xlu1 %v8434_v56, 264  ;;  %8436 = vbcast.lane.b32.xlu0 %v8434_v56, 256  ;;  %v15158_v56 = vld [vmem:[#allocation26_spill] sm:$0xff] }
 0x8be   : > { %8451 = vbcast.lane.b32.xlu1 %v8445_v40, 264  ;;  %8447 = vbcast.lane.b32.xlu0 %v8445_v40, 256 }
 0x8c2   : > { %8462 = vbcast.lane.b32.xlu1 %v8456_v53, 264  ;;  %8458 = vbcast.lane.b32.xlu0 %v8456_v53, 256  ;;  %v15159_v53 = vld [vmem:[#allocation28_spill] sm:$0xff] }
 0x8c6   : > { %8473 = vbcast.lane.b32.xlu1 %v8467_v3, 264  ;;  %8469 = vbcast.lane.b32.xlu0 %v8467_v3, 256 }
 0x8ca   : > { %8484 = vbcast.lane.b32.xlu1 %v8478_v1, 264  ;;  %8480 = vbcast.lane.b32.xlu0 %v8478_v1, 256 }
 0x8ce   : > { %8495 = vbcast.lane.b32.xlu1 %v8489_v29, 264  ;;  %8491 = vbcast.lane.b32.xlu0 %v8489_v29, 256 }
 0x904   : > { %v8331_v0 = vpop.permute.xlu1 %8330  ;;  %v8327_v7 = vpop.permute.xlu0 %8326 }
 0x905   : > { %v8498_v44 = vmul.f32 %v8331_v0, %v15150_v5  ;;  %v8497_v21 = vmul.f32 %v8327_v7, %v15151_v50  ;;  %v9359_v7 = vld [vmem:[%s14539_s13 + $0x30] sm:$0xff]  }
 0x907   : > { %v8594_v61 = vadd.f32 %v9293_v8, %v8498_v44  ;;  %v8593_v22 = vadd.f32 %v9292_v45, %v8497_v21  ;;  %v9312_v8 = vunpack.c.l.bf16 %v9358_v15  ;;  %v15160_v44 = vld [vmem:[#allocation27_spill] sm:$0xff]  ;;  %v15161_v21 = vld [vmem:[#allocation29_spill] sm:$0xff] }
 0x908   : > { %v8342_v31 = vpop.permute.xlu1 %8341  ;;  %v8338_v63 = vpop.permute.xlu0 %8337 }
 0x909   : > { %v8626_v12 = vmax.f32 %v8594_v61, 0.0  ;;  %v8625_v2 = vmax.f32 %v8593_v22, 0.0  ;;  %v8500_v25 = vmul.f32 %v8342_v31, %v15152_v42  ;;  %v8499_v55 = vmul.f32 %v8338_v63, %v15153_v16 }
 0x90a   : > { %v9316_v31 = vunpack.c.l.bf16 %v9359_v7 }
 0x90b   : > { %8658 = vst.msk [vmem:[%s14551_s20 + $0x8] sm:$0xff] %vm6018_vm2, %v8626_v12  ;;  %8657 = vst.msk [vmem:[%s14551_s20] sm:$0xff] %vm6018_vm2, %v8625_v2  ;;  %v8596_v18 = vadd.f32 %v9297_v38, %v8500_v25  ;;  %v8595_v24 = vadd.f32 %v9296_v11, %v8499_v55  ;;  %v9317_v11 = vunpack.c.h.bf16 %v9359_v7  ;;  %v9360_v12 = vld [vmem:[%s14539_s13 + $0x38] sm:$0xff]   ;;  %v15163_v55 = vld [vmem:[#allocation31_spill] sm:$0xff] }
 0x90c   : > { %v8353_v51 = vpop.permute.xlu1 %8352  ;;  %v8349_v39 = vpop.permute.xlu0 %8348  ;;  %v15162_v25 = vld [vmem:[#allocation30_spill] sm:$0xff] }
 0x90d   : > { %v8628_v34 = vmax.f32 %v8596_v18, 0.0  ;;  %v8627_v43 = vmax.f32 %v8595_v24, 0.0  ;;  %v8502_v4 = vmul.f32 %v8353_v51, %v15154_v33  ;;  %v8501_v26 = vmul.f32 %v8349_v39, %v15155_v17 }
 0x90e   : > { %v9320_v51 = vunpack.c.l.bf16 %v9360_v12 }
 0x90f   : > { %8660 = vst.msk [vmem:[%s14551_s20 + $0x18] sm:$0xff] %vm6018_vm2, %v8628_v34  ;;  %8659 = vst.msk [vmem:[%s14551_s20 + $0x10] sm:$0xff] %vm6018_vm2, %v8627_v43  ;;  %v8598_v13 = vadd.f32 %v9301_v58, %v8502_v4  ;;  %v8597_v54 = vadd.f32 %v9300_v35, %v8501_v26  ;;  %v9321_v35 = vunpack.c.h.bf16 %v9360_v12  ;;  %v9361_v34 = vld [vmem:[%s14539_s13 + $0x40] sm:$0xff]   ;;  %v15164_v4 = vld [vmem:[#allocation32_spill] sm:$0xff] }
 0x910   : > { %v8364_v10 = vpop.permute.xlu1 %8363  ;;  %v8360_v23 = vpop.permute.xlu0 %8359  ;;  %v15165_v26 = vld [vmem:[#allocation33_spill] sm:$0xff] }
 0x911   : > { %v8630_v49 = vmax.f32 %v8598_v13, 0.0  ;;  %v8629_v37 = vmax.f32 %v8597_v54, 0.0  ;;  %v8504_v32 = vmul.f32 %v8364_v10, %v15156_v30  ;;  %v8503_v19 = vmul.f32 %v8360_v23, %v15157_v6 }
 0x912   : > { %v9324_v10 = vunpack.c.l.bf16 %v9361_v34 }
 0x913   : > { %8662 = vst.msk [vmem:[%s14551_s20 + $0x28] sm:$0xff] %vm6018_vm2, %v8630_v49  ;;  %8661 = vst.msk [vmem:[%s14551_s20 + $0x20] sm:$0xff] %vm6018_vm2, %v8629_v37  ;;  %v8600_v62 = vadd.f32 %v9305_v28, %v8504_v32  ;;  %v8599_v20 = vadd.f32 %v9304_v46, %v8503_v19  ;;  %v9325_v46 = vunpack.c.h.bf16 %v9361_v34  ;;  %v9362_v49 = vld [vmem:[%s14539_s13 + $0x48] sm:$0xff]   ;;  %v15166_v32 = vld [vmem:[#allocation34_spill] sm:$0xff] }
 0x914   : > { %v8375_v36 = vpop.permute.xlu1 %8374  ;;  %v8371_v27 = vpop.permute.xlu0 %8370  ;;  %v15167_v19 = vld [vmem:[#allocation35_spill] sm:$0xff] }
 0x915   : > { %v8632_v52 = vmax.f32 %v8600_v62, 0.0  ;;  %v8631_v48 = vmax.f32 %v8599_v20, 0.0  ;;  %v8506_v40 = vmul.f32 %v8375_v36, %v15158_v56  ;;  %v8505_v3 = vmul.f32 %v8371_v27, %v15159_v53 }
 0x916   : > { %v9328_v36 = vunpack.c.l.bf16 %v9362_v49 }
 0x917   : > { %8664 = vst.msk [vmem:[%s14551_s20 + $0x38] sm:$0xff] %vm6018_vm2, %v8632_v52  ;;  %8663 = vst.msk [vmem:[%s14551_s20 + $0x30] sm:$0xff] %vm6018_vm2, %v8631_v48  ;;  %v8602_v1 = vadd.f32 %v9309_v57, %v8506_v40  ;;  %v8601_v29 = vadd.f32 %v9308_v9, %v8505_v3  ;;  %v9329_v9 = vunpack.c.h.bf16 %v9362_v49  ;;  %v9363_v52 = vld [vmem:[%s14539_s13 + $0x50] sm:$0xff]   ;;  %v15168_v40 = vld [vmem:[#allocation36_spill] sm:$0xff] }
 0x918   : > { %v8386_v45 = vpop.permute.xlu1 %8385  ;;  %v8382_v0 = vpop.permute.xlu0 %8381  ;;  %v15169_v3 = vld [vmem:[#allocation37_spill] sm:$0xff] }
 0x919   : > { %v8634_v60 = vmax.f32 %v8602_v1, 0.0  ;;  %v8633_v5 = vmax.f32 %v8601_v29, 0.0  ;;  %v8508_v50 = vmul.f32 %v8386_v45, %v15160_v44  ;;  %v8507_v61 = vmul.f32 %v8382_v0, %v15161_v21 }
 0x91a   : > { %v9332_v45 = vunpack.c.l.bf16 %v9363_v52 }
 0x91b   : > { %8666 = vst.msk [vmem:[%s14551_s20 + $0x48] sm:$0xff] %vm6018_vm2, %v8634_v60  ;;  %8665 = vst.msk [vmem:[%s14551_s20 + $0x40] sm:$0xff] %vm6018_vm2, %v8633_v5  ;;  %v8604_v22 = vadd.f32 %v9313_v41, %v8508_v50  ;;  %v8603_v38 = vadd.f32 %v9312_v8, %v8507_v61  ;;  %v9333_v8 = vunpack.c.h.bf16 %v9363_v52  ;;  %v9364_v60 = vld [vmem:[%s14539_s13 + $0x58] sm:$0xff]   ;;  %v15171_v61 = vld [vmem:[#allocation39_spill] sm:$0xff] }
 0x91c   : > { %v8397_v63 = vpop.permute.xlu1 %8396  ;;  %v8393_v47 = vpop.permute.xlu0 %8392  ;;  %v15170_v50 = vld [vmem:[#allocation38_spill] sm:$0xff] }
 0x91d   : > { %v8636_v2 = vmax.f32 %v8604_v22, 0.0  ;;  %v8635_v42 = vmax.f32 %v8603_v38, 0.0  ;;  %v8510_v16 = vmul.f32 %v8397_v63, %v15162_v25  ;;  %v8509_v18 = vmul.f32 %v8393_v47, %v15163_v55 }
 0x91e   : > { %v9336_v63 = vunpack.c.l.bf16 %v9364_v60 }
 0x91f   : > { %8668 = vst.msk [vmem:[%s14551_s20 + $0x58] sm:$0xff] %vm6018_vm2, %v8636_v2  ;;  %8667 = vst.msk [vmem:[%s14551_s20 + $0x50] sm:$0xff] %vm6018_vm2, %v8635_v42  ;;  %v8606_v24 = vadd.f32 %v9317_v11, %v8510_v16  ;;  %v8605_v58 = vadd.f32 %v9316_v31, %v8509_v18  ;;  %v9337_v31 = vunpack.c.h.bf16 %v9364_v60  ;;  %v9365_v2 = vld [vmem:[%s14539_s13 + $0x60] sm:$0xff]   ;;  %v15172_v16 = vld [vmem:[#allocation40_spill] sm:$0xff] }
 0x920   : > { %v8408_v39 = vpop.permute.xlu1 %8407  ;;  %v8404_v59 = vpop.permute.xlu0 %8403  ;;  %v15173_v18 = vld [vmem:[#allocation41_spill] sm:$0xff] }
 0x921   : > { %v8638_v43 = vmax.f32 %v8606_v24, 0.0  ;;  %v8637_v33 = vmax.f32 %v8605_v58, 0.0  ;;  %v8512_v17 = vmul.f32 %v8408_v39, %v15164_v4  ;;  %v8511_v13 = vmul.f32 %v8404_v59, %v15165_v26 }
 0x922   : > { %v9340_v39 = vunpack.c.l.bf16 %v9365_v2 }
 0x923   : > { %8670 = vst.msk [vmem:[%s14551_s20 + $0x68] sm:$0xff] %vm6018_vm2, %v8638_v43  ;;  %8669 = vst.msk [vmem:[%s14551_s20 + $0x60] sm:$0xff] %vm6018_vm2, %v8637_v33  ;;  %v8608_v54 = vadd.f32 %v9321_v35, %v8512_v17  ;;  %v8607_v28 = vadd.f32 %v9320_v51, %v8511_v13  ;;  %v9341_v51 = vunpack.c.h.bf16 %v9365_v2  ;;  %v9366_v43 = vld [vmem:[%s14539_s13 + $0x68] sm:$0xff]   ;;  %v15174_v17 = vld [vmem:[#allocation42_spill] sm:$0xff] }
 0x924   : > { %v8419_v23 = vpop.permute.xlu1 %8418  ;;  %v8415_v14 = vpop.permute.xlu0 %8414  ;;  %v15175_v13 = vld [vmem:[#allocation43_spill] sm:$0xff] }
 0x925   : > { %v8640_v37 = vmax.f32 %v8608_v54, 0.0  ;;  %v8639_v30 = vmax.f32 %v8607_v28, 0.0  ;;  %v8514_v6 = vmul.f32 %v8419_v23, %v15166_v32  ;;  %v8513_v62 = vmul.f32 %v8415_v14, %v15167_v19 }
 0x926   : > { %v9344_v23 = vunpack.c.l.bf16 %v9366_v43 }
 0x927   : > { %8672 = vst.msk [vmem:[%s14551_s20 + $0x78] sm:$0xff] %vm6018_vm2, %v8640_v37  ;;  %8671 = vst.msk [vmem:[%s14551_s20 + $0x70] sm:$0xff] %vm6018_vm2, %v8639_v30  ;;  %v8610_v20 = vadd.f32 %v9325_v46, %v8514_v6  ;;  %v8609_v57 = vadd.f32 %v9324_v10, %v8513_v62  ;;  %v9345_v10 = vunpack.c.h.bf16 %v9366_v43  ;;  %v9367_v37 = vld [vmem:[%s14539_s13 + $0x70] sm:$0xff]   ;;  %v15176_v6 = vld [vmem:[#allocation44_spill] sm:$0xff] }
 0x928   : > { %v8430_v27 = vpop.permute.xlu1 %8429  ;;  %v8426_v15 = vpop.permute.xlu0 %8425  ;;  %v15177_v62 = vld [vmem:[#allocation45_spill] sm:$0xff] }
 0x929   : > { %v8642_v48 = vmax.f32 %v8610_v20, 0.0  ;;  %v8641_v56 = vmax.f32 %v8609_v57, 0.0  ;;  %v8516_v53 = vmul.f32 %v8430_v27, %v15168_v40  ;;  %v8515_v1 = vmul.f32 %v8426_v15, %v15169_v3 }
 0x92a   : > { %v9348_v27 = vunpack.c.l.bf16 %v9367_v37 }
 0x92b   : > { %8674 = vst.msk [vmem:[%s14551_s20 + $0x88] sm:$0xff] %vm6018_vm2, %v8642_v48  ;;  %8673 = vst.msk [vmem:[%s14551_s20 + $0x80] sm:$0xff] %vm6018_vm2, %v8641_v56  ;;  %v8612_v29 = vadd.f32 %v9329_v9, %v8516_v53  ;;  %v8611_v41 = vadd.f32 %v9328_v36, %v8515_v1  ;;  %v9349_v36 = vunpack.c.h.bf16 %v9367_v37  ;;  %v9368_v48 = vld [vmem:[%s14539_s13 + $0x78] sm:$0xff]   ;;  %v15179_v1 = vld [vmem:[#allocation47_spill] sm:$0xff] }
 0x92c   : > { %v8441_v0 = vpop.permute.xlu1 %8440  ;;  %v8437_v7 = vpop.permute.xlu0 %8436  ;;  %v15178_v53 = vld [vmem:[#allocation46_spill] sm:$0xff] }
 0x92d   : > { %v8644_v5 = vmax.f32 %v8612_v29, 0.0  ;;  %v8643_v44 = vmax.f32 %v8611_v41, 0.0  ;;  %v8518_v21 = vmul.f32 %v8441_v0, %v15170_v50  ;;  %v8517_v22 = vmul.f32 %v8437_v7, %v15171_v61  ;;  %v15180_v50 = vld [vmem:[#allocation48_spill] sm:$0xff]  ;;  %v15181_v61 = vld [vmem:[#allocation49_spill] sm:$0xff] }
 0x92e   : > { %v9352_v0 = vunpack.c.l.bf16 %v9368_v48 }
 0x92f   : > { %8676 = vst.msk [vmem:[%s14551_s20 + $0x98] sm:$0xff] %vm6018_vm2, %v8644_v5  ;;  %8675 = vst.msk [vmem:[%s14551_s20 + $0x90] sm:$0xff] %vm6018_vm2, %v8643_v44  ;;  %v8614_v38 = vadd.f32 %v9333_v8, %v8518_v21  ;;  %v8613_v11 = vadd.f32 %v9332_v45, %v8517_v22  ;;  %v9353_v45 = vunpack.c.h.bf16 %v9368_v48 }
 0x930   : > { %v8452_v47 = vpop.permute.xlu1 %8451  ;;  %v8448_v12 = vpop.permute.xlu0 %8447 }
 0x931   : > { %v8646_v42 = vmax.f32 %v8614_v38, 0.0  ;;  %v8645_v25 = vmax.f32 %v8613_v11, 0.0  ;;  %v8520_v55 = vmul.f32 %v8452_v47, %v15172_v16  ;;  %v8519_v24 = vmul.f32 %v8448_v12, %v15173_v18 }
 0x933   : > { %8678 = vst.msk [vmem:[%s14551_s20 + $0xa8] sm:$0xff] %vm6018_vm2, %v8646_v42  ;;  %8677 = vst.msk [vmem:[%s14551_s20 + $0xa0] sm:$0xff] %vm6018_vm2, %v8645_v25  ;;  %v8616_v58 = vadd.f32 %v9337_v31, %v8520_v55  ;;  %v8615_v35 = vadd.f32 %v9336_v63, %v8519_v24 }
 0x934   : > { %v8463_v59 = vpop.permute.xlu1 %8462  ;;  %v8459_v34 = vpop.permute.xlu0 %8458 }
 0x935   : > { %v8648_v33 = vmax.f32 %v8616_v58, 0.0  ;;  %v8647_v4 = vmax.f32 %v8615_v35, 0.0  ;;  %v8522_v26 = vmul.f32 %v8463_v59, %v15174_v17  ;;  %v8521_v54 = vmul.f32 %v8459_v34, %v15175_v13 }
 0x937   : > { %8680 = vst.msk [vmem:[%s14551_s20 + $0xb8] sm:$0xff] %vm6018_vm2, %v8648_v33  ;;  %8679 = vst.msk [vmem:[%s14551_s20 + $0xb0] sm:$0xff] %vm6018_vm2, %v8647_v4  ;;  %v8618_v28 = vadd.f32 %v9341_v51, %v8522_v26  ;;  %v8617_v46 = vadd.f32 %v9340_v39, %v8521_v54 }
 0x938   : > { %v8474_v14 = vpop.permute.xlu1 %8473  ;;  %v8470_v49 = vpop.permute.xlu0 %8469 }
 0x939   : > { %v8650_v30 = vmax.f32 %v8618_v28, 0.0  ;;  %v8649_v32 = vmax.f32 %v8617_v46, 0.0  ;;  %v8524_v19 = vmul.f32 %v8474_v14, %v15176_v6  ;;  %v8523_v20 = vmul.f32 %v8470_v49, %v15177_v62 }
 0x93b   : > { %8682 = vst.msk [vmem:[%s14551_s20 + $0xc8] sm:$0xff] %vm6018_vm2, %v8650_v30  ;;  %8681 = vst.msk [vmem:[%s14551_s20 + $0xc0] sm:$0xff] %vm6018_vm2, %v8649_v32  ;;  %v8620_v57 = vadd.f32 %v9345_v10, %v8524_v19  ;;  %v8619_v9 = vadd.f32 %v9344_v23, %v8523_v20 }
 0x93c   : > { %v8485_v15 = vpop.permute.xlu1 %8484  ;;  %v8481_v52 = vpop.permute.xlu0 %8480 }
 0x93d   : > { %v8652_v56 = vmax.f32 %v8620_v57, 0.0  ;;  %v8651_v40 = vmax.f32 %v8619_v9, 0.0  ;;  %v8526_v3 = vmul.f32 %v8485_v15, %v15178_v53  ;;  %v8525_v29 = vmul.f32 %v8481_v52, %v15179_v1 }
 0x93f   : > { %8684 = vst.msk [vmem:[%s14551_s20 + $0xd8] sm:$0xff] %vm6018_vm2, %v8652_v56  ;;  %8683 = vst.msk [vmem:[%s14551_s20 + $0xd0] sm:$0xff] %vm6018_vm2, %v8651_v40  ;;  %v8622_v41 = vadd.f32 %v9349_v36, %v8526_v3  ;;  %v8621_v8 = vadd.f32 %v9348_v27, %v8525_v29 }
 0x940   : > { %v8496_v7 = vpop.permute.xlu1 %8495  ;;  %v8492_v60 = vpop.permute.xlu0 %8491 }
 0x941   : > { %v8654_v5 = vmax.f32 %v8622_v41, 0.0  ;;  %v8653_v44 = vmax.f32 %v8621_v8, 0.0  ;;  %v8528_v21 = vmul.f32 %v8496_v7, %v15180_v50  ;;  %v8527_v22 = vmul.f32 %v8492_v60, %v15181_v61 }
 0x943   : > { %8686 = vst.msk [vmem:[%s14551_s20 + $0xe8] sm:$0xff] %vm6018_vm2, %v8654_v5  ;;  %8685 = vst.msk [vmem:[%s14551_s20 + $0xe0] sm:$0xff] %vm6018_vm2, %v8653_v44  ;;  %v8624_v38 = vadd.f32 %v9353_v45, %v8528_v21  ;;  %v8623_v11 = vadd.f32 %v9352_v0, %v8527_v22 }
 0x945   : > { %v8656_v31 = vmax.f32 %v8624_v38, 0.0  ;;  %v8655_v63 = vmax.f32 %v8623_v11, 0.0 }
 0x947   : > { %8688 = vst.msk [vmem:[%s14551_s20 + $0xf8] sm:$0xff] %vm6018_vm2, %v8656_v31  ;;  %8687 = vst.msk [vmem:[%s14551_s20 + $0xf0] sm:$0xff] %vm6018_vm2, %v8655_v63 }
 0x948   : > { %10406 = shalt.err (!%p10403_p1)
}
 0x949   : > { %s10407_s9 = scalar_lea.hbm %s14659_s8, 4096  ;;  %s10411_s18 = scalar_lea.hbm %s14724_s14, 8192 }
 0x94a   : > { %p10408_p2 = scmp.ne.s32.totalorder %s14659_s8, %s10407_s9  ;;  %p10412_p9 = scmp.lt.u32.totalorder %s14659_s8, %s14724_s14 }
 0x94b   : > { %p10413_p5 = scmp.lt.u32.totalorder %s10411_s18, %s10407_s9  ;;  %p10415_p10 = scmp.lt.u32.totalorder %s10407_s9, %s14659_s8 }
 0x94c   : > { %p10409_p3 = pnand %p10408_p2, %p15182_p12 }
 0x94d   : > { %p10414_p6 = por %p10413_p5, %p10412_p9 }
 0x94e   : > { %p10410_p4 = pneg %p10409_p3 }
 0x94f   : > { %p10416_p0 = por %p10415_p10, %p10414_p6 }
 0x951   : > { %p10417_p7 = pnand %p10416_p0, %p10410_p4 }
 0x953   : > { %10420 = shalt.err (!%p10417_p7)
}
 0x954   : > { %s10478_s11 = smov 128   ;;  %s10479_s12 = smov 8  }
 0x955   : > { %10182 = dma.vmem_to_hbm [thread:$0]  (%p15182_p12), %s14661_s2, 4096, %s14659_s8, %s14669_s17, %s10478_s11, %s10478_s11, %s10479_s12  }
 0x956 PF: > { %p10199_p8 = scmp.ge.s32.totalorder %s10463_s16, 2  ;;  %s8718_s22 = sand.u32 1, %s10451_s29  }
 0x957   : > { %p15183_p11 = scmp.ne.s32.totalorder %s14875_s24, 0  ;;  %s8719_s21 = scalar_lea.sflag [#allocation5], %s8718_s22 }
 0x959   : > { %p10192_p13 = pnand %p10199_p8, %p15183_p11 }
 0x95b   : > { %10446 = dma.done.wait (!%p10192_p13), %s8719_s21, 4096  }
 0x95c   : > { %10448 = vsyncadd (!%p10192_p13), %s8719_s21, 4294963200  ;;  %s15184_s16 = sld [smem:[#allocation14_spill]]  ;;  %s15185_s13 = sld [smem:[#allocation13_spill]] }
 0x95d   : > { %s15186_s15 = sld [smem:[#allocation15_spill]]  ;;  %s15187_s29 = smov %s10455_s30 }
 0x962   : > { %p26_p1 = scmp.ge.s32.totalorder %s15184_s16, 4   ;;  %s15188_s30 = smov %s15185_s13 }
 0x964   :  { %28 = sbr.rel (!%p26_p1) target bundleno = 19 (0x13), region = 134 }
 0x96b   :  { %8724 = vsyncpa [#allocation5], 1 }
 0x96c   :  { %8726 = vsyncpa [#allocation5 + $0x1], 1 }
 0x96d   :  { %8727 = vsyncpa [#allocation6], 1 }
 0x96e   :  { %8729 = vsyncpa [#allocation6 + $0x1], 1 }
 0x96f   :  { %8730 = vsyncpa [#allocation8], 1 }

</bundles_post_ra>
